<compile_context>
chip_gen: v7x
topology: tpu7x:2x2x1
jax: 0.10.0
libtpu: 0.0.40
codegen_flags: <defaults>
</compile_context>

<pallas_src>
import functools

import jax
import jax.numpy as jnp
from jax.experimental import pallas as pl
from jax.experimental.pallas import tpu as pltpu


# ----------------------------------------------------------------------------
# Synthetic Darknet cfg (in-script; the PyTorch module parses this from a file)
# ----------------------------------------------------------------------------
CFG_TEXT = """
[net]
height=16
width=16
channels=3

[convolutional]
batch_normalize=1
filters=8
size=3
stride=1
pad=1
activation=leaky

[convolutional]
batch_normalize=1
filters=16
size=3
stride=2
pad=1
activation=leaky

[convolutional]
batch_normalize=1
filters=16
size=3
stride=1
pad=1
activation=leaky

[shortcut]
from=-2
activation=linear

[convolutional]
filters=21
size=1
stride=1
pad=1
activation=linear

[yolo]
mask=0,1,2
anchors=10,13,16,30,33,23,30,61,62,45,59,119
classes=2

[route]
layers=-3

[upsample]
stride=2

[route]
layers=-1,-8

[convolutional]
filters=21
size=1
stride=1
pad=1
activation=linear

[yolo]
mask=0,1,2
anchors=10,13,16,30,33,23,30,61,62,45,59,119
classes=2
"""


def parse_cfg_string(text):
    lines = [l.strip() for l in text.split("\n")]
    lines = [l for l in lines if len(l) > 0 and l[0] != "#"]
    block, blocks = {}, []
    for line in lines:
        if line[0] == "[":
            if block:
                blocks.append(block)
                block = {}
            block["type"] = line[1:-1].strip()
        else:
            k, v = line.split("=")
            block[k.strip()] = v.strip()
    blocks.append(block)
    return blocks


def _round_up(v, m):
    return ((v + m - 1) // m) * m


def _pad_and_tile(dim, align, max_tile):
    """Pad `dim` to `align`; if larger than `max_tile`, pad to a multiple of
    `max_tile` instead.  Returns (padded_dim, tile)."""
    p = _round_up(dim, align)
    if p <= max_tile:
        return p, p
    p = _round_up(dim, max_tile)
    return p, max_tile


# Conservative scoped-VMEM cap: fits v7x's 64 MiB physical VMEM with headroom,
# and is far above what the <=1.5 MiB block working sets here actually need.
VMEM_LIMIT_BYTES = 48 * 1024 * 1024

M_TILE_MAX = 256   # multiple of 16 (bf16 row packing)
N_TILE_MAX = 256   # feeds the full 256-wide MXU on v6e/v7x
K_TILE_MAX = 512   # multiple of 128


# ----------------------------------------------------------------------------
# Pallas kernels
# ----------------------------------------------------------------------------
def _mm_bias_kernel(x_ref, w_ref, b_ref, o_ref, acc_ref, *, leaky, nk):
    # Single-pass: K-accumulate in f32 scratch, add bias + leaky at the last
    # K step, store bf16 (lane-dense, TN multiple of 128).
    k = pl.program_id(2)

    @pl.when(k == 0)
    def _():
        acc_ref[...] = jnp.zeros_like(acc_ref)

    acc_ref[...] += jnp.dot(x_ref[...], w_ref[...],
                            preferred_element_type=jnp.float32)

    @pl.when(k == nk - 1)
    def _():
        y = acc_ref[...] + b_ref[...]
        if leaky:
            y = jnp.where(y > 0, y, 0.1 * y)
        o_ref[...] = y.astype(o_ref.dtype)


def _mm_stats_kernel(x_ref, w_ref, y_ref, sum_ref, ssq_ref, acc_ref, *, nk):
    # Grid = (n, m, k): for a fixed n the sum/ssq output blocks stay resident
    # across the whole (m, k) sweep, so per-channel batch statistics over all
    # valid rows are exact (padded X rows are zero and contribute nothing).
    # X is streamed exactly once; y is written exactly once (bf16).
    m = pl.program_id(1)
    k = pl.program_id(2)

    @pl.when(k == 0)
    def _():
        acc_ref[...] = jnp.zeros_like(acc_ref)

    acc_ref[...] += jnp.dot(x_ref[...], w_ref[...],
                            preferred_element_type=jnp.float32)

    @pl.when((m == 0) & (k == 0))
    def _():
        sum_ref[...] = jnp.zeros_like(sum_ref)
        ssq_ref[...] = jnp.zeros_like(ssq_ref)

    @pl.when(k == nk - 1)
    def _():
        y = acc_ref[...]
        sum_ref[...] += jnp.sum(y, axis=0, keepdims=True)
        ssq_ref[...] += jnp.sum(y * y, axis=0, keepdims=True)
        y_ref[...] = y.astype(y_ref.dtype)


def _bn_norm_kernel(y_ref, sum_ref, ssq_ref, g_ref, b_ref, o_ref,
                    *, leaky, inv_m):
    # Lightweight elementwise normalize + scale/shift + leaky over the stored
    # (bf16) pre-activation; aliased in place onto y's buffer.
    y = y_ref[...].astype(jnp.float32)
    mean = sum_ref[...] * inv_m
    var = jnp.maximum(ssq_ref[...] * inv_m - mean * mean, 0.0)
    z = (y - mean) * jax.lax.rsqrt(var + 1e-5) * g_ref[...] + b_ref[...]
    if leaky:
        z = jnp.where(z > 0, z, 0.1 * z)
    o_ref[...] = z.astype(o_ref.dtype)


def _yolo_kernel(p_ref, aux_ref, o_ref, *, stride):
    # p: (B, 8, Apad) f32, lane-dense (A = g*g*na padded to 128); aux rows:
    # 0,1 = cell offsets, 2,3 = anchor w/h, 4.. = 0.  One full-block compute
    # selected by a row iota, one unmasked store.
    p = p_ref[...]
    rowid = jax.lax.broadcasted_iota(jnp.int32, p.shape, 1)
    sig = jax.nn.sigmoid(p)
    ex = jnp.exp(p)
    aux = aux_ref[...][None]
    out = jnp.where(rowid < 2, (sig + aux) * stride,
                    jnp.where(rowid < 4, ex * aux, sig))
    o_ref[...] = out


# ----------------------------------------------------------------------------
# Pallas wrappers
# ----------------------------------------------------------------------------
def pallas_conv_bias(x_bf16, w_bf16, bias, *, TM, TN, TK, leaky):
    Mp, Kp = x_bf16.shape
    Np = w_bf16.shape[1]
    mt, nt, kt = Mp // TM, Np // TN, Kp // TK
    return pl.pallas_call(
        functools.partial(_mm_bias_kernel, leaky=leaky, nk=kt),
        out_shape=jax.ShapeDtypeStruct((Mp, Np), jnp.bfloat16),
        grid=(mt, nt, kt),
        in_specs=[
            pl.BlockSpec((TM, TK), lambda m, n, k: (m, k)),
            pl.BlockSpec((TK, TN), lambda m, n, k: (k, n)),
            pl.BlockSpec((1, TN), lambda m, n, k: (0, n)),
        ],
        out_specs=pl.BlockSpec((TM, TN), lambda m, n, k: (m, n)),
        scratch_shapes=[pltpu.VMEM((TM, TN), jnp.float32)],
        compiler_params=pltpu.CompilerParams(
            dimension_semantics=("parallel", "parallel", "arbitrary"),
            vmem_limit_bytes=VMEM_LIMIT_BYTES),
    )(x_bf16, w_bf16, bias)


def pallas_conv_bn_leaky(x_bf16, w_bf16, gamma, beta, *, TM, TN, TK,
                         leaky, m_valid):
    Mp, Kp = x_bf16.shape
    Np = w_bf16.shape[1]
    mt, nt, kt = Mp // TM, Np // TN, Kp // TK

    # Pass 1: matmul + per-channel sum / sum-of-squares, bf16 y written once.
    # N axis "parallel" (independent stats / y slabs per N tile) so both v7x
    # TensorCores participate at real channel counts; m, k accumulate and are
    # "arbitrary".
    y, s, ss = pl.pallas_call(
        functools.partial(_mm_stats_kernel, nk=kt),
        out_shape=(jax.ShapeDtypeStruct((Mp, Np), jnp.bfloat16),
                   jax.ShapeDtypeStruct((1, Np), jnp.float32),
                   jax.ShapeDtypeStruct((1, Np), jnp.float32)),
        grid=(nt, mt, kt),
        in_specs=[
            pl.BlockSpec((TM, TK), lambda n, m, k: (m, k)),
            pl.BlockSpec((TK, TN), lambda n, m, k: (k, n)),
        ],
        out_specs=(
            pl.BlockSpec((TM, TN), lambda n, m, k: (m, n)),
            pl.BlockSpec((1, TN), lambda n, m, k: (0, n)),
            pl.BlockSpec((1, TN), lambda n, m, k: (0, n)),
        ),
        scratch_shapes=[pltpu.VMEM((TM, TN), jnp.float32)],
        compiler_params=pltpu.CompilerParams(
            dimension_semantics=("parallel", "arbitrary", "arbitrary"),
            vmem_limit_bytes=VMEM_LIMIT_BYTES),
    )(x_bf16, w_bf16)

    # Pass 2: elementwise normalize + leaky, written in place over y.
    return pl.pallas_call(
        functools.partial(_bn_norm_kernel, leaky=leaky,
                          inv_m=1.0 / float(m_valid)),
        out_shape=jax.ShapeDtypeStruct((Mp, Np), jnp.bfloat16),
        grid=(mt, nt),
        in_specs=[
            pl.BlockSpec((TM, TN), lambda m, n: (m, n)),
            pl.BlockSpec((1, TN), lambda m, n: (0, n)),
            pl.BlockSpec((1, TN), lambda m, n: (0, n)),
            pl.BlockSpec((1, TN), lambda m, n: (0, n)),
            pl.BlockSpec((1, TN), lambda m, n: (0, n)),
        ],
        out_specs=pl.BlockSpec((TM, TN), lambda m, n: (m, n)),
        input_output_aliases={0: 0},
        compiler_params=pltpu.CompilerParams(
            dimension_semantics=("parallel", "parallel"),
            vmem_limit_bytes=VMEM_LIMIT_BYTES),
    )(y, s, ss, gamma, beta)


# ----------------------------------------------------------------------------
# Layer helpers (JAX glue around the Pallas kernels)
# ----------------------------------------------------------------------------
def im2col_nhwc(x, k, stride, pad):
    """x: (N, H, W, C) bf16 -> (N*Ho*Wo, C*k*k); column order (C slow, ki, kj
    fast) matches torch conv weight.reshape(Cout, Cin*k*k)."""
    # TODO(synk): the k*k patch gather stays as XLA strided-slice glue; fusing
    # it into the kernel via overlapping windows matters only at real sizes.
    N, H, W, C = x.shape
    xp = jnp.pad(x, ((0, 0), (pad, pad), (pad, pad), (0, 0)))
    Ho = (H + 2 * pad - k) // stride + 1
    Wo = (W + 2 * pad - k) // stride + 1
    cols = []
    for i in range(k):
        for j in range(k):
            cols.append(xp[:, i:i + stride * Ho:stride,
                           j:j + stride * Wo:stride, :])
    patches = jnp.stack(cols, axis=3)                  # (N, Ho, Wo, k*k, C)
    patches = patches.transpose(0, 1, 2, 4, 3)         # (N, Ho, Wo, C, k*k)
    return patches.reshape(N * Ho * Wo, C * k * k), Ho, Wo


def conv_layer(x_nhwc, p):
    N = x_nhwc.shape[0]
    # Cast to bf16 BEFORE im2col so the patch-replicated intermediate is bf16.
    X, Ho, Wo = im2col_nhwc(x_nhwc.astype(jnp.bfloat16),
                            p["ksize"], p["stride"], p["pad"])
    M, K = X.shape
    Kp, Np, TK, TN = p["kpad"], p["npad"], p["tk"], p["tn"]
    Mp, TM = _pad_and_tile(M, 16, M_TILE_MAX)
    X = jnp.pad(X, ((0, Mp - M), (0, Kp - K)))         # zero rows/cols: exact

    leaky = p["activation"] == "leaky"
    if p["bn"]:
        Y = pallas_conv_bn_leaky(X, p["w_kn"], p["gamma"], p["beta"],
                                 TM=TM, TN=TN, TK=TK, leaky=leaky, m_valid=M)
    else:
        Y = pallas_conv_bias(X, p["w_kn"], p["bias"],
                             TM=TM, TN=TN, TK=TK, leaky=leaky)

    # TODO(synk): carrying 128-padded channels across layers (slicing only at
    # route/shortcut/yolo boundaries) would avoid this slice/re-pad round trip.
    return Y[:M, :p["cout"]].reshape(N, Ho, Wo, p["cout"])


def predict_transform_pallas(x_nhwc, inp_dim, anchors, num_classes):
    """YOLO detection-head transform (matches the standard predict_transform)."""
    x = x_nhwc.astype(jnp.float32)
    B, g, _, _ = x.shape
    stride = inp_dim // g
    na = len(anchors)
    bbox = 5 + num_classes
    A = g * g * na
    Apad = _round_up(A, 128)
    bbox_pad = 8

    # (B, g, g, na*bbox) -> (B, cell, a, bbox) -> lane-dense (B, bbox_pad, Apad)
    p = x.reshape(B, g * g, na, bbox).transpose(0, 3, 1, 2).reshape(B, bbox, A)
    p = jnp.pad(p, ((0, 0), (0, bbox_pad - bbox), (0, Apad - A)))

    grid_c = jnp.arange(g, dtype=jnp.float32)
    xv, yv = jnp.meshgrid(grid_c, grid_c)              # 'xy' indexing
    xo = jnp.repeat(xv.reshape(-1), na)                # (A,)
    yo = jnp.repeat(yv.reshape(-1), na)
    anc = jnp.array(anchors, jnp.float32).T            # (2, na): widths, heights
    anc = jnp.tile(anc, (1, g * g))                    # (2, A), anchor fastest
    aux = jnp.concatenate(
        [jnp.stack([xo, yo], axis=0), anc,
         jnp.zeros((bbox_pad - 4, A), jnp.float32)], axis=0)
    aux = jnp.pad(aux, ((0, 0), (0, Apad - A)))        # (bbox_pad, Apad)

    out = pl.pallas_call(
        functools.partial(_yolo_kernel, stride=float(stride)),
        out_shape=jax.ShapeDtypeStruct((B, bbox_pad, Apad), jnp.float32),
    )(p, aux)
    return out[:, :bbox, :A].transpose(0, 2, 1)        # (B, A, bbox)


# ----------------------------------------------------------------------------
# Parameter construction (deterministic, pre-padded) & forward
# ----------------------------------------------------------------------------
def create_params(blocks, key):
    net_info = blocks[0]
    prev_filters = int(net_info.get("channels", 3))
    output_filters, params = [], []
    for index, b in enumerate(blocks[1:]):
        p = {"type": b["type"]}
        filters = prev_filters
        if b["type"] == "convolutional":
            bn = int(b.get("batch_normalize", 0))
            filters = int(b["filters"])
            ksize = int(b["size"])
            stride = int(b["stride"])
            pad = (ksize - 1) // 2 if int(b["pad"]) else 0
            K = prev_filters * ksize * ksize
            Kp, TK = _pad_and_tile(K, 128, K_TILE_MAX)
            Np, TN = _pad_and_tile(filters, 128, N_TILE_MAX)

            key, kw, kg, kb, kbias = jax.random.split(key, 5)
            w = 0.1 * jax.random.normal(
                kw, (filters, prev_filters, ksize, ksize), jnp.float32)
            # Pre-transpose + pre-pad once at build time (not per-forward).
            w_kn = jnp.pad(w.reshape(filters, K).T,
                           ((0, Kp - K), (0, Np - filters))).astype(jnp.bfloat16)
            p["w_kn"] = w_kn
            if bn:
                gamma = 1.0 + 0.1 * jax.random.normal(kg, (filters,), jnp.float32)
                beta = 0.1 * jax.random.normal(kb, (filters,), jnp.float32)
                p["gamma"] = jnp.pad(gamma, (0, Np - filters)).reshape(1, Np)
                p["beta"] = jnp.pad(beta, (0, Np - filters)).reshape(1, Np)
            else:
                bias = 0.1 * jax.random.normal(kbias, (filters,), jnp.float32)
                p["bias"] = jnp.pad(bias, (0, Np - filters)).reshape(1, Np)
            p.update(bn=bn, ksize=ksize, stride=stride, pad=pad,
                     activation=b["activation"], cout=filters,
                     kpad=Kp, npad=Np, tk=TK, tn=TN)
        elif b["type"] == "route":
            layers = [int(a) for a in b["layers"].split(",")]
            start = layers[0]
            end = layers[1] if len(layers) > 1 else 0
            if start > 0:
                start -= index
            if end > 0:
                end -= index
            if end < 0:
                filters = output_filters[index + start] + output_filters[index + end]
            else:
                filters = output_filters[index + start]
        elif b["type"] == "yolo":
            mask = [int(m) for m in b["mask"].split(",")]
            anc = [int(a) for a in b["anchors"].split(",")]
            anc = [(anc[i], anc[i + 1]) for i in range(0, len(anc), 2)]
            p["anchors"] = [anc[m] for m in mask]
        params.append(p)
        prev_filters = filters
        output_filters.append(filters)
    return params


def darknet_forward(blocks, params, x_nchw):
    net_info = blocks[0]
    modules = blocks[1:]
    outputs = {}
    detections = None
    # Internal layout: bf16 NHWC (natural layout of the fused conv epilogue).
    x = jnp.transpose(x_nchw, (0, 2, 3, 1)).astype(jnp.bfloat16)
    for i, module in enumerate(modules):
        t = module["type"]
        if t == "convolutional":
            x = conv_layer(x, params[i])
        elif t == "upsample":
            # nearest-neighbor 2x upsample: pure data replication, left to XLA.
            x = jnp.repeat(jnp.repeat(x, 2, axis=1), 2, axis=2)
        elif t == "route":
            layers = [int(a) for a in module["layers"].split(",")]
            if layers[0] > 0:
                layers[0] -= i
            if len(layers) == 1:
                x = outputs[i + layers[0]]
            else:
                if layers[1] > 0:
                    layers[1] -= i
                x = jnp.concatenate(
                    [outputs[i + layers[0]], outputs[i + layers[1]]], axis=3)
        elif t == "shortcut":
            # few-KiB elementwise add: XLA fuses it (no pallas dispatch).
            frm = int(module["from"])
            x = outputs[i - 1] + outputs[i + frm]
        elif t == "yolo":
            anchors = params[i]["anchors"]
            inp_dim = int(net_info["height"])
            num_classes = int(module["classes"])
            x = predict_transform_pallas(x, inp_dim, anchors, num_classes)
            detections = x if detections is None else jnp.concatenate(
                [detections, x], axis=1)
        outputs[i] = x
    return detections


# ----------------------------------------------------------------------------
if __name__ == "__main__":
    blocks = parse_cfg_string(CFG_TEXT)
    key = jax.random.PRNGKey(0)
    key, pkey, xkey = jax.random.split(key, 3)
    params = create_params(blocks, pkey)

    # input: batch=2, channels=3, 16x16 (NCHW, matching the [net] block)
    x = jax.random.normal(xkey, (2, 3, 16, 16), jnp.float32)

    fwd = jax.jit(lambda inp: darknet_forward(blocks, params, inp))
    detections = fwd(x)
    jax.block_until_ready(detections)

    # expected: (2, 8*8*3 + 16*16*3, 7) = (2, 960, 7)
    assert detections.shape == (2, 960, 7), detections.shape
    assert bool(jnp.all(jnp.isfinite(detections)))
    print("KERNEL_OK")
</pallas_src>

<mosaic_0001>
module attributes {stable_mosaic.version = 11 : i64} {
  func.func @_mm_stats_kernel(%arg0: i32, %arg1: i32, %arg2: i32, %arg3: memref<256x128xbf16, #tpu.memory_space<vmem>>, %arg4: memref<128x128xbf16, #tpu.memory_space<vmem>>, %arg5: memref<256x128xbf16, #tpu.memory_space<vmem>>, %arg6: memref<1x128xf32, #tpu.memory_space<vmem>>, %arg7: memref<1x128xf32, #tpu.memory_space<vmem>>, %arg8: memref<256x128xf32, #tpu.memory_space<vmem>>) attributes {dimension_semantics = [#tpu.dimension_semantics<parallel>, #tpu.dimension_semantics<arbitrary>, #tpu.dimension_semantics<arbitrary>], iteration_bounds = array<i64: 1, 2, 1>, scalar_prefetch = 0 : i64, scratch_operands = 1 : i64, tpu.core_type = #tpu.core_type<tc>, window_params = [{transform_indices = @transform_0, window_bounds = array<i64: 256, 128>}, {transform_indices = @transform_1, window_bounds = array<i64: 128, 128>}, {transform_indices = @transform_2, window_bounds = array<i64: 256, 128>}, {transform_indices = @transform_3, window_bounds = array<i64: 1, 128>}, {transform_indices = @transform_4, window_bounds = array<i64: 1, 128>}]} {
    %c0_i32 = arith.constant 0 : i32
    %0 = arith.cmpi eq, %arg2, %c0_i32 : i32
    %1 = arith.extui %0 : i1 to i32
    %c0_i32_0 = arith.constant 0 : i32
    %2 = arith.cmpi ne, %1, %c0_i32_0 : i32
    scf.if %2 {
      %cst_13 = arith.constant 0.000000e+00 : f32
      %17 = vector.broadcast %cst_13 : f32 to vector<256x128xf32>
      %c0_14 = arith.constant 0 : index
      %c0_15 = arith.constant 0 : index
      %18 = vector.load %arg8[%c0_14, %c0_15] : memref<256x128xf32, #tpu.memory_space<vmem>>, vector<256x128xf32>
      tpu.vector_store %arg8[%c0_14, %c0_15], %17 {strides = array<i32>} : memref<256x128xf32, #tpu.memory_space<vmem>>, vector<256x128xf32>,
    } else {
    }
    %c0 = arith.constant 0 : index
    %c0_1 = arith.constant 0 : index
    %3 = vector.load %arg8[%c0, %c0_1] : memref<256x128xf32, #tpu.memory_space<vmem>>, vector<256x128xf32>
    %c0_2 = arith.constant 0 : index
    %c0_3 = arith.constant 0 : index
    %4 = vector.load %arg3[%c0_2, %c0_3] : memref<256x128xbf16, #tpu.memory_space<vmem>>, vector<256x128xbf16>
    %c0_4 = arith.constant 0 : index
    %c0_5 = arith.constant 0 : index
    %5 = vector.load %arg4[%c0_4, %c0_5] : memref<128x128xbf16, #tpu.memory_space<vmem>>, vector<128x128xbf16>
    %cst = arith.constant dense<0.000000e+00> : vector<256x128xf32>
    %6 = tpu.matmul %4, %5, %cst {dimension_numbers = #tpu.dot_dimension_numbers<[1], [0], [0], [1], [0, 0, 1, 1], [], []>} : vector<256x128xbf16>, vector<128x128xbf16>, vector<256x128xf32> -> vector<256x128xf32>
    %7 = arith.addf %3, %6 : vector<256x128xf32>
    %c0_6 = arith.constant 0 : index
    %c0_7 = arith.constant 0 : index
    %8 = vector.load %arg8[%c0_6, %c0_7] : memref<256x128xf32, #tpu.memory_space<vmem>>, vector<256x128xf32>
    tpu.vector_store %arg8[%c0_6, %c0_7], %7 {strides = array<i32>} : memref<256x128xf32, #tpu.memory_space<vmem>>, vector<256x128xf32>,
    %c0_i32_8 = arith.constant 0 : i32
    %9 = arith.cmpi eq, %arg1, %c0_i32_8 : i32
    %c0_i32_9 = arith.constant 0 : i32
    %10 = arith.cmpi eq, %arg2, %c0_i32_9 : i32
    %11 = arith.andi %9, %10 : i1
    %12 = arith.extui %11 : i1 to i32
    %c0_i32_10 = arith.constant 0 : i32
    %13 = arith.cmpi ne, %12, %c0_i32_10 : i32
    scf.if %13 {
      %cst_13 = arith.constant 0.000000e+00 : f32
      %17 = vector.broadcast %cst_13 : f32 to vector<1x128xf32>
      %c0_14 = arith.constant 0 : index
      %c0_15 = arith.constant 0 : index
      %18 = vector.load %arg6[%c0_14, %c0_15] : memref<1x128xf32, #tpu.memory_space<vmem>>, vector<1x128xf32>
      tpu.vector_store %arg6[%c0_14, %c0_15], %17 {strides = array<i32>} : memref<1x128xf32, #tpu.memory_space<vmem>>, vector<1x128xf32>,
      %cst_16 = arith.constant 0.000000e+00 : f32
      %19 = vector.broadcast %cst_16 : f32 to vector<1x128xf32>
      %c0_17 = arith.constant 0 : index
      %c0_18 = arith.constant 0 : index
      %20 = vector.load %arg7[%c0_17, %c0_18] : memref<1x128xf32, #tpu.memory_space<vmem>>, vector<1x128xf32>
      tpu.vector_store %arg7[%c0_17, %c0_18], %19 {strides = array<i32>} : memref<1x128xf32, #tpu.memory_space<vmem>>, vector<1x128xf32>,
    } else {
    }
    %c0_i32_11 = arith.constant 0 : i32
    %14 = arith.cmpi eq, %arg2, %c0_i32_11 : i32
    %15 = arith.extui %14 : i1 to i32
    %c0_i32_12 = arith.constant 0 : i32
    %16 = arith.cmpi ne, %15, %c0_i32_12 : i32
    scf.if %16 {
      %c0_13 = arith.constant 0 : index
      %c0_14 = arith.constant 0 : index
      %17 = vector.load %arg8[%c0_13, %c0_14] : memref<256x128xf32, #tpu.memory_space<vmem>>, vector<256x128xf32>
      %c0_15 = arith.constant 0 : index
      %c0_16 = arith.constant 0 : index
      %18 = vector.load %arg6[%c0_15, %c0_16] : memref<1x128xf32, #tpu.memory_space<vmem>>, vector<1x128xf32>
      %cst_17 = arith.constant dense<0.000000e+00> : vector<128xf32>
      %19 = vector.multi_reduction <add>, %17, %cst_17 [0] : vector<256x128xf32> to vector<128xf32>
      %20 = vector.shape_cast %19 : vector<128xf32> to vector<1x128xf32>
      %21 = arith.addf %18, %20 : vector<1x128xf32>
      %c0_18 = arith.constant 0 : index
      %c0_19 = arith.constant 0 : index
      %22 = vector.load %arg6[%c0_18, %c0_19] : memref<1x128xf32, #tpu.memory_space<vmem>>, vector<1x128xf32>
      tpu.vector_store %arg6[%c0_18, %c0_19], %21 {strides = array<i32>} : memref<1x128xf32, #tpu.memory_space<vmem>>, vector<1x128xf32>,
      %c0_20 = arith.constant 0 : index
      %c0_21 = arith.constant 0 : index
      %23 = vector.load %arg7[%c0_20, %c0_21] : memref<1x128xf32, #tpu.memory_space<vmem>>, vector<1x128xf32>
      %24 = arith.mulf %17, %17 : vector<256x128xf32>
      %cst_22 = arith.constant dense<0.000000e+00> : vector<128xf32>
      %25 = vector.multi_reduction <add>, %24, %cst_22 [0] : vector<256x128xf32> to vector<128xf32>
      %26 = vector.shape_cast %25 : vector<128xf32> to vector<1x128xf32>
      %27 = arith.addf %23, %26 : vector<1x128xf32>
      %c0_23 = arith.constant 0 : index
      %c0_24 = arith.constant 0 : index
      %28 = vector.load %arg7[%c0_23, %c0_24] : memref<1x128xf32, #tpu.memory_space<vmem>>, vector<1x128xf32>
      tpu.vector_store %arg7[%c0_23, %c0_24], %27 {strides = array<i32>} : memref<1x128xf32, #tpu.memory_space<vmem>>, vector<1x128xf32>,
      %29 = arith.truncf %17 : vector<256x128xf32> to vector<256x128xbf16>
      %c0_25 = arith.constant 0 : index
      %c0_26 = arith.constant 0 : index
      %30 = vector.load %arg5[%c0_25, %c0_26] : memref<256x128xbf16, #tpu.memory_space<vmem>>, vector<256x128xbf16>
      tpu.vector_store %arg5[%c0_25, %c0_26], %29 {strides = array<i32>} : memref<256x128xbf16, #tpu.memory_space<vmem>>, vector<256x128xbf16>,
    } else {
    }
    return
  }
  func.func @transform_0(%arg0: i32, %arg1: i32, %arg2: i32) -> (i32, i32) {
    %c0_i32 = arith.constant 0 : i32
    return %arg1, %arg2 : i32, i32
  }
  func.func @transform_1(%arg0: i32, %arg1: i32, %arg2: i32) -> (i32, i32) {
    %c0_i32 = arith.constant 0 : i32
    return %arg2, %arg0 : i32, i32
  }
  func.func @transform_2(%arg0: i32, %arg1: i32, %arg2: i32) -> (i32, i32) {
    %c0_i32 = arith.constant 0 : i32
    return %arg1, %arg0 : i32, i32
  }
  func.func @transform_3(%arg0: i32, %arg1: i32, %arg2: i32) -> (i32, i32) {
    %c0_i32 = arith.constant 0 : i32
    %c0_i32_0 = arith.constant 0 : i32
    return %c0_i32, %arg0 : i32, i32
  }
  func.func @transform_4(%arg0: i32, %arg1: i32, %arg2: i32) -> (i32, i32) {
    %c0_i32 = arith.constant 0 : i32
    %c0_i32_0 = arith.constant 0 : i32
    return %c0_i32, %arg0 : i32, i32
  }
}

module attributes {stable_mosaic.version = 11 : i64} {
  func.func @_bn_norm_kernel(%arg0: i32, %arg1: i32, %arg2: memref<256x128xbf16, #tpu.memory_space<vmem>>, %arg3: memref<1x128xf32, #tpu.memory_space<vmem>>, %arg4: memref<1x128xf32, #tpu.memory_space<vmem>>, %arg5: memref<1x128xf32, #tpu.memory_space<vmem>>, %arg6: memref<1x128xf32, #tpu.memory_space<vmem>>, %arg7: memref<256x128xbf16, #tpu.memory_space<vmem>>) attributes {dimension_semantics = [#tpu.dimension_semantics<parallel>, #tpu.dimension_semantics<parallel>], iteration_bounds = array<i64: 2, 1>, scalar_prefetch = 0 : i64, scratch_operands = 0 : i64, tpu.core_type = #tpu.core_type<tc>, window_params = [{transform_indices = @transform_0, window_bounds = array<i64: 256, 128>}, {transform_indices = @transform_1, window_bounds = array<i64: 1, 128>}, {transform_indices = @transform_2, window_bounds = array<i64: 1, 128>}, {transform_indices = @transform_3, window_bounds = array<i64: 1, 128>}, {transform_indices = @transform_4, window_bounds = array<i64: 1, 128>}, {transform_indices = @transform_5, window_bounds = array<i64: 256, 128>}]} {
    %c0 = arith.constant 0 : index
    %c0_0 = arith.constant 0 : index
    %0 = vector.load %arg2[%c0, %c0_0] : memref<256x128xbf16, #tpu.memory_space<vmem>>, vector<256x128xbf16>
    %1 = arith.extf %0 : vector<256x128xbf16> to vector<256x128xf32>
    %c0_1 = arith.constant 0 : index
    %c0_2 = arith.constant 0 : index
    %2 = vector.load %arg3[%c0_1, %c0_2] : memref<1x128xf32, #tpu.memory_space<vmem>>, vector<1x128xf32>
    %cst = arith.constant 0.001953125 : f32
    %3 = vector.broadcast %cst : f32 to vector<1x128xf32>
    %4 = arith.mulf %2, %3 : vector<1x128xf32>
    %c0_3 = arith.constant 0 : index
    %c0_4 = arith.constant 0 : index
    %5 = vector.load %arg4[%c0_3, %c0_4] : memref<1x128xf32, #tpu.memory_space<vmem>>, vector<1x128xf32>
    %cst_5 = arith.constant 0.001953125 : f32
    %6 = vector.broadcast %cst_5 : f32 to vector<1x128xf32>
    %7 = arith.mulf %5, %6 : vector<1x128xf32>
    %8 = arith.mulf %4, %4 : vector<1x128xf32>
    %9 = arith.subf %7, %8 : vector<1x128xf32>
    %cst_6 = arith.constant 0.000000e+00 : f32
    %10 = vector.broadcast %cst_6 : f32 to vector<1x128xf32>
    %11 = arith.maximumf %9, %10 : vector<1x128xf32>
    %12 = vector.broadcast %4 : vector<1x128xf32> to vector<256x128xf32>
    %13 = arith.subf %1, %12 : vector<256x128xf32>
    %cst_7 = arith.constant 9.99999974E-6 : f32
    %14 = vector.broadcast %cst_7 : f32 to vector<1x128xf32>
    %15 = arith.addf %11, %14 : vector<1x128xf32>
    %16 = math.rsqrt %15 : vector<1x128xf32>
    %17 = vector.broadcast %16 : vector<1x128xf32> to vector<256x128xf32>
    %18 = arith.mulf %13, %17 : vector<256x128xf32>
    %c0_8 = arith.constant 0 : index
    %c0_9 = arith.constant 0 : index
    %19 = vector.load %arg5[%c0_8, %c0_9] : memref<1x128xf32, #tpu.memory_space<vmem>>, vector<1x128xf32>
    %20 = vector.broadcast %19 : vector<1x128xf32> to vector<256x128xf32>
    %21 = arith.mulf %18, %20 : vector<256x128xf32>
    %c0_10 = arith.constant 0 : index
    %c0_11 = arith.constant 0 : index
    %22 = vector.load %arg6[%c0_10, %c0_11] : memref<1x128xf32, #tpu.memory_space<vmem>>, vector<1x128xf32>
    %23 = vector.broadcast %22 : vector<1x128xf32> to vector<256x128xf32>
    %24 = arith.addf %21, %23 : vector<256x128xf32>
    %cst_12 = arith.constant 0.000000e+00 : f32
    %25 = vector.broadcast %cst_12 : f32 to vector<256x128xf32>
    %26 = arith.cmpf ogt, %24, %25 : vector<256x128xf32>
    %cst_13 = arith.constant 1.000000e-01 : f32
    %27 = vector.broadcast %cst_13 : f32 to vector<256x128xf32>
    %28 = arith.mulf %27, %24 : vector<256x128xf32>
    %29 = arith.select %26, %24, %28 : vector<256x128xi1>, vector<256x128xf32>
    %30 = arith.truncf %29 : vector<256x128xf32> to vector<256x128xbf16>
    %c0_14 = arith.constant 0 : index
    %c0_15 = arith.constant 0 : index
    %31 = vector.load %arg7[%c0_14, %c0_15] : memref<256x128xbf16, #tpu.memory_space<vmem>>, vector<256x128xbf16>
    tpu.vector_store %arg7[%c0_14, %c0_15], %30 {strides = array<i32>} : memref<256x128xbf16, #tpu.memory_space<vmem>>, vector<256x128xbf16>,
    return
  }
  func.func @transform_0(%arg0: i32, %arg1: i32) -> (i32, i32) {
    %c0_i32 = arith.constant 0 : i32
    return %arg0, %arg1 : i32, i32
  }
  func.func @transform_1(%arg0: i32, %arg1: i32) -> (i32, i32) {
    %c0_i32 = arith.constant 0 : i32
    %c0_i32_0 = arith.constant 0 : i32
    return %c0_i32, %arg1 : i32, i32
  }
  func.func @transform_2(%arg0: i32, %arg1: i32) -> (i32, i32) {
    %c0_i32 = arith.constant 0 : i32
    %c0_i32_0 = arith.constant 0 : i32
    return %c0_i32, %arg1 : i32, i32
  }
  func.func @transform_3(%arg0: i32, %arg1: i32) -> (i32, i32) {
    %c0_i32 = arith.constant 0 : i32
    %c0_i32_0 = arith.constant 0 : i32
    return %c0_i32, %arg1 : i32, i32
  }
  func.func @transform_4(%arg0: i32, %arg1: i32) -> (i32, i32) {
    %c0_i32 = arith.constant 0 : i32
    %c0_i32_0 = arith.constant 0 : i32
    return %c0_i32, %arg1 : i32, i32
  }
  func.func @transform_5(%arg0: i32, %arg1: i32) -> (i32, i32) {
    %c0_i32 = arith.constant 0 : i32
    return %arg0, %arg1 : i32, i32
  }
}

module attributes {stable_mosaic.version = 11 : i64} {
  func.func @_mm_stats_kernel(%arg0: i32, %arg1: i32, %arg2: i32, %arg3: memref<128x128xbf16, #tpu.memory_space<vmem>>, %arg4: memref<128x128xbf16, #tpu.memory_space<vmem>>, %arg5: memref<128x128xbf16, #tpu.memory_space<vmem>>, %arg6: memref<1x128xf32, #tpu.memory_space<vmem>>, %arg7: memref<1x128xf32, #tpu.memory_space<vmem>>, %arg8: memref<128x128xf32, #tpu.memory_space<vmem>>) attributes {dimension_semantics = [#tpu.dimension_semantics<parallel>, #tpu.dimension_semantics<arbitrary>, #tpu.dimension_semantics<arbitrary>], iteration_bounds = array<i64: 1, 1, 1>, scalar_prefetch = 0 : i64, scratch_operands = 1 : i64, tpu.core_type = #tpu.core_type<tc>, window_params = [{transform_indices = @transform_0, window_bounds = array<i64: 128, 128>}, {transform_indices = @transform_1, window_bounds = array<i64: 128, 128>}, {transform_indices = @transform_2, window_bounds = array<i64: 128, 128>}, {transform_indices = @transform_3, window_bounds = array<i64: 1, 128>}, {transform_indices = @transform_4, window_bounds = array<i64: 1, 128>}]} {
    %c0_i32 = arith.constant 0 : i32
    %0 = arith.cmpi eq, %arg2, %c0_i32 : i32
    %1 = arith.extui %0 : i1 to i32
    %c0_i32_0 = arith.constant 0 : i32
    %2 = arith.cmpi ne, %1, %c0_i32_0 : i32
    scf.if %2 {
      %cst_13 = arith.constant 0.000000e+00 : f32
      %17 = vector.broadcast %cst_13 : f32 to vector<128x128xf32>
      %c0_14 = arith.constant 0 : index
      %c0_15 = arith.constant 0 : index
      %18 = vector.load %arg8[%c0_14, %c0_15] : memref<128x128xf32, #tpu.memory_space<vmem>>, vector<128x128xf32>
      tpu.vector_store %arg8[%c0_14, %c0_15], %17 {strides = array<i32>} : memref<128x128xf32, #tpu.memory_space<vmem>>, vector<128x128xf32>,
    } else {
    }
    %c0 = arith.constant 0 : index
    %c0_1 = arith.constant 0 : index
    %3 = vector.load %arg8[%c0, %c0_1] : memref<128x128xf32, #tpu.memory_space<vmem>>, vector<128x128xf32>
    %c0_2 = arith.constant 0 : index
    %c0_3 = arith.constant 0 : index
    %4 = vector.load %arg3[%c0_2, %c0_3] : memref<128x128xbf16, #tpu.memory_space<vmem>>, vector<128x128xbf16>
    %c0_4 = arith.constant 0 : index
    %c0_5 = arith.constant 0 : index
    %5 = vector.load %arg4[%c0_4, %c0_5] : memref<128x128xbf16, #tpu.memory_space<vmem>>, vector<128x128xbf16>
    %cst = arith.constant dense<0.000000e+00> : vector<128x128xf32>
    %6 = tpu.matmul %4, %5, %cst {dimension_numbers = #tpu.dot_dimension_numbers<[1], [0], [0], [1], [0, 0, 1, 1], [], []>} : vector<128x128xbf16>, vector<128x128xbf16>, vector<128x128xf32> -> vector<128x128xf32>
    %7 = arith.addf %3, %6 : vector<128x128xf32>
    %c0_6 = arith.constant 0 : index
    %c0_7 = arith.constant 0 : index
    %8 = vector.load %arg8[%c0_6, %c0_7] : memref<128x128xf32, #tpu.memory_space<vmem>>, vector<128x128xf32>
    tpu.vector_store %arg8[%c0_6, %c0_7], %7 {strides = array<i32>} : memref<128x128xf32, #tpu.memory_space<vmem>>, vector<128x128xf32>,
    %c0_i32_8 = arith.constant 0 : i32
    %9 = arith.cmpi eq, %arg1, %c0_i32_8 : i32
    %c0_i32_9 = arith.constant 0 : i32
    %10 = arith.cmpi eq, %arg2, %c0_i32_9 : i32
    %11 = arith.andi %9, %10 : i1
    %12 = arith.extui %11 : i1 to i32
    %c0_i32_10 = arith.constant 0 : i32
    %13 = arith.cmpi ne, %12, %c0_i32_10 : i32
    scf.if %13 {
      %cst_13 = arith.constant 0.000000e+00 : f32
      %17 = vector.broadcast %cst_13 : f32 to vector<1x128xf32>
      %c0_14 = arith.constant 0 : index
      %c0_15 = arith.constant 0 : index
      %18 = vector.load %arg6[%c0_14, %c0_15] : memref<1x128xf32, #tpu.memory_space<vmem>>, vector<1x128xf32>
      tpu.vector_store %arg6[%c0_14, %c0_15], %17 {strides = array<i32>} : memref<1x128xf32, #tpu.memory_space<vmem>>, vector<1x128xf32>,
      %cst_16 = arith.constant 0.000000e+00 : f32
      %19 = vector.broadcast %cst_16 : f32 to vector<1x128xf32>
      %c0_17 = arith.constant 0 : index
      %c0_18 = arith.constant 0 : index
      %20 = vector.load %arg7[%c0_17, %c0_18] : memref<1x128xf32, #tpu.memory_space<vmem>>, vector<1x128xf32>
      tpu.vector_store %arg7[%c0_17, %c0_18], %19 {strides = array<i32>} : memref<1x128xf32, #tpu.memory_space<vmem>>, vector<1x128xf32>,
    } else {
    }
    %c0_i32_11 = arith.constant 0 : i32
    %14 = arith.cmpi eq, %arg2, %c0_i32_11 : i32
    %15 = arith.extui %14 : i1 to i32
    %c0_i32_12 = arith.constant 0 : i32
    %16 = arith.cmpi ne, %15, %c0_i32_12 : i32
    scf.if %16 {
      %c0_13 = arith.constant 0 : index
      %c0_14 = arith.constant 0 : index
      %17 = vector.load %arg8[%c0_13, %c0_14] : memref<128x128xf32, #tpu.memory_space<vmem>>, vector<128x128xf32>
      %c0_15 = arith.constant 0 : index
      %c0_16 = arith.constant 0 : index
      %18 = vector.load %arg6[%c0_15, %c0_16] : memref<1x128xf32, #tpu.memory_space<vmem>>, vector<1x128xf32>
      %cst_17 = arith.constant dense<0.000000e+00> : vector<128xf32>
      %19 = vector.multi_reduction <add>, %17, %cst_17 [0] : vector<128x128xf32> to vector<128xf32>
      %20 = vector.shape_cast %19 : vector<128xf32> to vector<1x128xf32>
      %21 = arith.addf %18, %20 : vector<1x128xf32>
      %c0_18 = arith.constant 0 : index
      %c0_19 = arith.constant 0 : index
      %22 = vector.load %arg6[%c0_18, %c0_19] : memref<1x128xf32, #tpu.memory_space<vmem>>, vector<1x128xf32>
      tpu.vector_store %arg6[%c0_18, %c0_19], %21 {strides = array<i32>} : memref<1x128xf32, #tpu.memory_space<vmem>>, vector<1x128xf32>,
      %c0_20 = arith.constant 0 : index
      %c0_21 = arith.constant 0 : index
      %23 = vector.load %arg7[%c0_20, %c0_21] : memref<1x128xf32, #tpu.memory_space<vmem>>, vector<1x128xf32>
      %24 = arith.mulf %17, %17 : vector<128x128xf32>
      %cst_22 = arith.constant dense<0.000000e+00> : vector<128xf32>
      %25 = vector.multi_reduction <add>, %24, %cst_22 [0] : vector<128x128xf32> to vector<128xf32>
      %26 = vector.shape_cast %25 : vector<128xf32> to vector<1x128xf32>
      %27 = arith.addf %23, %26 : vector<1x128xf32>
      %c0_23 = arith.constant 0 : index
      %c0_24 = arith.constant 0 : index
      %28 = vector.load %arg7[%c0_23, %c0_24] : memref<1x128xf32, #tpu.memory_space<vmem>>, vector<1x128xf32>
      tpu.vector_store %arg7[%c0_23, %c0_24], %27 {strides = array<i32>} : memref<1x128xf32, #tpu.memory_space<vmem>>, vector<1x128xf32>,
      %29 = arith.truncf %17 : vector<128x128xf32> to vector<128x128xbf16>
      %c0_25 = arith.constant 0 : index
      %c0_26 = arith.constant 0 : index
      %30 = vector.load %arg5[%c0_25, %c0_26] : memref<128x128xbf16, #tpu.memory_space<vmem>>, vector<128x128xbf16>
      tpu.vector_store %arg5[%c0_25, %c0_26], %29 {strides = array<i32>} : memref<128x128xbf16, #tpu.memory_space<vmem>>, vector<128x128xbf16>,
    } else {
    }
    return
  }
  func.func @transform_0(%arg0: i32, %arg1: i32, %arg2: i32) -> (i32, i32) {
    %c0_i32 = arith.constant 0 : i32
    return %arg1, %arg2 : i32, i32
  }
  func.func @transform_1(%arg0: i32, %arg1: i32, %arg2: i32) -> (i32, i32) {
    %c0_i32 = arith.constant 0 : i32
    return %arg2, %arg0 : i32, i32
  }
  func.func @transform_2(%arg0: i32, %arg1: i32, %arg2: i32) -> (i32, i32) {
    %c0_i32 = arith.constant 0 : i32
    return %arg1, %arg0 : i32, i32
  }
  func.func @transform_3(%arg0: i32, %arg1: i32, %arg2: i32) -> (i32, i32) {
    %c0_i32 = arith.constant 0 : i32
    %c0_i32_0 = arith.constant 0 : i32
    return %c0_i32, %arg0 : i32, i32
  }
  func.func @transform_4(%arg0: i32, %arg1: i32, %arg2: i32) -> (i32, i32) {
    %c0_i32 = arith.constant 0 : i32
    %c0_i32_0 = arith.constant 0 : i32
    return %c0_i32, %arg0 : i32, i32
  }
}

module attributes {stable_mosaic.version = 11 : i64} {
  func.func @_bn_norm_kernel(%arg0: i32, %arg1: i32, %arg2: memref<128x128xbf16, #tpu.memory_space<vmem>>, %arg3: memref<1x128xf32, #tpu.memory_space<vmem>>, %arg4: memref<1x128xf32, #tpu.memory_space<vmem>>, %arg5: memref<1x128xf32, #tpu.memory_space<vmem>>, %arg6: memref<1x128xf32, #tpu.memory_space<vmem>>, %arg7: memref<128x128xbf16, #tpu.memory_space<vmem>>) attributes {dimension_semantics = [#tpu.dimension_semantics<parallel>, #tpu.dimension_semantics<parallel>], iteration_bounds = array<i64: 1, 1>, scalar_prefetch = 0 : i64, scratch_operands = 0 : i64, tpu.core_type = #tpu.core_type<tc>, window_params = [{transform_indices = @transform_0, window_bounds = array<i64: 128, 128>}, {transform_indices = @transform_1, window_bounds = array<i64: 1, 128>}, {transform_indices = @transform_2, window_bounds = array<i64: 1, 128>}, {transform_indices = @transform_3, window_bounds = array<i64: 1, 128>}, {transform_indices = @transform_4, window_bounds = array<i64: 1, 128>}, {transform_indices = @transform_5, window_bounds = array<i64: 128, 128>}]} {
    %c0 = arith.constant 0 : index
    %c0_0 = arith.constant 0 : index
    %0 = vector.load %arg2[%c0, %c0_0] : memref<128x128xbf16, #tpu.memory_space<vmem>>, vector<128x128xbf16>
    %1 = arith.extf %0 : vector<128x128xbf16> to vector<128x128xf32>
    %c0_1 = arith.constant 0 : index
    %c0_2 = arith.constant 0 : index
    %2 = vector.load %arg3[%c0_1, %c0_2] : memref<1x128xf32, #tpu.memory_space<vmem>>, vector<1x128xf32>
    %cst = arith.constant 7.812500e-03 : f32
    %3 = vector.broadcast %cst : f32 to vector<1x128xf32>
    %4 = arith.mulf %2, %3 : vector<1x128xf32>
    %c0_3 = arith.constant 0 : index
    %c0_4 = arith.constant 0 : index
    %5 = vector.load %arg4[%c0_3, %c0_4] : memref<1x128xf32, #tpu.memory_space<vmem>>, vector<1x128xf32>
    %cst_5 = arith.constant 7.812500e-03 : f32
    %6 = vector.broadcast %cst_5 : f32 to vector<1x128xf32>
    %7 = arith.mulf %5, %6 : vector<1x128xf32>
    %8 = arith.mulf %4, %4 : vector<1x128xf32>
    %9 = arith.subf %7, %8 : vector<1x128xf32>
    %cst_6 = arith.constant 0.000000e+00 : f32
    %10 = vector.broadcast %cst_6 : f32 to vector<1x128xf32>
    %11 = arith.maximumf %9, %10 : vector<1x128xf32>
    %12 = vector.broadcast %4 : vector<1x128xf32> to vector<128x128xf32>
    %13 = arith.subf %1, %12 : vector<128x128xf32>
    %cst_7 = arith.constant 9.99999974E-6 : f32
    %14 = vector.broadcast %cst_7 : f32 to vector<1x128xf32>
    %15 = arith.addf %11, %14 : vector<1x128xf32>
    %16 = math.rsqrt %15 : vector<1x128xf32>
    %17 = vector.broadcast %16 : vector<1x128xf32> to vector<128x128xf32>
    %18 = arith.mulf %13, %17 : vector<128x128xf32>
    %c0_8 = arith.constant 0 : index
    %c0_9 = arith.constant 0 : index
    %19 = vector.load %arg5[%c0_8, %c0_9] : memref<1x128xf32, #tpu.memory_space<vmem>>, vector<1x128xf32>
    %20 = vector.broadcast %19 : vector<1x128xf32> to vector<128x128xf32>
    %21 = arith.mulf %18, %20 : vector<128x128xf32>
    %c0_10 = arith.constant 0 : index
    %c0_11 = arith.constant 0 : index
    %22 = vector.load %arg6[%c0_10, %c0_11] : memref<1x128xf32, #tpu.memory_space<vmem>>, vector<1x128xf32>
    %23 = vector.broadcast %22 : vector<1x128xf32> to vector<128x128xf32>
    %24 = arith.addf %21, %23 : vector<128x128xf32>
    %cst_12 = arith.constant 0.000000e+00 : f32
    %25 = vector.broadcast %cst_12 : f32 to vector<128x128xf32>
    %26 = arith.cmpf ogt, %24, %25 : vector<128x128xf32>
    %cst_13 = arith.constant 1.000000e-01 : f32
    %27 = vector.broadcast %cst_13 : f32 to vector<128x128xf32>
    %28 = arith.mulf %27, %24 : vector<128x128xf32>
    %29 = arith.select %26, %24, %28 : vector<128x128xi1>, vector<128x128xf32>
    %30 = arith.truncf %29 : vector<128x128xf32> to vector<128x128xbf16>
    %c0_14 = arith.constant 0 : index
    %c0_15 = arith.constant 0 : index
    %31 = vector.load %arg7[%c0_14, %c0_15] : memref<128x128xbf16, #tpu.memory_space<vmem>>, vector<128x128xbf16>
    tpu.vector_store %arg7[%c0_14, %c0_15], %30 {strides = array<i32>} : memref<128x128xbf16, #tpu.memory_space<vmem>>, vector<128x128xbf16>,
    return
  }
  func.func @transform_0(%arg0: i32, %arg1: i32) -> (i32, i32) {
    %c0_i32 = arith.constant 0 : i32
    return %arg0, %arg1 : i32, i32
  }
  func.func @transform_1(%arg0: i32, %arg1: i32) -> (i32, i32) {
    %c0_i32 = arith.constant 0 : i32
    %c0_i32_0 = arith.constant 0 : i32
    return %c0_i32, %arg1 : i32, i32
  }
  func.func @transform_2(%arg0: i32, %arg1: i32) -> (i32, i32) {
    %c0_i32 = arith.constant 0 : i32
    %c0_i32_0 = arith.constant 0 : i32
    return %c0_i32, %arg1 : i32, i32
  }
  func.func @transform_3(%arg0: i32, %arg1: i32) -> (i32, i32) {
    %c0_i32 = arith.constant 0 : i32
    %c0_i32_0 = arith.constant 0 : i32
    return %c0_i32, %arg1 : i32, i32
  }
  func.func @transform_4(%arg0: i32, %arg1: i32) -> (i32, i32) {
    %c0_i32 = arith.constant 0 : i32
    %c0_i32_0 = arith.constant 0 : i32
    return %c0_i32, %arg1 : i32, i32
  }
  func.func @transform_5(%arg0: i32, %arg1: i32) -> (i32, i32) {
    %c0_i32 = arith.constant 0 : i32
    return %arg0, %arg1 : i32, i32
  }
}

module attributes {stable_mosaic.version = 11 : i64} {
  func.func @_mm_stats_kernel(%arg0: i32, %arg1: i32, %arg2: i32, %arg3: memref<128x256xbf16, #tpu.memory_space<vmem>>, %arg4: memref<256x128xbf16, #tpu.memory_space<vmem>>, %arg5: memref<128x128xbf16, #tpu.memory_space<vmem>>, %arg6: memref<1x128xf32, #tpu.memory_space<vmem>>, %arg7: memref<1x128xf32, #tpu.memory_space<vmem>>, %arg8: memref<128x128xf32, #tpu.memory_space<vmem>>) attributes {dimension_semantics = [#tpu.dimension_semantics<parallel>, #tpu.dimension_semantics<arbitrary>, #tpu.dimension_semantics<arbitrary>], iteration_bounds = array<i64: 1, 1, 1>, scalar_prefetch = 0 : i64, scratch_operands = 1 : i64, tpu.core_type = #tpu.core_type<tc>, window_params = [{transform_indices = @transform_0, window_bounds = array<i64: 128, 256>}, {transform_indices = @transform_1, window_bounds = array<i64: 256, 128>}, {transform_indices = @transform_2, window_bounds = array<i64: 128, 128>}, {transform_indices = @transform_3, window_bounds = array<i64: 1, 128>}, {transform_indices = @transform_4, window_bounds = array<i64: 1, 128>}]} {
    %c0_i32 = arith.constant 0 : i32
    %0 = arith.cmpi eq, %arg2, %c0_i32 : i32
    %1 = arith.extui %0 : i1 to i32
    %c0_i32_0 = arith.constant 0 : i32
    %2 = arith.cmpi ne, %1, %c0_i32_0 : i32
    scf.if %2 {
      %cst_13 = arith.constant 0.000000e+00 : f32
      %17 = vector.broadcast %cst_13 : f32 to vector<128x128xf32>
      %c0_14 = arith.constant 0 : index
      %c0_15 = arith.constant 0 : index
      %18 = vector.load %arg8[%c0_14, %c0_15] : memref<128x128xf32, #tpu.memory_space<vmem>>, vector<128x128xf32>
      tpu.vector_store %arg8[%c0_14, %c0_15], %17 {strides = array<i32>} : memref<128x128xf32, #tpu.memory_space<vmem>>, vector<128x128xf32>,
    } else {
    }
    %c0 = arith.constant 0 : index
    %c0_1 = arith.constant 0 : index
    %3 = vector.load %arg8[%c0, %c0_1] : memref<128x128xf32, #tpu.memory_space<vmem>>, vector<128x128xf32>
    %c0_2 = arith.constant 0 : index
    %c0_3 = arith.constant 0 : index
    %4 = vector.load %arg3[%c0_2, %c0_3] : memref<128x256xbf16, #tpu.memory_space<vmem>>, vector<128x256xbf16>
    %c0_4 = arith.constant 0 : index
    %c0_5 = arith.constant 0 : index
    %5 = vector.load %arg4[%c0_4, %c0_5] : memref<256x128xbf16, #tpu.memory_space<vmem>>, vector<256x128xbf16>
    %cst = arith.constant dense<0.000000e+00> : vector<128x128xf32>
    %6 = tpu.matmul %4, %5, %cst {dimension_numbers = #tpu.dot_dimension_numbers<[1], [0], [0], [1], [0, 0, 1, 1], [], []>} : vector<128x256xbf16>, vector<256x128xbf16>, vector<128x128xf32> -> vector<128x128xf32>
    %7 = arith.addf %3, %6 : vector<128x128xf32>
    %c0_6 = arith.constant 0 : index
    %c0_7 = arith.constant 0 : index
    %8 = vector.load %arg8[%c0_6, %c0_7] : memref<128x128xf32, #tpu.memory_space<vmem>>, vector<128x128xf32>
    tpu.vector_store %arg8[%c0_6, %c0_7], %7 {strides = array<i32>} : memref<128x128xf32, #tpu.memory_space<vmem>>, vector<128x128xf32>,
    %c0_i32_8 = arith.constant 0 : i32
    %9 = arith.cmpi eq, %arg1, %c0_i32_8 : i32
    %c0_i32_9 = arith.constant 0 : i32
    %10 = arith.cmpi eq, %arg2, %c0_i32_9 : i32
    %11 = arith.andi %9, %10 : i1
    %12 = arith.extui %11 : i1 to i32
    %c0_i32_10 = arith.constant 0 : i32
    %13 = arith.cmpi ne, %12, %c0_i32_10 : i32
    scf.if %13 {
      %cst_13 = arith.constant 0.000000e+00 : f32
      %17 = vector.broadcast %cst_13 : f32 to vector<1x128xf32>
      %c0_14 = arith.constant 0 : index
      %c0_15 = arith.constant 0 : index
      %18 = vector.load %arg6[%c0_14, %c0_15] : memref<1x128xf32, #tpu.memory_space<vmem>>, vector<1x128xf32>
      tpu.vector_store %arg6[%c0_14, %c0_15], %17 {strides = array<i32>} : memref<1x128xf32, #tpu.memory_space<vmem>>, vector<1x128xf32>,
      %cst_16 = arith.constant 0.000000e+00 : f32
      %19 = vector.broadcast %cst_16 : f32 to vector<1x128xf32>
      %c0_17 = arith.constant 0 : index
      %c0_18 = arith.constant 0 : index
      %20 = vector.load %arg7[%c0_17, %c0_18] : memref<1x128xf32, #tpu.memory_space<vmem>>, vector<1x128xf32>
      tpu.vector_store %arg7[%c0_17, %c0_18], %19 {strides = array<i32>} : memref<1x128xf32, #tpu.memory_space<vmem>>, vector<1x128xf32>,
    } else {
    }
    %c0_i32_11 = arith.constant 0 : i32
    %14 = arith.cmpi eq, %arg2, %c0_i32_11 : i32
    %15 = arith.extui %14 : i1 to i32
    %c0_i32_12 = arith.constant 0 : i32
    %16 = arith.cmpi ne, %15, %c0_i32_12 : i32
    scf.if %16 {
      %c0_13 = arith.constant 0 : index
      %c0_14 = arith.constant 0 : index
      %17 = vector.load %arg8[%c0_13, %c0_14] : memref<128x128xf32, #tpu.memory_space<vmem>>, vector<128x128xf32>
      %c0_15 = arith.constant 0 : index
      %c0_16 = arith.constant 0 : index
      %18 = vector.load %arg6[%c0_15, %c0_16] : memref<1x128xf32, #tpu.memory_space<vmem>>, vector<1x128xf32>
      %cst_17 = arith.constant dense<0.000000e+00> : vector<128xf32>
      %19 = vector.multi_reduction <add>, %17, %cst_17 [0] : vector<128x128xf32> to vector<128xf32>
      %20 = vector.shape_cast %19 : vector<128xf32> to vector<1x128xf32>
      %21 = arith.addf %18, %20 : vector<1x128xf32>
      %c0_18 = arith.constant 0 : index
      %c0_19 = arith.constant 0 : index
      %22 = vector.load %arg6[%c0_18, %c0_19] : memref<1x128xf32, #tpu.memory_space<vmem>>, vector<1x128xf32>
      tpu.vector_store %arg6[%c0_18, %c0_19], %21 {strides = array<i32>} : memref<1x128xf32, #tpu.memory_space<vmem>>, vector<1x128xf32>,
      %c0_20 = arith.constant 0 : index
      %c0_21 = arith.constant 0 : index
      %23 = vector.load %arg7[%c0_20, %c0_21] : memref<1x128xf32, #tpu.memory_space<vmem>>, vector<1x128xf32>
      %24 = arith.mulf %17, %17 : vector<128x128xf32>
      %cst_22 = arith.constant dense<0.000000e+00> : vector<128xf32>
      %25 = vector.multi_reduction <add>, %24, %cst_22 [0] : vector<128x128xf32> to vector<128xf32>
      %26 = vector.shape_cast %25 : vector<128xf32> to vector<1x128xf32>
      %27 = arith.addf %23, %26 : vector<1x128xf32>
      %c0_23 = arith.constant 0 : index
      %c0_24 = arith.constant 0 : index
      %28 = vector.load %arg7[%c0_23, %c0_24] : memref<1x128xf32, #tpu.memory_space<vmem>>, vector<1x128xf32>
      tpu.vector_store %arg7[%c0_23, %c0_24], %27 {strides = array<i32>} : memref<1x128xf32, #tpu.memory_space<vmem>>, vector<1x128xf32>,
      %29 = arith.truncf %17 : vector<128x128xf32> to vector<128x128xbf16>
      %c0_25 = arith.constant 0 : index
      %c0_26 = arith.constant 0 : index
      %30 = vector.load %arg5[%c0_25, %c0_26] : memref<128x128xbf16, #tpu.memory_space<vmem>>, vector<128x128xbf16>
      tpu.vector_store %arg5[%c0_25, %c0_26], %29 {strides = array<i32>} : memref<128x128xbf16, #tpu.memory_space<vmem>>, vector<128x128xbf16>,
    } else {
    }
    return
  }
  func.func @transform_0(%arg0: i32, %arg1: i32, %arg2: i32) -> (i32, i32) {
    %c0_i32 = arith.constant 0 : i32
    return %arg1, %arg2 : i32, i32
  }
  func.func @transform_1(%arg0: i32, %arg1: i32, %arg2: i32) -> (i32, i32) {
    %c0_i32 = arith.constant 0 : i32
    return %arg2, %arg0 : i32, i32
  }
  func.func @transform_2(%arg0: i32, %arg1: i32, %arg2: i32) -> (i32, i32) {
    %c0_i32 = arith.constant 0 : i32
    return %arg1, %arg0 : i32, i32
  }
  func.func @transform_3(%arg0: i32, %arg1: i32, %arg2: i32) -> (i32, i32) {
    %c0_i32 = arith.constant 0 : i32
    %c0_i32_0 = arith.constant 0 : i32
    return %c0_i32, %arg0 : i32, i32
  }
  func.func @transform_4(%arg0: i32, %arg1: i32, %arg2: i32) -> (i32, i32) {
    %c0_i32 = arith.constant 0 : i32
    %c0_i32_0 = arith.constant 0 : i32
    return %c0_i32, %arg0 : i32, i32
  }
}

module attributes {stable_mosaic.version = 11 : i64} {
  func.func @_mm_bias_kernel(%arg0: i32, %arg1: i32, %arg2: i32, %arg3: memref<256x128xbf16, #tpu.memory_space<vmem>>, %arg4: memref<128x128xbf16, #tpu.memory_space<vmem>>, %arg5: memref<1x128xf32, #tpu.memory_space<vmem>>, %arg6: memref<256x128xbf16, #tpu.memory_space<vmem>>, %arg7: memref<256x128xf32, #tpu.memory_space<vmem>>) attributes {dimension_semantics = [#tpu.dimension_semantics<parallel>, #tpu.dimension_semantics<parallel>, #tpu.dimension_semantics<arbitrary>], iteration_bounds = array<i64: 2, 1, 1>, scalar_prefetch = 0 : i64, scratch_operands = 1 : i64, tpu.core_type = #tpu.core_type<tc>, window_params = [{transform_indices = @transform_0, window_bounds = array<i64: 256, 128>}, {transform_indices = @transform_1, window_bounds = array<i64: 128, 128>}, {transform_indices = @transform_2, window_bounds = array<i64: 1, 128>}, {transform_indices = @transform_3, window_bounds = array<i64: 256, 128>}]} {
    %c0_i32 = arith.constant 0 : i32
    %0 = arith.cmpi eq, %arg2, %c0_i32 : i32
    %1 = arith.extui %0 : i1 to i32
    %c0_i32_0 = arith.constant 0 : i32
    %2 = arith.cmpi ne, %1, %c0_i32_0 : i32
    scf.if %2 {
      %cst_10 = arith.constant 0.000000e+00 : f32
      %12 = vector.broadcast %cst_10 : f32 to vector<256x128xf32>
      %c0_11 = arith.constant 0 : index
      %c0_12 = arith.constant 0 : index
      %13 = vector.load %arg7[%c0_11, %c0_12] : memref<256x128xf32, #tpu.memory_space<vmem>>, vector<256x128xf32>
      tpu.vector_store %arg7[%c0_11, %c0_12], %12 {strides = array<i32>} : memref<256x128xf32, #tpu.memory_space<vmem>>, vector<256x128xf32>,
    } else {
    }
    %c0 = arith.constant 0 : index
    %c0_1 = arith.constant 0 : index
    %3 = vector.load %arg7[%c0, %c0_1] : memref<256x128xf32, #tpu.memory_space<vmem>>, vector<256x128xf32>
    %c0_2 = arith.constant 0 : index
    %c0_3 = arith.constant 0 : index
    %4 = vector.load %arg3[%c0_2, %c0_3] : memref<256x128xbf16, #tpu.memory_space<vmem>>, vector<256x128xbf16>
    %c0_4 = arith.constant 0 : index
    %c0_5 = arith.constant 0 : index
    %5 = vector.load %arg4[%c0_4, %c0_5] : memref<128x128xbf16, #tpu.memory_space<vmem>>, vector<128x128xbf16>
    %cst = arith.constant dense<0.000000e+00> : vector<256x128xf32>
    %6 = tpu.matmul %4, %5, %cst {dimension_numbers = #tpu.dot_dimension_numbers<[1], [0], [0], [1], [0, 0, 1, 1], [], []>} : vector<256x128xbf16>, vector<128x128xbf16>, vector<256x128xf32> -> vector<256x128xf32>
    %7 = arith.addf %3, %6 : vector<256x128xf32>
    %c0_6 = arith.constant 0 : index
    %c0_7 = arith.constant 0 : index
    %8 = vector.load %arg7[%c0_6, %c0_7] : memref<256x128xf32, #tpu.memory_space<vmem>>, vector<256x128xf32>
    tpu.vector_store %arg7[%c0_6, %c0_7], %7 {strides = array<i32>} : memref<256x128xf32, #tpu.memory_space<vmem>>, vector<256x128xf32>,
    %c0_i32_8 = arith.constant 0 : i32
    %9 = arith.cmpi eq, %arg2, %c0_i32_8 : i32
    %10 = arith.extui %9 : i1 to i32
    %c0_i32_9 = arith.constant 0 : i32
    %11 = arith.cmpi ne, %10, %c0_i32_9 : i32
    scf.if %11 {
      %c0_10 = arith.constant 0 : index
      %c0_11 = arith.constant 0 : index
      %12 = vector.load %arg7[%c0_10, %c0_11] : memref<256x128xf32, #tpu.memory_space<vmem>>, vector<256x128xf32>
      %c0_12 = arith.constant 0 : index
      %c0_13 = arith.constant 0 : index
      %13 = vector.load %arg5[%c0_12, %c0_13] : memref<1x128xf32, #tpu.memory_space<vmem>>, vector<1x128xf32>
      %14 = vector.broadcast %13 : vector<1x128xf32> to vector<256x128xf32>
      %15 = arith.addf %12, %14 : vector<256x128xf32>
      %16 = arith.truncf %15 : vector<256x128xf32> to vector<256x128xbf16>
      %c0_14 = arith.constant 0 : index
      %c0_15 = arith.constant 0 : index
      %17 = vector.load %arg6[%c0_14, %c0_15] : memref<256x128xbf16, #tpu.memory_space<vmem>>, vector<256x128xbf16>
      tpu.vector_store %arg6[%c0_14, %c0_15], %16 {strides = array<i32>} : memref<256x128xbf16, #tpu.memory_space<vmem>>, vector<256x128xbf16>,
    } else {
    }
    return
  }
  func.func @transform_0(%arg0: i32, %arg1: i32, %arg2: i32) -> (i32, i32) {
    %c0_i32 = arith.constant 0 : i32
    return %arg0, %arg2 : i32, i32
  }
  func.func @transform_1(%arg0: i32, %arg1: i32, %arg2: i32) -> (i32, i32) {
    %c0_i32 = arith.constant 0 : i32
    return %arg2, %arg1 : i32, i32
  }
  func.func @transform_2(%arg0: i32, %arg1: i32, %arg2: i32) -> (i32, i32) {
    %c0_i32 = arith.constant 0 : i32
    %c0_i32_0 = arith.constant 0 : i32
    return %c0_i32, %arg1 : i32, i32
  }
  func.func @transform_3(%arg0: i32, %arg1: i32, %arg2: i32) -> (i32, i32) {
    %c0_i32 = arith.constant 0 : i32
    return %arg0, %arg1 : i32, i32
  }
}

module attributes {stable_mosaic.version = 11 : i64} {
  func.func @_yolo_kernel(%arg0: memref<2x8x768xf32, #tpu.memory_space<vmem>>, %arg1: memref<8x768xf32, #tpu.memory_space<vmem>>, %arg2: memref<2x8x768xf32, #tpu.memory_space<vmem>>) attributes {dimension_semantics = [], scalar_prefetch = 0 : i64, scratch_operands = 0 : i64, tpu.core_type = #tpu.core_type<tc>} {
    %c0 = arith.constant 0 : index
    %c0_0 = arith.constant 0 : index
    %c0_1 = arith.constant 0 : index
    %0 = vector.load %arg0[%c0, %c0_0, %c0_1] : memref<2x8x768xf32, #tpu.memory_space<vmem>>, vector<2x8x768xf32>
    %1 = tpu.iota {dimensions = array<i32: 1>} : vector<2x8x768xi32>
    %2 = arith.negf %0 : vector<2x8x768xf32>
    %3 = math.exp %2 : vector<2x8x768xf32>
    %cst = arith.constant 1.000000e+00 : f32
    %4 = vector.broadcast %cst : f32 to vector<2x8x768xf32>
    %5 = arith.addf %4, %3 : vector<2x8x768xf32>
    %6 = arith.divf %4, %5 : vector<2x8x768xf32>
    %7 = math.exp %0 : vector<2x8x768xf32>
    %c0_2 = arith.constant 0 : index
    %c0_3 = arith.constant 0 : index
    %8 = vector.load %arg1[%c0_2, %c0_3] : memref<8x768xf32, #tpu.memory_space<vmem>>, vector<8x768xf32>
    %9 = vector.shape_cast %8 : vector<8x768xf32> to vector<1x8x768xf32>
    %c2_i32 = arith.constant 2 : i32
    %10 = vector.broadcast %c2_i32 : i32 to vector<2x8x768xi32>
    %11 = arith.cmpi slt, %1, %10 : vector<2x8x768xi32>
    %12 = vector.broadcast %9 : vector<1x8x768xf32> to vector<2x8x768xf32>
    %13 = arith.addf %6, %12 : vector<2x8x768xf32>
    %cst_4 = arith.constant 1.000000e+00 : f32
    %14 = vector.broadcast %cst_4 : f32 to vector<2x8x768xf32>
    %15 = arith.mulf %13, %14 : vector<2x8x768xf32>
    %c4_i32 = arith.constant 4 : i32
    %16 = vector.broadcast %c4_i32 : i32 to vector<2x8x768xi32>
    %17 = arith.cmpi slt, %1, %16 : vector<2x8x768xi32>
    %18 = vector.broadcast %9 : vector<1x8x768xf32> to vector<2x8x768xf32>
    %19 = arith.mulf %7, %18 : vector<2x8x768xf32>
    %20 = arith.select %17, %19, %6 : vector<2x8x768xi1>, vector<2x8x768xf32>
    %21 = arith.select %11, %15, %20 : vector<2x8x768xi1>, vector<2x8x768xf32>
    %c0_5 = arith.constant 0 : index
    %c0_6 = arith.constant 0 : index
    %c0_7 = arith.constant 0 : index
    %22 = vector.load %arg2[%c0_5, %c0_6, %c0_7] : memref<2x8x768xf32, #tpu.memory_space<vmem>>, vector<2x8x768xf32>
    tpu.vector_store %arg2[%c0_5, %c0_6, %c0_7], %21 {strides = array<i32>} : memref<2x8x768xf32, #tpu.memory_space<vmem>>, vector<2x8x768xf32>,
    return
  }
}

module attributes {stable_mosaic.version = 11 : i64} {
  func.func @_mm_bias_kernel(%arg0: i32, %arg1: i32, %arg2: i32, %arg3: memref<128x128xbf16, #tpu.memory_space<vmem>>, %arg4: memref<128x128xbf16, #tpu.memory_space<vmem>>, %arg5: memref<1x128xf32, #tpu.memory_space<vmem>>, %arg6: memref<128x128xbf16, #tpu.memory_space<vmem>>, %arg7: memref<128x128xf32, #tpu.memory_space<vmem>>) attributes {dimension_semantics = [#tpu.dimension_semantics<parallel>, #tpu.dimension_semantics<parallel>, #tpu.dimension_semantics<arbitrary>], iteration_bounds = array<i64: 1, 1, 1>, scalar_prefetch = 0 : i64, scratch_operands = 1 : i64, tpu.core_type = #tpu.core_type<tc>, window_params = [{transform_indices = @transform_0, window_bounds = array<i64: 128, 128>}, {transform_indices = @transform_1, window_bounds = array<i64: 128, 128>}, {transform_indices = @transform_2, window_bounds = array<i64: 1, 128>}, {transform_indices = @transform_3, window_bounds = array<i64: 128, 128>}]} {
    %c0_i32 = arith.constant 0 : i32
    %0 = arith.cmpi eq, %arg2, %c0_i32 : i32
    %1 = arith.extui %0 : i1 to i32
    %c0_i32_0 = arith.constant 0 : i32
    %2 = arith.cmpi ne, %1, %c0_i32_0 : i32
    scf.if %2 {
      %cst_10 = arith.constant 0.000000e+00 : f32
      %12 = vector.broadcast %cst_10 : f32 to vector<128x128xf32>
      %c0_11 = arith.constant 0 : index
      %c0_12 = arith.constant 0 : index
      %13 = vector.load %arg7[%c0_11, %c0_12] : memref<128x128xf32, #tpu.memory_space<vmem>>, vector<128x128xf32>
      tpu.vector_store %arg7[%c0_11, %c0_12], %12 {strides = array<i32>} : memref<128x128xf32, #tpu.memory_space<vmem>>, vector<128x128xf32>,
    } else {
    }
    %c0 = arith.constant 0 : index
    %c0_1 = arith.constant 0 : index
    %3 = vector.load %arg7[%c0, %c0_1] : memref<128x128xf32, #tpu.memory_space<vmem>>, vector<128x128xf32>
    %c0_2 = arith.constant 0 : index
    %c0_3 = arith.constant 0 : index
    %4 = vector.load %arg3[%c0_2, %c0_3] : memref<128x128xbf16, #tpu.memory_space<vmem>>, vector<128x128xbf16>
    %c0_4 = arith.constant 0 : index
    %c0_5 = arith.constant 0 : index
    %5 = vector.load %arg4[%c0_4, %c0_5] : memref<128x128xbf16, #tpu.memory_space<vmem>>, vector<128x128xbf16>
    %cst = arith.constant dense<0.000000e+00> : vector<128x128xf32>
    %6 = tpu.matmul %4, %5, %cst {dimension_numbers = #tpu.dot_dimension_numbers<[1], [0], [0], [1], [0, 0, 1, 1], [], []>} : vector<128x128xbf16>, vector<128x128xbf16>, vector<128x128xf32> -> vector<128x128xf32>
    %7 = arith.addf %3, %6 : vector<128x128xf32>
    %c0_6 = arith.constant 0 : index
    %c0_7 = arith.constant 0 : index
    %8 = vector.load %arg7[%c0_6, %c0_7] : memref<128x128xf32, #tpu.memory_space<vmem>>, vector<128x128xf32>
    tpu.vector_store %arg7[%c0_6, %c0_7], %7 {strides = array<i32>} : memref<128x128xf32, #tpu.memory_space<vmem>>, vector<128x128xf32>,
    %c0_i32_8 = arith.constant 0 : i32
    %9 = arith.cmpi eq, %arg2, %c0_i32_8 : i32
    %10 = arith.extui %9 : i1 to i32
    %c0_i32_9 = arith.constant 0 : i32
    %11 = arith.cmpi ne, %10, %c0_i32_9 : i32
    scf.if %11 {
      %c0_10 = arith.constant 0 : index
      %c0_11 = arith.constant 0 : index
      %12 = vector.load %arg7[%c0_10, %c0_11] : memref<128x128xf32, #tpu.memory_space<vmem>>, vector<128x128xf32>
      %c0_12 = arith.constant 0 : index
      %c0_13 = arith.constant 0 : index
      %13 = vector.load %arg5[%c0_12, %c0_13] : memref<1x128xf32, #tpu.memory_space<vmem>>, vector<1x128xf32>
      %14 = vector.broadcast %13 : vector<1x128xf32> to vector<128x128xf32>
      %15 = arith.addf %12, %14 : vector<128x128xf32>
      %16 = arith.truncf %15 : vector<128x128xf32> to vector<128x128xbf16>
      %c0_14 = arith.constant 0 : index
      %c0_15 = arith.constant 0 : index
      %17 = vector.load %arg6[%c0_14, %c0_15] : memref<128x128xbf16, #tpu.memory_space<vmem>>, vector<128x128xbf16>
      tpu.vector_store %arg6[%c0_14, %c0_15], %16 {strides = array<i32>} : memref<128x128xbf16, #tpu.memory_space<vmem>>, vector<128x128xbf16>,
    } else {
    }
    return
  }
  func.func @transform_0(%arg0: i32, %arg1: i32, %arg2: i32) -> (i32, i32) {
    %c0_i32 = arith.constant 0 : i32
    return %arg0, %arg2 : i32, i32
  }
  func.func @transform_1(%arg0: i32, %arg1: i32, %arg2: i32) -> (i32, i32) {
    %c0_i32 = arith.constant 0 : i32
    return %arg2, %arg1 : i32, i32
  }
  func.func @transform_2(%arg0: i32, %arg1: i32, %arg2: i32) -> (i32, i32) {
    %c0_i32 = arith.constant 0 : i32
    %c0_i32_0 = arith.constant 0 : i32
    return %c0_i32, %arg1 : i32, i32
  }
  func.func @transform_3(%arg0: i32, %arg1: i32, %arg2: i32) -> (i32, i32) {
    %c0_i32 = arith.constant 0 : i32
    return %arg0, %arg1 : i32, i32
  }
}

module attributes {stable_mosaic.version = 11 : i64} {
  func.func @_yolo_kernel(%arg0: memref<2x8x256xf32, #tpu.memory_space<vmem>>, %arg1: memref<8x256xf32, #tpu.memory_space<vmem>>, %arg2: memref<2x8x256xf32, #tpu.memory_space<vmem>>) attributes {dimension_semantics = [], scalar_prefetch = 0 : i64, scratch_operands = 0 : i64, tpu.core_type = #tpu.core_type<tc>} {
    %c0 = arith.constant 0 : index
    %c0_0 = arith.constant 0 : index
    %c0_1 = arith.constant 0 : index
    %0 = vector.load %arg0[%c0, %c0_0, %c0_1] : memref<2x8x256xf32, #tpu.memory_space<vmem>>, vector<2x8x256xf32>
    %1 = tpu.iota {dimensions = array<i32: 1>} : vector<2x8x256xi32>
    %2 = arith.negf %0 : vector<2x8x256xf32>
    %3 = math.exp %2 : vector<2x8x256xf32>
    %cst = arith.constant 1.000000e+00 : f32
    %4 = vector.broadcast %cst : f32 to vector<2x8x256xf32>
    %5 = arith.addf %4, %3 : vector<2x8x256xf32>
    %6 = arith.divf %4, %5 : vector<2x8x256xf32>
    %7 = math.exp %0 : vector<2x8x256xf32>
    %c0_2 = arith.constant 0 : index
    %c0_3 = arith.constant 0 : index
    %8 = vector.load %arg1[%c0_2, %c0_3] : memref<8x256xf32, #tpu.memory_space<vmem>>, vector<8x256xf32>
    %9 = vector.shape_cast %8 : vector<8x256xf32> to vector<1x8x256xf32>
    %c2_i32 = arith.constant 2 : i32
    %10 = vector.broadcast %c2_i32 : i32 to vector<2x8x256xi32>
    %11 = arith.cmpi slt, %1, %10 : vector<2x8x256xi32>
    %12 = vector.broadcast %9 : vector<1x8x256xf32> to vector<2x8x256xf32>
    %13 = arith.addf %6, %12 : vector<2x8x256xf32>
    %cst_4 = arith.constant 2.000000e+00 : f32
    %14 = vector.broadcast %cst_4 : f32 to vector<2x8x256xf32>
    %15 = arith.mulf %13, %14 : vector<2x8x256xf32>
    %c4_i32 = arith.constant 4 : i32
    %16 = vector.broadcast %c4_i32 : i32 to vector<2x8x256xi32>
    %17 = arith.cmpi slt, %1, %16 : vector<2x8x256xi32>
    %18 = vector.broadcast %9 : vector<1x8x256xf32> to vector<2x8x256xf32>
    %19 = arith.mulf %7, %18 : vector<2x8x256xf32>
    %20 = arith.select %17, %19, %6 : vector<2x8x256xi1>, vector<2x8x256xf32>
    %21 = arith.select %11, %15, %20 : vector<2x8x256xi1>, vector<2x8x256xf32>
    %c0_5 = arith.constant 0 : index
    %c0_6 = arith.constant 0 : index
    %c0_7 = arith.constant 0 : index
    %22 = vector.load %arg2[%c0_5, %c0_6, %c0_7] : memref<2x8x256xf32, #tpu.memory_space<vmem>>, vector<2x8x256xf32>
    tpu.vector_store %arg2[%c0_5, %c0_6, %c0_7], %21 {strides = array<i32>} : memref<2x8x256xf32, #tpu.memory_space<vmem>>, vector<2x8x256xf32>,
    return
  }
}

</mosaic_0001>

<bundles_post_ra>
// kernel: _lambda_.11
= control target key start
LH: loop header
LB: loop body
LE: loop exit
PB: predicated region body
PF: predicated region fallthrough
CT: control target
= control target key end

     0   :  { %s1259_s18 = smov 0   ;;  %s1261_s19 = smov 0   ;;  %s1482_s0 = inlined_call_operand.vmem [shape: bf16[512,128], index: 0, kind: input, shape index: {}, may-alias: {0,5}]   ;;  %s1483_s1 = inlined_call_operand.vmem [shape: f32[1,128], index: 1, kind: input, shape index: {}]   ;;  %s1484_s2 = inlined_call_operand.vmem [shape: f32[1,128], index: 2, kind: input, shape index: {}]   ;;  %s1485_s3 = inlined_call_operand.vmem [shape: f32[1,128], index: 3, kind: input, shape index: {}]   ;;  %s1486_s4 = inlined_call_operand.vmem [shape: f32[1,128], index: 4, kind: input, shape index: {}]   ;;  %s1487_s5 = inlined_call_operand.vmem [shape: bf16[512,128], index: 5, kind: output, shape index: {}, may-alias: {0,5}]  }
   0x1   :  { %s1263_s20 = smov 0  }
   0x2 LB: > { %s27_s21 = sadd.s32 1, %s1223_s19  ;;  %p932_p0 = scmp.ge.s32.totalorder %s1227_s20, 1  ;;  %s1227_s20 = sphi %s1263_s20, %s15_s20   ;;  %s1223_s19 = sphi %s1261_s19, %s1489_s19   ;;  %s1219_s18 = sphi %s1259_s18, %s1488_s18  }
   0x3   : > { %p29_p1 = scmp.ge.s32.totalorder %s27_s21, 2  ;;  %p239_p2 = scmp.lt.s32.totalorder %s1227_s20, 3 }
   0x5   : > { %s1491_s21 = smov (%p29_p1, %s27_s21), 0  ;;  %p240_p3 = pnand %p932_p0, %p239_p2 }
   0x6   : > { %s933_s22 = sshll.u32 (!%p240_p3), %s1219_s18, 5  ;;  %v379_v0 = vld [vmem:[%s1483_s1] sm:$0x1] (!%p240_p3)  ;;  %v387_v3 = vlaneseq (!%p240_p3) }
   0x7   : > { %243 = sbr.rel (%p240_p3) target bundleno = 92 (0x5c), region = 40  ;;  %p286_p4 = scmp.lt.s32.totalorder (!%p240_p3), %s933_s22, 63  ;;  %v380_v1 = vmul.f32 (!%p240_p3), 0.001953125, %v379_v0  ;;  %v381_v2 = vld [vmem:[%s1484_s2] sm:$0x1] (!%p240_p3) }
   0x8   : > { %v382_v4 = vmul.f32 (!%p240_p3), 0.001953125, %v381_v2  ;;  %v1286_v6 = vshrl.u32 (!%p240_p3), %v387_v3, 7 }
   0x9   : > { %v383_v5 = vmul.f32 (!%p240_p3), %v380_v1, %v380_v1 }
   0xa   : > { %v389_v8 = vsub.s32 (!%p240_p3), 0, %v1286_v6 }
   0xb   : > { %v384_v7 = vsub.f32 (!%p240_p3), %v382_v4, %v383_v5 }
   0xc   : > { %v1305_v20 = vrot.slane (!%p240_p3), %v380_v1, %v389_v8 }
   0xd   : > { %v385_v13 = vmax.f32 (!%p240_p3), %v384_v7, 0.0 }
   0xe   : > { %s1493_s22 = smov (!%p286_p4, %s933_s22), 63 }
   0xf   : > { %s934_s27 = sshll.u32 %s1493_s22, 2  ;;  %v424_v32 = vadd.f32 1e-05, %v385_v13 }
  0x10   : > { %s1293_s30 = scalar_lea.vmem %s1482_s0, %s934_s27  ;;  %s1411_s12 = scalar_lea.vmem %s1487_s5, %s934_s27 }
  0x11   : > { %v1006_v9 = vld [vmem:[%s1293_s30] sm:$0xff]   ;;  %v1149_v10 = vld [vmem:[%s1293_s30 + $0x8] sm:$0xff]   ;;  %v1150_v11 = vld [vmem:[%s1293_s30 + $0x10] sm:$0xff]   ;;  %1203 = vrsqrt.f32 %v424_v32 }
  0x12   : > { %v1151_v12 = vld [vmem:[%s1293_s30 + $0x18] sm:$0xff]   ;;  %v1152_v14 = vld [vmem:[%s1293_s30 + $0x20] sm:$0xff]   ;;  %v1007_v15 = vunpack.c.l.bf16 %v1006_v9  ;;  %v1008_v16 = vunpack.c.h.bf16 %v1006_v9  ;;  %v1011_v17 = vunpack.c.l.bf16 %v1149_v10  ;;  %v1153_v18 = vld [vmem:[%s1293_s30 + $0x28] sm:$0xff]   ;;  %v1012_v21 = vunpack.c.h.bf16 %v1149_v10 }
  0x13   : > { %v1154_v19 = vld [vmem:[%s1293_s30 + $0x30] sm:$0xff]   ;;  %v1015_v22 = vunpack.c.l.bf16 %v1150_v11  ;;  %v1016_v23 = vunpack.c.h.bf16 %v1150_v11  ;;  %v1019_v24 = vunpack.c.l.bf16 %v1151_v12  ;;  %v1155_v25 = vld [vmem:[%s1293_s30 + $0x38] sm:$0xff]   ;;  %v1156_v26 = vld [vmem:[%s1293_s30 + $0x40] sm:$0xff]   ;;  %v1020_v27 = vunpack.c.h.bf16 %v1151_v12 }
  0x14   : > { %v1023_v28 = vunpack.c.l.bf16 %v1152_v14  ;;  %v1024_v29 = vunpack.c.h.bf16 %v1152_v14  ;;  %v1157_v30 = vld [vmem:[%s1293_s30 + $0x48] sm:$0xff]   ;;  %v1158_v31 = vld [vmem:[%s1293_s30 + $0x50] sm:$0xff]   ;;  %v1027_v33 = vunpack.c.l.bf16 %v1153_v18  ;;  %v1028_v34 = vunpack.c.h.bf16 %v1153_v18  ;;  %v1159_v37 = vld [vmem:[%s1293_s30 + $0x58] sm:$0xff]  }
  0x15   : > { %v1031_v35 = vunpack.c.l.bf16 %v1154_v19  ;;  %v1032_v36 = vunpack.c.h.bf16 %v1154_v19  ;;  %v1160_v38 = vld [vmem:[%s1293_s30 + $0x60] sm:$0xff]   ;;  %v1035_v39 = vunpack.c.l.bf16 %v1155_v25  ;;  %v1036_v40 = vunpack.c.h.bf16 %v1155_v25  ;;  %v1161_v42 = vld [vmem:[%s1293_s30 + $0x68] sm:$0xff]   ;;  %v1162_v43 = vld [vmem:[%s1293_s30 + $0x70] sm:$0xff]  }
  0x16   : > { %v1039_v41 = vunpack.c.l.bf16 %v1156_v26  ;;  %v1040_v44 = vunpack.c.h.bf16 %v1156_v26  ;;  %v1043_v45 = vunpack.c.l.bf16 %v1157_v30  ;;  %v1044_v46 = vunpack.c.h.bf16 %v1157_v30  ;;  %v1163_v48 = vld [vmem:[%s1293_s30 + $0x78] sm:$0xff]  }
  0x17   : > { %v1047_v47 = vunpack.c.l.bf16 %v1158_v31  ;;  %v1048_v49 = vunpack.c.h.bf16 %v1158_v31  ;;  %v1051_v50 = vunpack.c.l.bf16 %v1159_v37  ;;  %v1052_v51 = vunpack.c.h.bf16 %v1159_v37 }
  0x18   : > { %v1055_v52 = vunpack.c.l.bf16 %v1160_v38  ;;  %v1056_v53 = vunpack.c.h.bf16 %v1160_v38  ;;  %v1059_v54 = vunpack.c.l.bf16 %v1161_v42  ;;  %v1060_v55 = vunpack.c.h.bf16 %v1161_v42 }
  0x19   : > { %v1063_v56 = vunpack.c.l.bf16 %v1162_v43  ;;  %v1064_v57 = vunpack.c.h.bf16 %v1162_v43  ;;  %v1067_v58 = vunpack.c.l.bf16 %v1163_v48  ;;  %v1068_v59 = vunpack.c.h.bf16 %v1163_v48 }
  0x1a   : > { %v392_v60 = vsub.f32 %v1007_v15, %v1305_v20  ;;  %v393_v61 = vsub.f32 %v1008_v16, %v1305_v20  ;;  %v394_v62 = vsub.f32 %v1011_v17, %v1305_v20  ;;  %v395_v63 = vsub.f32 %v1012_v21, %v1305_v20 }
  0x1b   : > { %v396_v0 = vsub.f32 %v1015_v22, %v1305_v20  ;;  %v397_v1 = vsub.f32 %v1016_v23, %v1305_v20  ;;  %v398_v2 = vsub.f32 %v1019_v24, %v1305_v20  ;;  %v399_v3 = vsub.f32 %v1020_v27, %v1305_v20  ;;  %v1204_v19 = vpop.eup %1203 }
  0x1c   : > { %v400_v4 = vsub.f32 %v1023_v28, %v1305_v20  ;;  %v401_v5 = vsub.f32 %v1024_v29, %v1305_v20  ;;  %v402_v7 = vsub.f32 %v1027_v33, %v1305_v20  ;;  %v403_v9 = vsub.f32 %v1028_v34, %v1305_v20 }
  0x1d   : > { %v404_v10 = vsub.f32 %v1031_v35, %v1305_v20  ;;  %v405_v11 = vsub.f32 %v1032_v36, %v1305_v20  ;;  %v406_v12 = vsub.f32 %v1035_v39, %v1305_v20  ;;  %v407_v13 = vsub.f32 %v1036_v40, %v1305_v20 }
  0x1e   : > { %v408_v14 = vsub.f32 %v1039_v41, %v1305_v20  ;;  %v409_v15 = vsub.f32 %v1040_v44, %v1305_v20  ;;  %v410_v16 = vsub.f32 %v1043_v45, %v1305_v20  ;;  %v411_v17 = vsub.f32 %v1044_v46, %v1305_v20 }
  0x1f   : > { %v412_v18 = vsub.f32 %v1047_v47, %v1305_v20  ;;  %v413_v21 = vsub.f32 %v1048_v49, %v1305_v20  ;;  %v414_v22 = vsub.f32 %v1051_v50, %v1305_v20  ;;  %v415_v23 = vsub.f32 %v1052_v51, %v1305_v20 }
  0x20   : > { %v416_v24 = vsub.f32 %v1055_v52, %v1305_v20  ;;  %v417_v25 = vsub.f32 %v1056_v53, %v1305_v20  ;;  %v418_v26 = vsub.f32 %v1059_v54, %v1305_v20  ;;  %v419_v27 = vsub.f32 %v1060_v55, %v1305_v20  ;;  %v937_v54 = vld [vmem:[%s1485_s3] ss:$0 sm:$0xff] }
  0x21   : > { %v430_v28 = vrot.slane %v1204_v19, %v389_v8  ;;  %v420_v29 = vsub.f32 %v1063_v56, %v1305_v20  ;;  %v421_v30 = vsub.f32 %v1064_v57, %v1305_v20  ;;  %v422_v31 = vsub.f32 %v1067_v58, %v1305_v20 }
  0x22   : > { %v423_v32 = vsub.f32 %v1068_v59, %v1305_v20 }
  0x23   : > { %v432_v33 = vmul.f32 %v430_v28, %v392_v60  ;;  %v433_v34 = vmul.f32 %v430_v28, %v393_v61  ;;  %v434_v35 = vmul.f32 %v430_v28, %v394_v62  ;;  %v435_v36 = vmul.f32 %v430_v28, %v395_v63 }
  0x24   : > { %v436_v37 = vmul.f32 %v430_v28, %v396_v0  ;;  %v437_v38 = vmul.f32 %v430_v28, %v397_v1  ;;  %v438_v39 = vmul.f32 %v430_v28, %v398_v2  ;;  %v439_v40 = vmul.f32 %v430_v28, %v399_v3 }
  0x25   : > { %v440_v41 = vmul.f32 %v430_v28, %v400_v4  ;;  %v441_v42 = vmul.f32 %v430_v28, %v401_v5  ;;  %v442_v6 = vmul.f32 %v430_v28, %v402_v7  ;;  %v443_v8 = vmul.f32 %v430_v28, %v403_v9 }
  0x26   : > { %v444_v43 = vmul.f32 %v430_v28, %v404_v10  ;;  %v445_v44 = vmul.f32 %v430_v28, %v405_v11  ;;  %v446_v45 = vmul.f32 %v430_v28, %v406_v12  ;;  %v447_v46 = vmul.f32 %v430_v28, %v407_v13 }
  0x27   : > { %v448_v47 = vmul.f32 %v430_v28, %v408_v14  ;;  %v449_v48 = vmul.f32 %v430_v28, %v409_v15  ;;  %v450_v49 = vmul.f32 %v430_v28, %v410_v16  ;;  %v451_v20 = vmul.f32 %v430_v28, %v411_v17 }
  0x28   : > { %v452_v50 = vmul.f32 %v430_v28, %v412_v18  ;;  %v453_v51 = vmul.f32 %v430_v28, %v413_v21  ;;  %v454_v52 = vmul.f32 %v430_v28, %v414_v22  ;;  %v455_v53 = vmul.f32 %v430_v28, %v415_v23 }
  0x29   : > { %v456_v55 = vmul.f32 %v430_v28, %v416_v24  ;;  %v457_v56 = vmul.f32 %v430_v28, %v417_v25  ;;  %v458_v57 = vmul.f32 %v430_v28, %v418_v26  ;;  %v459_v58 = vmul.f32 %v430_v28, %v419_v27  ;;  %v1380_v26 = vld [vmem:[%s1486_s4] ss:$0 sm:$0xff] }
  0x2a   : > { %v460_v59 = vmul.f32 %v430_v28, %v420_v29  ;;  %v461_v60 = vmul.f32 %v430_v28, %v421_v30  ;;  %v462_v61 = vmul.f32 %v430_v28, %v422_v31  ;;  %v463_v62 = vmul.f32 %v430_v28, %v423_v32 }
  0x2b   : > { %v471_v63 = vmul.f32 %v937_v54, %v432_v33  ;;  %v472_v0 = vmul.f32 %v937_v54, %v433_v34  ;;  %v473_v1 = vmul.f32 %v937_v54, %v434_v35  ;;  %v474_v2 = vmul.f32 %v937_v54, %v435_v36 }
  0x2c   : > { %v475_v3 = vmul.f32 %v937_v54, %v436_v37  ;;  %v476_v4 = vmul.f32 %v937_v54, %v437_v38  ;;  %v477_v5 = vmul.f32 %v937_v54, %v438_v39  ;;  %v478_v7 = vmul.f32 %v937_v54, %v439_v40 }
  0x2d   : > { %v479_v9 = vmul.f32 %v937_v54, %v440_v41  ;;  %v480_v10 = vmul.f32 %v937_v54, %v441_v42  ;;  %v481_v11 = vmul.f32 %v937_v54, %v442_v6  ;;  %v482_v12 = vmul.f32 %v937_v54, %v443_v8 }
  0x2e   : > { %v1353_v13 = vmul.f32 %v937_v54, %v444_v43  ;;  %v1355_v14 = vmul.f32 %v937_v54, %v445_v44  ;;  %v1357_v15 = vmul.f32 %v937_v54, %v446_v45  ;;  %v1359_v16 = vmul.f32 %v937_v54, %v447_v46 }
  0x2f   : > { %v1361_v17 = vmul.f32 %v937_v54, %v448_v47  ;;  %v1363_v18 = vmul.f32 %v937_v54, %v449_v48  ;;  %v1365_v19 = vmul.f32 %v937_v54, %v450_v49  ;;  %v1367_v21 = vmul.f32 %v937_v54, %v451_v20 }
  0x30   : > { %v1369_v22 = vmul.f32 %v937_v54, %v452_v50  ;;  %v1371_v23 = vmul.f32 %v937_v54, %v453_v51  ;;  %v1373_v24 = vmul.f32 %v937_v54, %v454_v52  ;;  %v1375_v25 = vmul.f32 %v937_v54, %v455_v53 }
  0x31   : > { %v1382_v27 = vmul.f32 %v937_v54, %v456_v55  ;;  %v1384_v28 = vmul.f32 %v937_v54, %v457_v56  ;;  %v1386_v29 = vmul.f32 %v937_v54, %v458_v57  ;;  %v1388_v30 = vmul.f32 %v937_v54, %v459_v58 }
  0x32   : > { %v1390_v31 = vmul.f32 %v937_v54, %v460_v59  ;;  %v1392_v32 = vmul.f32 %v937_v54, %v461_v60  ;;  %v1394_v33 = vmul.f32 %v937_v54, %v462_v61  ;;  %v1396_v34 = vmul.f32 %v937_v54, %v463_v62 }
  0x33   : > { %v510_v35 = vadd.f32 %v1380_v26, %v471_v63  ;;  %v511_v36 = vadd.f32 %v1380_v26, %v472_v0  ;;  %v512_v37 = vadd.f32 %v1380_v26, %v473_v1  ;;  %v513_v38 = vadd.f32 %v1380_v26, %v474_v2 }
  0x34   : > { %v514_v39 = vadd.f32 %v1380_v26, %v475_v3  ;;  %v515_v40 = vadd.f32 %v1380_v26, %v476_v4  ;;  %v516_v41 = vadd.f32 %v1380_v26, %v477_v5  ;;  %v517_v42 = vadd.f32 %v1380_v26, %v478_v7 }
  0x35   : > { %vm542_vm0 = vcmp.gt.f32.partialorder %v510_v35, 0.0  ;;  %vm543_vm1 = vcmp.gt.f32.partialorder %v511_v36, 0.0  ;;  %v574_v6 = vmul.f32 0.1, %v510_v35  ;;  %v575_v8 = vmul.f32 0.1, %v511_v36 }
  0x36   : > { %vm544_vm2 = vcmp.gt.f32.partialorder %v512_v37, 0.0  ;;  %vm545_vm3 = vcmp.gt.f32.partialorder %v513_v38, 0.0  ;;  %v576_v43 = vmul.f32 0.1, %v512_v37  ;;  %v577_v44 = vmul.f32 0.1, %v513_v38 }
  0x37   : > { %v606_v45 = vsel %vm542_vm0, %v510_v35, %v574_v6  ;;  %v607_v46 = vsel %vm543_vm1, %v511_v36, %v575_v8  ;;  %vm546_vm4 = vcmp.gt.f32.partialorder %v514_v39, 0.0  ;;  %vm547_vm5 = vcmp.gt.f32.partialorder %v515_v40, 0.0 }
  0x38   : > { %v1072_v47 = vpack.c.bf16 %v607_v46, %v606_v45  ;;  %v608_v48 = vsel %vm544_vm2, %v512_v37, %v576_v43  ;;  %v609_v49 = vsel %vm545_vm3, %v513_v38, %v577_v44  ;;  %v578_v20 = vmul.f32 0.1, %v514_v39 }
  0x39   : > { %v1077_v50 = vpack.c.bf16 %v609_v49, %v608_v48  ;;  %v579_v51 = vmul.f32 0.1, %v515_v40  ;;  %vm548_vm6 = vcmp.gt.f32.partialorder %v516_v41, 0.0  ;;  %vm549_vm7 = vcmp.gt.f32.partialorder %v517_v42, 0.0 }
  0x3a   : > { %1073 = vst [vmem:[%s1411_s12] sm:$0xff] %v1072_v47   ;;  %v610_v52 = vsel %vm546_vm4, %v514_v39, %v578_v20  ;;  %v580_v53 = vmul.f32 0.1, %v516_v41  ;;  %v581_v54 = vmul.f32 0.1, %v517_v42  ;;  %v518_v55 = vadd.f32 %v1380_v26, %v479_v9 }
  0x3b   : > { %1164 = vst [vmem:[%s1411_s12 + $0x8] sm:$0xff] %v1077_v50   ;;  %v611_v56 = vsel %vm547_vm5, %v515_v40, %v579_v51  ;;  %v519_v57 = vadd.f32 %v1380_v26, %v480_v10  ;;  %v520_v58 = vadd.f32 %v1380_v26, %v481_v11  ;;  %v521_v59 = vadd.f32 %v1380_v26, %v482_v12 }
  0x3c   : > { %v1082_v60 = vpack.c.bf16 %v611_v56, %v610_v52  ;;  %v612_v61 = vsel %vm548_vm6, %v516_v41, %v580_v53  ;;  %v613_v62 = vsel %vm549_vm7, %v517_v42, %v581_v54  ;;  %vm550_vm8 = vcmp.gt.f32.partialorder %v518_v55, 0.0 }
  0x3d   : > { %v1087_v63 = vpack.c.bf16 %v613_v62, %v612_v61  ;;  %vm551_vm9 = vcmp.gt.f32.partialorder %v519_v57, 0.0  ;;  %v582_v0 = vmul.f32 0.1, %v518_v55  ;;  %v583_v1 = vmul.f32 0.1, %v519_v57 }
  0x3e   : > { %1165 = vst [vmem:[%s1411_s12 + $0x10] sm:$0xff] %v1082_v60   ;;  %vm552_vm10 = vcmp.gt.f32.partialorder %v520_v58, 0.0  ;;  %vm553_vm11 = vcmp.gt.f32.partialorder %v521_v59, 0.0  ;;  %v584_v2 = vmul.f32 0.1, %v520_v58  ;;  %v522_v7 = vadd.f32 %v1380_v26, %v1353_v13 }
  0x3f   : > { %v585_v3 = vmul.f32 0.1, %v521_v59  ;;  %1166 = vst [vmem:[%s1411_s12 + $0x18] sm:$0xff] %v1087_v63   ;;  %v614_v4 = vsel %vm550_vm8, %v518_v55, %v582_v0  ;;  %v615_v5 = vsel %vm551_vm9, %v519_v57, %v583_v1  ;;  %v523_v9 = vadd.f32 %v1380_v26, %v1355_v14 }
  0x40   : > { %v1092_v10 = vpack.c.bf16 %v615_v5, %v614_v4  ;;  %v616_v11 = vsel %vm552_vm10, %v520_v58, %v584_v2  ;;  %v524_v35 = vadd.f32 %v1380_v26, %v1357_v15  ;;  %vm554_vm12 = vcmp.gt.f32.partialorder %v522_v7, 0.0 }
  0x41   : > { %v617_v12 = vsel %vm553_vm11, %v521_v59, %v585_v3  ;;  %vm555_vm13 = vcmp.gt.f32.partialorder %v523_v9, 0.0  ;;  %v586_v37 = vmul.f32 0.1, %v522_v7  ;;  %v587_v38 = vmul.f32 0.1, %v523_v9 }
  0x42   : > { %v1097_v36 = vpack.c.bf16 %v617_v12, %v616_v11  ;;  %1167 = vst [vmem:[%s1411_s12 + $0x20] sm:$0xff] %v1092_v10   ;;  %v525_v39 = vadd.f32 %v1380_v26, %v1359_v16  ;;  %vm556_vm14 = vcmp.gt.f32.partialorder %v524_v35, 0.0  ;;  %v588_v13 = vmul.f32 0.1, %v524_v35 }
  0x43   : > { %v618_v40 = vsel %vm554_vm12, %v522_v7, %v586_v37  ;;  %v526_v14 = vadd.f32 %v1380_v26, %v1361_v17  ;;  %v527_v15 = vadd.f32 %v1380_v26, %v1363_v18  ;;  %v528_v41 = vadd.f32 %v1380_v26, %v1365_v19 }
  0x44   : > { %1168 = vst [vmem:[%s1411_s12 + $0x28] sm:$0xff] %v1097_v36   ;;  %v619_v42 = vsel %vm555_vm13, %v523_v9, %v587_v38  ;;  %vm557_vm15 = vcmp.gt.f32.partialorder %v525_v39, 0.0  ;;  %v589_v6 = vmul.f32 0.1, %v525_v39  ;;  %v620_v8 = vsel %vm556_vm14, %v524_v35, %v588_v13 }
  0x45   : > { %v1102_v43 = vpack.c.bf16 %v619_v42, %v618_v40  ;;  %vm558_vm0 = vcmp.gt.f32.partialorder %v526_v14, 0.0  ;;  %vm559_vm1 = vcmp.gt.f32.partialorder %v527_v15, 0.0  ;;  %v590_v16 = vmul.f32 0.1, %v526_v14 }
  0x46   : > { %v621_v44 = vsel %vm557_vm15, %v525_v39, %v589_v6  ;;  %v591_v45 = vmul.f32 0.1, %v527_v15  ;;  %v529_v17 = vadd.f32 %v1380_v26, %v1367_v21  ;;  %vm560_vm2 = vcmp.gt.f32.partialorder %v528_v41, 0.0 }
  0x47   : > { %1169 = vst [vmem:[%s1411_s12 + $0x30] sm:$0xff] %v1102_v43   ;;  %v1107_v18 = vpack.c.bf16 %v621_v44, %v620_v8  ;;  %v622_v46 = vsel %vm558_vm0, %v526_v14, %v590_v16  ;;  %v592_v19 = vmul.f32 0.1, %v528_v41  ;;  %v530_v47 = vadd.f32 %v1380_v26, %v1369_v22 }
  0x48   : > { %v623_v48 = vsel %vm559_vm1, %v527_v15, %v591_v45  ;;  %vm561_vm3 = vcmp.gt.f32.partialorder %v529_v17, 0.0  ;;  %v593_v49 = vmul.f32 0.1, %v529_v17  ;;  %v531_v20 = vadd.f32 %v1380_v26, %v1371_v23 }
  0x49   : > { %1170 = vst [vmem:[%s1411_s12 + $0x38] sm:$0xff] %v1107_v18   ;;  %v1112_v50 = vpack.c.bf16 %v623_v48, %v622_v46  ;;  %v624_v51 = vsel %vm560_vm2, %v528_v41, %v592_v19  ;;  %vm562_vm4 = vcmp.gt.f32.partialorder %v530_v47, 0.0  ;;  %v594_v21 = vmul.f32 0.1, %v530_v47 }
  0x4a   : > { %v625_v52 = vsel %vm561_vm3, %v529_v17, %v593_v49  ;;  %vm563_vm5 = vcmp.gt.f32.partialorder %v531_v20, 0.0  ;;  %v595_v53 = vmul.f32 0.1, %v531_v20  ;;  %v532_v54 = vadd.f32 %v1380_v26, %v1373_v24 }
  0x4b   : > { %1171 = vst [vmem:[%s1411_s12 + $0x40] sm:$0xff] %v1112_v50   ;;  %v1117_v22 = vpack.c.bf16 %v625_v52, %v624_v51  ;;  %v626_v55 = vsel %vm562_vm4, %v530_v47, %v594_v21  ;;  %v533_v56 = vadd.f32 %v1380_v26, %v1375_v25  ;;  %v534_v23 = vadd.f32 %v1380_v26, %v1382_v27 }
  0x4c   : > { %v627_v57 = vsel %vm563_vm5, %v531_v20, %v595_v53  ;;  %vm564_vm6 = vcmp.gt.f32.partialorder %v532_v54, 0.0  ;;  %v596_v58 = vmul.f32 0.1, %v532_v54  ;;  %v535_v59 = vadd.f32 %v1380_v26, %v1384_v28 }
  0x4d   : > { %1172 = vst [vmem:[%s1411_s12 + $0x48] sm:$0xff] %v1117_v22   ;;  %v1122_v60 = vpack.c.bf16 %v627_v57, %v626_v55  ;;  %vm565_vm7 = vcmp.gt.f32.partialorder %v533_v56, 0.0  ;;  %v597_v24 = vmul.f32 0.1, %v533_v56  ;;  %vm566_vm8 = vcmp.gt.f32.partialorder %v534_v23, 0.0 }
  0x4e   : > { %v628_v61 = vsel %vm564_vm6, %v532_v54, %v596_v58  ;;  %vm567_vm9 = vcmp.gt.f32.partialorder %v535_v59, 0.0  ;;  %v598_v62 = vmul.f32 0.1, %v534_v23  ;;  %v599_v63 = vmul.f32 0.1, %v535_v59 }
  0x4f   : > { %1173 = vst [vmem:[%s1411_s12 + $0x50] sm:$0xff] %v1122_v60   ;;  %v629_v25 = vsel %vm565_vm7, %v533_v56, %v597_v24  ;;  %v536_v27 = vadd.f32 %v1380_v26, %v1386_v29  ;;  %v537_v0 = vadd.f32 %v1380_v26, %v1388_v30  ;;  %v538_v28 = vadd.f32 %v1380_v26, %v1390_v31 }
  0x50   : > { %v1127_v1 = vpack.c.bf16 %v629_v25, %v628_v61  ;;  %v630_v2 = vsel %vm566_vm8, %v534_v23, %v598_v62  ;;  %v631_v3 = vsel %vm567_vm9, %v535_v59, %v599_v63  ;;  %v539_v4 = vadd.f32 %v1380_v26, %v1392_v32 }
  0x51   : > { %v1132_v5 = vpack.c.bf16 %v631_v3, %v630_v2  ;;  %vm568_vm10 = vcmp.gt.f32.partialorder %v536_v27, 0.0  ;;  %vm569_vm11 = vcmp.gt.f32.partialorder %v537_v0, 0.0  ;;  %v600_v7 = vmul.f32 0.1, %v536_v27 }
  0x52   : > { %1174 = vst [vmem:[%s1411_s12 + $0x58] sm:$0xff] %v1127_v1   ;;  %v601_v9 = vmul.f32 0.1, %v537_v0  ;;  %vm570_vm12 = vcmp.gt.f32.partialorder %v538_v28, 0.0  ;;  %vm571_vm13 = vcmp.gt.f32.partialorder %v539_v4, 0.0  ;;  %v540_v10 = vadd.f32 %v1380_v26, %v1394_v33 }
  0x53   : > { %v602_v29 = vmul.f32 0.1, %v538_v28  ;;  %1175 = vst [vmem:[%s1411_s12 + $0x60] sm:$0xff] %v1132_v5   ;;  %v632_v30 = vsel %vm568_vm10, %v536_v27, %v600_v7  ;;  %v603_v31 = vmul.f32 0.1, %v539_v4  ;;  %v541_v32 = vadd.f32 %v1380_v26, %v1396_v34 }
  0x54   : > { %v633_v11 = vsel %vm569_vm11, %v537_v0, %v601_v9  ;;  %vm572_vm14 = vcmp.gt.f32.partialorder %v540_v10, 0.0  ;;  %v604_v38 = vmul.f32 0.1, %v540_v10 }
  0x55   : > { %v634_v12 = vsel %vm570_vm12, %v538_v28, %v602_v29  ;;  %v1137_v35 = vpack.c.bf16 %v633_v11, %v632_v30  ;;  %v635_v36 = vsel %vm571_vm13, %v539_v4, %v603_v31  ;;  %vm573_vm15 = vcmp.gt.f32.partialorder %v541_v32, 0.0 }
  0x56   : > { %v1142_v37 = vpack.c.bf16 %v635_v36, %v634_v12  ;;  %v605_v39 = vmul.f32 0.1, %v541_v32  ;;  %v636_v13 = vsel %vm572_vm14, %v540_v10, %v604_v38 }
  0x57   : > { %1176 = vst [vmem:[%s1411_s12 + $0x68] sm:$0xff] %v1137_v35  }
  0x58   : > { %1177 = vst [vmem:[%s1411_s12 + $0x70] sm:$0xff] %v1142_v37   ;;  %v637_v40 = vsel %vm573_vm15, %v541_v32, %v605_v39 }
  0x59   : > { %v1147_v14 = vpack.c.bf16 %v637_v40, %v636_v13 }
  0x5b   : > { %1178 = vst [vmem:[%s1411_s12 + $0x78] sm:$0xff] %v1147_v14  }
  0x5c PF: > { %s15_s20 = sadd.s32 1, %s1227_s20   ;;  %s1488_s18 = smov %s1223_s19 }
  0x5d   : > { %p12_p5 = scmp.ge.s32.totalorder %s15_s20, 4   ;;  %s1489_s19 = smov %s1491_s21 }
  0x5f   :  { %14 = sbr.rel (!%p12_p5) target bundleno = 2 (0x2), region = 82 }

// kernel: _lambda_.10
= control target key start
LH: loop header
LB: loop body
LE: loop exit
PB: predicated region body
PF: predicated region fallthrough
CT: control target
= control target key end

     0   :  { %s1619_s15 = smov 0   ;;  %s1621_s16 = smov 0   ;;  %s1868_s0 = inlined_call_operand.vmem [shape: bf16[512,128], index: 0, kind: input, shape index: {}]   ;;  %s1869_s1 = inlined_call_operand.vmem [shape: bf16[128,128], index: 1, kind: input, shape index: {}]   ;;  %s1870_s2 = inlined_call_operand.vmem [shape: bf16[512,128], index: 2, kind: output, shape index: {0}]   ;;  %s1871_s3 = inlined_call_operand.vmem [shape: f32[1,128], index: 3, kind: output, shape index: {1}]   ;;  %s1872_s4 = inlined_call_operand.vmem [shape: f32[1,128], index: 4, kind: output, shape index: {2}]  }
   0x1   :  { %s1623_s17 = smov 0  }
   0x2 LB: > { %s30_s18 = sadd.s32 1, %s1587_s16  ;;  %p1237_p0 = scmp.ge.s32.totalorder %s1591_s17, 1  ;;  %s1591_s17 = sphi %s1623_s17, %s15_s17   ;;  %s1587_s16 = sphi %s1621_s16, %s1874_s16   ;;  %s1583_s15 = sphi %s1619_s15, %s1873_s15  }
   0x3   : > { %p32_p1 = scmp.ge.s32.totalorder %s30_s18, 2  ;;  %p210_p2 = scmp.lt.s32.totalorder %s1591_s17, 3 }
   0x5   : > { %s1876_s18 = smov (%p32_p1, %s30_s18), 0  ;;  %p211_p3 = pnand %p1237_p0, %p210_p2 }
   0x6   : > { %v1545_v0 = vld [vmem:[%s1869_s1] sm:$0xff] (!%p211_p3)   ;;  %s1238_s21 = sshll.u32 (!%p211_p3), %s1583_s15, 5  ;;  %v1546_v1 = vld [vmem:[%s1869_s1 + $0x8] sm:$0xff] (!%p211_p3)   ;;  %v1547_v2 = vld [vmem:[%s1869_s1 + $0x10] sm:$0xff] (!%p211_p3)   ;;  %p775_p5 = scmp.eq.s32.totalorder (!%p211_p3), %s1583_s15, 0 }
   0x7   : > { %214 = sbr.rel (%p211_p3) target bundleno = 359 (0x167), region = 28  ;;  %p257_p4 = scmp.lt.s32.totalorder (!%p211_p3), %s1238_s21, 63  ;;  %1455 = vmatprep.subr.bf16.mxu0 (!%p211_p3), %v1545_v0  ;;  %1503 = vmatprep.subr.bf16.mxu1 (!%p211_p3), %v1545_v0  ;;  %v1548_v3 = vld [vmem:[%s1869_s1 + $0x18] sm:$0xff] (!%p211_p3)   ;;  %v1549_v6 = vld [vmem:[%s1869_s1 + $0x20] sm:$0xff] (!%p211_p3)   ;;  %v1550_v7 = vld [vmem:[%s1869_s1 + $0x28] sm:$0xff] (!%p211_p3)  }
   0x8   : > { %1456 = vmatpush3.bf16.msra.mxu0 (!%p211_p3), %v1545_v0  ;;  %1511 = vmatpush3.bf16.msra.mxu1 (!%p211_p3), %v1545_v0  ;;  %v1551_v8 = vld [vmem:[%s1869_s1 + $0x30] sm:$0xff] (!%p211_p3)   ;;  %v1552_v9 = vld [vmem:[%s1869_s1 + $0x38] sm:$0xff] (!%p211_p3)  }
   0x9   : > { %1457 = vmatprep.subr.bf16.mxu0 (!%p211_p3), %v1546_v1  ;;  %1504 = vmatprep.subr.bf16.mxu1 (!%p211_p3), %v1546_v1 }
   0xc   : > { %1458 = vmatpush3.bf16.msra.mxu0 (!%p211_p3), %v1546_v1  ;;  %1512 = vmatpush3.bf16.msra.mxu1 (!%p211_p3), %v1546_v1 }
   0xd   : > { %1459 = vmatprep.subr.bf16.mxu0 (!%p211_p3), %v1547_v2  ;;  %1505 = vmatprep.subr.bf16.mxu1 (!%p211_p3), %v1547_v2 }
   0xe   : > { %s1878_s21 = smov (!%p257_p4, %s1238_s21), 63  ;;  %v1593_v56 = vmov (%p775_p5), 0.0  }
   0xf   : > { %s1239_s26 = sshll.u32 %s1878_s21, 2  ;;  %780 = vst [vmem:[%s1871_s3] sm:$0x1] (%p775_p5), %v1593_v56  ;;  %781 = vst [vmem:[%s1872_s4] sm:$0x1] (%p775_p5), %v1593_v56 }
  0x10   : > { %s1652_s29 = scalar_lea.vmem %s1868_s0, %s1239_s26  ;;  %s1657_s6 = scalar_lea.vmem %s1870_s2, %s1239_s26  ;;  %1460 = vmatpush3.bf16.msra.mxu0 %v1547_v2  ;;  %1513 = vmatpush3.bf16.msra.mxu1 %v1547_v2 }
  0x11   : > { %v1553_v4 = vld [vmem:[%s1652_s29] sm:$0xff]   ;;  %1461 = vmatprep.subr.bf16.mxu0 %v1548_v3  ;;  %1506 = vmatprep.subr.bf16.mxu1 %v1548_v3  ;;  %v1555_v10 = vld [vmem:[%s1652_s29 + $0x8] sm:$0xff]   ;;  %v1557_v12 = vld [vmem:[%s1652_s29 + $0x10] sm:$0xff]  }
  0x12   : > { %v1554_v5 = vld [vmem:[%s1652_s29 + $0x40] sm:$0xff]   ;;  %1471 = vmatprep.mubr.bf16.mxu0 %v1553_v4  ;;  %v1556_v11 = vld [vmem:[%s1652_s29 + $0x48] sm:$0xff]   ;;  %v1558_v13 = vld [vmem:[%s1652_s29 + $0x50] sm:$0xff]  }
  0x13   : > { %1487 = vmatprep.mubr.bf16.mxu1 %v1554_v5  ;;  %v1559_v14 = vld [vmem:[%s1652_s29 + $0x18] sm:$0xff]   ;;  %v1561_v16 = vld [vmem:[%s1652_s29 + $0x20] sm:$0xff]   ;;  %v1563_v18 = vld [vmem:[%s1652_s29 + $0x28] sm:$0xff]  }
  0x14   : > { %1462 = vmatpush3.bf16.msra.mxu0 %v1548_v3  ;;  %1514 = vmatpush3.bf16.msra.mxu1 %v1548_v3  ;;  %v1560_v15 = vld [vmem:[%s1652_s29 + $0x58] sm:$0xff]   ;;  %v1562_v17 = vld [vmem:[%s1652_s29 + $0x60] sm:$0xff]   ;;  %v1564_v19 = vld [vmem:[%s1652_s29 + $0x68] sm:$0xff]  }
  0x15   : > { %1463 = vmatprep.subr.bf16.mxu0 %v1549_v6  ;;  %1507 = vmatprep.subr.bf16.mxu1 %v1549_v6  ;;  %v1565_v20 = vld [vmem:[%s1652_s29 + $0x30] sm:$0xff]   ;;  %v1567_v22 = vld [vmem:[%s1652_s29 + $0x38] sm:$0xff]  }
  0x16   : > { %v1566_v21 = vld [vmem:[%s1652_s29 + $0x70] sm:$0xff]   ;;  %v1568_v23 = vld [vmem:[%s1652_s29 + $0x78] sm:$0xff]  }
  0x18   : > { %1464 = vmatpush3.bf16.msra.mxu0 %v1549_v6  ;;  %1515 = vmatpush3.bf16.msra.mxu1 %v1549_v6 }
  0x19   : > { %1465 = vmatprep.subr.bf16.mxu0 %v1550_v7  ;;  %1508 = vmatprep.subr.bf16.mxu1 %v1550_v7 }
  0x1c   : > { %1466 = vmatpush3.bf16.msra.mxu0 %v1550_v7  ;;  %1516 = vmatpush3.bf16.msra.mxu1 %v1550_v7 }
  0x1d   : > { %1467 = vmatprep.subr.bf16.mxu0 %v1551_v8  ;;  %1509 = vmatprep.subr.bf16.mxu1 %v1551_v8 }
  0x20   : > { %1468 = vmatpush3.bf16.msra.mxu0 %v1551_v8  ;;  %1517 = vmatpush3.bf16.msra.mxu1 %v1551_v8 }
  0x21   : > { %1469 = vmatprep.subr.bf16.mxu0 %v1552_v9  ;;  %1510 = vmatprep.subr.bf16.mxu1 %v1552_v9 }
  0x24   : > { %1470 = vmatpush3.bf16.msra.mxu0 %v1552_v9  ;;  %1518 = vmatpush3.bf16.msra.mxu1 %v1552_v9 }
  0x27   : > { %1472 = vmatmul.mubr.bf16.vlgmr.msra.gmra.mrb[0].mxu0 %v1555_v10  ;;  %1488 = vmatmul.mubr.bf16.vlgmr.msra.gmra.mrb[0].mxu1 %v1556_v11 }
  0x28   : > { %1475 = vmatprep.mubr.bf16.mxu0 %v1557_v12  ;;  %1491 = vmatprep.mubr.bf16.mxu1 %v1558_v13 }
  0x2f   : > { %1476 = vmatmul.mubr.bf16.gmra.mrb[4].mxu0 %v1559_v14  ;;  %1492 = vmatmul.mubr.bf16.gmra.mrb[4].mxu1 %v1560_v15 }
  0x30   : > { %1479 = vmatprep.mubr.bf16.mxu0 %v1561_v16  ;;  %1495 = vmatprep.mubr.bf16.mxu1 %v1562_v17 }
  0x37   : > { %1480 = vmatmul.mubr.bf16.gmra.mrb[8].mxu0 %v1563_v18  ;;  %1496 = vmatmul.mubr.bf16.gmra.mrb[8].mxu1 %v1564_v19 }
  0x38   : > { %1483 = vmatprep.mubr.bf16.mxu0 %v1565_v20  ;;  %1499 = vmatprep.mubr.bf16.mxu1 %v1566_v21 }
  0x3f   : > { %1484 = vmatmul.mubr.bf16.gmra.mrb[12].mxu0 %v1567_v22  ;;  %1500 = vmatmul.mubr.bf16.gmra.mrb[12].mxu1 %v1568_v23 }
  0xfa   : > { %v1473_v24 = vpop.f32.mrb[0].mxu0  ;;  %v1489_v25 = vpop.f32.mrb[0].mxu1 }
  0xfb   : > { %v584_v26 = vpop.f32.mrb[1].mxu0  ;;  %v648_v27 = vpop.f32.mrb[1].mxu1  ;;  %745 = vst [vmem:[#allocation2 + $0x10] sm:$0xff] %v1473_v24  ;;  %761 = vst [vmem:[#allocation2 + $0x90] sm:$0xff] %v1489_v25 }
  0xfc   : > { %v1474_v28 = vpop.f32.mrb[2].mxu0  ;;  %v1490_v29 = vpop.f32.mrb[2].mxu1  ;;  %743 = vst [vmem:[#allocation2] sm:$0xff] %v584_v26  ;;  %759 = vst [vmem:[#allocation2 + $0x80] sm:$0xff] %v648_v27 }
  0xfd   : > { %v587_v30 = vpop.f32.mrb[3].mxu0  ;;  %v651_v31 = vpop.f32.mrb[3].mxu1  ;;  %746 = vst [vmem:[#allocation2 + $0x18] sm:$0xff] %v1474_v28  ;;  %762 = vst [vmem:[#allocation2 + $0x98] sm:$0xff] %v1490_v29 }
  0xfe   : > { %744 = vst [vmem:[#allocation2 + $0x8] sm:$0xff] %v587_v30  ;;  %760 = vst [vmem:[#allocation2 + $0x88] sm:$0xff] %v651_v31 }
 0x102   : > { %v1477_v32 = vpop.f32.mrb[4].mxu0  ;;  %v1493_v33 = vpop.f32.mrb[4].mxu1 }
 0x103   : > { %v600_v34 = vpop.f32.mrb[5].mxu0  ;;  %v664_v35 = vpop.f32.mrb[5].mxu1  ;;  %749 = vst [vmem:[#allocation2 + $0x30] sm:$0xff] %v1477_v32  ;;  %765 = vst [vmem:[#allocation2 + $0xb0] sm:$0xff] %v1493_v33 }
 0x104   : > { %v1478_v36 = vpop.f32.mrb[6].mxu0  ;;  %v1494_v37 = vpop.f32.mrb[6].mxu1  ;;  %747 = vst [vmem:[#allocation2 + $0x20] sm:$0xff] %v600_v34  ;;  %763 = vst [vmem:[#allocation2 + $0xa0] sm:$0xff] %v664_v35 }
 0x105   : > { %v603_v38 = vpop.f32.mrb[7].mxu0  ;;  %v667_v39 = vpop.f32.mrb[7].mxu1  ;;  %750 = vst [vmem:[#allocation2 + $0x38] sm:$0xff] %v1478_v36  ;;  %766 = vst [vmem:[#allocation2 + $0xb8] sm:$0xff] %v1494_v37 }
 0x106   : > { %748 = vst [vmem:[#allocation2 + $0x28] sm:$0xff] %v603_v38  ;;  %764 = vst [vmem:[#allocation2 + $0xa8] sm:$0xff] %v667_v39 }
 0x10a   : > { %v1481_v40 = vpop.f32.mrb[8].mxu0  ;;  %v1497_v41 = vpop.f32.mrb[8].mxu1 }
 0x10b   : > { %v616_v42 = vpop.f32.mrb[9].mxu0  ;;  %v680_v43 = vpop.f32.mrb[9].mxu1  ;;  %753 = vst [vmem:[#allocation2 + $0x50] sm:$0xff] %v1481_v40  ;;  %769 = vst [vmem:[#allocation2 + $0xd0] sm:$0xff] %v1497_v41 }
 0x10c   : > { %v1482_v44 = vpop.f32.mrb[10].mxu0  ;;  %v1498_v45 = vpop.f32.mrb[10].mxu1  ;;  %751 = vst [vmem:[#allocation2 + $0x40] sm:$0xff] %v616_v42  ;;  %767 = vst [vmem:[#allocation2 + $0xc0] sm:$0xff] %v680_v43 }
 0x10d   : > { %v619_v46 = vpop.f32.mrb[11].mxu0  ;;  %v683_v47 = vpop.f32.mrb[11].mxu1  ;;  %754 = vst [vmem:[#allocation2 + $0x58] sm:$0xff] %v1482_v44  ;;  %770 = vst [vmem:[#allocation2 + $0xd8] sm:$0xff] %v1498_v45 }
 0x10e   : > { %752 = vst [vmem:[#allocation2 + $0x48] sm:$0xff] %v619_v46  ;;  %768 = vst [vmem:[#allocation2 + $0xc8] sm:$0xff] %v683_v47 }
 0x110   : > { %779 = sbr.rel (!%p775_p5) target bundleno = 279 (0x117), region = 36 }
 0x112   : > { %v1485_v48 = vpop.f32.mrb[12].mxu0  ;;  %v1501_v49 = vpop.f32.mrb[12].mxu1 }
 0x113   : > { %v632_v50 = vpop.f32.mrb[13].mxu0  ;;  %v696_v51 = vpop.f32.mrb[13].mxu1  ;;  %757 = vst [vmem:[#allocation2 + $0x70] sm:$0xff] %v1485_v48  ;;  %773 = vst [vmem:[#allocation2 + $0xf0] sm:$0xff] %v1501_v49 }
 0x114   : > { %v1486_v52 = vpop.f32.mrb[14].mxu0  ;;  %v1502_v53 = vpop.f32.mrb[14].mxu1  ;;  %755 = vst [vmem:[#allocation2 + $0x60] sm:$0xff] %v632_v50  ;;  %771 = vst [vmem:[#allocation2 + $0xe0] sm:$0xff] %v696_v51 }
 0x115   : > { %v635_v54 = vpop.f32.mrb[15].mxu0  ;;  %v699_v55 = vpop.f32.mrb[15].mxu1  ;;  %758 = vst [vmem:[#allocation2 + $0x78] sm:$0xff] %v1486_v52  ;;  %774 = vst [vmem:[#allocation2 + $0xf8] sm:$0xff] %v1502_v53 }
 0x116   : > { %756 = vst [vmem:[#allocation2 + $0x68] sm:$0xff] %v635_v54  ;;  %772 = vst [vmem:[#allocation2 + $0xe8] sm:$0xff] %v699_v55 }
 0x117 PF: > { %v785_v57 = vld [vmem:[#allocation2] sm:$0xff]  ;;  %v786_v58 = vld [vmem:[#allocation2 + $0x8] sm:$0xff]  ;;  %v787_v59 = vld [vmem:[#allocation2 + $0x10] sm:$0xff] }
 0x118   : > { %v788_v60 = vld [vmem:[#allocation2 + $0x18] sm:$0xff]  ;;  %v818_v61 = vadd.f32 %v786_v58, %v785_v57  ;;  %v858_v62 = vmul.f32 %v785_v57, %v785_v57  ;;  %v859_v63 = vmul.f32 %v786_v58, %v786_v58  ;;  %v860_v0 = vmul.f32 %v787_v59, %v787_v59  ;;  %v789_v2 = vld [vmem:[#allocation2 + $0x20] sm:$0xff]  ;;  %v790_v6 = vld [vmem:[#allocation2 + $0x28] sm:$0xff] }
 0x119   : > { %v1339_v1 = vpack.c.bf16 %v786_v58, %v785_v57  ;;  %v861_v4 = vmul.f32 %v788_v60, %v788_v60  ;;  %v862_v8 = vmul.f32 %v789_v2, %v789_v2  ;;  %v791_v10 = vld [vmem:[#allocation2 + $0x30] sm:$0xff]  ;;  %v792_v12 = vld [vmem:[#allocation2 + $0x38] sm:$0xff]  ;;  %v793_v13 = vld [vmem:[#allocation2 + $0x40] sm:$0xff]  ;;  %v863_v14 = vmul.f32 %v790_v6, %v790_v6 }
 0x11a   : > { %v819_v3 = vadd.f32 %v818_v61, %v787_v59  ;;  %v890_v5 = vadd.f32 %v859_v63, %v858_v62  ;;  %v794_v16 = vld [vmem:[#allocation2 + $0x48] sm:$0xff]  ;;  %v1700_v18 = vld [vmem:[#allocation2 + $0x50] sm:$0xff]  ;;  %v1702_v19 = vld [vmem:[#allocation2 + $0x58] sm:$0xff]  ;;  %v864_v24 = vmul.f32 %v791_v10, %v791_v10  ;;  %v865_v31 = vmul.f32 %v792_v12, %v792_v12 }
 0x11b   : > { %1340 = vst [vmem:[%s1657_s6] sm:$0xff] %v1339_v1   ;;  %v1704_v20 = vld [vmem:[#allocation2 + $0x60] sm:$0xff]  ;;  %v1708_v22 = vld [vmem:[#allocation2 + $0x70] sm:$0xff]  ;;  %v1714_v27 = vld [vmem:[#allocation2 + $0x88] sm:$0xff]  ;;  %v866_v32 = vmul.f32 %v793_v13, %v793_v13  ;;  %v1344_v33 = vpack.c.bf16 %v788_v60, %v787_v59  ;;  %v1349_v38 = vpack.c.bf16 %v790_v6, %v789_v2  ;;  %v1354_v39 = vpack.c.bf16 %v792_v12, %v791_v10 }
 0x11c   : > { %v820_v7 = vadd.f32 %v819_v3, %v788_v60  ;;  %v891_v9 = vadd.f32 %v890_v5, %v860_v0  ;;  %v1710_v23 = vld [vmem:[#allocation2 + $0x78] sm:$0xff]  ;;  %v1712_v26 = vld [vmem:[#allocation2 + $0x80] sm:$0xff]  ;;  %v1716_v28 = vld [vmem:[#allocation2 + $0x90] sm:$0xff]  ;;  %v1359_v40 = vpack.c.bf16 %v794_v16, %v793_v13  ;;  %v1364_v45 = vpack.c.bf16 %v1702_v19, %v1700_v18 }
 0x11d   : > { %v1706_v21 = vld [vmem:[#allocation2 + $0x68] sm:$0xff]  ;;  %v1718_v29 = vld [vmem:[#allocation2 + $0x98] sm:$0xff]  ;;  %v1720_v34 = vld [vmem:[#allocation2 + $0xa0] sm:$0xff]  ;;  %1416 = vst [vmem:[%s1657_s6 + $0x8] sm:$0xff] %v1344_v33   ;;  %v1374_v47 = vpack.c.bf16 %v1710_v23, %v1708_v22  ;;  %v1379_v52 = vpack.c.bf16 %v1714_v27, %v1712_v26  ;;  %v867_v62 = vmul.f32 %v794_v16, %v794_v16  ;;  %v868_v3 = vmul.f32 %v1700_v18, %v1700_v18 }
 0x11e   : > { %v821_v11 = vadd.f32 %v820_v7, %v789_v2  ;;  %v892_v15 = vadd.f32 %v891_v9, %v861_v4  ;;  %v1722_v35 = vld [vmem:[#allocation2 + $0xa8] sm:$0xff]  ;;  %v1724_v36 = vld [vmem:[#allocation2 + $0xb0] sm:$0xff]  ;;  %v1726_v41 = vld [vmem:[#allocation2 + $0xb8] sm:$0xff]  ;;  %v1369_v46 = vpack.c.bf16 %v1706_v21, %v1704_v20  ;;  %1417 = vst [vmem:[%s1657_s6 + $0x10] sm:$0xff] %v1349_v38   ;;  %v1384_v53 = vpack.c.bf16 %v1718_v29, %v1716_v28 }
 0x11f   : > { %v1728_v42 = vld [vmem:[#allocation2 + $0xc0] sm:$0xff]  ;;  %v1730_v43 = vld [vmem:[#allocation2 + $0xc8] sm:$0xff]  ;;  %v1739_v48 = vld [vmem:[#allocation2 + $0xd0] sm:$0xff]  ;;  %1418 = vst [vmem:[%s1657_s6 + $0x18] sm:$0xff] %v1354_v39   ;;  %v1389_v54 = vpack.c.bf16 %v1722_v35, %v1720_v34  ;;  %v1394_v59 = vpack.c.bf16 %v1726_v41, %v1724_v36  ;;  %v870_v9 = vmul.f32 %v1704_v20, %v1704_v20 }
 0x120   : > { %v822_v17 = vadd.f32 %v821_v11, %v790_v6  ;;  %v893_v25 = vadd.f32 %v892_v15, %v862_v8  ;;  %v1741_v49 = vld [vmem:[#allocation2 + $0xd8] sm:$0xff]  ;;  %v1743_v50 = vld [vmem:[#allocation2 + $0xe0] sm:$0xff]  ;;  %1419 = vst [vmem:[%s1657_s6 + $0x20] sm:$0xff] %v1359_v40   ;;  %v1754_v55 = vld [vmem:[#allocation2 + $0xe8] sm:$0xff]  ;;  %v1399_v60 = vpack.c.bf16 %v1730_v43, %v1728_v42  ;;  %v869_v6 = vmul.f32 %v1702_v19, %v1702_v19 }
 0x121   : > { %v1756_v56 = vld [vmem:[#allocation2 + $0xf0] sm:$0xff]  ;;  %v1758_v57 = vld [vmem:[#allocation2 + $0xf8] sm:$0xff]  ;;  %1420 = vst [vmem:[%s1657_s6 + $0x28] sm:$0xff] %v1364_v45   ;;  %1421 = vst [vmem:[%s1657_s6 + $0x30] sm:$0xff] %v1369_v46   ;;  %v1404_v61 = vpack.c.bf16 %v1741_v49, %v1739_v48  ;;  %v1409_v0 = vpack.c.bf16 %v1754_v55, %v1743_v50  ;;  %v872_v15 = vmul.f32 %v1708_v22, %v1708_v22 }
 0x122   : > { %v823_v30 = vadd.f32 %v822_v17, %v791_v10  ;;  %v894_v37 = vadd.f32 %v893_v25, %v863_v14  ;;  %1422 = vst [vmem:[%s1657_s6 + $0x38] sm:$0xff] %v1374_v47   ;;  %1423 = vst [vmem:[%s1657_s6 + $0x40] sm:$0xff] %v1379_v52   ;;  %v1414_v1 = vpack.c.bf16 %v1758_v57, %v1756_v56 }
 0x123   : > { %1424 = vst [vmem:[%s1657_s6 + $0x48] sm:$0xff] %v1384_v53   ;;  %1425 = vst [vmem:[%s1657_s6 + $0x50] sm:$0xff] %v1389_v54  }
 0x124   : > { %v824_v44 = vadd.f32 %v823_v30, %v792_v12  ;;  %v895_v51 = vadd.f32 %v894_v37, %v864_v24  ;;  %1426 = vst [vmem:[%s1657_s6 + $0x58] sm:$0xff] %v1394_v59   ;;  %1427 = vst [vmem:[%s1657_s6 + $0x60] sm:$0xff] %v1399_v60   ;;  %v871_v12 = vmul.f32 %v1706_v21, %v1706_v21 }
 0x125   : > { %1428 = vst [vmem:[%s1657_s6 + $0x68] sm:$0xff] %v1404_v61   ;;  %1429 = vst [vmem:[%s1657_s6 + $0x70] sm:$0xff] %v1409_v0  }
 0x126   : > { %v825_v58 = vadd.f32 %v824_v44, %v793_v13  ;;  %v896_v63 = vadd.f32 %v895_v51, %v865_v31  ;;  %1430 = vst [vmem:[%s1657_s6 + $0x78] sm:$0xff] %v1414_v1  }
 0x128   : > { %v826_v2 = vadd.f32 %v825_v58, %v794_v16  ;;  %v897_v4 = vadd.f32 %v896_v63, %v866_v32 }
 0x12a   : > { %v827_v5 = vadd.f32 %v826_v2, %v1700_v18  ;;  %v898_v7 = vadd.f32 %v897_v4, %v867_v62  ;;  %v873_v18 = vmul.f32 %v1710_v23, %v1710_v23 }
 0x12c   : > { %v828_v8 = vadd.f32 %v827_v5, %v1702_v19  ;;  %v899_v10 = vadd.f32 %v898_v7, %v868_v3 }
 0x12e   : > { %v829_v11 = vadd.f32 %v828_v8, %v1704_v20  ;;  %v900_v13 = vadd.f32 %v899_v10, %v869_v6  ;;  %v874_v20 = vmul.f32 %v1712_v26, %v1712_v26 }
 0x130   : > { %v830_v14 = vadd.f32 %v829_v11, %v1706_v21  ;;  %v901_v16 = vadd.f32 %v900_v13, %v870_v9  ;;  %v875_v21 = vmul.f32 %v1714_v27, %v1714_v27 }
 0x132   : > { %v831_v17 = vadd.f32 %v830_v14, %v1708_v22  ;;  %v902_v19 = vadd.f32 %v901_v16, %v871_v12  ;;  %v876_v22 = vmul.f32 %v1716_v28, %v1716_v28 }
 0x134   : > { %v832_v24 = vadd.f32 %v831_v17, %v1710_v23  ;;  %v903_v25 = vadd.f32 %v902_v19, %v872_v15  ;;  %v877_v23 = vmul.f32 %v1718_v29, %v1718_v29 }
 0x136   : > { %v833_v30 = vadd.f32 %v832_v24, %v1712_v26  ;;  %v904_v31 = vadd.f32 %v903_v25, %v873_v18  ;;  %v878_v26 = vmul.f32 %v1720_v34, %v1720_v34 }
 0x138   : > { %v834_v32 = vadd.f32 %v833_v30, %v1714_v27  ;;  %v905_v33 = vadd.f32 %v904_v31, %v874_v20  ;;  %v879_v27 = vmul.f32 %v1722_v35, %v1722_v35 }
 0x13a   : > { %v835_v37 = vadd.f32 %v834_v32, %v1716_v28  ;;  %v906_v38 = vadd.f32 %v905_v33, %v875_v21  ;;  %v880_v28 = vmul.f32 %v1724_v36, %v1724_v36 }
 0x13c   : > { %v836_v39 = vadd.f32 %v835_v37, %v1718_v29  ;;  %v907_v40 = vadd.f32 %v906_v38, %v876_v22  ;;  %v881_v29 = vmul.f32 %v1726_v41, %v1726_v41 }
 0x13e   : > { %v837_v44 = vadd.f32 %v836_v39, %v1720_v34  ;;  %v908_v45 = vadd.f32 %v907_v40, %v877_v23  ;;  %v882_v34 = vmul.f32 %v1728_v42, %v1728_v42 }
 0x140   : > { %v838_v46 = vadd.f32 %v837_v44, %v1722_v35  ;;  %v909_v47 = vadd.f32 %v908_v45, %v878_v26  ;;  %v883_v35 = vmul.f32 %v1730_v43, %v1730_v43 }
 0x142   : > { %v839_v51 = vadd.f32 %v838_v46, %v1724_v36  ;;  %v910_v52 = vadd.f32 %v909_v47, %v879_v27  ;;  %v884_v36 = vmul.f32 %v1739_v48, %v1739_v48 }
 0x144   : > { %v840_v53 = vadd.f32 %v839_v51, %v1726_v41  ;;  %v911_v54 = vadd.f32 %v910_v52, %v880_v28  ;;  %v885_v41 = vmul.f32 %v1741_v49, %v1741_v49 }
 0x146   : > { %v841_v58 = vadd.f32 %v840_v53, %v1728_v42  ;;  %v912_v59 = vadd.f32 %v911_v54, %v881_v29  ;;  %v886_v42 = vmul.f32 %v1743_v50, %v1743_v50 }
 0x148   : > { %v842_v60 = vadd.f32 %v841_v58, %v1730_v43  ;;  %v913_v61 = vadd.f32 %v912_v59, %v882_v34  ;;  %v887_v43 = vmul.f32 %v1754_v55, %v1754_v55 }
 0x14a   : > { %v843_v62 = vadd.f32 %v842_v60, %v1739_v48  ;;  %v914_v63 = vadd.f32 %v913_v61, %v883_v35  ;;  %v888_v48 = vmul.f32 %v1756_v56, %v1756_v56 }
 0x14c   : > { %v844_v0 = vadd.f32 %v843_v62, %v1741_v49  ;;  %v915_v1 = vadd.f32 %v914_v63, %v884_v36  ;;  %v889_v49 = vmul.f32 %v1758_v57, %v1758_v57 }
 0x14e   : > { %v845_v2 = vadd.f32 %v844_v0, %v1743_v50  ;;  %v916_v3 = vadd.f32 %v915_v1, %v885_v41 }
 0x150   : > { %v846_v4 = vadd.f32 %v845_v2, %v1754_v55  ;;  %v917_v5 = vadd.f32 %v916_v3, %v886_v42 }
 0x152   : > { %v847_v6 = vadd.f32 %v846_v4, %v1756_v56  ;;  %v918_v7 = vadd.f32 %v917_v5, %v887_v43  ;;  %v817_v56 = vld [vmem:[%s1871_s3] sm:$0x1] }
 0x154   : > { %v848_v8 = vadd.f32 %v847_v6, %v1758_v57  ;;  %v919_v9 = vadd.f32 %v918_v7, %v888_v48  ;;  %v857_v57 = vld [vmem:[%s1872_s4] sm:$0x1] }
 0x156   : > { %v849_v50 = vrot.slane %v848_v8, 4  ;;  %v920_v10 = vadd.f32 %v919_v9, %v889_v49 }
 0x158   : > { %v850_v11 = vadd.f32 %v849_v50, %v848_v8  ;;  %v921_v12 = vrot.slane %v920_v10, 4 }
 0x15a   : > { %v851_v13 = vrot.slane %v850_v11, 2  ;;  %v922_v14 = vadd.f32 %v921_v12, %v920_v10 }
 0x15c   : > { %v852_v55 = vadd.f32 %v851_v13, %v850_v11  ;;  %v923_v15 = vrot.slane %v922_v14, 2 }
 0x15e   : > { %v853_v16 = vrot.slane %v852_v55, 1  ;;  %v924_v17 = vadd.f32 %v923_v15, %v922_v14 }
 0x160   : > { %v854_v18 = vadd.f32 %v853_v16, %v852_v55  ;;  %v925_v19 = vrot.slane %v924_v17, 1 }
 0x162   : > { %v855_v24 = vadd.f32 %v854_v18, %v817_v56  ;;  %v926_v20 = vadd.f32 %v925_v19, %v924_v17 }
 0x164   : > { %856 = vst [vmem:[%s1871_s3] sm:$0x1] %v855_v24  ;;  %v927_v25 = vadd.f32 %v926_v20, %v857_v57 }
 0x166   : > { %928 = vst [vmem:[%s1872_s4] sm:$0x1] %v927_v25 }
 0x167 PF: > { %s15_s17 = sadd.s32 1, %s1591_s17   ;;  %s1873_s15 = smov %s1587_s16 }
 0x168   : > { %p12_p6 = scmp.ge.s32.totalorder %s15_s17, 4   ;;  %s1874_s16 = smov %s1876_s18 }
 0x16a   :  { %14 = sbr.rel (!%p12_p6) target bundleno = 2 (0x2), region = 97 }

// kernel: _lambda_.12
= control target key start
LH: loop header
LB: loop body
LE: loop exit
PB: predicated region body
PF: predicated region fallthrough
CT: control target
= control target key end

     0   :  { %v666_v16 = vmov 0.0   ;;  %s782_s1 = inlined_call_operand.vmem [shape: bf16[128,128], index: 1, kind: input, shape index: {}]   ;;  %s783_s0 = inlined_call_operand.vmem [shape: bf16[128,128], index: 0, kind: input, shape index: {}]   ;;  %s784_s3 = inlined_call_operand.vmem [shape: f32[1,128], index: 3, kind: output, shape index: {1}]   ;;  %s785_s4 = inlined_call_operand.vmem [shape: f32[1,128], index: 4, kind: output, shape index: {2}]   ;;  %s786_s2 = inlined_call_operand.vmem [shape: bf16[128,128], index: 2, kind: output, shape index: {0}]  }
   0x1   :  { %v650_v0 = vld [vmem:[%s782_s1] sm:$0xff]   ;;  %v651_v1 = vld [vmem:[%s782_s1 + $0x8] sm:$0xff]   ;;  %v652_v2 = vld [vmem:[%s782_s1 + $0x10] sm:$0xff]   ;;  %313 = vst [vmem:[%s784_s3] sm:$0x1] %v666_v16 }
   0x2   :  { %601 = vmatprep.subr.bf16.mxu0 %v650_v0  ;;  %633 = vmatprep.subr.bf16.mxu1 %v650_v0  ;;  %v653_v3 = vld [vmem:[%s782_s1 + $0x18] sm:$0xff]   ;;  %v658_v4 = vld [vmem:[%s783_s0] sm:$0xff]   ;;  %v655_v7 = vld [vmem:[%s782_s1 + $0x28] sm:$0xff]   ;;  %314 = vst [vmem:[%s785_s4] sm:$0x1] %v666_v16 }
   0x3   :  { %602 = vmatpush3.bf16.msra.mxu0 %v650_v0  ;;  %641 = vmatpush3.bf16.msra.mxu1 %v650_v0  ;;  %v654_v5 = vld [vmem:[%s782_s1 + $0x20] sm:$0xff]   ;;  %v656_v8 = vld [vmem:[%s782_s1 + $0x30] sm:$0xff]   ;;  %v657_v9 = vld [vmem:[%s782_s1 + $0x38] sm:$0xff]  }
   0x4   :  { %603 = vmatprep.subr.bf16.mxu0 %v651_v1  ;;  %634 = vmatprep.subr.bf16.mxu1 %v651_v1  ;;  %v662_v6 = vld [vmem:[%s783_s0 + $0x20] sm:$0xff]   ;;  %v659_v10 = vld [vmem:[%s783_s0 + $0x8] sm:$0xff]   ;;  %v660_v12 = vld [vmem:[%s783_s0 + $0x10] sm:$0xff]  }
   0x5   :  { %617 = vmatprep.mubr.bf16.mxu0 %v658_v4  ;;  %625 = vmatprep.mubr.bf16.mxu1 %v662_v6  ;;  %v663_v11 = vld [vmem:[%s783_s0 + $0x28] sm:$0xff]   ;;  %v664_v13 = vld [vmem:[%s783_s0 + $0x30] sm:$0xff]   ;;  %v661_v14 = vld [vmem:[%s783_s0 + $0x18] sm:$0xff]  }
   0x6   :  { %v665_v15 = vld [vmem:[%s783_s0 + $0x38] sm:$0xff]  }
   0x7   :  { %604 = vmatpush3.bf16.msra.mxu0 %v651_v1  ;;  %642 = vmatpush3.bf16.msra.mxu1 %v651_v1 }
   0x8   :  { %605 = vmatprep.subr.bf16.mxu0 %v652_v2  ;;  %635 = vmatprep.subr.bf16.mxu1 %v652_v2 }
   0xb   :  { %606 = vmatpush3.bf16.msra.mxu0 %v652_v2  ;;  %643 = vmatpush3.bf16.msra.mxu1 %v652_v2 }
   0xc   :  { %607 = vmatprep.subr.bf16.mxu0 %v653_v3  ;;  %636 = vmatprep.subr.bf16.mxu1 %v653_v3 }
   0xf   :  { %608 = vmatpush3.bf16.msra.mxu0 %v653_v3  ;;  %644 = vmatpush3.bf16.msra.mxu1 %v653_v3 }
  0x10   :  { %609 = vmatprep.subr.bf16.mxu0 %v654_v5  ;;  %637 = vmatprep.subr.bf16.mxu1 %v654_v5 }
  0x13   :  { %610 = vmatpush3.bf16.msra.mxu0 %v654_v5  ;;  %645 = vmatpush3.bf16.msra.mxu1 %v654_v5 }
  0x14   :  { %611 = vmatprep.subr.bf16.mxu0 %v655_v7  ;;  %638 = vmatprep.subr.bf16.mxu1 %v655_v7 }
  0x17   :  { %612 = vmatpush3.bf16.msra.mxu0 %v655_v7  ;;  %646 = vmatpush3.bf16.msra.mxu1 %v655_v7 }
  0x18   :  { %613 = vmatprep.subr.bf16.mxu0 %v656_v8  ;;  %639 = vmatprep.subr.bf16.mxu1 %v656_v8 }
  0x1b   :  { %614 = vmatpush3.bf16.msra.mxu0 %v656_v8  ;;  %647 = vmatpush3.bf16.msra.mxu1 %v656_v8 }
  0x1c   :  { %615 = vmatprep.subr.bf16.mxu0 %v657_v9  ;;  %640 = vmatprep.subr.bf16.mxu1 %v657_v9 }
  0x1f   :  { %616 = vmatpush3.bf16.msra.mxu0 %v657_v9  ;;  %648 = vmatpush3.bf16.msra.mxu1 %v657_v9 }
  0x22   :  { %618 = vmatmul.mubr.bf16.vlgmr.msra.gmra.mrb[0].mxu0 %v659_v10  ;;  %626 = vmatmul.mubr.bf16.vlgmr.msra.gmra.mrb[0].mxu1 %v663_v11 }
  0x23   :  { %621 = vmatprep.mubr.bf16.mxu0 %v660_v12  ;;  %629 = vmatprep.mubr.bf16.mxu1 %v664_v13 }
  0x2a   :  { %622 = vmatmul.mubr.bf16.gmra.mrb[4].mxu0 %v661_v14  ;;  %630 = vmatmul.mubr.bf16.gmra.mrb[4].mxu1 %v665_v15 }
  0xf5   :  { %v619_v17 = vpop.f32.mrb[0].mxu0  ;;  %v627_v18 = vpop.f32.mrb[0].mxu1 }
  0xf6   :  { %v213_v19 = vpop.f32.mrb[1].mxu0  ;;  %v245_v20 = vpop.f32.mrb[1].mxu1  ;;  %v361_v32 = vmul.f32 %v619_v17, %v619_v17  ;;  %v369_v4 = vmul.f32 %v627_v18, %v627_v18 }
  0xf7   :  { %v620_v21 = vpop.f32.mrb[2].mxu0  ;;  %v628_v22 = vpop.f32.mrb[2].mxu1  ;;  %v359_v27 = vmul.f32 %v213_v19, %v213_v19  ;;  %v367_v62 = vmul.f32 %v245_v20, %v245_v20 }
  0xf8   :  { %v546_v23 = vpack.c.bf16 %v620_v21, %v619_v17  ;;  %v216_v24 = vpop.f32.mrb[3].mxu0  ;;  %v566_v25 = vpack.c.bf16 %v628_v22, %v627_v18  ;;  %v248_v26 = vpop.f32.mrb[3].mxu1  ;;  %v362_v35 = vmul.f32 %v620_v21, %v620_v21  ;;  %v370_v7 = vmul.f32 %v628_v22, %v628_v22 }
  0xf9   :  { %v335_v28 = vadd.f32 %v216_v24, %v213_v19  ;;  %v360_v29 = vmul.f32 %v216_v24, %v216_v24  ;;  %v541_v30 = vpack.c.bf16 %v216_v24, %v213_v19  ;;  %v561_v31 = vpack.c.bf16 %v248_v26, %v245_v20 }
  0xfa   :  { %578 = vst [vmem:[%s786_s2 + $0x8] sm:$0xff] %v546_v23   ;;  %582 = vst [vmem:[%s786_s2 + $0x28] sm:$0xff] %v566_v25   ;;  %v368_v3 = vmul.f32 %v248_v26, %v248_v26 }
  0xfb   :  { %v336_v33 = vadd.f32 %v619_v17, %v335_v28  ;;  %v375_v34 = vadd.f32 %v360_v29, %v359_v27  ;;  %542 = vst [vmem:[%s786_s2] sm:$0xff] %v541_v30   ;;  %581 = vst [vmem:[%s786_s2 + $0x20] sm:$0xff] %v561_v31  }
  0xfd   :  { %v376_v36 = vadd.f32 %v375_v34, %v361_v32  ;;  %v623_v37 = vpop.f32.mrb[4].mxu0  ;;  %v337_v38 = vadd.f32 %v620_v21, %v336_v33  ;;  %v631_v39 = vpop.f32.mrb[4].mxu1  ;;  %v334_v32 = vld [vmem:[%s784_s3] sm:$0x1] }
  0xfe   :  { %v229_v40 = vpop.f32.mrb[5].mxu0  ;;  %v261_v41 = vpop.f32.mrb[5].mxu1  ;;  %v365_v56 = vmul.f32 %v623_v37, %v623_v37  ;;  %v373_v16 = vmul.f32 %v631_v39, %v631_v39 }
  0xff   :  { %v338_v42 = vadd.f32 %v337_v38, %v229_v40  ;;  %v363_v43 = vmul.f32 %v229_v40, %v229_v40  ;;  %v377_v44 = vadd.f32 %v376_v36, %v362_v35  ;;  %v624_v45 = vpop.f32.mrb[6].mxu0  ;;  %v632_v46 = vpop.f32.mrb[6].mxu1  ;;  %v371_v10 = vmul.f32 %v261_v41, %v261_v41  ;;  %v358_v35 = vld [vmem:[%s785_s4] sm:$0x1] }
 0x100   :  { %v556_v47 = vpack.c.bf16 %v624_v45, %v623_v37  ;;  %v232_v48 = vpop.f32.mrb[7].mxu0  ;;  %v576_v49 = vpack.c.bf16 %v632_v46, %v631_v39  ;;  %v264_v50 = vpop.f32.mrb[7].mxu1  ;;  %v366_v59 = vmul.f32 %v624_v45, %v624_v45 }
 0x101   :  { %v378_v51 = vadd.f32 %v377_v44, %v363_v43  ;;  %v339_v52 = vadd.f32 %v338_v42, %v232_v48  ;;  %v364_v53 = vmul.f32 %v232_v48, %v232_v48  ;;  %v551_v54 = vpack.c.bf16 %v232_v48, %v229_v40 }
 0x102   :  { %580 = vst [vmem:[%s786_s2 + $0x18] sm:$0xff] %v556_v47   ;;  %584 = vst [vmem:[%s786_s2 + $0x38] sm:$0xff] %v576_v49   ;;  %v571_v55 = vpack.c.bf16 %v264_v50, %v261_v41  ;;  %v372_v15 = vmul.f32 %v264_v50, %v264_v50 }
 0x103   :  { %v340_v57 = vadd.f32 %v623_v37, %v339_v52  ;;  %v379_v58 = vadd.f32 %v378_v51, %v364_v53  ;;  %579 = vst [vmem:[%s786_s2 + $0x10] sm:$0xff] %v551_v54  }
 0x104   :  { %583 = vst [vmem:[%s786_s2 + $0x30] sm:$0xff] %v571_v55  }
 0x105   :  { %v380_v60 = vadd.f32 %v379_v58, %v365_v56  ;;  %v341_v61 = vadd.f32 %v624_v45, %v340_v57 }
 0x107   :  { %v342_v63 = vadd.f32 %v341_v61, %v245_v20  ;;  %v381_v0 = vadd.f32 %v380_v60, %v366_v59  ;;  %v374_v20 = vmul.f32 %v632_v46, %v632_v46 }
 0x109   :  { %v382_v1 = vadd.f32 %v381_v0, %v367_v62  ;;  %v343_v2 = vadd.f32 %v342_v63, %v248_v26 }
 0x10b   :  { %v344_v5 = vadd.f32 %v627_v18, %v343_v2  ;;  %v383_v6 = vadd.f32 %v382_v1, %v368_v3 }
 0x10d   :  { %v384_v8 = vadd.f32 %v383_v6, %v369_v4  ;;  %v345_v9 = vadd.f32 %v628_v22, %v344_v5 }
 0x10f   :  { %v346_v11 = vadd.f32 %v345_v9, %v261_v41  ;;  %v385_v12 = vadd.f32 %v384_v8, %v370_v7 }
 0x111   :  { %v386_v13 = vadd.f32 %v385_v12, %v371_v10  ;;  %v347_v14 = vadd.f32 %v346_v11, %v264_v50 }
 0x113   :  { %v348_v17 = vadd.f32 %v631_v39, %v347_v14  ;;  %v387_v19 = vadd.f32 %v386_v13, %v372_v15 }
 0x115   :  { %v349_v21 = vadd.f32 %v632_v46, %v348_v17  ;;  %v388_v23 = vadd.f32 %v387_v19, %v373_v16 }
 0x117   :  { %v350_v24 = vrot.slane %v349_v21, 4  ;;  %v389_v25 = vadd.f32 %v388_v23, %v374_v20 }
 0x119   :  { %v351_v26 = vadd.f32 %v350_v24, %v349_v21  ;;  %v390_v18 = vrot.slane %v389_v25, 4 }
 0x11b   :  { %v352_v27 = vrot.slane %v351_v26, 2  ;;  %v391_v28 = vadd.f32 %v390_v18, %v389_v25 }
 0x11d   :  { %v353_v29 = vadd.f32 %v352_v27, %v351_v26  ;;  %v392_v22 = vrot.slane %v391_v28, 2 }
 0x11f   :  { %v354_v30 = vrot.slane %v353_v29, 1  ;;  %v393_v31 = vadd.f32 %v392_v22, %v391_v28 }
 0x121   :  { %v355_v33 = vadd.f32 %v354_v30, %v353_v29  ;;  %v394_v34 = vrot.slane %v393_v31, 1 }
 0x123   :  { %v356_v36 = vadd.f32 %v355_v33, %v334_v32  ;;  %v395_v37 = vadd.f32 %v394_v34, %v393_v31 }
 0x125   :  { %357 = vst [vmem:[%s784_s3] sm:$0x1] %v356_v36  ;;  %v396_v38 = vadd.f32 %v395_v37, %v358_v35 }
 0x127   :  { %397 = vst [vmem:[%s785_s4] sm:$0x1] %v396_v38 }

// kernel: _lambda_.13
= control target key start
LH: loop header
LB: loop body
LE: loop exit
PB: predicated region body
PF: predicated region fallthrough
CT: control target
= control target key end

     0   :  { %v60_v5 = vlaneseq  ;;  %s561_s1 = inlined_call_operand.vmem [shape: f32[1,128], index: 1, kind: input, shape index: {}]   ;;  %s562_s2 = inlined_call_operand.vmem [shape: f32[1,128], index: 2, kind: input, shape index: {}]   ;;  %s563_s0 = inlined_call_operand.vmem [shape: bf16[128,128], index: 0, kind: input, shape index: {}, may-alias: {0,5}]   ;;  %s564_s3 = inlined_call_operand.vmem [shape: f32[1,128], index: 3, kind: input, shape index: {}]   ;;  %s565_s4 = inlined_call_operand.vmem [shape: f32[1,128], index: 4, kind: input, shape index: {}]   ;;  %s566_s5 = inlined_call_operand.vmem [shape: bf16[128,128], index: 5, kind: output, shape index: {}, may-alias: {0,5}]  }
   0x1   :  { %v52_v0 = vld [vmem:[%s561_s1] sm:$0x1]  ;;  %v389_v12 = vld [vmem:[%s563_s0 + $0x8] sm:$0xff]   ;;  %v390_v13 = vld [vmem:[%s563_s0 + $0x10] sm:$0xff]  }
   0x2   :  { %v54_v1 = vld [vmem:[%s562_s2] sm:$0x1]  ;;  %v53_v2 = vmul.f32 0.0078125, %v52_v0  ;;  %v61_v8 = vshrl.u32 %v60_v5, 7  ;;  %v391_v14 = vld [vmem:[%s563_s0 + $0x18] sm:$0xff]   ;;  %v393_v18 = vld [vmem:[%s563_s0 + $0x28] sm:$0xff]   ;;  %v323_v21 = vunpack.c.l.bf16 %v389_v12  ;;  %v324_v22 = vunpack.c.h.bf16 %v389_v12 }
   0x3   :  { %v55_v3 = vmul.f32 0.0078125, %v54_v1  ;;  %v318_v11 = vld [vmem:[%s563_s0] sm:$0xff]   ;;  %v394_v19 = vld [vmem:[%s563_s0 + $0x30] sm:$0xff]   ;;  %v327_v23 = vunpack.c.l.bf16 %v390_v13  ;;  %v395_v24 = vld [vmem:[%s563_s0 + $0x38] sm:$0xff]   ;;  %v328_v25 = vunpack.c.h.bf16 %v390_v13  ;;  %v331_v26 = vunpack.c.l.bf16 %v391_v14 }
   0x4   :  { %v56_v4 = vmul.f32 %v53_v2, %v53_v2  ;;  %v62_v10 = vsub.s32 0, %v61_v8  ;;  %v392_v15 = vld [vmem:[%s563_s0 + $0x20] sm:$0xff]   ;;  %v319_v16 = vunpack.c.l.bf16 %v318_v11  ;;  %v320_v20 = vunpack.c.h.bf16 %v318_v11 }
   0x5   :  { %v332_v27 = vunpack.c.h.bf16 %v391_v14  ;;  %v335_v28 = vunpack.c.l.bf16 %v392_v15  ;;  %v336_v29 = vunpack.c.h.bf16 %v392_v15  ;;  %v339_v30 = vunpack.c.l.bf16 %v393_v18  ;;  %v470_v50 = vld [vmem:[%s564_s3] ss:$0 sm:$0xff] }
   0x6   :  { %v57_v6 = vsub.f32 %v55_v3, %v56_v4  ;;  %v63_v17 = vrot.slane %v53_v2, %v62_v10  ;;  %v340_v31 = vunpack.c.h.bf16 %v393_v18  ;;  %v343_v32 = vunpack.c.l.bf16 %v394_v19  ;;  %v487_v59 = vld [vmem:[%s565_s4] ss:$0 sm:$0xff] }
   0x7   :  { %v344_v34 = vunpack.c.h.bf16 %v394_v19  ;;  %v347_v35 = vunpack.c.l.bf16 %v395_v24  ;;  %v348_v36 = vunpack.c.h.bf16 %v395_v24 }
   0x8   :  { %v58_v7 = vmax.f32 %v57_v6, 0.0  ;;  %v65_v33 = vsub.f32 %v319_v16, %v63_v17  ;;  %v66_v37 = vsub.f32 %v320_v20, %v63_v17  ;;  %v67_v38 = vsub.f32 %v323_v21, %v63_v17 }
   0x9   :  { %v68_v39 = vsub.f32 %v324_v22, %v63_v17  ;;  %v69_v40 = vsub.f32 %v327_v23, %v63_v17  ;;  %v70_v42 = vsub.f32 %v328_v25, %v63_v17  ;;  %v71_v43 = vsub.f32 %v331_v26, %v63_v17 }
   0xa   :  { %v81_v9 = vadd.f32 1e-05, %v58_v7  ;;  %v72_v44 = vsub.f32 %v332_v27, %v63_v17  ;;  %v73_v45 = vsub.f32 %v335_v28, %v63_v17  ;;  %v74_v47 = vsub.f32 %v336_v29, %v63_v17 }
   0xb   :  { %v75_v48 = vsub.f32 %v339_v30, %v63_v17  ;;  %v76_v49 = vsub.f32 %v340_v31, %v63_v17  ;;  %v472_v51 = vsub.f32 %v343_v32, %v63_v17  ;;  %v474_v52 = vsub.f32 %v344_v34, %v63_v17 }
   0xc   :  { %403 = vrsqrt.f32 %v81_v9  ;;  %v476_v53 = vsub.f32 %v347_v35, %v63_v17  ;;  %v478_v54 = vsub.f32 %v348_v36, %v63_v17 }
  0x16   :  { %v404_v41 = vpop.eup %403 }
  0x17   :  { %v465_v46 = vrot.slane %v404_v41, %v62_v10 }
  0x19   :  { %v89_v55 = vmul.f32 %v465_v46, %v65_v33  ;;  %v90_v56 = vmul.f32 %v465_v46, %v66_v37  ;;  %v91_v57 = vmul.f32 %v465_v46, %v67_v38  ;;  %v92_v58 = vmul.f32 %v465_v46, %v68_v39 }
  0x1a   :  { %v93_v60 = vmul.f32 %v465_v46, %v69_v40  ;;  %v94_v61 = vmul.f32 %v465_v46, %v70_v42  ;;  %v95_v62 = vmul.f32 %v465_v46, %v71_v43  ;;  %v96_v63 = vmul.f32 %v465_v46, %v72_v44 }
  0x1b   :  { %v112_v0 = vmul.f32 %v470_v50, %v89_v55  ;;  %v113_v1 = vmul.f32 %v470_v50, %v90_v56  ;;  %v114_v2 = vmul.f32 %v470_v50, %v91_v57  ;;  %v115_v3 = vmul.f32 %v470_v50, %v92_v58 }
  0x1c   :  { %v116_v4 = vmul.f32 %v470_v50, %v93_v60  ;;  %v117_v5 = vmul.f32 %v470_v50, %v94_v61  ;;  %v118_v6 = vmul.f32 %v470_v50, %v95_v62  ;;  %v119_v7 = vmul.f32 %v470_v50, %v96_v63 }
  0x1d   :  { %v135_v8 = vadd.f32 %v487_v59, %v112_v0  ;;  %v136_v9 = vadd.f32 %v487_v59, %v113_v1  ;;  %v137_v10 = vadd.f32 %v487_v59, %v114_v2  ;;  %v138_v11 = vadd.f32 %v487_v59, %v115_v3 }
  0x1e   :  { %v139_v12 = vadd.f32 %v487_v59, %v116_v4  ;;  %v140_v13 = vadd.f32 %v487_v59, %v117_v5  ;;  %v141_v14 = vadd.f32 %v487_v59, %v118_v6  ;;  %v142_v15 = vadd.f32 %v487_v59, %v119_v7 }
  0x1f   :  { %vm151_vm0 = vcmp.gt.f32.partialorder %v135_v8, 0.0  ;;  %vm152_vm1 = vcmp.gt.f32.partialorder %v136_v9, 0.0  ;;  %v167_v16 = vmul.f32 0.1, %v135_v8  ;;  %v168_v17 = vmul.f32 0.1, %v136_v9 }
  0x20   :  { %vm153_vm2 = vcmp.gt.f32.partialorder %v137_v10, 0.0  ;;  %vm154_vm3 = vcmp.gt.f32.partialorder %v138_v11, 0.0  ;;  %v169_v18 = vmul.f32 0.1, %v137_v10  ;;  %v170_v19 = vmul.f32 0.1, %v138_v11 }
  0x21   :  { %v183_v20 = vsel %vm151_vm0, %v135_v8, %v167_v16  ;;  %v184_v21 = vsel %vm152_vm1, %v136_v9, %v168_v17  ;;  %vm155_vm4 = vcmp.gt.f32.partialorder %v139_v12, 0.0  ;;  %vm156_vm5 = vcmp.gt.f32.partialorder %v140_v13, 0.0 }
  0x22   :  { %v352_v22 = vpack.c.bf16 %v184_v21, %v183_v20  ;;  %v185_v23 = vsel %vm153_vm2, %v137_v10, %v169_v18  ;;  %v186_v24 = vsel %vm154_vm3, %v138_v11, %v170_v19  ;;  %v171_v25 = vmul.f32 0.1, %v139_v12 }
  0x23   :  { %v357_v26 = vpack.c.bf16 %v186_v24, %v185_v23  ;;  %v172_v27 = vmul.f32 0.1, %v140_v13  ;;  %vm157_vm6 = vcmp.gt.f32.partialorder %v141_v14, 0.0  ;;  %vm158_vm7 = vcmp.gt.f32.partialorder %v142_v15, 0.0 }
  0x24   :  { %353 = vst [vmem:[%s566_s5] sm:$0xff] %v352_v22   ;;  %v187_v28 = vsel %vm155_vm4, %v139_v12, %v171_v25  ;;  %v173_v29 = vmul.f32 0.1, %v141_v14  ;;  %v174_v30 = vmul.f32 0.1, %v142_v15  ;;  %v97_v31 = vmul.f32 %v465_v46, %v73_v45 }
  0x25   :  { %396 = vst [vmem:[%s566_s5 + $0x8] sm:$0xff] %v357_v26   ;;  %v188_v32 = vsel %vm156_vm5, %v140_v13, %v172_v27  ;;  %v98_v33 = vmul.f32 %v465_v46, %v74_v47  ;;  %v99_v34 = vmul.f32 %v465_v46, %v75_v48  ;;  %v100_v35 = vmul.f32 %v465_v46, %v76_v49 }
  0x26   :  { %v362_v36 = vpack.c.bf16 %v188_v32, %v187_v28  ;;  %v189_v37 = vsel %vm157_vm6, %v141_v14, %v173_v29  ;;  %v190_v38 = vsel %vm158_vm7, %v142_v15, %v174_v30  ;;  %v120_v39 = vmul.f32 %v470_v50, %v97_v31 }
  0x27   :  { %v367_v40 = vpack.c.bf16 %v190_v38, %v189_v37  ;;  %v121_v41 = vmul.f32 %v470_v50, %v98_v33  ;;  %v122_v42 = vmul.f32 %v470_v50, %v99_v34  ;;  %v123_v43 = vmul.f32 %v470_v50, %v100_v35 }
  0x28   :  { %397 = vst [vmem:[%s566_s5 + $0x10] sm:$0xff] %v362_v36   ;;  %v143_v44 = vadd.f32 %v487_v59, %v120_v39  ;;  %v101_v45 = vmul.f32 %v465_v46, %v472_v51  ;;  %v102_v47 = vmul.f32 %v465_v46, %v474_v52  ;;  %v103_v48 = vmul.f32 %v465_v46, %v476_v53 }
  0x29   :  { %398 = vst [vmem:[%s566_s5 + $0x18] sm:$0xff] %v367_v40   ;;  %v144_v49 = vadd.f32 %v487_v59, %v121_v41  ;;  %v145_v55 = vadd.f32 %v487_v59, %v122_v42  ;;  %v146_v56 = vadd.f32 %v487_v59, %v123_v43  ;;  %v104_v57 = vmul.f32 %v465_v46, %v478_v54 }
  0x2a   :  { %vm159_vm8 = vcmp.gt.f32.partialorder %v143_v44, 0.0  ;;  %v175_v51 = vmul.f32 0.1, %v143_v44  ;;  %v124_v52 = vmul.f32 %v470_v50, %v101_v45  ;;  %v125_v58 = vmul.f32 %v470_v50, %v102_v47 }
  0x2b   :  { %vm160_vm9 = vcmp.gt.f32.partialorder %v144_v49, 0.0  ;;  %v176_v53 = vmul.f32 0.1, %v144_v49  ;;  %vm161_vm10 = vcmp.gt.f32.partialorder %v145_v55, 0.0  ;;  %vm162_vm11 = vcmp.gt.f32.partialorder %v146_v56, 0.0 }
  0x2c   :  { %v191_v60 = vsel %vm159_vm8, %v143_v44, %v175_v51  ;;  %v177_v61 = vmul.f32 0.1, %v145_v55  ;;  %v178_v62 = vmul.f32 0.1, %v146_v56  ;;  %v147_v63 = vadd.f32 %v487_v59, %v124_v52 }
  0x2d   :  { %v192_v0 = vsel %vm160_vm9, %v144_v49, %v176_v53  ;;  %v148_v1 = vadd.f32 %v487_v59, %v125_v58  ;;  %v126_v46 = vmul.f32 %v470_v50, %v103_v48  ;;  %v127_v54 = vmul.f32 %v470_v50, %v104_v57 }
  0x2e   :  { %v372_v2 = vpack.c.bf16 %v192_v0, %v191_v60  ;;  %v193_v3 = vsel %vm161_vm10, %v145_v55, %v177_v61  ;;  %v194_v4 = vsel %vm162_vm11, %v146_v56, %v178_v62  ;;  %vm163_vm12 = vcmp.gt.f32.partialorder %v147_v63, 0.0 }
  0x2f   :  { %v377_v5 = vpack.c.bf16 %v194_v4, %v193_v3  ;;  %vm164_vm13 = vcmp.gt.f32.partialorder %v148_v1, 0.0  ;;  %v179_v6 = vmul.f32 0.1, %v147_v63  ;;  %v180_v7 = vmul.f32 0.1, %v148_v1 }
  0x30   :  { %399 = vst [vmem:[%s566_s5 + $0x20] sm:$0xff] %v372_v2   ;;  %v149_v8 = vadd.f32 %v487_v59, %v126_v46  ;;  %v150_v9 = vadd.f32 %v487_v59, %v127_v54 }
  0x31   :  { %400 = vst [vmem:[%s566_s5 + $0x28] sm:$0xff] %v377_v5   ;;  %v195_v50 = vsel %vm163_vm12, %v147_v63, %v179_v6  ;;  %v196_v10 = vsel %vm164_vm13, %v148_v1, %v180_v7 }
  0x32   :  { %v382_v11 = vpack.c.bf16 %v196_v10, %v195_v50  ;;  %vm165_vm14 = vcmp.gt.f32.partialorder %v149_v8, 0.0  ;;  %vm166_vm15 = vcmp.gt.f32.partialorder %v150_v9, 0.0  ;;  %v181_v12 = vmul.f32 0.1, %v149_v8 }
  0x33   :  { %v182_v13 = vmul.f32 0.1, %v150_v9 }
  0x34   :  { %401 = vst [vmem:[%s566_s5 + $0x30] sm:$0xff] %v382_v11   ;;  %v197_v14 = vsel %vm165_vm14, %v149_v8, %v181_v12 }
  0x35   :  { %v198_v15 = vsel %vm166_vm15, %v150_v9, %v182_v13 }
  0x36   :  { %v387_v16 = vpack.c.bf16 %v198_v15, %v197_v14 }
  0x38   :  { %402 = vst [vmem:[%s566_s5 + $0x38] sm:$0xff] %v387_v16  }

// kernel: _lambda_.14
= control target key start
LH: loop header
LB: loop body
LE: loop exit
PB: predicated region body
PF: predicated region fallthrough
CT: control target
= control target key end

     0   :  { %v818_v32 = vmov 0.0   ;;  %s1000_s1 = inlined_call_operand.vmem [shape: bf16[256,128], index: 1, kind: input, shape index: {}]   ;;  %s1001_s0 = inlined_call_operand.vmem [shape: bf16[128,256], index: 0, kind: input, shape index: {}]   ;;  %s1002_s3 = inlined_call_operand.vmem [shape: f32[1,128], index: 3, kind: output, shape index: {1}]   ;;  %s1003_s4 = inlined_call_operand.vmem [shape: f32[1,128], index: 4, kind: output, shape index: {2}]   ;;  %s1004_s2 = inlined_call_operand.vmem [shape: bf16[128,128], index: 2, kind: output, shape index: {0}]  }
   0x1   :  { %v778_v0 = vld [vmem:[%s1000_s1 + $0x40] sm:$0xff]   ;;  %v780_v2 = vld [vmem:[%s1000_s1 + $0x48] sm:$0xff]   ;;  %v782_v4 = vld [vmem:[%s1000_s1 + $0x50] sm:$0xff]   ;;  %409 = vst [vmem:[%s1002_s3] sm:$0x1] %v818_v32 }
   0x2   :  { %v779_v1 = vld [vmem:[%s1000_s1] sm:$0xff]   ;;  %697 = vmatprep.subr.bf16.mxu0 %v778_v0  ;;  %761 = vmatprep.subr.bf16.mxu1 %v778_v0  ;;  %v781_v3 = vld [vmem:[%s1000_s1 + $0x8] sm:$0xff]   ;;  %v783_v5 = vld [vmem:[%s1000_s1 + $0x10] sm:$0xff]   ;;  %410 = vst [vmem:[%s1003_s4] sm:$0x1] %v818_v32 }
   0x3   :  { %698 = vmatpush3.bf16.msra.mxu0 %v779_v1  ;;  %769 = vmatpush3.bf16.msra.mxu1 %v779_v1  ;;  %v784_v6 = vld [vmem:[%s1000_s1 + $0x58] sm:$0xff]   ;;  %v786_v8 = vld [vmem:[%s1000_s1 + $0x60] sm:$0xff]   ;;  %v788_v10 = vld [vmem:[%s1000_s1 + $0x68] sm:$0xff]  }
   0x4   :  { %699 = vmatprep.subr.bf16.mxu0 %v780_v2  ;;  %762 = vmatprep.subr.bf16.mxu1 %v780_v2  ;;  %v785_v7 = vld [vmem:[%s1000_s1 + $0x18] sm:$0xff]   ;;  %v787_v9 = vld [vmem:[%s1000_s1 + $0x20] sm:$0xff]   ;;  %v789_v12 = vld [vmem:[%s1000_s1 + $0x28] sm:$0xff]  }
   0x5   :  { %v796_v11 = vld [vmem:[%s1001_s0 + $0x4] ss:$8 sps:$4 sm:$0xff]   ;;  %v790_v14 = vld [vmem:[%s1000_s1 + $0x70] sm:$0xff]   ;;  %v792_v16 = vld [vmem:[%s1000_s1 + $0x78] sm:$0xff]  }
   0x6   :  { %v802_v13 = vld [vmem:[%s1001_s0 + $0x44] ss:$8 sps:$4 sm:$0xff]   ;;  %307 = vmatprep.mubr.bf16.mxu0 %v796_v11  ;;  %v791_v15 = vld [vmem:[%s1000_s1 + $0x30] sm:$0xff]   ;;  %v793_v17 = vld [vmem:[%s1000_s1 + $0x38] sm:$0xff]  }
   0x7   :  { %700 = vmatpush3.bf16.msra.mxu0 %v781_v3  ;;  %770 = vmatpush3.bf16.msra.mxu1 %v781_v3  ;;  %v794_v18 = vld [vmem:[%s1001_s0] ss:$8 sps:$4 sm:$0xff]   ;;  %v797_v20 = vld [vmem:[%s1001_s0 + $0x14] ss:$8 sps:$4 sm:$0xff]   ;;  %v799_v22 = vld [vmem:[%s1001_s0 + $0x10] ss:$8 sps:$4 sm:$0xff]  }
   0x8   :  { %701 = vmatprep.subr.bf16.mxu0 %v782_v4  ;;  %763 = vmatprep.subr.bf16.mxu1 %v782_v4  ;;  %v800_v19 = vld [vmem:[%s1001_s0 + $0x40] ss:$8 sps:$4 sm:$0xff]   ;;  %v806_v21 = vld [vmem:[%s1001_s0 + $0x54] ss:$8 sps:$4 sm:$0xff]   ;;  %v808_v23 = vld [vmem:[%s1001_s0 + $0x50] ss:$8 sps:$4 sm:$0xff]  }
   0x9   :  { %339 = vmatprep.mubr.bf16.mxu1 %v802_v13  ;;  %v803_v24 = vld [vmem:[%s1001_s0 + $0x24] ss:$8 sps:$4 sm:$0xff]   ;;  %v805_v26 = vld [vmem:[%s1001_s0 + $0x20] ss:$8 sps:$4 sm:$0xff]   ;;  %v809_v28 = vld [vmem:[%s1001_s0 + $0x34] ss:$8 sps:$4 sm:$0xff]  }
   0xa   :  { %v812_v25 = vld [vmem:[%s1001_s0 + $0x64] ss:$8 sps:$4 sm:$0xff]   ;;  %v814_v27 = vld [vmem:[%s1001_s0 + $0x60] ss:$8 sps:$4 sm:$0xff]   ;;  %v815_v29 = vld [vmem:[%s1001_s0 + $0x74] ss:$8 sps:$4 sm:$0xff]  }
   0xb   :  { %702 = vmatpush3.bf16.msra.mxu0 %v783_v5  ;;  %771 = vmatpush3.bf16.msra.mxu1 %v783_v5  ;;  %v811_v30 = vld [vmem:[%s1001_s0 + $0x30] ss:$8 sps:$4 sm:$0xff]  }
   0xc   :  { %703 = vmatprep.subr.bf16.mxu0 %v784_v6  ;;  %764 = vmatprep.subr.bf16.mxu1 %v784_v6  ;;  %v817_v31 = vld [vmem:[%s1001_s0 + $0x70] ss:$8 sps:$4 sm:$0xff]  }
   0xf   :  { %704 = vmatpush3.bf16.msra.mxu0 %v785_v7  ;;  %772 = vmatpush3.bf16.msra.mxu1 %v785_v7 }
  0x10   :  { %705 = vmatprep.subr.bf16.mxu0 %v786_v8  ;;  %765 = vmatprep.subr.bf16.mxu1 %v786_v8 }
  0x13   :  { %706 = vmatpush3.bf16.msra.mxu0 %v787_v9  ;;  %773 = vmatpush3.bf16.msra.mxu1 %v787_v9 }
  0x14   :  { %707 = vmatprep.subr.bf16.mxu0 %v788_v10  ;;  %766 = vmatprep.subr.bf16.mxu1 %v788_v10 }
  0x17   :  { %708 = vmatpush3.bf16.msra.mxu0 %v789_v12  ;;  %774 = vmatpush3.bf16.msra.mxu1 %v789_v12 }
  0x18   :  { %709 = vmatprep.subr.bf16.mxu0 %v790_v14  ;;  %767 = vmatprep.subr.bf16.mxu1 %v790_v14 }
  0x1b   :  { %710 = vmatpush3.bf16.msra.mxu0 %v791_v15  ;;  %775 = vmatpush3.bf16.msra.mxu1 %v791_v15 }
  0x1c   :  { %711 = vmatprep.subr.bf16.mxu0 %v792_v16  ;;  %768 = vmatprep.subr.bf16.mxu1 %v792_v16 }
  0x1f   :  { %712 = vmatpush3.bf16.msra.mxu0 %v793_v17  ;;  %776 = vmatpush3.bf16.msra.mxu1 %v793_v17 }
  0x22   :  { %308 = vmatmul.mubr.bf16.vlgmr.msra.gmra.mrb[0].mxu0 %v794_v18  ;;  %340 = vmatmul.mubr.bf16.vlgmr.msra.gmra.mrb[0].mxu1 %v800_v19 }
  0x23   :  { %315 = vmatprep.mubr.bf16.mxu0 %v797_v20  ;;  %347 = vmatprep.mubr.bf16.mxu1 %v806_v21 }
  0x2a   :  { %316 = vmatmul.mubr.bf16.gmra.mrb[4].mxu0 %v799_v22  ;;  %348 = vmatmul.mubr.bf16.gmra.mrb[4].mxu1 %v808_v23 }
  0x2b   :  { %323 = vmatprep.mubr.bf16.mxu0 %v803_v24  ;;  %355 = vmatprep.mubr.bf16.mxu1 %v812_v25 }
  0x32   :  { %324 = vmatmul.mubr.bf16.gmra.mrb[8].mxu0 %v805_v26  ;;  %356 = vmatmul.mubr.bf16.gmra.mrb[8].mxu1 %v814_v27 }
  0x33   :  { %331 = vmatprep.mubr.bf16.mxu0 %v809_v28  ;;  %363 = vmatprep.mubr.bf16.mxu1 %v815_v29 }
  0x3a   :  { %332 = vmatmul.mubr.bf16.gmra.mrb[12].mxu0 %v811_v30  ;;  %364 = vmatmul.mubr.bf16.gmra.mrb[12].mxu1 %v817_v31 }
  0xf5   :  { %v713_v33 = vpop.f32.mrb[0].mxu0  ;;  %v737_v34 = vpop.f32.mrb[0].mxu1 }
  0xf6   :  { %v714_v35 = vpop.f32.mrb[1].mxu0  ;;  %v738_v36 = vpop.f32.mrb[1].mxu1 }
  0xf7   :  { %v715_v37 = vadd.f32 %v714_v35, %v713_v33  ;;  %v716_v38 = vpop.f32.mrb[2].mxu0  ;;  %v946_v39 = vadd.f32 %v738_v36, %v737_v34  ;;  %v740_v40 = vpop.f32.mrb[2].mxu1 }
  0xf8   :  { %v717_v41 = vpop.f32.mrb[3].mxu0  ;;  %v741_v42 = vpop.f32.mrb[3].mxu1 }
  0xf9   :  { %v718_v43 = vadd.f32 %v717_v41, %v716_v38  ;;  %v948_v44 = vadd.f32 %v741_v42, %v740_v40  ;;  %v455_v45 = vmul.f32 %v715_v37, %v715_v37 }
  0xfb   :  { %v431_v46 = vadd.f32 %v718_v43, %v715_v37  ;;  %v456_v47 = vmul.f32 %v718_v43, %v718_v43  ;;  %v653_v48 = vpack.c.bf16 %v718_v43, %v715_v37  ;;  %v673_v49 = vpack.c.bf16 %v948_v44, %v946_v39 }
  0xfd   :  { %v471_v50 = vadd.f32 %v456_v47, %v455_v45  ;;  %654 = vst [vmem:[%s1004_s2] sm:$0xff] %v653_v48   ;;  %v719_v51 = vpop.f32.mrb[4].mxu0  ;;  %v743_v52 = vpop.f32.mrb[4].mxu1  ;;  %693 = vst [vmem:[%s1004_s2 + $0x20] sm:$0xff] %v673_v49   ;;  %v463_v48 = vmul.f32 %v946_v39, %v946_v39 }
  0xfe   :  { %v720_v53 = vpop.f32.mrb[5].mxu0  ;;  %v744_v54 = vpop.f32.mrb[5].mxu1 }
  0xff   :  { %v721_v55 = vadd.f32 %v720_v53, %v719_v51  ;;  %v722_v56 = vpop.f32.mrb[6].mxu0  ;;  %v958_v57 = vadd.f32 %v744_v54, %v743_v52  ;;  %v746_v58 = vpop.f32.mrb[6].mxu1  ;;  %v464_v51 = vmul.f32 %v948_v44, %v948_v44 }
 0x100   :  { %v723_v59 = vpop.f32.mrb[7].mxu0  ;;  %v747_v60 = vpop.f32.mrb[7].mxu1 }
 0x101   :  { %v432_v61 = vadd.f32 %v721_v55, %v431_v46  ;;  %v457_v62 = vmul.f32 %v721_v55, %v721_v55  ;;  %v724_v63 = vadd.f32 %v723_v59, %v722_v56  ;;  %v748_v0 = vadd.f32 %v747_v60, %v746_v58 }
 0x102   :  { %v465_v54 = vmul.f32 %v958_v57, %v958_v57 }
 0x103   :  { %v472_v1 = vadd.f32 %v471_v50, %v457_v62  ;;  %v433_v2 = vadd.f32 %v724_v63, %v432_v61  ;;  %v458_v3 = vmul.f32 %v724_v63, %v724_v63  ;;  %v658_v4 = vpack.c.bf16 %v724_v63, %v721_v55 }
 0x104   :  { %v678_v5 = vpack.c.bf16 %v748_v0, %v958_v57  ;;  %v466_v56 = vmul.f32 %v748_v0, %v748_v0 }
 0x105   :  { %v473_v6 = vadd.f32 %v472_v1, %v458_v3  ;;  %690 = vst [vmem:[%s1004_s2 + $0x8] sm:$0xff] %v658_v4   ;;  %v725_v7 = vpop.f32.mrb[8].mxu0  ;;  %v749_v8 = vpop.f32.mrb[8].mxu1 }
 0x106   :  { %v726_v9 = vpop.f32.mrb[9].mxu0  ;;  %694 = vst [vmem:[%s1004_s2 + $0x28] sm:$0xff] %v678_v5   ;;  %v750_v10 = vpop.f32.mrb[9].mxu1 }
 0x107   :  { %v727_v11 = vadd.f32 %v726_v9, %v725_v7  ;;  %v728_v12 = vpop.f32.mrb[10].mxu0  ;;  %v751_v13 = vadd.f32 %v750_v10, %v749_v8  ;;  %v752_v14 = vpop.f32.mrb[10].mxu1 }
 0x108   :  { %v729_v15 = vpop.f32.mrb[11].mxu0  ;;  %v753_v16 = vpop.f32.mrb[11].mxu1 }
 0x109   :  { %v434_v17 = vadd.f32 %v727_v11, %v433_v2  ;;  %v459_v18 = vmul.f32 %v727_v11, %v727_v11  ;;  %v730_v19 = vadd.f32 %v729_v15, %v728_v12  ;;  %v754_v20 = vadd.f32 %v753_v16, %v752_v14  ;;  %v430_v16 = vld [vmem:[%s1002_s3] sm:$0x1] }
 0x10a   :  { %v467_v61 = vmul.f32 %v751_v13, %v751_v13 }
 0x10b   :  { %v474_v21 = vadd.f32 %v473_v6, %v459_v18  ;;  %v435_v22 = vadd.f32 %v730_v19, %v434_v17  ;;  %v460_v23 = vmul.f32 %v730_v19, %v730_v19  ;;  %v663_v24 = vpack.c.bf16 %v730_v19, %v727_v11  ;;  %v454_v19 = vld [vmem:[%s1003_s4] sm:$0x1] }
 0x10c   :  { %v683_v25 = vpack.c.bf16 %v754_v20, %v751_v13  ;;  %v468_v2 = vmul.f32 %v754_v20, %v754_v20 }
 0x10d   :  { %v475_v26 = vadd.f32 %v474_v21, %v460_v23  ;;  %691 = vst [vmem:[%s1004_s2 + $0x10] sm:$0xff] %v663_v24   ;;  %v731_v27 = vpop.f32.mrb[12].mxu0  ;;  %v755_v28 = vpop.f32.mrb[12].mxu1 }
 0x10e   :  { %v732_v29 = vpop.f32.mrb[13].mxu0  ;;  %695 = vst [vmem:[%s1004_s2 + $0x30] sm:$0xff] %v683_v25   ;;  %v756_v30 = vpop.f32.mrb[13].mxu1 }
 0x10f   :  { %v733_v31 = vadd.f32 %v732_v29, %v731_v27  ;;  %v734_v32 = vpop.f32.mrb[14].mxu0  ;;  %v757_v33 = vadd.f32 %v756_v30, %v755_v28  ;;  %v758_v34 = vpop.f32.mrb[14].mxu1 }
 0x110   :  { %v735_v35 = vpop.f32.mrb[15].mxu0  ;;  %v759_v36 = vpop.f32.mrb[15].mxu1 }
 0x111   :  { %v436_v37 = vadd.f32 %v733_v31, %v435_v22  ;;  %v461_v38 = vmul.f32 %v733_v31, %v733_v31  ;;  %v736_v40 = vadd.f32 %v735_v35, %v734_v32  ;;  %v760_v41 = vadd.f32 %v759_v36, %v758_v34 }
 0x112   :  { %v469_v3 = vmul.f32 %v757_v33, %v757_v33 }
 0x113   :  { %v476_v42 = vadd.f32 %v475_v26, %v461_v38  ;;  %v437_v43 = vadd.f32 %v736_v40, %v436_v37  ;;  %v462_v45 = vmul.f32 %v736_v40, %v736_v40  ;;  %v668_v46 = vpack.c.bf16 %v736_v40, %v733_v31 }
 0x114   :  { %v688_v47 = vpack.c.bf16 %v760_v41, %v757_v33  ;;  %v470_v7 = vmul.f32 %v760_v41, %v760_v41 }
 0x115   :  { %v438_v49 = vadd.f32 %v946_v39, %v437_v43  ;;  %v477_v50 = vadd.f32 %v476_v42, %v462_v45  ;;  %692 = vst [vmem:[%s1004_s2 + $0x18] sm:$0xff] %v668_v46  }
 0x116   :  { %696 = vst [vmem:[%s1004_s2 + $0x38] sm:$0xff] %v688_v47  }
 0x117   :  { %v439_v52 = vadd.f32 %v948_v44, %v438_v49  ;;  %v478_v53 = vadd.f32 %v477_v50, %v463_v48 }
 0x119   :  { %v479_v55 = vadd.f32 %v478_v53, %v464_v51  ;;  %v440_v39 = vadd.f32 %v958_v57, %v439_v52 }
 0x11b   :  { %v441_v58 = vadd.f32 %v748_v0, %v440_v39  ;;  %v480_v59 = vadd.f32 %v479_v55, %v465_v54 }
 0x11d   :  { %v442_v60 = vadd.f32 %v751_v13, %v441_v58  ;;  %v481_v62 = vadd.f32 %v480_v59, %v466_v56 }
 0x11f   :  { %v482_v63 = vadd.f32 %v481_v62, %v467_v61  ;;  %v443_v1 = vadd.f32 %v754_v20, %v442_v60 }
 0x121   :  { %v483_v4 = vadd.f32 %v482_v63, %v468_v2  ;;  %v444_v5 = vadd.f32 %v757_v33, %v443_v1 }
 0x123   :  { %v484_v44 = vadd.f32 %v483_v4, %v469_v3  ;;  %v445_v6 = vadd.f32 %v760_v41, %v444_v5 }
 0x125   :  { %v446_v8 = vrot.slane %v445_v6, 4  ;;  %v485_v9 = vadd.f32 %v484_v44, %v470_v7 }
 0x127   :  { %v447_v10 = vadd.f32 %v446_v8, %v445_v6  ;;  %v486_v11 = vrot.slane %v485_v9, 4 }
 0x129   :  { %v448_v57 = vrot.slane %v447_v10, 2  ;;  %v487_v12 = vadd.f32 %v486_v11, %v485_v9 }
 0x12b   :  { %v449_v0 = vadd.f32 %v448_v57, %v447_v10  ;;  %v488_v14 = vrot.slane %v487_v12, 2 }
 0x12d   :  { %v450_v15 = vrot.slane %v449_v0, 1  ;;  %v489_v13 = vadd.f32 %v488_v14, %v487_v12 }
 0x12f   :  { %v451_v17 = vadd.f32 %v450_v15, %v449_v0  ;;  %v490_v18 = vrot.slane %v489_v13, 1 }
 0x131   :  { %v452_v20 = vadd.f32 %v451_v17, %v430_v16  ;;  %v491_v21 = vadd.f32 %v490_v18, %v489_v13 }
 0x133   :  { %453 = vst [vmem:[%s1002_s3] sm:$0x1] %v452_v20  ;;  %v492_v22 = vadd.f32 %v491_v21, %v454_v19 }
 0x135   :  { %493 = vst [vmem:[%s1003_s4] sm:$0x1] %v492_v22 }

// kernel: _lambda_.18
= control target key start
LH: loop header
LB: loop body
LE: loop exit
PB: predicated region body
PF: predicated region fallthrough
CT: control target
= control target key end

     0   :  { %s1467_s12 = smov 0   ;;  %s1469_s13 = smov 0   ;;  %s1604_s0 = inlined_call_operand.vmem [shape: bf16[512,128], index: 0, kind: input, shape index: {}]   ;;  %s1605_s1 = inlined_call_operand.vmem [shape: bf16[128,128], index: 1, kind: input, shape index: {}]   ;;  %s1606_s2 = inlined_call_operand.vmem [shape: f32[1,128], index: 2, kind: input, shape index: {}]   ;;  %s1607_s3 = inlined_call_operand.vmem [shape: bf16[512,128], index: 3, kind: output, shape index: {}]  }
   0x1   :  { %s1471_s14 = smov 0  }
   0x2 LB: > { %s32_s15 = sadd.s32 1, %s1441_s13  ;;  %p1096_p0 = scmp.ge.s32.totalorder %s1445_s14, 1  ;;  %s1445_s14 = sphi %s1471_s14, %s13_s14   ;;  %s1441_s13 = sphi %s1469_s13, %s1609_s13   ;;  %s1437_s12 = sphi %s1467_s12, %s1608_s12  }
   0x3   : > { %p34_p1 = scmp.ge.s32.totalorder %s32_s15, 2  ;;  %p188_p2 = scmp.lt.s32.totalorder %s1445_s14, 3 }
   0x5   : > { %s1611_s15 = smov (%p34_p1, %s32_s15), 0  ;;  %p189_p3 = pnand %p1096_p0, %p188_p2 }
   0x6   : > { %v1399_v0 = vld [vmem:[%s1605_s1] sm:$0xff] (!%p189_p3)   ;;  %s1097_s18 = sshll.u32 (!%p189_p3), %s1437_s12, 5  ;;  %v1400_v1 = vld [vmem:[%s1605_s1 + $0x8] sm:$0xff] (!%p189_p3)   ;;  %v1401_v2 = vld [vmem:[%s1605_s1 + $0x10] sm:$0xff] (!%p189_p3)  }
   0x7   : > { %192 = sbr.rel (%p189_p3) target bundleno = 283 (0x11b), region = 32  ;;  %p230_p4 = scmp.lt.s32.totalorder (!%p189_p3), %s1097_s18, 63  ;;  %1311 = vmatprep.subr.bf16.mxu0 (!%p189_p3), %v1399_v0  ;;  %1359 = vmatprep.subr.bf16.mxu1 (!%p189_p3), %v1399_v0  ;;  %v1402_v3 = vld [vmem:[%s1605_s1 + $0x18] sm:$0xff] (!%p189_p3)   ;;  %v1403_v6 = vld [vmem:[%s1605_s1 + $0x20] sm:$0xff] (!%p189_p3)   ;;  %v1404_v7 = vld [vmem:[%s1605_s1 + $0x28] sm:$0xff] (!%p189_p3)  }
   0x8   : > { %1312 = vmatpush3.bf16.msra.mxu0 (!%p189_p3), %v1399_v0  ;;  %1367 = vmatpush3.bf16.msra.mxu1 (!%p189_p3), %v1399_v0  ;;  %v1405_v8 = vld [vmem:[%s1605_s1 + $0x30] sm:$0xff] (!%p189_p3)   ;;  %v1406_v9 = vld [vmem:[%s1605_s1 + $0x38] sm:$0xff] (!%p189_p3)   ;;  %v1538_v25 = vld [vmem:[%s1606_s2] ss:$0 sm:$0xff] (!%p189_p3) }
   0x9   : > { %1313 = vmatprep.subr.bf16.mxu0 (!%p189_p3), %v1400_v1  ;;  %1360 = vmatprep.subr.bf16.mxu1 (!%p189_p3), %v1400_v1 }
   0xc   : > { %1314 = vmatpush3.bf16.msra.mxu0 (!%p189_p3), %v1400_v1  ;;  %1368 = vmatpush3.bf16.msra.mxu1 (!%p189_p3), %v1400_v1 }
   0xd   : > { %1315 = vmatprep.subr.bf16.mxu0 (!%p189_p3), %v1401_v2  ;;  %1361 = vmatprep.subr.bf16.mxu1 (!%p189_p3), %v1401_v2 }
   0xe   : > { %s1613_s18 = smov (!%p230_p4, %s1097_s18), 63 }
   0xf   : > { %s1098_s23 = sshll.u32 %s1613_s18, 2 }
  0x10   : > { %s1502_s26 = scalar_lea.vmem %s1604_s0, %s1098_s23  ;;  %1316 = vmatpush3.bf16.msra.mxu0 %v1401_v2  ;;  %1369 = vmatpush3.bf16.msra.mxu1 %v1401_v2  ;;  %s1551_s17 = scalar_lea.vmem %s1607_s3, %s1098_s23 }
  0x11   : > { %v1407_v4 = vld [vmem:[%s1502_s26] sm:$0xff]   ;;  %1317 = vmatprep.subr.bf16.mxu0 %v1402_v3  ;;  %1362 = vmatprep.subr.bf16.mxu1 %v1402_v3  ;;  %v1409_v10 = vld [vmem:[%s1502_s26 + $0x8] sm:$0xff]   ;;  %v1411_v12 = vld [vmem:[%s1502_s26 + $0x10] sm:$0xff]  }
  0x12   : > { %v1408_v5 = vld [vmem:[%s1502_s26 + $0x40] sm:$0xff]   ;;  %1327 = vmatprep.mubr.bf16.mxu0 %v1407_v4  ;;  %v1410_v11 = vld [vmem:[%s1502_s26 + $0x48] sm:$0xff]   ;;  %v1412_v13 = vld [vmem:[%s1502_s26 + $0x50] sm:$0xff]  }
  0x13   : > { %1343 = vmatprep.mubr.bf16.mxu1 %v1408_v5  ;;  %v1413_v14 = vld [vmem:[%s1502_s26 + $0x18] sm:$0xff]   ;;  %v1415_v16 = vld [vmem:[%s1502_s26 + $0x20] sm:$0xff]   ;;  %v1417_v18 = vld [vmem:[%s1502_s26 + $0x28] sm:$0xff]  }
  0x14   : > { %1318 = vmatpush3.bf16.msra.mxu0 %v1402_v3  ;;  %1370 = vmatpush3.bf16.msra.mxu1 %v1402_v3  ;;  %v1414_v15 = vld [vmem:[%s1502_s26 + $0x58] sm:$0xff]   ;;  %v1416_v17 = vld [vmem:[%s1502_s26 + $0x60] sm:$0xff]   ;;  %v1418_v19 = vld [vmem:[%s1502_s26 + $0x68] sm:$0xff]  }
  0x15   : > { %1319 = vmatprep.subr.bf16.mxu0 %v1403_v6  ;;  %1363 = vmatprep.subr.bf16.mxu1 %v1403_v6  ;;  %v1419_v20 = vld [vmem:[%s1502_s26 + $0x30] sm:$0xff]   ;;  %v1421_v22 = vld [vmem:[%s1502_s26 + $0x38] sm:$0xff]  }
  0x16   : > { %v1420_v21 = vld [vmem:[%s1502_s26 + $0x70] sm:$0xff]   ;;  %v1422_v23 = vld [vmem:[%s1502_s26 + $0x78] sm:$0xff]  }
  0x18   : > { %1320 = vmatpush3.bf16.msra.mxu0 %v1403_v6  ;;  %1371 = vmatpush3.bf16.msra.mxu1 %v1403_v6 }
  0x19   : > { %1321 = vmatprep.subr.bf16.mxu0 %v1404_v7  ;;  %1364 = vmatprep.subr.bf16.mxu1 %v1404_v7 }
  0x1c   : > { %1322 = vmatpush3.bf16.msra.mxu0 %v1404_v7  ;;  %1372 = vmatpush3.bf16.msra.mxu1 %v1404_v7 }
  0x1d   : > { %1323 = vmatprep.subr.bf16.mxu0 %v1405_v8  ;;  %1365 = vmatprep.subr.bf16.mxu1 %v1405_v8 }
  0x20   : > { %1324 = vmatpush3.bf16.msra.mxu0 %v1405_v8  ;;  %1373 = vmatpush3.bf16.msra.mxu1 %v1405_v8 }
  0x21   : > { %1325 = vmatprep.subr.bf16.mxu0 %v1406_v9  ;;  %1366 = vmatprep.subr.bf16.mxu1 %v1406_v9 }
  0x24   : > { %1326 = vmatpush3.bf16.msra.mxu0 %v1406_v9  ;;  %1374 = vmatpush3.bf16.msra.mxu1 %v1406_v9 }
  0x27   : > { %1328 = vmatmul.mubr.bf16.vlgmr.msra.gmra.mrb[0].mxu0 %v1409_v10  ;;  %1344 = vmatmul.mubr.bf16.vlgmr.msra.gmra.mrb[0].mxu1 %v1410_v11 }
  0x28   : > { %1331 = vmatprep.mubr.bf16.mxu0 %v1411_v12  ;;  %1347 = vmatprep.mubr.bf16.mxu1 %v1412_v13 }
  0x2f   : > { %1332 = vmatmul.mubr.bf16.gmra.mrb[4].mxu0 %v1413_v14  ;;  %1348 = vmatmul.mubr.bf16.gmra.mrb[4].mxu1 %v1414_v15 }
  0x30   : > { %1335 = vmatprep.mubr.bf16.mxu0 %v1415_v16  ;;  %1351 = vmatprep.mubr.bf16.mxu1 %v1416_v17 }
  0x37   : > { %1336 = vmatmul.mubr.bf16.gmra.mrb[8].mxu0 %v1417_v18  ;;  %1352 = vmatmul.mubr.bf16.gmra.mrb[8].mxu1 %v1418_v19 }
  0x38   : > { %1339 = vmatprep.mubr.bf16.mxu0 %v1419_v20  ;;  %1355 = vmatprep.mubr.bf16.mxu1 %v1420_v21 }
  0x3f   : > { %1340 = vmatmul.mubr.bf16.gmra.mrb[12].mxu0 %v1421_v22  ;;  %1356 = vmatmul.mubr.bf16.gmra.mrb[12].mxu1 %v1422_v23 }
  0xfa   : > { %v1329_v24 = vpop.f32.mrb[0].mxu0  ;;  %v1345_v26 = vpop.f32.mrb[0].mxu1 }
  0xfb   : > { %v554_v27 = vpop.f32.mrb[1].mxu0  ;;  %v618_v28 = vpop.f32.mrb[1].mxu1  ;;  %v789_v31 = vadd.f32 %v1329_v24, %v1538_v25  ;;  %v805_v32 = vadd.f32 %v1345_v26, %v1538_v25 }
  0xfc   : > { %v1330_v29 = vpop.f32.mrb[2].mxu0  ;;  %v1346_v30 = vpop.f32.mrb[2].mxu1  ;;  %v787_v37 = vadd.f32 %v1538_v25, %v554_v27  ;;  %v803_v38 = vadd.f32 %v1538_v25, %v618_v28 }
  0xfd   : > { %v790_v33 = vadd.f32 %v1330_v29, %v1538_v25  ;;  %v806_v34 = vadd.f32 %v1346_v30, %v1538_v25  ;;  %v557_v35 = vpop.f32.mrb[3].mxu0  ;;  %v621_v36 = vpop.f32.mrb[3].mxu1 }
  0xfe   : > { %v788_v39 = vadd.f32 %v1538_v25, %v557_v35  ;;  %v804_v40 = vadd.f32 %v1538_v25, %v621_v36 }
  0xff   : > { %v1200_v41 = vpack.c.bf16 %v790_v33, %v789_v31  ;;  %v1240_v42 = vpack.c.bf16 %v806_v34, %v805_v32 }
 0x100   : > { %v1195_v43 = vpack.c.bf16 %v788_v39, %v787_v37  ;;  %v1235_v44 = vpack.c.bf16 %v804_v40, %v803_v38 }
 0x101   : > { %1272 = vst [vmem:[%s1551_s17 + $0x8] sm:$0xff] %v1200_v41   ;;  %1280 = vst [vmem:[%s1551_s17 + $0x48] sm:$0xff] %v1240_v42  }
 0x102   : > { %1196 = vst [vmem:[%s1551_s17] sm:$0xff] %v1195_v43   ;;  %1279 = vst [vmem:[%s1551_s17 + $0x40] sm:$0xff] %v1235_v44   ;;  %v1333_v45 = vpop.f32.mrb[4].mxu0  ;;  %v1349_v46 = vpop.f32.mrb[4].mxu1 }
 0x103   : > { %v570_v47 = vpop.f32.mrb[5].mxu0  ;;  %v634_v48 = vpop.f32.mrb[5].mxu1  ;;  %v793_v51 = vadd.f32 %v1333_v45, %v1538_v25  ;;  %v809_v52 = vadd.f32 %v1349_v46, %v1538_v25 }
 0x104   : > { %v1334_v49 = vpop.f32.mrb[6].mxu0  ;;  %v1350_v50 = vpop.f32.mrb[6].mxu1  ;;  %v791_v57 = vadd.f32 %v1538_v25, %v570_v47  ;;  %v807_v58 = vadd.f32 %v1538_v25, %v634_v48 }
 0x105   : > { %v794_v53 = vadd.f32 %v1334_v49, %v1538_v25  ;;  %v810_v54 = vadd.f32 %v1350_v50, %v1538_v25  ;;  %v573_v55 = vpop.f32.mrb[7].mxu0  ;;  %v637_v56 = vpop.f32.mrb[7].mxu1 }
 0x106   : > { %v792_v59 = vadd.f32 %v1538_v25, %v573_v55  ;;  %v808_v60 = vadd.f32 %v1538_v25, %v637_v56 }
 0x107   : > { %v1210_v61 = vpack.c.bf16 %v794_v53, %v793_v51  ;;  %v1250_v62 = vpack.c.bf16 %v810_v54, %v809_v52 }
 0x108   : > { %v1205_v63 = vpack.c.bf16 %v792_v59, %v791_v57  ;;  %v1245_v0 = vpack.c.bf16 %v808_v60, %v807_v58 }
 0x109   : > { %1274 = vst [vmem:[%s1551_s17 + $0x18] sm:$0xff] %v1210_v61   ;;  %1282 = vst [vmem:[%s1551_s17 + $0x58] sm:$0xff] %v1250_v62  }
 0x10a   : > { %1273 = vst [vmem:[%s1551_s17 + $0x10] sm:$0xff] %v1205_v63   ;;  %1281 = vst [vmem:[%s1551_s17 + $0x50] sm:$0xff] %v1245_v0   ;;  %v1337_v1 = vpop.f32.mrb[8].mxu0  ;;  %v1353_v2 = vpop.f32.mrb[8].mxu1 }
 0x10b   : > { %v586_v3 = vpop.f32.mrb[9].mxu0  ;;  %v650_v4 = vpop.f32.mrb[9].mxu1  ;;  %v797_v7 = vadd.f32 %v1337_v1, %v1538_v25  ;;  %v813_v8 = vadd.f32 %v1353_v2, %v1538_v25 }
 0x10c   : > { %v1338_v5 = vpop.f32.mrb[10].mxu0  ;;  %v1354_v6 = vpop.f32.mrb[10].mxu1  ;;  %v795_v13 = vadd.f32 %v1538_v25, %v586_v3  ;;  %v811_v14 = vadd.f32 %v1538_v25, %v650_v4 }
 0x10d   : > { %v798_v9 = vadd.f32 %v1338_v5, %v1538_v25  ;;  %v814_v10 = vadd.f32 %v1354_v6, %v1538_v25  ;;  %v589_v11 = vpop.f32.mrb[11].mxu0  ;;  %v653_v12 = vpop.f32.mrb[11].mxu1 }
 0x10e   : > { %v796_v15 = vadd.f32 %v1538_v25, %v589_v11  ;;  %v812_v16 = vadd.f32 %v1538_v25, %v653_v12 }
 0x10f   : > { %v1220_v17 = vpack.c.bf16 %v798_v9, %v797_v7  ;;  %v1260_v18 = vpack.c.bf16 %v814_v10, %v813_v8 }
 0x110   : > { %v1215_v19 = vpack.c.bf16 %v796_v15, %v795_v13  ;;  %v1255_v20 = vpack.c.bf16 %v812_v16, %v811_v14 }
 0x111   : > { %1276 = vst [vmem:[%s1551_s17 + $0x28] sm:$0xff] %v1220_v17   ;;  %1284 = vst [vmem:[%s1551_s17 + $0x68] sm:$0xff] %v1260_v18  }
 0x112   : > { %1275 = vst [vmem:[%s1551_s17 + $0x20] sm:$0xff] %v1215_v19   ;;  %1283 = vst [vmem:[%s1551_s17 + $0x60] sm:$0xff] %v1255_v20   ;;  %v1341_v21 = vpop.f32.mrb[12].mxu0  ;;  %v1357_v22 = vpop.f32.mrb[12].mxu1 }
 0x113   : > { %v602_v23 = vpop.f32.mrb[13].mxu0  ;;  %v666_v24 = vpop.f32.mrb[13].mxu1  ;;  %v801_v28 = vadd.f32 %v1341_v21, %v1538_v25  ;;  %v817_v29 = vadd.f32 %v1357_v22, %v1538_v25 }
 0x114   : > { %v1342_v26 = vpop.f32.mrb[14].mxu0  ;;  %v1358_v27 = vpop.f32.mrb[14].mxu1  ;;  %v799_v34 = vadd.f32 %v1538_v25, %v602_v23  ;;  %v815_v35 = vadd.f32 %v1538_v25, %v666_v24 }
 0x115   : > { %v802_v30 = vadd.f32 %v1342_v26, %v1538_v25  ;;  %v818_v31 = vadd.f32 %v1358_v27, %v1538_v25  ;;  %v605_v32 = vpop.f32.mrb[15].mxu0  ;;  %v669_v33 = vpop.f32.mrb[15].mxu1 }
 0x116   : > { %v800_v36 = vadd.f32 %v1538_v25, %v605_v32  ;;  %v816_v37 = vadd.f32 %v1538_v25, %v669_v33 }
 0x117   : > { %v1230_v38 = vpack.c.bf16 %v802_v30, %v801_v28  ;;  %v1270_v39 = vpack.c.bf16 %v818_v31, %v817_v29 }
 0x118   : > { %v1225_v40 = vpack.c.bf16 %v800_v36, %v799_v34  ;;  %v1265_v41 = vpack.c.bf16 %v816_v37, %v815_v35 }
 0x119   : > { %1278 = vst [vmem:[%s1551_s17 + $0x38] sm:$0xff] %v1230_v38   ;;  %1286 = vst [vmem:[%s1551_s17 + $0x78] sm:$0xff] %v1270_v39  }
 0x11a   : > { %1277 = vst [vmem:[%s1551_s17 + $0x30] sm:$0xff] %v1225_v40   ;;  %1285 = vst [vmem:[%s1551_s17 + $0x70] sm:$0xff] %v1265_v41  }
 0x11b PF: > { %s13_s14 = sadd.s32 1, %s1445_s14   ;;  %s1608_s12 = smov %s1441_s13 }
 0x11c   : > { %p10_p5 = scmp.ge.s32.totalorder %s13_s14, 4   ;;  %s1609_s13 = smov %s1611_s15 }
 0x11e   :  { %12 = sbr.rel (!%p10_p5) target bundleno = 2 (0x2), region = 76 }

// kernel: tile.15
= control target key start
LH: loop header
LB: loop body
LE: loop exit
PB: predicated region body
PF: predicated region fallthrough
CT: control target
= control target key end

     0   :  { %vm5_vm0 = vcmask 1041409   ;;  %vm9_vm1 = vcmask 1042434   ;;  %vm13_vm2 = vcmask 1043459   ;;  %vm47_vm3 = vcmask 7168   ;;  %s3376_s11 = smov 127   ;;  %s3377_s18 = smov 125   ;;  %s5555_s0 = inlined_call_operand.vmem [shape: f32[2,256,3], index: 0, kind: input, shape index: {}]   ;;  %s5556_s1 = inlined_call_operand.vmem [shape: f32[2,768], index: 1, kind: output, shape index: {}]  }
   0x1   :  { %v2728_v0 = vld [vmem:[%s5555_s0 + $0xd5] sm:$0x1]   ;;  %v2744_v11 = vld [vmem:[%s5555_s0 + $0xff] sm:$0x1]   ;;  %vm51_vm4 = vcmask 15360   ;;  %s3378_s10 = smov 126  }
   0x2   :  { %v2729_v1 = vld [vmem:[%s5555_s0 + $0x1d4] sm:$0x2]   ;;  %v2745_v14 = vld [vmem:[%s5555_s0 + $0x1fe] sm:$0x2]   ;;  %v2736_v19 = vld [vmem:[%s5555_s0 + $0xaa] sm:$0x1]  }
   0x3   :  { %v2730_v2 = vld [vmem:[%s5555_s0 + $0x53] sm:$0x4]   ;;  %v24_v4 = vsel %vm5_vm0, %v2729_v1, %v2728_v0  ;;  %v2746_v15 = vld [vmem:[%s5555_s0 + $0x7d] sm:$0x4]   ;;  %v107_v18 = vsel %vm5_vm0, %v2745_v14, %v2744_v11  ;;  %v2737_v20 = vld [vmem:[%s5555_s0 + $0x1a9] sm:$0x2]  }
   0x4   :  { %v2731_v3 = vld [vmem:[%s5555_s0 + $0x152] sm:$0x8]   ;;  %v28_v8 = vsel %vm9_vm1, %v2730_v2, %v24_v4  ;;  %v2747_v16 = vld [vmem:[%s5555_s0 + $0x17c] sm:$0x8]   ;;  %v111_v22 = vsel %vm9_vm1, %v2746_v15, %v107_v18  ;;  %v66_v23 = vsel %vm5_vm0, %v2737_v20, %v2736_v19  ;;  %v2738_v24 = vld [vmem:[%s5555_s0 + $0x28] sm:$0x4]  }
   0x5   :  { %v2732_v5 = vld [vmem:[%s5555_s0 + $0xd5] sm:$0x1]   ;;  %v32_v12 = vsel %vm13_vm2, %v2731_v3, %v28_v8  ;;  %v2739_v25 = vld [vmem:[%s5555_s0 + $0x127] sm:$0x8]   ;;  %v115_v27 = vsel %vm13_vm2, %v2747_v16, %v111_v22  ;;  %v70_v28 = vsel %vm9_vm1, %v2738_v24, %v66_v23  ;;  %v2748_v34 = vld [vmem:[%s5555_s0 + $0xd4] sm:$0x1]  }
   0x6   :  { %v2733_v6 = vld [vmem:[%s5555_s0 + $0x1d4] sm:$0x2]   ;;  %v2740_v26 = vld [vmem:[%s5555_s0 + $0x2a] sm:$0x1]   ;;  %116 = vrot.lane.b32.xlu1 %v115_v27, %s3377_s18  ;;  %v74_v32 = vsel %vm13_vm2, %v2739_v25, %v70_v28  ;;  %v2749_v35 = vld [vmem:[%s5555_s0 + $0x1d3] sm:$0x2]  }
   0x7   :  { %v2734_v7 = vld [vmem:[%s5555_s0 + $0x53] sm:$0x4]   ;;  %v38_v9 = vsel %vm5_vm0, %v2733_v6, %v2732_v5  ;;  %v2741_v29 = vld [vmem:[%s5555_s0 + $0x129] sm:$0x2]   ;;  %v128_v37 = vsel %vm5_vm0, %v2749_v35, %v2748_v34  ;;  %v2750_v38 = vld [vmem:[%s5555_s0 + $0x52] sm:$0x4]  }
   0x8   :  { %v2735_v10 = vld [vmem:[%s5555_s0 + $0x152] sm:$0x8]   ;;  %v42_v13 = vsel %vm9_vm1, %v2734_v7, %v38_v9  ;;  %v2742_v30 = vld [vmem:[%s5555_s0 + $0xa8] sm:$0x4]   ;;  %v80_v33 = vsel %vm5_vm0, %v2741_v29, %v2740_v26  ;;  %v2751_v39 = vld [vmem:[%s5555_s0 + $0x151] sm:$0x8]   ;;  %v132_v42 = vsel %vm9_vm1, %v2750_v38, %v128_v37 }
   0x9   :  { %v46_v17 = vsel %vm13_vm2, %v2735_v10, %v42_v13  ;;  %v2743_v31 = vld [vmem:[%s5555_s0 + $0x1a7] sm:$0x8]   ;;  %v84_v36 = vsel %vm9_vm1, %v2742_v30, %v80_v33  ;;  %v2752_v40 = vld [vmem:[%s5555_s0 + $0x29] sm:$0x1]   ;;  %v136_v47 = vsel %vm13_vm2, %v2751_v39, %v132_v42  ;;  %v2756_v49 = vld [vmem:[%s5555_s0 + $0xfe] sm:$0x1]  }
   0xa   :  { %v48_v21 = vsel %vm47_vm3, %v46_v17, %v32_v12  ;;  %v88_v41 = vsel %vm13_vm2, %v2743_v31, %v84_v36  ;;  %v2753_v43 = vld [vmem:[%s5555_s0 + $0x128] sm:$0x2]   ;;  %v2757_v50 = vld [vmem:[%s5555_s0 + $0x1fd] sm:$0x2]   ;;  %v2760_v57 = vld [vmem:[%s5555_s0 + $0xd3] sm:$0x1]  }
   0xb   :  { %49 = vrot.lane.b32.xlu0 %v48_v21, %s3376_s11  ;;  %v2754_v44 = vld [vmem:[%s5555_s0 + $0xa7] sm:$0x4]   ;;  %v90_v46 = vsel %vm51_vm4, %v88_v41, %v74_v32  ;;  %v149_v48 = vsel %vm5_vm0, %v2753_v43, %v2752_v40  ;;  %s3379_s11 = smov 124   ;;  %v169_v52 = vsel %vm5_vm0, %v2757_v50, %v2756_v49  ;;  %v2758_v53 = vld [vmem:[%s5555_s0 + $0x7c] sm:$0x4]   ;;  %s3380_s5 = smov 123  }
   0xc   :  { %v2755_v45 = vld [vmem:[%s5555_s0 + $0x1a6] sm:$0x8]   ;;  %137 = vrot.lane.b32.xlu1 %v136_v47, %s3379_s11  ;;  %v153_v51 = vsel %vm9_vm1, %v2754_v44, %v149_v48  ;;  %v2759_v54 = vld [vmem:[%s5555_s0 + $0x17b] sm:$0x8]   ;;  %v173_v56 = vsel %vm9_vm1, %v2758_v53, %v169_v52  ;;  %v2761_v58 = vld [vmem:[%s5555_s0 + $0x1d2] sm:$0x2]  }
   0xd   :  { %v157_v55 = vsel %vm13_vm2, %v2755_v45, %v153_v51  ;;  %v2762_v59 = vld [vmem:[%s5555_s0 + $0x51] sm:$0x4]   ;;  %v177_v60 = vsel %vm13_vm2, %v2759_v54, %v173_v56  ;;  %v190_v61 = vsel %vm5_vm0, %v2761_v58, %v2760_v57  ;;  %v2764_v63 = vld [vmem:[%s5555_s0 + $0x28] sm:$0x1]   ;;  %v2768_v5 = vld [vmem:[%s5555_s0 + $0xfd] sm:$0x1]  }
   0xe   :  { %v2763_v62 = vld [vmem:[%s5555_s0 + $0x150] sm:$0x8]   ;;  %v2765_v0 = vld [vmem:[%s5555_s0 + $0x127] sm:$0x2]   ;;  %v194_v1 = vsel %vm9_vm1, %v2762_v59, %v190_v61  ;;  %s3381_s6 = smov 122   ;;  %s3382_s27 = smov 121  }
   0xf   :  { %91 = vrot.lane.b32.xlu0 %v90_v46, %s3378_s10  ;;  %v211_v2 = vsel %vm5_vm0, %v2765_v0, %v2764_v63  ;;  %v2766_v3 = vld [vmem:[%s5555_s0 + $0xa6] sm:$0x4]   ;;  %v2769_v7 = vld [vmem:[%s5555_s0 + $0x1fc] sm:$0x2]   ;;  %v198_v9 = vsel %vm13_vm2, %v2763_v62, %v194_v1  ;;  %v2772_v13 = vld [vmem:[%s5555_s0 + $0xd2] sm:$0x1]  }
  0x10   :  { %v2767_v4 = vld [vmem:[%s5555_s0 + $0x1a5] sm:$0x8]   ;;  %178 = vrot.lane.b32.xlu1 %v177_v60, %s3381_s6  ;;  %v215_v6 = vsel %vm9_vm1, %v2766_v3, %v211_v2  ;;  %v2770_v8 = vld [vmem:[%s5555_s0 + $0x7b] sm:$0x4]   ;;  %v231_v11 = vsel %vm5_vm0, %v2769_v7, %v2768_v5  ;;  %v2773_v14 = vld [vmem:[%s5555_s0 + $0x1d1] sm:$0x2]  }
  0x11   :  { %v219_v10 = vsel %vm13_vm2, %v2767_v4, %v215_v6  ;;  %v2771_v12 = vld [vmem:[%s5555_s0 + $0x17a] sm:$0x8]   ;;  %v235_v15 = vsel %vm9_vm1, %v2770_v8, %v231_v11  ;;  %v252_v16 = vsel %vm5_vm0, %v2773_v14, %v2772_v13  ;;  %v2774_v17 = vld [vmem:[%s5555_s0 + $0x50] sm:$0x4]   ;;  %v2776_v19 = vld [vmem:[%s5555_s0 + $0x27] sm:$0x1]  }
  0x12   :  { %v2775_v18 = vld [vmem:[%s5555_s0 + $0x14f] sm:$0x8]   ;;  %v256_v20 = vsel %vm9_vm1, %v2774_v17, %v252_v16  ;;  %v2777_v21 = vld [vmem:[%s5555_s0 + $0x126] sm:$0x2]   ;;  %s3383_s28 = smov 120   ;;  %v239_v26 = vsel %vm13_vm2, %v2771_v12, %v235_v15  ;;  %s3384_s20 = smov 119  }
  0x13   :  { %158 = vrot.lane.b32.xlu0 %v157_v55, %s3380_s5  ;;  %v2778_v22 = vld [vmem:[%s5555_s0 + $0xa5] sm:$0x4]   ;;  %v273_v23 = vsel %vm5_vm0, %v2777_v21, %v2776_v19  ;;  %v2780_v24 = vld [vmem:[%s5555_s0 + $0xfc] sm:$0x1]   ;;  %v260_v27 = vsel %vm13_vm2, %v2775_v18, %v256_v20  ;;  %v2784_v30 = vld [vmem:[%s5555_s0 + $0xd1] sm:$0x1]  }
  0x14   :  { %220 = vrot.lane.b32.xlu1 %v219_v10, %s3383_s28  ;;  %v2781_v25 = vld [vmem:[%s5555_s0 + $0x1fb] sm:$0x2]   ;;  %v277_v31 = vsel %vm9_vm1, %v2778_v22, %v273_v23  ;;  %v2779_v32 = vld [vmem:[%s5555_s0 + $0x1a4] sm:$0x8]   ;;  %v2785_v35 = vld [vmem:[%s5555_s0 + $0x1d0] sm:$0x2]  }
  0x15   :  { %v293_v28 = vsel %vm5_vm0, %v2781_v25, %v2780_v24  ;;  %v2782_v29 = vld [vmem:[%s5555_s0 + $0x7a] sm:$0x4]   ;;  %v314_v36 = vsel %vm5_vm0, %v2785_v35, %v2784_v30  ;;  %v2786_v37 = vld [vmem:[%s5555_s0 + $0x4f] sm:$0x4]   ;;  %v2788_v38 = vld [vmem:[%s5555_s0 + $0x26] sm:$0x1]   ;;  %v281_v42 = vsel %vm13_vm2, %v2779_v32, %v277_v31 }
  0x16   :  { %v297_v33 = vsel %vm9_vm1, %v2782_v29, %v293_v28  ;;  %v2783_v34 = vld [vmem:[%s5555_s0 + $0x179] sm:$0x8]   ;;  %v2789_v39 = vld [vmem:[%s5555_s0 + $0x125] sm:$0x2]   ;;  %s3385_s21 = smov 118   ;;  %v318_v47 = vsel %vm9_vm1, %v2786_v37, %v314_v36  ;;  %s3386_s11 = smov 117  }
  0x17   :  { %199 = vrot.lane.b32.xlu0 %v198_v9, %s3382_s27  ;;  %v335_v40 = vsel %vm5_vm0, %v2789_v39, %v2788_v38  ;;  %v2790_v41 = vld [vmem:[%s5555_s0 + $0xa4] sm:$0x4]   ;;  %v301_v43 = vsel %vm13_vm2, %v2783_v34, %v297_v33  ;;  %v2787_v44 = vld [vmem:[%s5555_s0 + $0x14e] sm:$0x8]   ;;  %v2792_v45 = vld [vmem:[%s5555_s0 + $0xfb] sm:$0x1]  }
  0x18   :  { %261 = vrot.lane.b32.xlu1 %v260_v27, %s3385_s21  ;;  %v2793_v46 = vld [vmem:[%s5555_s0 + $0x1fa] sm:$0x2]   ;;  %v339_v48 = vsel %vm9_vm1, %v2790_v41, %v335_v40  ;;  %v2791_v49 = vld [vmem:[%s5555_s0 + $0x1a3] sm:$0x8]   ;;  %v2796_v50 = vld [vmem:[%s5555_s0 + $0xd0] sm:$0x1]   ;;  %v322_v58 = vsel %vm13_vm2, %v2787_v44, %v318_v47 }
  0x19   :  { %v2797_v51 = vld [vmem:[%s5555_s0 + $0x1cf] sm:$0x2]   ;;  %v355_v52 = vsel %vm5_vm0, %v2793_v46, %v2792_v45  ;;  %v2794_v53 = vld [vmem:[%s5555_s0 + $0x79] sm:$0x4]   ;;  %s3387_s12 = smov 116   ;;  %v343_v59 = vsel %vm13_vm2, %v2791_v49, %v339_v48  ;;  %s3388_s4 = smov 115  }
  0x1a   :  { %v376_v54 = vsel %vm5_vm0, %v2797_v51, %v2796_v50  ;;  %v2798_v55 = vld [vmem:[%s5555_s0 + $0x4e] sm:$0x4]   ;;  %v2800_v56 = vld [vmem:[%s5555_s0 + $0x25] sm:$0x1]   ;;  %v2804_v60 = vld [vmem:[%s5555_s0 + $0xfa] sm:$0x1]   ;;  %v359_v62 = vsel %vm9_vm1, %v2794_v53, %v355_v52 }
  0x1b   :  { %240 = vrot.lane.b32.xlu0 %v239_v26, %s3384_s20  ;;  %v2801_v57 = vld [vmem:[%s5555_s0 + $0x124] sm:$0x2]   ;;  %v2805_v61 = vld [vmem:[%s5555_s0 + $0x1f9] sm:$0x2]   ;;  %v2795_v63 = vld [vmem:[%s5555_s0 + $0x178] sm:$0x8]   ;;  %v380_v0 = vsel %vm9_vm1, %v2798_v55, %v376_v54 }
  0x1c   :  { %302 = vrot.lane.b32.xlu1 %v301_v43, %s3387_s12  ;;  %v2799_v1 = vld [vmem:[%s5555_s0 + $0x14d] sm:$0x8]   ;;  %v2802_v2 = vld [vmem:[%s5555_s0 + $0xa3] sm:$0x4]   ;;  %v397_v3 = vsel %vm5_vm0, %v2801_v57, %v2800_v56  ;;  %v417_v4 = vsel %vm5_vm0, %v2805_v61, %v2804_v60  ;;  %v2806_v5 = vld [vmem:[%s5555_s0 + $0x78] sm:$0x4]   ;;  %v363_v10 = vsel %vm13_vm2, %v2795_v63, %v359_v62 }
  0x1d   :  { %v2808_v6 = vld [vmem:[%s5555_s0 + $0xcf] sm:$0x1]   ;;  %s3389_s5 = smov 114   ;;  %v2812_v8 = vld [vmem:[%s5555_s0 + $0x24] sm:$0x1]   ;;  %v384_v11 = vsel %vm13_vm2, %v2799_v1, %v380_v0  ;;  %v401_v12 = vsel %vm9_vm1, %v2802_v2, %v397_v3  ;;  %v421_v14 = vsel %vm9_vm1, %v2806_v5, %v417_v4  ;;  %s3390_s22 = smov 113  }
  0x1e   :  { %v2809_v7 = vld [vmem:[%s5555_s0 + $0x1ce] sm:$0x2]   ;;  %v2813_v9 = vld [vmem:[%s5555_s0 + $0x123] sm:$0x2]   ;;  %v2803_v13 = vld [vmem:[%s5555_s0 + $0x1a2] sm:$0x8]  }
  0x1f   :  { %282 = vrot.lane.b32.xlu0 %v281_v42, %s3386_s11  ;;  %v2807_v15 = vld [vmem:[%s5555_s0 + $0x177] sm:$0x8]   ;;  %v2810_v16 = vld [vmem:[%s5555_s0 + $0x4d] sm:$0x4]   ;;  %v438_v17 = vsel %vm5_vm0, %v2809_v7, %v2808_v6  ;;  %v459_v18 = vsel %vm5_vm0, %v2813_v9, %v2812_v8  ;;  %v2814_v19 = vld [vmem:[%s5555_s0 + $0xa2] sm:$0x4]   ;;  %v405_v24 = vsel %vm13_vm2, %v2803_v13, %v401_v12 }
  0x20   :  { %344 = vrot.lane.b32.xlu1 %v343_v59, %s3389_s5  ;;  %v2816_v20 = vld [vmem:[%s5555_s0 + $0xf9] sm:$0x1]   ;;  %s3391_s23 = smov 112   ;;  %v2820_v22 = vld [vmem:[%s5555_s0 + $0xce] sm:$0x1]   ;;  %v425_v25 = vsel %vm13_vm2, %v2807_v15, %v421_v14  ;;  %v442_v26 = vsel %vm9_vm1, %v2810_v16, %v438_v17  ;;  %v463_v28 = vsel %vm9_vm1, %v2814_v19, %v459_v18  ;;  %s3392_s11 = smov 111  }
  0x21   :  { %v2817_v21 = vld [vmem:[%s5555_s0 + $0x1f8] sm:$0x2]   ;;  %v2821_v23 = vld [vmem:[%s5555_s0 + $0x1cd] sm:$0x2]   ;;  %v2811_v27 = vld [vmem:[%s5555_s0 + $0x14c] sm:$0x8]  }
  0x22   :  { %v2815_v29 = vld [vmem:[%s5555_s0 + $0x1a1] sm:$0x8]   ;;  %v2818_v30 = vld [vmem:[%s5555_s0 + $0x77] sm:$0x4]   ;;  %v479_v31 = vsel %vm5_vm0, %v2817_v21, %v2816_v20  ;;  %v500_v32 = vsel %vm5_vm0, %v2821_v23, %v2820_v22  ;;  %v2822_v33 = vld [vmem:[%s5555_s0 + $0x4c] sm:$0x4]   ;;  %v446_v38 = vsel %vm13_vm2, %v2811_v27, %v442_v26 }
  0x23   :  { %323 = vrot.lane.b32.xlu0 %v322_v58, %s3388_s4  ;;  %v2824_v34 = vld [vmem:[%s5555_s0 + $0x23] sm:$0x1]   ;;  %s3393_s12 = smov 110   ;;  %v2828_v36 = vld [vmem:[%s5555_s0 + $0xf8] sm:$0x1]   ;;  %v467_v39 = vsel %vm13_vm2, %v2815_v29, %v463_v28  ;;  %v483_v40 = vsel %vm9_vm1, %v2818_v30, %v479_v31  ;;  %v504_v42 = vsel %vm9_vm1, %v2822_v33, %v500_v32  ;;  %s3394_s29 = smov 109  }
  0x24   :  { %385 = vrot.lane.b32.xlu1 %v384_v11, %s3391_s23  ;;  %v2825_v35 = vld [vmem:[%s5555_s0 + $0x122] sm:$0x2]   ;;  %v2829_v37 = vld [vmem:[%s5555_s0 + $0x1f7] sm:$0x2]   ;;  %v2819_v41 = vld [vmem:[%s5555_s0 + $0x176] sm:$0x8]  }
  0x25   :  { %v2823_v43 = vld [vmem:[%s5555_s0 + $0x14b] sm:$0x8]   ;;  %v2826_v44 = vld [vmem:[%s5555_s0 + $0xa1] sm:$0x4]   ;;  %v521_v45 = vsel %vm5_vm0, %v2825_v35, %v2824_v34  ;;  %v541_v46 = vsel %vm5_vm0, %v2829_v37, %v2828_v36  ;;  %v2830_v47 = vld [vmem:[%s5555_s0 + $0x76] sm:$0x4]   ;;  %v487_v52 = vsel %vm13_vm2, %v2819_v41, %v483_v40 }
  0x26   :  { %v2832_v48 = vld [vmem:[%s5555_s0 + $0xcd] sm:$0x1]   ;;  %s3395_s30 = smov 108   ;;  %v2836_v50 = vld [vmem:[%s5555_s0 + $0x22] sm:$0x1]   ;;  %v508_v53 = vsel %vm13_vm2, %v2823_v43, %v504_v42  ;;  %v525_v54 = vsel %vm9_vm1, %v2826_v44, %v521_v45  ;;  %v545_v56 = vsel %vm9_vm1, %v2830_v47, %v541_v46  ;;  %s3396_s18 = smov 107  }
  0x27   :  { %364 = vrot.lane.b32.xlu0 %v363_v10, %s3390_s22  ;;  %v2833_v49 = vld [vmem:[%s5555_s0 + $0x1cc] sm:$0x2]   ;;  %v2837_v51 = vld [vmem:[%s5555_s0 + $0x121] sm:$0x2]   ;;  %v2827_v55 = vld [vmem:[%s5555_s0 + $0x1a0] sm:$0x8]  }
  0x28   :  { %426 = vrot.lane.b32.xlu1 %v425_v25, %s3393_s12  ;;  %v2831_v57 = vld [vmem:[%s5555_s0 + $0x175] sm:$0x8]   ;;  %v2834_v58 = vld [vmem:[%s5555_s0 + $0x4b] sm:$0x4]   ;;  %v562_v59 = vsel %vm5_vm0, %v2833_v49, %v2832_v48  ;;  %v583_v60 = vsel %vm5_vm0, %v2837_v51, %v2836_v50  ;;  %v2838_v61 = vld [vmem:[%s5555_s0 + $0xa0] sm:$0x4]   ;;  %v529_v2 = vsel %vm13_vm2, %v2827_v55, %v525_v54 }
  0x29   :  { %v2840_v62 = vld [vmem:[%s5555_s0 + $0xf7] sm:$0x1]   ;;  %s3397_s19 = smov 106   ;;  %v2844_v0 = vld [vmem:[%s5555_s0 + $0xcc] sm:$0x1]   ;;  %v549_v3 = vsel %vm13_vm2, %v2831_v57, %v545_v56  ;;  %v566_v4 = vsel %vm9_vm1, %v2834_v58, %v562_v59  ;;  %v587_v6 = vsel %vm9_vm1, %v2838_v61, %v583_v60  ;;  %s3398_s7 = smov 105  }
  0x2a   :  { %v2841_v63 = vld [vmem:[%s5555_s0 + $0x1f6] sm:$0x2]   ;;  %v2845_v1 = vld [vmem:[%s5555_s0 + $0x1cb] sm:$0x2]   ;;  %v2835_v5 = vld [vmem:[%s5555_s0 + $0x14a] sm:$0x8]  }
  0x2b   :  { %406 = vrot.lane.b32.xlu0 %v405_v24, %s3392_s11  ;;  %v2839_v7 = vld [vmem:[%s5555_s0 + $0x19f] sm:$0x8]   ;;  %v2842_v8 = vld [vmem:[%s5555_s0 + $0x75] sm:$0x4]   ;;  %v603_v9 = vsel %vm5_vm0, %v2841_v63, %v2840_v62  ;;  %v624_v10 = vsel %vm5_vm0, %v2845_v1, %v2844_v0  ;;  %v2846_v11 = vld [vmem:[%s5555_s0 + $0x4a] sm:$0x4]   ;;  %v570_v16 = vsel %vm13_vm2, %v2835_v5, %v566_v4 }
  0x2c   :  { %468 = vrot.lane.b32.xlu1 %v467_v39, %s3395_s30  ;;  %v2848_v12 = vld [vmem:[%s5555_s0 + $0x21] sm:$0x1]   ;;  %s3399_s8 = smov 104   ;;  %v2852_v14 = vld [vmem:[%s5555_s0 + $0xf6] sm:$0x1]   ;;  %v591_v17 = vsel %vm13_vm2, %v2839_v7, %v587_v6  ;;  %v607_v18 = vsel %vm9_vm1, %v2842_v8, %v603_v9  ;;  %v628_v20 = vsel %vm9_vm1, %v2846_v11, %v624_v10  ;;  %s3400_s25 = smov 103  }
  0x2d   :  { %v2849_v13 = vld [vmem:[%s5555_s0 + $0x120] sm:$0x2]   ;;  %v2853_v15 = vld [vmem:[%s5555_s0 + $0x1f5] sm:$0x2]   ;;  %v2843_v19 = vld [vmem:[%s5555_s0 + $0x174] sm:$0x8]  }
  0x2e   :  { %v2847_v21 = vld [vmem:[%s5555_s0 + $0x149] sm:$0x8]   ;;  %v2850_v22 = vld [vmem:[%s5555_s0 + $0x9f] sm:$0x4]   ;;  %v645_v23 = vsel %vm5_vm0, %v2849_v13, %v2848_v12  ;;  %v665_v24 = vsel %vm5_vm0, %v2853_v15, %v2852_v14  ;;  %v2854_v25 = vld [vmem:[%s5555_s0 + $0x74] sm:$0x4]   ;;  %v611_v30 = vsel %vm13_vm2, %v2843_v19, %v607_v18 }
  0x2f   :  { %447 = vrot.lane.b32.xlu0 %v446_v38, %s3394_s29  ;;  %v2856_v26 = vld [vmem:[%s5555_s0 + $0xcb] sm:$0x1]   ;;  %s3401_s26 = smov 102   ;;  %v2860_v28 = vld [vmem:[%s5555_s0 + $0x20] sm:$0x1]   ;;  %v632_v31 = vsel %vm13_vm2, %v2847_v21, %v628_v20  ;;  %v649_v32 = vsel %vm9_vm1, %v2850_v22, %v645_v23  ;;  %v669_v34 = vsel %vm9_vm1, %v2854_v25, %v665_v24  ;;  %s3402_s14 = smov 101  }
  0x30   :  { %509 = vrot.lane.b32.xlu1 %v508_v53, %s3397_s19  ;;  %v2857_v27 = vld [vmem:[%s5555_s0 + $0x1ca] sm:$0x2]   ;;  %v2861_v29 = vld [vmem:[%s5555_s0 + $0x11f] sm:$0x2]   ;;  %v2851_v33 = vld [vmem:[%s5555_s0 + $0x19e] sm:$0x8]  }
  0x31   :  { %v2855_v35 = vld [vmem:[%s5555_s0 + $0x173] sm:$0x8]   ;;  %v2858_v36 = vld [vmem:[%s5555_s0 + $0x49] sm:$0x4]   ;;  %v686_v37 = vsel %vm5_vm0, %v2857_v27, %v2856_v26  ;;  %v707_v38 = vsel %vm5_vm0, %v2861_v29, %v2860_v28  ;;  %v2862_v39 = vld [vmem:[%s5555_s0 + $0x9e] sm:$0x4]   ;;  %v653_v44 = vsel %vm13_vm2, %v2851_v33, %v649_v32 }
  0x32   :  { %v2864_v40 = vld [vmem:[%s5555_s0 + $0xf5] sm:$0x1]   ;;  %s3403_s15 = smov 100   ;;  %v2868_v42 = vld [vmem:[%s5555_s0 + $0xca] sm:$0x1]   ;;  %v673_v45 = vsel %vm13_vm2, %v2855_v35, %v669_v34  ;;  %v690_v46 = vsel %vm9_vm1, %v2858_v36, %v686_v37  ;;  %v711_v48 = vsel %vm9_vm1, %v2862_v39, %v707_v38  ;;  %s3404_s3 = smov 99  }
  0x33   :  { %488 = vrot.lane.b32.xlu0 %v487_v52, %s3396_s18  ;;  %v2865_v41 = vld [vmem:[%s5555_s0 + $0x1f4] sm:$0x2]   ;;  %v2869_v43 = vld [vmem:[%s5555_s0 + $0x1c9] sm:$0x2]   ;;  %v2859_v47 = vld [vmem:[%s5555_s0 + $0x148] sm:$0x8]  }
  0x34   :  { %550 = vrot.lane.b32.xlu1 %v549_v3, %s3399_s8  ;;  %v2863_v49 = vld [vmem:[%s5555_s0 + $0x19d] sm:$0x8]   ;;  %v2866_v50 = vld [vmem:[%s5555_s0 + $0x73] sm:$0x4]   ;;  %v727_v51 = vsel %vm5_vm0, %v2865_v41, %v2864_v40  ;;  %v748_v52 = vsel %vm5_vm0, %v2869_v43, %v2868_v42  ;;  %v2870_v53 = vld [vmem:[%s5555_s0 + $0x48] sm:$0x4]   ;;  %v694_v58 = vsel %vm13_vm2, %v2859_v47, %v690_v46 }
  0x35   :  { %v2872_v54 = vld [vmem:[%s5555_s0 + $0x1f] sm:$0x1]   ;;  %s3405_s4 = smov 98   ;;  %v2876_v56 = vld [vmem:[%s5555_s0 + $0xf4] sm:$0x1]   ;;  %v715_v59 = vsel %vm13_vm2, %v2863_v49, %v711_v48  ;;  %v731_v60 = vsel %vm9_vm1, %v2866_v50, %v727_v51  ;;  %v752_v62 = vsel %vm9_vm1, %v2870_v53, %v748_v52  ;;  %s3406_s21 = smov 97  }
  0x36   :  { %v2873_v55 = vld [vmem:[%s5555_s0 + $0x11e] sm:$0x2]   ;;  %v2877_v57 = vld [vmem:[%s5555_s0 + $0x1f3] sm:$0x2]   ;;  %v2867_v61 = vld [vmem:[%s5555_s0 + $0x172] sm:$0x8]  }
  0x37   :  { %530 = vrot.lane.b32.xlu0 %v529_v2, %s3398_s7  ;;  %v2871_v63 = vld [vmem:[%s5555_s0 + $0x147] sm:$0x8]   ;;  %v2874_v0 = vld [vmem:[%s5555_s0 + $0x9d] sm:$0x4]   ;;  %v769_v1 = vsel %vm5_vm0, %v2873_v55, %v2872_v54  ;;  %v789_v2 = vsel %vm5_vm0, %v2877_v57, %v2876_v56  ;;  %v2878_v3 = vld [vmem:[%s5555_s0 + $0x72] sm:$0x4]   ;;  %v735_v8 = vsel %vm13_vm2, %v2867_v61, %v731_v60 }
  0x38   :  { %592 = vrot.lane.b32.xlu1 %v591_v17, %s3401_s26  ;;  %v2880_v4 = vld [vmem:[%s5555_s0 + $0xc9] sm:$0x1]   ;;  %s3407_s22 = smov 96   ;;  %v2884_v6 = vld [vmem:[%s5555_s0 + $0x1e] sm:$0x1]   ;;  %v756_v9 = vsel %vm13_vm2, %v2871_v63, %v752_v62  ;;  %v773_v10 = vsel %vm9_vm1, %v2874_v0, %v769_v1  ;;  %v793_v12 = vsel %vm9_vm1, %v2878_v3, %v789_v2  ;;  %s3408_s10 = smov 95  }
  0x39   :  { %v2881_v5 = vld [vmem:[%s5555_s0 + $0x1c8] sm:$0x2]   ;;  %v2885_v7 = vld [vmem:[%s5555_s0 + $0x11d] sm:$0x2]   ;;  %v2875_v11 = vld [vmem:[%s5555_s0 + $0x19c] sm:$0x8]  }
  0x3a   :  { %v2879_v13 = vld [vmem:[%s5555_s0 + $0x171] sm:$0x8]   ;;  %v2882_v14 = vld [vmem:[%s5555_s0 + $0x47] sm:$0x4]   ;;  %v810_v15 = vsel %vm5_vm0, %v2881_v5, %v2880_v4  ;;  %v2886_v17 = vld [vmem:[%s5555_s0 + $0x9c] sm:$0x4]   ;;  %v777_v22 = vsel %vm13_vm2, %v2875_v11, %v773_v10 }
  0x3b   :  { %571 = vrot.lane.b32.xlu0 %v570_v16, %s3400_s25  ;;  %v831_v16 = vsel %vm5_vm0, %v2885_v7, %v2884_v6  ;;  %v2888_v18 = vld [vmem:[%s5555_s0 + $0xf3] sm:$0x1]   ;;  %s3409_s11 = smov 94   ;;  %v2892_v20 = vld [vmem:[%s5555_s0 + $0xc8] sm:$0x1]   ;;  %v797_v23 = vsel %vm13_vm2, %v2879_v13, %v793_v12  ;;  %v814_v24 = vsel %vm9_vm1, %v2882_v14, %v810_v15  ;;  %s3410_s28 = smov 93  }
  0x3c   :  { %633 = vrot.lane.b32.xlu1 %v632_v31, %s3403_s15  ;;  %v2889_v19 = vld [vmem:[%s5555_s0 + $0x1f2] sm:$0x2]   ;;  %v2893_v21 = vld [vmem:[%s5555_s0 + $0x1c7] sm:$0x2]   ;;  %v2883_v25 = vld [vmem:[%s5555_s0 + $0x146] sm:$0x8]   ;;  %v835_v26 = vsel %vm9_vm1, %v2886_v17, %v831_v16 }
  0x3d   :  { %v2887_v27 = vld [vmem:[%s5555_s0 + $0x19b] sm:$0x8]   ;;  %v2890_v28 = vld [vmem:[%s5555_s0 + $0x71] sm:$0x4]   ;;  %v851_v29 = vsel %vm5_vm0, %v2889_v19, %v2888_v18  ;;  %v2894_v31 = vld [vmem:[%s5555_s0 + $0x46] sm:$0x4]   ;;  %v818_v36 = vsel %vm13_vm2, %v2883_v25, %v814_v24 }
  0x3e   :  { %v2896_v32 = vld [vmem:[%s5555_s0 + $0x1d] sm:$0x1]   ;;  %s3411_s29 = smov 92   ;;  %v2900_v34 = vld [vmem:[%s5555_s0 + $0xf2] sm:$0x1]   ;;  %v839_v37 = vsel %vm13_vm2, %v2887_v27, %v835_v26  ;;  %v855_v38 = vsel %vm9_vm1, %v2890_v28, %v851_v29  ;;  %s3412_s17 = smov 91  }
  0x3f   :  { %612 = vrot.lane.b32.xlu0 %v611_v30, %s3402_s14  ;;  %v872_v30 = vsel %vm5_vm0, %v2893_v21, %v2892_v20  ;;  %v2897_v33 = vld [vmem:[%s5555_s0 + $0x11c] sm:$0x2]   ;;  %v2901_v35 = vld [vmem:[%s5555_s0 + $0x1f1] sm:$0x2]   ;;  %v2891_v39 = vld [vmem:[%s5555_s0 + $0x170] sm:$0x8]  }
  0x40   :  { %674 = vrot.lane.b32.xlu1 %v673_v45, %s3405_s4  ;;  %v876_v40 = vsel %vm9_vm1, %v2894_v31, %v872_v30  ;;  %v2895_v41 = vld [vmem:[%s5555_s0 + $0x145] sm:$0x8]   ;;  %v2898_v42 = vld [vmem:[%s5555_s0 + $0x9b] sm:$0x4]   ;;  %v893_v43 = vsel %vm5_vm0, %v2897_v33, %v2896_v32  ;;  %v2902_v45 = vld [vmem:[%s5555_s0 + $0x70] sm:$0x4]   ;;  %v859_v50 = vsel %vm13_vm2, %v2891_v39, %v855_v38 }
  0x41   :  { %v2904_v46 = vld [vmem:[%s5555_s0 + $0xc7] sm:$0x1]   ;;  %s3413_s18 = smov 90   ;;  %v2908_v48 = vld [vmem:[%s5555_s0 + $0x1c] sm:$0x1]   ;;  %v880_v51 = vsel %vm13_vm2, %v2895_v41, %v876_v40  ;;  %v897_v52 = vsel %vm9_vm1, %v2898_v42, %v893_v43  ;;  %s3414_s6 = smov 89  }
  0x42   :  { %v2905_v47 = vld [vmem:[%s5555_s0 + $0x1c6] sm:$0x2]   ;;  %v2909_v49 = vld [vmem:[%s5555_s0 + $0x11b] sm:$0x2]   ;;  %v2899_v53 = vld [vmem:[%s5555_s0 + $0x19a] sm:$0x8]  }
  0x43   :  { %654 = vrot.lane.b32.xlu0 %v653_v44, %s3404_s3  ;;  %v913_v44 = vsel %vm5_vm0, %v2901_v35, %v2900_v34  ;;  %v2903_v55 = vld [vmem:[%s5555_s0 + $0x16f] sm:$0x8]   ;;  %v2906_v56 = vld [vmem:[%s5555_s0 + $0x45] sm:$0x4]   ;;  %v934_v57 = vsel %vm5_vm0, %v2905_v47, %v2904_v46  ;;  %v2912_v60 = vld [vmem:[%s5555_s0 + $0xf1] sm:$0x1]   ;;  %v901_v0 = vsel %vm13_vm2, %v2899_v53, %v897_v52 }
  0x44   :  { %716 = vrot.lane.b32.xlu1 %v715_v59, %s3407_s22  ;;  %v917_v54 = vsel %vm9_vm1, %v2902_v45, %v913_v44  ;;  %v2910_v59 = vld [vmem:[%s5555_s0 + $0x9a] sm:$0x4]   ;;  %v2913_v61 = vld [vmem:[%s5555_s0 + $0x1f0] sm:$0x2]   ;;  %s3415_s7 = smov 88   ;;  %v938_v2 = vsel %vm9_vm1, %v2906_v56, %v934_v57  ;;  %s3416_s24 = smov 87  }
  0x45   :  { %v2916_v62 = vld [vmem:[%s5555_s0 + $0xc6] sm:$0x1]   ;;  %v921_v1 = vsel %vm13_vm2, %v2903_v55, %v917_v54  ;;  %v2907_v3 = vld [vmem:[%s5555_s0 + $0x144] sm:$0x8]   ;;  %v2911_v5 = vld [vmem:[%s5555_s0 + $0x199] sm:$0x8]   ;;  %v975_v7 = vsel %vm5_vm0, %v2913_v61, %v2912_v60 }
  0x46   :  { %v2917_v63 = vld [vmem:[%s5555_s0 + $0x1c5] sm:$0x2]   ;;  %v2914_v6 = vld [vmem:[%s5555_s0 + $0x6f] sm:$0x4]   ;;  %v2920_v10 = vld [vmem:[%s5555_s0 + $0x1b] sm:$0x1]   ;;  %v942_v14 = vsel %vm13_vm2, %v2907_v3, %v938_v2 }
  0x47   :  { %695 = vrot.lane.b32.xlu0 %v694_v58, %s3406_s21  ;;  %v955_v58 = vsel %vm5_vm0, %v2909_v49, %v2908_v48  ;;  %v2921_v11 = vld [vmem:[%s5555_s0 + $0x11a] sm:$0x2]   ;;  %s3417_s25 = smov 86   ;;  %v2924_v12 = vld [vmem:[%s5555_s0 + $0xf0] sm:$0x1]   ;;  %v979_v16 = vsel %vm9_vm1, %v2914_v6, %v975_v7  ;;  %s3418_s13 = smov 85  }
  0x48   :  { %757 = vrot.lane.b32.xlu1 %v756_v9, %s3409_s11  ;;  %v959_v4 = vsel %vm9_vm1, %v2910_v59, %v955_v58  ;;  %v2918_v9 = vld [vmem:[%s5555_s0 + $0x44] sm:$0x4]   ;;  %v2925_v13 = vld [vmem:[%s5555_s0 + $0x1ef] sm:$0x2]   ;;  %v2915_v17 = vld [vmem:[%s5555_s0 + $0x16e] sm:$0x8]   ;;  %v1017_v21 = vsel %vm5_vm0, %v2921_v11, %v2920_v10 }
  0x49   :  { %v963_v15 = vsel %vm13_vm2, %v2911_v5, %v959_v4  ;;  %v2919_v19 = vld [vmem:[%s5555_s0 + $0x143] sm:$0x8]   ;;  %v2922_v20 = vld [vmem:[%s5555_s0 + $0x99] sm:$0x4]   ;;  %v2928_v24 = vld [vmem:[%s5555_s0 + $0xc5] sm:$0x1]   ;;  %v983_v28 = vsel %vm13_vm2, %v2915_v17, %v979_v16 }
  0x4a   :  { %v2929_v25 = vld [vmem:[%s5555_s0 + $0x1c4] sm:$0x2]   ;;  %s3419_s14 = smov 84   ;;  %v2932_v26 = vld [vmem:[%s5555_s0 + $0x1a] sm:$0x1]   ;;  %v1021_v32 = vsel %vm9_vm1, %v2922_v20, %v1017_v21  ;;  %vm15_vm5 = vcmask 23552  }
  0x4b   :  { %736 = vrot.lane.b32.xlu0 %v735_v8, %s3408_s10  ;;  %v996_v8 = vsel %vm5_vm0, %v2917_v63, %v2916_v62  ;;  %v2933_v27 = vld [vmem:[%s5555_s0 + $0x119] sm:$0x2]   ;;  %v2923_v30 = vld [vmem:[%s5555_s0 + $0x198] sm:$0x8]   ;;  %v2927_v31 = vld [vmem:[%s5555_s0 + $0x16d] sm:$0x8]  }
  0x4c   :  { %798 = vrot.lane.b32.xlu1 %v797_v23, %s3411_s29  ;;  %v1000_v18 = vsel %vm9_vm1, %v2918_v9, %v996_v8  ;;  %v2926_v23 = vld [vmem:[%s5555_s0 + $0x6e] sm:$0x4]   ;;  %v2930_v34 = vld [vmem:[%s5555_s0 + $0x43] sm:$0x4]   ;;  %v2934_v35 = vld [vmem:[%s5555_s0 + $0x98] sm:$0x4]   ;;  %v1079_v38 = vsel %vm5_vm0, %v2933_v27, %v2932_v26  ;;  %v1025_v44 = vsel %vm13_vm2, %v2923_v30, %v1021_v32 }
  0x4d   :  { %v1004_v29 = vsel %vm13_vm2, %v2919_v19, %v1000_v18  ;;  %v2937_v39 = vld [vmem:[%s5555_s0 + $0x1ee] sm:$0x2]   ;;  %v2940_v40 = vld [vmem:[%s5555_s0 + $0xc4] sm:$0x1]   ;;  %v2726_v42 = vld [vmem:[%s5555_s0 + $0xfe] sm:$0x4]  }
  0x4e   :  { %v2941_v41 = vld [vmem:[%s5555_s0 + $0x1c3] sm:$0x2]   ;;  %v2_v43 = vld [vmem:[%s5555_s0] sm:$0x1]   ;;  %v2931_v46 = vld [vmem:[%s5555_s0 + $0x142] sm:$0x8]  }
  0x4f   :  { %778 = vrot.lane.b32.xlu0 %v777_v22, %s3410_s28  ;;  %v1037_v22 = vsel %vm5_vm0, %v2925_v13, %v2924_v12  ;;  %v2727_v47 = vld [vmem:[%s5555_s0 + $0x17d] sm:$0x8]   ;;  %v2938_v52 = vld [vmem:[%s5555_s0 + $0x6d] sm:$0x4]   ;;  %v1120_v55 = vsel %vm5_vm0, %v2941_v41, %v2940_v40  ;;  %v2942_v56 = vld [vmem:[%s5555_s0 + $0x42] sm:$0x4]  }
  0x50   :  { %840 = vrot.lane.b32.xlu1 %v839_v37, %s3413_s18  ;;  %v1041_v33 = vsel %vm9_vm1, %v2926_v23, %v1037_v22  ;;  %v1058_v37 = vsel %vm5_vm0, %v2929_v25, %v2928_v24  ;;  %v2725_v48 = vld [vmem:[%s5555_s0 + $0x7f] sm:$0x2]   ;;  %v2944_v57 = vld [vmem:[%s5555_s0 + $0x19] sm:$0x1]   ;;  %s3422_s28 = smov 81   ;;  %s3423_s29 = smov 80   ;;  %v1124_v3 = vsel %vm9_vm1, %v2942_v56, %v1120_v55 }
  0x51   :  { %v1045_v45 = vsel %vm13_vm2, %v2927_v31, %v1041_v33  ;;  %v1062_v49 = vsel %vm9_vm1, %v2930_v34, %v1058_v37  ;;  %v6_v53 = vsel %vm5_vm0, %v2725_v48, %v2_v43  ;;  %v2945_v58 = vld [vmem:[%s5555_s0 + $0x118] sm:$0x2]   ;;  %v2948_v60 = vld [vmem:[%s5555_s0 + $0xee] sm:$0x1]   ;;  %v2939_v2 = vld [vmem:[%s5555_s0 + $0x16c] sm:$0x8]  }
  0x52   :  { %v10_v59 = vsel %vm9_vm1, %v2726_v42, %v6_v53  ;;  %v2949_v61 = vld [vmem:[%s5555_s0 + $0x1ed] sm:$0x2]   ;;  %v1066_v63 = vsel %vm13_vm2, %v2931_v46, %v1062_v49  ;;  %v2943_v4 = vld [vmem:[%s5555_s0 + $0x141] sm:$0x8]   ;;  %v2946_v5 = vld [vmem:[%s5555_s0 + $0x97] sm:$0x4]   ;;  %v1141_v6 = vsel %vm5_vm0, %v2945_v58, %v2944_v57 }
  0x53   :  { %819 = vrot.lane.b32.xlu0 %v818_v36, %s3412_s17  ;;  %v2936_v36 = vld [vmem:[%s5555_s0 + $0xef] sm:$0x1]   ;;  %v14_v62 = vsel %vm13_vm2, %v2727_v47, %v10_v59  ;;  %v1161_v7 = vsel %vm5_vm0, %v2949_v61, %v2948_v60  ;;  %v2950_v8 = vld [vmem:[%s5555_s0 + $0x6c] sm:$0x4]   ;;  %v2952_v9 = vld [vmem:[%s5555_s0 + $0xc3] sm:$0x1]  }
  0x54   :  { %881 = vrot.lane.b32.xlu1 %v880_v51, %s3415_s7  ;;  %s3421_s7 = smov 82   ;;  %v2935_v51 = vld [vmem:[%s5555_s0 + $0x197] sm:$0x8]   ;;  %v1099_v54 = vsel %vm5_vm0, %v2937_v39, %v2936_v36  ;;  %16 = vst.msk [vmem:[#allocation0] ss:$24 sm:$0x3] %vm15_vm5, %v14_v62   ;;  %v1165_v17 = vsel %vm9_vm1, %v2950_v8, %v1161_v7 }
  0x55   :  { %18 = vst.msk [vmem:[#allocation0 - $0x2f] ss:$24 sm:$0xc] %vm15_vm5, %v14_v62   ;;  %v2953_v10 = vld [vmem:[%s5555_s0 + $0x1c2] sm:$0x2]   ;;  %s3424_s17 = smov 79  }
  0x56   :  { %s3425_s18 = smov 78   ;;  %v2956_v11 = vld [vmem:[%s5555_s0 + $0x18] sm:$0x1]   ;;  %v2947_v16 = vld [vmem:[%s5555_s0 + $0x196] sm:$0x8]   ;;  %v1182_v20 = vsel %vm5_vm0, %v2953_v10, %v2952_v9  ;;  %vm56_vm6 = vcmask 1048568  }
  0x57   :  { %860 = vrot.lane.b32.xlu0 %v859_v50, %s3414_s6  ;;  %s3420_s6 = smov 83   ;;  %v1083_v50 = vsel %vm9_vm1, %v2934_v35, %v1079_v38  ;;  %v2957_v12 = vld [vmem:[%s5555_s0 + $0x117] sm:$0x2]   ;;  %v2951_v18 = vld [vmem:[%s5555_s0 + $0x16b] sm:$0x8]   ;;  %s3432_s2 = smov 71  }
  0x58   :  { %922 = vrot.lane.b32.xlu1 %v921_v1, %s3417_s25  ;;  %v1103_v1 = vsel %vm9_vm1, %v2938_v52, %v1099_v54  ;;  %v2954_v19 = vld [vmem:[%s5555_s0 + $0x41] sm:$0x4]   ;;  %v1203_v21 = vsel %vm5_vm0, %v2957_v12, %v2956_v11  ;;  %v2958_v22 = vld [vmem:[%s5555_s0 + $0x96] sm:$0x4]   ;;  %v2960_v23 = vld [vmem:[%s5555_s0 + $0xed] sm:$0x1]  }
  0x59   :  { %v1107_v13 = vsel %vm13_vm2, %v2939_v2, %v1103_v1  ;;  %v2961_v24 = vld [vmem:[%s5555_s0 + $0x1ec] sm:$0x2]   ;;  %v2964_v25 = vld [vmem:[%s5555_s0 + $0xc2] sm:$0x1]   ;;  %v2955_v30 = vld [vmem:[%s5555_s0 + $0x140] sm:$0x8]   ;;  %v1207_v31 = vsel %vm9_vm1, %v2958_v22, %v1203_v21 }
  0x5a   :  { %v2965_v26 = vld [vmem:[%s5555_s0 + $0x1c1] sm:$0x2]   ;;  %v2959_v32 = vld [vmem:[%s5555_s0 + $0x195] sm:$0x8]   ;;  %v2962_v33 = vld [vmem:[%s5555_s0 + $0x6b] sm:$0x4]   ;;  %v1223_v34 = vsel %vm5_vm0, %v2961_v24, %v2960_v23 }
  0x5b   :  { %902 = vrot.lane.b32.xlu0 %v901_v0, %s3416_s24  ;;  %v1087_v0 = vsel %vm13_vm2, %v2935_v51, %v1083_v50  ;;  %v1244_v35 = vsel %vm5_vm0, %v2965_v26, %v2964_v25  ;;  %v2966_v36 = vld [vmem:[%s5555_s0 + $0x40] sm:$0x4]   ;;  %v2968_v37 = vld [vmem:[%s5555_s0 + $0x17] sm:$0x1]   ;;  %s3428_s24 = smov 75   ;;  %s3429_s25 = smov 74   ;;  %v1211_v42 = vsel %vm13_vm2, %v2959_v32, %v1207_v31  ;;  %v1227_v43 = vsel %vm9_vm1, %v2962_v33, %v1223_v34 }
  0x5c   :  { %964 = vrot.lane.b32.xlu1 %v963_v15, %s3419_s14  ;;  %v1145_v15 = vsel %vm9_vm1, %v2946_v5, %v1141_v6  ;;  %v2969_v38 = vld [vmem:[%s5555_s0 + $0x116] sm:$0x2]   ;;  %v2972_v39 = vld [vmem:[%s5555_s0 + $0xec] sm:$0x1]   ;;  %v2967_v46 = vld [vmem:[%s5555_s0 + $0x13f] sm:$0x8]  }
  0x5d   :  { %v1149_v27 = vsel %vm13_vm2, %v2947_v16, %v1145_v15  ;;  %v2973_v40 = vld [vmem:[%s5555_s0 + $0x1eb] sm:$0x2]   ;;  %v2970_v47 = vld [vmem:[%s5555_s0 + $0x95] sm:$0x4]   ;;  %v1265_v48 = vsel %vm5_vm0, %v2969_v38, %v2968_v37  ;;  %v2976_v51 = vld [vmem:[%s5555_s0 + $0xc1] sm:$0x1]  }
  0x5e   :  { %v1285_v49 = vsel %vm5_vm0, %v2973_v40, %v2972_v39  ;;  %v2974_v50 = vld [vmem:[%s5555_s0 + $0x6a] sm:$0x4]   ;;  %v2977_v52 = vld [vmem:[%s5555_s0 + $0x1c0] sm:$0x2]   ;;  %s3431_s14 = smov 72   ;;  %v1269_v57 = vsel %vm9_vm1, %v2970_v47, %v1265_v48  ;;  %s3433_s3 = smov 70  }
  0x5f   :  { %943 = vrot.lane.b32.xlu0 %v942_v14, %s3418_s13  ;;  %v1128_v14 = vsel %vm13_vm2, %v2943_v4, %v1124_v3  ;;  %s3430_s13 = smov 73   ;;  %v2980_v53 = vld [vmem:[%s5555_s0 + $0x16] sm:$0x1]   ;;  %v2971_v58 = vld [vmem:[%s5555_s0 + $0x194] sm:$0x8]   ;;  %v1289_v59 = vsel %vm9_vm1, %v2974_v50, %v1285_v49  ;;  %v1306_v62 = vsel %vm5_vm0, %v2977_v52, %v2976_v51  ;;  %vm118_vm7 = vcmask 1048552  }
  0x60   :  { %1005 = vrot.lane.b32.xlu1 %v1004_v29, %s3421_s7  ;;  %s3427_s7 = smov 76   ;;  %v1186_v29 = vsel %vm9_vm1, %v2954_v19, %v1182_v20  ;;  %v2981_v54 = vld [vmem:[%s5555_s0 + $0x115] sm:$0x2]   ;;  %v2975_v60 = vld [vmem:[%s5555_s0 + $0x169] sm:$0x8]   ;;  %v1273_v6 = vsel %vm13_vm2, %v2971_v58, %v1269_v57  ;;  %s3434_s20 = smov 69  }
  0x61   :  { %v1190_v41 = vsel %vm13_vm2, %v2955_v30, %v1186_v29  ;;  %v2978_v61 = vld [vmem:[%s5555_s0 + $0x3f] sm:$0x4]   ;;  %v2984_v1 = vld [vmem:[%s5555_s0 + $0xeb] sm:$0x1]   ;;  %v2988_v3 = vld [vmem:[%s5555_s0 + $0xc0] sm:$0x1]   ;;  %v1293_v7 = vsel %vm13_vm2, %v2975_v60, %v1289_v59 }
  0x62   :  { %v2985_v2 = vld [vmem:[%s5555_s0 + $0x1ea] sm:$0x2]   ;;  %v2989_v4 = vld [vmem:[%s5555_s0 + $0x1bf] sm:$0x2]   ;;  %v1310_v9 = vsel %vm9_vm1, %v2978_v61, %v1306_v62  ;;  %v2979_v10 = vld [vmem:[%s5555_s0 + $0x13e] sm:$0x8]  }
  0x63   :  { %984 = vrot.lane.b32.xlu0 %v983_v28, %s3420_s6  ;;  %s3426_s6 = smov 77   ;;  %v1169_v28 = vsel %vm13_vm2, %v2951_v18, %v1165_v17  ;;  %v2983_v12 = vld [vmem:[%s5555_s0 + $0x193] sm:$0x8]   ;;  %v1368_v15 = vsel %vm5_vm0, %v2989_v4, %v2988_v3  ;;  %v2990_v16 = vld [vmem:[%s5555_s0 + $0x3e] sm:$0x4]   ;;  %s3435_s21 = smov 68   ;;  %v1314_v21 = vsel %vm13_vm2, %v2979_v10, %v1310_v9 }
  0x64   :  { %1046 = vrot.lane.b32.xlu1 %v1045_v45, %s3423_s29  ;;  %v1248_v45 = vsel %vm9_vm1, %v2966_v36, %v1244_v35  ;;  %v2992_v17 = vld [vmem:[%s5555_s0 + $0x15] sm:$0x1]   ;;  %vm98_vm8 = vcmask 1048560   ;;  %v2996_v19 = vld [vmem:[%s5555_s0 + $0xea] sm:$0x1]   ;;  %vm139_vm9 = vcmask 1040352  }
  0x65   :  { %v1252_v56 = vsel %vm13_vm2, %v2967_v46, %v1248_v45  ;;  %v2993_v18 = vld [vmem:[%s5555_s0 + $0x114] sm:$0x2]   ;;  %v2997_v20 = vld [vmem:[%s5555_s0 + $0x1e9] sm:$0x2]   ;;  %v2987_v26 = vld [vmem:[%s5555_s0 + $0x168] sm:$0x8]  }
  0x66   :  { %v2994_v29 = vld [vmem:[%s5555_s0 + $0x93] sm:$0x4]   ;;  %v1389_v30 = vsel %vm5_vm0, %v2993_v18, %v2992_v17  ;;  %v1409_v31 = vsel %vm5_vm0, %v2997_v20, %v2996_v19  ;;  %v2998_v32 = vld [vmem:[%s5555_s0 + $0x68] sm:$0x4]   ;;  %v3000_v33 = vld [vmem:[%s5555_s0 + $0xbf] sm:$0x1]  }
  0x67   :  { %1026 = vrot.lane.b32.xlu0 %v1025_v44, %s3422_s28  ;;  %v2963_v44 = vld [vmem:[%s5555_s0 + $0x16a] sm:$0x8]   ;;  %v3001_v34 = vld [vmem:[%s5555_s0 + $0x1be] sm:$0x2]   ;;  %s3436_s9 = smov 67   ;;  %vm160_vm10 = vcmask 1032152  }
  0x68   :  { %1088 = vrot.lane.b32.xlu1 %v1087_v0, %s3425_s18  ;;  %v1231_v55 = vsel %vm13_vm2, %v2963_v44, %v1227_v43  ;;  %v2982_v0 = vld [vmem:[%s5555_s0 + $0x94] sm:$0x4]   ;;  %s3437_s10 = smov 66   ;;  %vm180_vm11 = vcmask 1023952   ;;  %v3004_v35 = vld [vmem:[%s5555_s0 + $0x14] sm:$0x1]   ;;  %v1413_v43 = vsel %vm9_vm1, %v2998_v32, %v1409_v31  ;;  %v1430_v46 = vsel %vm5_vm0, %v3001_v34, %v3000_v33 }
  0x69   :  { %v3005_v36 = vld [vmem:[%s5555_s0 + $0x113] sm:$0x2]   ;;  %v2999_v44 = vld [vmem:[%s5555_s0 + $0x167] sm:$0x8]   ;;  %v3002_v45 = vld [vmem:[%s5555_s0 + $0x3d] sm:$0x4]  }
  0x6a   :  { %v1451_v47 = vsel %vm5_vm0, %v3005_v36, %v3004_v35  ;;  %v3006_v48 = vld [vmem:[%s5555_s0 + $0x92] sm:$0x4]   ;;  %v3008_v49 = vld [vmem:[%s5555_s0 + $0xe9] sm:$0x1]   ;;  %s3438_s27 = smov 65   ;;  %vm201_vm12 = vcmask 1015752   ;;  %v1434_v57 = vsel %vm9_vm1, %v3002_v45, %v1430_v46 }
  0x6b   :  { %1067 = vrot.lane.b32.xlu0 %v1066_v63, %s3424_s17  ;;  %v1327_v63 = vsel %vm5_vm0, %v2981_v54, %v2980_v53  ;;  %v3009_v50 = vld [vmem:[%s5555_s0 + $0x1e8] sm:$0x2]   ;;  %s3439_s28 = smov 64   ;;  %vm222_vm13 = vcmask 1007552   ;;  %v3012_v51 = vld [vmem:[%s5555_s0 + $0xbe] sm:$0x1]   ;;  %v1417_v54 = vsel %vm13_vm2, %v2999_v44, %v1413_v43  ;;  %v1455_v59 = vsel %vm9_vm1, %v3006_v48, %v1451_v47 }
  0x6c   :  { %1129 = vrot.lane.b32.xlu1 %v1128_v14, %s3427_s7  ;;  %v1331_v11 = vsel %vm9_vm1, %v2982_v0, %v1327_v63  ;;  %v1347_v14 = vsel %vm5_vm0, %v2985_v2, %v2984_v1  ;;  %v3013_v52 = vld [vmem:[%s5555_s0 + $0x1bd] sm:$0x2]   ;;  %v3003_v58 = vld [vmem:[%s5555_s0 + $0x13c] sm:$0x8]   ;;  %v3007_v60 = vld [vmem:[%s5555_s0 + $0x191] sm:$0x8]   ;;  %v1471_v62 = vsel %vm5_vm0, %v3009_v50, %v3008_v49 }
  0x6d   :  { %v1335_v22 = vsel %vm13_vm2, %v2983_v12, %v1331_v11  ;;  %v3010_v61 = vld [vmem:[%s5555_s0 + $0x67] sm:$0x4]   ;;  %v1492_v63 = vsel %vm5_vm0, %v3013_v52, %v3012_v51  ;;  %v3014_v0 = vld [vmem:[%s5555_s0 + $0x3c] sm:$0x4]   ;;  %v3016_v1 = vld [vmem:[%s5555_s0 + $0x13] sm:$0x1]  }
  0x6e   :  { %v3017_v2 = vld [vmem:[%s5555_s0 + $0x112] sm:$0x2]   ;;  %s3440_s16 = smov 63   ;;  %vm242_vm14 = vcmask 999352   ;;  %s3441_s17 = smov 62   ;;  %vm263_vm15 = vcmask 991152   ;;  %v1475_v9 = vsel %vm9_vm1, %v3010_v61, %v1471_v62  ;;  %v1496_v11 = vsel %vm9_vm1, %v3014_v0, %v1492_v63 }
  0x6f   :  { %1108 = vrot.lane.b32.xlu0 %v1107_v13, %s3426_s6  ;;  %v2986_v13 = vld [vmem:[%s5555_s0 + $0x69] sm:$0x4]   ;;  %v3020_v3 = vld [vmem:[%s5555_s0 + $0xe8] sm:$0x1]   ;;  %v3011_v10 = vld [vmem:[%s5555_s0 + $0x166] sm:$0x8]  }
  0x70   :  { %1170 = vrot.lane.b32.xlu1 %v1169_v28, %s3429_s25  ;;  %v1351_v25 = vsel %vm9_vm1, %v2986_v13, %v1347_v14  ;;  %v2991_v28 = vld [vmem:[%s5555_s0 + $0x13d] sm:$0x8]   ;;  %v3021_v4 = vld [vmem:[%s5555_s0 + $0x1e7] sm:$0x2]   ;;  %v3015_v12 = vld [vmem:[%s5555_s0 + $0x13b] sm:$0x8]   ;;  %v1513_v14 = vsel %vm5_vm0, %v3017_v2, %v3016_v1 }
  0x71   :  { %v1355_v37 = vsel %vm13_vm2, %v2987_v26, %v1351_v25  ;;  %v3018_v13 = vld [vmem:[%s5555_s0 + $0x91] sm:$0x4]   ;;  %v3024_v17 = vld [vmem:[%s5555_s0 + $0xbd] sm:$0x1]   ;;  %s3442_s5 = smov 61   ;;  %s3443_s6 = smov 60  }
  0x72   :  { %v3025_v18 = vld [vmem:[%s5555_s0 + $0x1bc] sm:$0x2]   ;;  %v3028_v19 = vld [vmem:[%s5555_s0 + $0x12] sm:$0x1]   ;;  %v1517_v25 = vsel %vm9_vm1, %v3018_v13, %v1513_v14  ;;  %v3019_v26 = vld [vmem:[%s5555_s0 + $0x190] sm:$0x8]  }
  0x73   :  { %1150 = vrot.lane.b32.xlu0 %v1149_v27, %s3428_s24  ;;  %v1372_v27 = vsel %vm9_vm1, %v2990_v16, %v1368_v15  ;;  %v1533_v15 = vsel %vm5_vm0, %v3021_v4, %v3020_v3  ;;  %v3022_v16 = vld [vmem:[%s5555_s0 + $0x66] sm:$0x4]   ;;  %v3029_v20 = vld [vmem:[%s5555_s0 + $0x111] sm:$0x2]   ;;  %v3032_v33 = vld [vmem:[%s5555_s0 + $0xe7] sm:$0x1]  }
  0x74   :  { %1212 = vrot.lane.b32.xlu1 %v1211_v42, %s3431_s14  ;;  %v1376_v38 = vsel %vm13_vm2, %v2991_v28, %v1372_v27  ;;  %v2995_v42 = vld [vmem:[%s5555_s0 + $0x192] sm:$0x8]   ;;  %v1537_v27 = vsel %vm9_vm1, %v3022_v16, %v1533_v15  ;;  %v3023_v28 = vld [vmem:[%s5555_s0 + $0x165] sm:$0x8]   ;;  %v1575_v31 = vsel %vm5_vm0, %v3029_v20, %v3028_v19  ;;  %v3030_v32 = vld [vmem:[%s5555_s0 + $0x90] sm:$0x4]  }
  0x75   :  { %v3033_v34 = vld [vmem:[%s5555_s0 + $0x1e6] sm:$0x2]   ;;  %s3444_s23 = smov 59   ;;  %vm325_vm5 = vcmask 966552   ;;  %s3445_s24 = smov 58   ;;  %v1579_v43 = vsel %vm9_vm1, %v3030_v32, %v1575_v31 }
  0x76   :  { %v3036_v35 = vld [vmem:[%s5555_s0 + $0xbc] sm:$0x1]   ;;  %v3031_v44 = vld [vmem:[%s5555_s0 + $0x18f] sm:$0x8]   ;;  %v3034_v45 = vld [vmem:[%s5555_s0 + $0x65] sm:$0x4]   ;;  %v1595_v46 = vsel %vm5_vm0, %v3033_v34, %v3032_v33 }
  0x77   :  { %1191 = vrot.lane.b32.xlu0 %v1190_v41, %s3430_s13  ;;  %v1393_v41 = vsel %vm9_vm1, %v2994_v29, %v1389_v30  ;;  %v3026_v29 = vld [vmem:[%s5555_s0 + $0x3b] sm:$0x4]   ;;  %v1554_v30 = vsel %vm5_vm0, %v3025_v18, %v3024_v17  ;;  %v3037_v36 = vld [vmem:[%s5555_s0 + $0x1bb] sm:$0x2]   ;;  %v3040_v49 = vld [vmem:[%s5555_s0 + $0x11] sm:$0x1]  }
  0x78   :  { %1253 = vrot.lane.b32.xlu1 %v1252_v56, %s3433_s3  ;;  %v117_v8 = vpop.permute.xlu1 %116   ;;  %v1397_v53 = vsel %vm13_vm2, %v2995_v42, %v1393_v41  ;;  %v1558_v41 = vsel %vm9_vm1, %v3026_v29, %v1554_v30  ;;  %v3027_v42 = vld [vmem:[%s5555_s0 + $0x13a] sm:$0x8]   ;;  %v1616_v47 = vsel %vm5_vm0, %v3037_v36, %v3036_v35  ;;  %v3038_v48 = vld [vmem:[%s5555_s0 + $0x3a] sm:$0x4]   ;;  %v3041_v50 = vld [vmem:[%s5555_s0 + $0x110] sm:$0x2]  }
  0x79   :  { %s3446_s12 = smov 57   ;;  %s3447_s13 = smov 56   ;;  %v3044_v51 = vld [vmem:[%s5555_s0 + $0xe6] sm:$0x1]   ;;  %v3042_v61 = vld [vmem:[%s5555_s0 + $0x8f] sm:$0x4]   ;;  %v1637_v62 = vsel %vm5_vm0, %v3041_v50, %v3040_v49 }
  0x7a   :  { %v3045_v52 = vld [vmem:[%s5555_s0 + $0x1e5] sm:$0x2]   ;;  %v3048_v1 = vld [vmem:[%s5555_s0 + $0xbb] sm:$0x1]   ;;  %s3448_s30 = smov 55   ;;  %s3450_s19 = smov 53  }
  0x7b   :  { %1232 = vrot.lane.b32.xlu0 %v1231_v55, %s3432_s2  ;;  %v1657_v63 = vsel %vm5_vm0, %v3045_v52, %v3044_v51  ;;  %v3046_v0 = vld [vmem:[%s5555_s0 + $0x64] sm:$0x4]   ;;  %v3049_v2 = vld [vmem:[%s5555_s0 + $0x1ba] sm:$0x2]   ;;  %s3449_s2 = smov 54   ;;  %s3452_s8 = smov 51  }
  0x7c   :  { %1294 = vrot.lane.b32.xlu1 %v1293_v7, %s3435_s21  ;;  %v3052_v3 = vld [vmem:[%s5555_s0 + $0x10] sm:$0x1]   ;;  %v3050_v13 = vld [vmem:[%s5555_s0 + $0x39] sm:$0x4]   ;;  %v1678_v14 = vsel %vm5_vm0, %v3049_v2, %v3048_v1  ;;  %v3056_v17 = vld [vmem:[%s5555_s0 + $0xe5] sm:$0x1]  }
  0x7d   :  { %v50_v5 = vpop.permute.xlu0 %49   ;;  %v3053_v4 = vld [vmem:[%s5555_s0 + $0x10f] sm:$0x2]   ;;  %v3057_v18 = vld [vmem:[%s5555_s0 + $0x1e4] sm:$0x2]   ;;  %v3060_v19 = vld [vmem:[%s5555_s0 + $0xba] sm:$0x1]  }
  0x7e   :  { %53 = vst.msk [vmem:[#allocation0 + $0x28] sm:$0x3] %vm51_vm4, %v50_v5   ;;  %55 = vst.msk [vmem:[#allocation0 + $0xe] sm:$0xc] %vm51_vm4, %v50_v5   ;;  %v138_v24 = vpop.permute.xlu1 %137   ;;  %vm304_vm4 = vcmask 974752   ;;  %v1699_v15 = vsel %vm5_vm0, %v3053_v4, %v3052_v3  ;;  %v1719_v30 = vsel %vm5_vm0, %v3057_v18, %v3056_v17  ;;  %s3454_s26 = smov 49  }
  0x7f   :  { %58 = vst.msk [vmem:[#allocation0 + $0x20] sm:$0x3] %vm56_vm6, %v50_v5   ;;  %60 = vst.msk [vmem:[#allocation0 + $0x6] sm:$0xc] %vm56_vm6, %v50_v5   ;;  %1274 = vrot.lane.b32.xlu0 %v1273_v6, %s3434_s20  ;;  %v1438_v5 = vsel %vm13_vm2, %v3003_v58, %v1434_v57  ;;  %v1459_v6 = vsel %vm13_vm2, %v3007_v60, %v1455_v59  ;;  %vm346_vm6 = vcmask 958352   ;;  %v1599_v57 = vsel %vm9_vm1, %v3034_v45, %v1595_v46  ;;  %s3451_s20 = smov 52  }
  0x80   :  { %120 = vst.msk [vmem:[#allocation0 + $0x28] sm:$0x3] %vm118_vm7, %v117_v8   ;;  %122 = vst.msk [vmem:[#allocation0 + $0xe] sm:$0xc] %vm118_vm7, %v117_v8   ;;  %1336 = vrot.lane.b32.xlu1 %v1335_v22, %s3437_s10  ;;  %v1500_v22 = vsel %vm13_vm2, %v3015_v12, %v1496_v11  ;;  %vm366_vm7 = vcmask 950152   ;;  %v1620_v59 = vsel %vm9_vm1, %v3038_v48, %v1616_v47  ;;  %v1661_v11 = vsel %vm9_vm1, %v3046_v0, %v1657_v63  ;;  %s3456_s15 = smov 47  }
  0x81   :  { %v92_v23 = vpop.permute.xlu0 %91   ;;  %v3035_v58 = vld [vmem:[%s5555_s0 + $0x164] sm:$0x8]   ;;  %v3039_v60 = vld [vmem:[%s5555_s0 + $0x139] sm:$0x8]   ;;  %v3047_v12 = vld [vmem:[%s5555_s0 + $0x163] sm:$0x8]  }
  0x82   :  { %95 = vst.msk [vmem:[#allocation0 + $0x20] sm:$0x3] %vm47_vm3, %v92_v23   ;;  %97 = vst.msk [vmem:[#allocation0 + $0x6] sm:$0xc] %vm47_vm3, %v92_v23   ;;  %v179_v40 = vpop.permute.xlu1 %178   ;;  %vm284_vm3 = vcmask 982952   ;;  %s3458_s4 = smov 45  }
  0x83   :  { %99 = vst.msk [vmem:[#allocation0] sm:$0x3] %vm98_vm8, %v92_v23   ;;  %101 = vst.msk [vmem:[#allocation0 + $0x16] sm:$0xc] %vm98_vm8, %v92_v23   ;;  %1315 = vrot.lane.b32.xlu0 %v1314_v21, %s3436_s9  ;;  %v1479_v21 = vsel %vm13_vm2, %v3011_v10, %v1475_v9  ;;  %vm387_vm8 = vcmask 941952   ;;  %v1641_v9 = vsel %vm9_vm1, %v3042_v61, %v1637_v62  ;;  %s3453_s9 = smov 50  }
  0x84   :  { %141 = vst.msk [vmem:[#allocation0 + $0x20] sm:$0x3] %vm139_vm9, %v138_v24   ;;  %143 = vst.msk [vmem:[#allocation0 + $0x6] sm:$0xc] %vm139_vm9, %v138_v24   ;;  %1377 = vrot.lane.b32.xlu1 %v1376_v38, %s3439_s28  ;;  %v1541_v38 = vsel %vm13_vm2, %v3023_v28, %v1537_v27  ;;  %vm408_vm9 = vcmask 933752   ;;  %s3460_s22 = smov 43  }
  0x85   :  { %v159_v39 = vpop.permute.xlu0 %158   ;;  %182 = vst.msk [vmem:[#allocation0 + $0x28] sm:$0x3] %vm180_vm11, %v179_v40   ;;  %184 = vst.msk [vmem:[#allocation0 + $0xe] sm:$0xc] %vm180_vm11, %v179_v40   ;;  %v3043_v10 = vld [vmem:[%s5555_s0 + $0x18e] sm:$0x8]  }
  0x86   :  { %161 = vst.msk [vmem:[#allocation0] sm:$0x3] %vm160_vm10, %v159_v39   ;;  %163 = vst.msk [vmem:[#allocation0 + $0x16] sm:$0xc] %vm160_vm10, %v159_v39   ;;  %v221_v56 = vpop.permute.xlu1 %220   ;;  %vm428_vm10 = vcmask 925552   ;;  %vm449_vm11 = vcmask 917352  }
  0x87   :  { %1356 = vrot.lane.b32.xlu0 %v1355_v37, %s3438_s27  ;;  %223 = vst.msk [vmem:[#allocation0] sm:$0x3] %vm222_vm13, %v221_v56   ;;  %225 = vst.msk [vmem:[#allocation0 + $0x16] sm:$0xc] %vm222_vm13, %v221_v56   ;;  %v1521_v37 = vsel %vm13_vm2, %v3019_v26, %v1517_v25  ;;  %v3054_v16 = vld [vmem:[%s5555_s0 + $0x8e] sm:$0x4]   ;;  %v1682_v25 = vsel %vm9_vm1, %v3050_v13, %v1678_v14 }
  0x88   :  { %1418 = vrot.lane.b32.xlu1 %v1417_v54, %s3441_s17  ;;  %v1583_v54 = vsel %vm13_vm2, %v3031_v44, %v1579_v43  ;;  %v3061_v20 = vld [vmem:[%s5555_s0 + $0x1b9] sm:$0x2]   ;;  %v3051_v26 = vld [vmem:[%s5555_s0 + $0x138] sm:$0x8]   ;;  %v1703_v27 = vsel %vm9_vm1, %v3054_v16, %v1699_v15  ;;  %v3055_v28 = vld [vmem:[%s5555_s0 + $0x18d] sm:$0x8]  }
  0x89   :  { %v200_v55 = vpop.permute.xlu0 %199   ;;  %v3058_v29 = vld [vmem:[%s5555_s0 + $0x63] sm:$0x4]   ;;  %v1740_v31 = vsel %vm5_vm0, %v3061_v20, %v3060_v19  ;;  %v3062_v32 = vld [vmem:[%s5555_s0 + $0x38] sm:$0x4]   ;;  %v3064_v33 = vld [vmem:[%s5555_s0 + $0xf] sm:$0x1]  }
  0x8a   :  { %203 = vst.msk [vmem:[#allocation0 + $0x20] sm:$0x3] %vm201_vm12, %v200_v55   ;;  %205 = vst.msk [vmem:[#allocation0 + $0x6] sm:$0xc] %vm201_vm12, %v200_v55   ;;  %v262_v8 = vpop.permute.xlu1 %261   ;;  %vm470_vm12 = vcmask 909152   ;;  %vm490_vm13 = vcmask 900952   ;;  %v1744_v43 = vsel %vm9_vm1, %v3062_v32, %v1740_v31 }
  0x8b   :  { %1398 = vrot.lane.b32.xlu0 %v1397_v53, %s3440_s16  ;;  %265 = vst.msk [vmem:[#allocation0 + $0x20] sm:$0x3] %vm263_vm15, %v262_v8   ;;  %267 = vst.msk [vmem:[#allocation0 + $0x6] sm:$0xc] %vm263_vm15, %v262_v8   ;;  %v1562_v53 = vsel %vm13_vm2, %v3027_v42, %v1558_v41  ;;  %v3065_v34 = vld [vmem:[%s5555_s0 + $0x10e] sm:$0x2]   ;;  %v1723_v41 = vsel %vm9_vm1, %v3058_v29, %v1719_v30 }
  0x8c   :  { %1460 = vrot.lane.b32.xlu1 %v1459_v6, %s3443_s6  ;;  %v1624_v6 = vsel %vm13_vm2, %v3039_v60, %v1620_v59  ;;  %v3068_v35 = vld [vmem:[%s5555_s0 + $0xe4] sm:$0x1]   ;;  %v3059_v42 = vld [vmem:[%s5555_s0 + $0x162] sm:$0x8]   ;;  %v3063_v44 = vld [vmem:[%s5555_s0 + $0x137] sm:$0x8]   ;;  %v1761_v46 = vsel %vm5_vm0, %v3065_v34, %v3064_v33 }
  0x8d   :  { %v241_v7 = vpop.permute.xlu0 %240   ;;  %v3069_v36 = vld [vmem:[%s5555_s0 + $0x1e3] sm:$0x2]   ;;  %v3066_v45 = vld [vmem:[%s5555_s0 + $0x8d] sm:$0x4]   ;;  %v3072_v49 = vld [vmem:[%s5555_s0 + $0xb9] sm:$0x1]  }
  0x8e   :  { %244 = vst.msk [vmem:[#allocation0 + $0x28] sm:$0x3] %vm242_vm14, %v241_v7   ;;  %246 = vst.msk [vmem:[#allocation0 + $0xe] sm:$0xc] %vm242_vm14, %v241_v7   ;;  %v303_v24 = vpop.permute.xlu1 %302   ;;  %vm511_vm14 = vcmask 892752   ;;  %v1781_v47 = vsel %vm5_vm0, %v3069_v36, %v3068_v35  ;;  %vm532_vm15 = vcmask 884552  }
  0x8f   :  { %1439 = vrot.lane.b32.xlu0 %v1438_v5, %s3442_s5  ;;  %306 = vst.msk [vmem:[#allocation0 + $0x28] sm:$0x3] %vm304_vm4, %v303_v24   ;;  %308 = vst.msk [vmem:[#allocation0 + $0xe] sm:$0xc] %vm304_vm4, %v303_v24   ;;  %v1603_v5 = vsel %vm13_vm2, %v3035_v58, %v1599_v57  ;;  %v3070_v48 = vld [vmem:[%s5555_s0 + $0x62] sm:$0x4]   ;;  %v1765_v57 = vsel %vm9_vm1, %v3066_v45, %v1761_v46 }
  0x90   :  { %1501 = vrot.lane.b32.xlu1 %v1500_v22, %s3445_s24  ;;  %v1665_v22 = vsel %vm13_vm2, %v3047_v12, %v1661_v11  ;;  %v3073_v50 = vld [vmem:[%s5555_s0 + $0x1b8] sm:$0x2]   ;;  %s3455_s27 = smov 48   ;;  %v3076_v51 = vld [vmem:[%s5555_s0 + $0xe] sm:$0x1]   ;;  %v1785_v59 = vsel %vm9_vm1, %v3070_v48, %v1781_v47  ;;  %vm573_vm4 = vcmask 868152  }
  0x91   :  { %v283_v23 = vpop.permute.xlu0 %282   ;;  %v3077_v52 = vld [vmem:[%s5555_s0 + $0x10d] sm:$0x2]   ;;  %v3067_v58 = vld [vmem:[%s5555_s0 + $0x18c] sm:$0x8]   ;;  %v3071_v60 = vld [vmem:[%s5555_s0 + $0x161] sm:$0x8]   ;;  %v1802_v62 = vsel %vm5_vm0, %v3073_v50, %v3072_v49 }
  0x92   :  { %285 = vst.msk [vmem:[#allocation0] sm:$0x3] %vm284_vm3, %v283_v23   ;;  %287 = vst.msk [vmem:[#allocation0 + $0x16] sm:$0xc] %vm284_vm3, %v283_v23   ;;  %v345_v40 = vpop.permute.xlu1 %344   ;;  %vm552_vm3 = vcmask 876352   ;;  %v1823_v63 = vsel %vm5_vm0, %v3077_v52, %v3076_v51  ;;  %s3457_s16 = smov 46  }
  0x93   :  { %1480 = vrot.lane.b32.xlu0 %v1479_v21, %s3444_s23  ;;  %347 = vst.msk [vmem:[#allocation0] sm:$0x3] %vm346_vm6, %v345_v40   ;;  %349 = vst.msk [vmem:[#allocation0 + $0x16] sm:$0xc] %vm346_vm6, %v345_v40   ;;  %v1645_v21 = vsel %vm13_vm2, %v3043_v10, %v1641_v9  ;;  %v3074_v61 = vld [vmem:[%s5555_s0 + $0x37] sm:$0x4]  }
  0x94   :  { %1542 = vrot.lane.b32.xlu1 %v1541_v38, %s3447_s13  ;;  %v1707_v38 = vsel %vm13_vm2, %v3055_v28, %v1703_v27  ;;  %v3078_v0 = vld [vmem:[%s5555_s0 + $0x8c] sm:$0x4]   ;;  %v3080_v1 = vld [vmem:[%s5555_s0 + $0xe3] sm:$0x1]   ;;  %v3084_v3 = vld [vmem:[%s5555_s0 + $0xb8] sm:$0x1]   ;;  %v1806_v9 = vsel %vm9_vm1, %v3074_v61, %v1802_v62 }
  0x95   :  { %v324_v39 = vpop.permute.xlu0 %323   ;;  %v3081_v2 = vld [vmem:[%s5555_s0 + $0x1e2] sm:$0x2]   ;;  %v3085_v4 = vld [vmem:[%s5555_s0 + $0x1b7] sm:$0x2]   ;;  %v3075_v10 = vld [vmem:[%s5555_s0 + $0x136] sm:$0x8]   ;;  %v1827_v11 = vsel %vm9_vm1, %v3078_v0, %v1823_v63 }
  0x96   :  { %327 = vst.msk [vmem:[#allocation0 + $0x20] sm:$0x3] %vm325_vm5, %v324_v39   ;;  %329 = vst.msk [vmem:[#allocation0 + $0x6] sm:$0xc] %vm325_vm5, %v324_v39   ;;  %v386_v56 = vpop.permute.xlu1 %385   ;;  %vm594_vm5 = vcmask 859952   ;;  %v1843_v14 = vsel %vm5_vm0, %v3081_v2, %v3080_v1  ;;  %v1864_v15 = vsel %vm5_vm0, %v3085_v4, %v3084_v3  ;;  %vm614_vm6 = vcmask 851752  }
  0x97   :  { %1522 = vrot.lane.b32.xlu0 %v1521_v37, %s3446_s12  ;;  %389 = vst.msk [vmem:[#allocation0 + $0x20] sm:$0x3] %vm387_vm8, %v386_v56   ;;  %391 = vst.msk [vmem:[#allocation0 + $0x6] sm:$0xc] %vm387_vm8, %v386_v56   ;;  %v1686_v37 = vsel %vm13_vm2, %v3051_v26, %v1682_v25  ;;  %v3079_v12 = vld [vmem:[%s5555_s0 + $0x18b] sm:$0x8]  }
  0x98   :  { %1584 = vrot.lane.b32.xlu1 %v1583_v54, %s3449_s2  ;;  %v1748_v54 = vsel %vm13_vm2, %v3063_v44, %v1744_v43  ;;  %v3082_v13 = vld [vmem:[%s5555_s0 + $0x61] sm:$0x4]   ;;  %v3086_v16 = vld [vmem:[%s5555_s0 + $0x36] sm:$0x4]   ;;  %v3088_v17 = vld [vmem:[%s5555_s0 + $0xd] sm:$0x1]  }
  0x99   :  { %v365_v55 = vpop.permute.xlu0 %364   ;;  %v3089_v18 = vld [vmem:[%s5555_s0 + $0x10c] sm:$0x2]   ;;  %s3459_s5 = smov 44   ;;  %v3092_v19 = vld [vmem:[%s5555_s0 + $0xe2] sm:$0x1]   ;;  %v1847_v25 = vsel %vm9_vm1, %v3082_v13, %v1843_v14  ;;  %v1868_v27 = vsel %vm9_vm1, %v3086_v16, %v1864_v15  ;;  %vm656_vm8 = vcmask 835352  }
  0x9a   :  { %368 = vst.msk [vmem:[#allocation0 + $0x28] sm:$0x3] %vm366_vm7, %v365_v55   ;;  %370 = vst.msk [vmem:[#allocation0 + $0xe] sm:$0xc] %vm366_vm7, %v365_v55   ;;  %v427_v8 = vpop.permute.xlu1 %426   ;;  %vm635_vm7 = vcmask 843552   ;;  %v1885_v30 = vsel %vm5_vm0, %v3089_v18, %v3088_v17  ;;  %s3461_s23 = smov 42  }
  0x9b   :  { %1563 = vrot.lane.b32.xlu0 %v1562_v53, %s3448_s30  ;;  %430 = vst.msk [vmem:[#allocation0 + $0x28] sm:$0x3] %vm428_vm10, %v427_v8   ;;  %432 = vst.msk [vmem:[#allocation0 + $0xe] sm:$0xc] %vm428_vm10, %v427_v8   ;;  %v1727_v53 = vsel %vm13_vm2, %v3059_v42, %v1723_v41  ;;  %v3093_v20 = vld [vmem:[%s5555_s0 + $0x1e1] sm:$0x2]  }
  0x9c   :  { %1625 = vrot.lane.b32.xlu1 %v1624_v6, %s3451_s20  ;;  %v1789_v6 = vsel %vm13_vm2, %v3071_v60, %v1785_v59  ;;  %v3083_v26 = vld [vmem:[%s5555_s0 + $0x160] sm:$0x8]   ;;  %v3087_v28 = vld [vmem:[%s5555_s0 + $0x135] sm:$0x8]   ;;  %v3090_v29 = vld [vmem:[%s5555_s0 + $0x8b] sm:$0x4]   ;;  %v1905_v31 = vsel %vm5_vm0, %v3093_v20, %v3092_v19 }
  0x9d   :  { %v407_v7 = vpop.permute.xlu0 %406   ;;  %v3094_v32 = vld [vmem:[%s5555_s0 + $0x60] sm:$0x4]   ;;  %v3096_v33 = vld [vmem:[%s5555_s0 + $0xb7] sm:$0x1]   ;;  %v3100_v35 = vld [vmem:[%s5555_s0 + $0xc] sm:$0x1]   ;;  %v1889_v41 = vsel %vm9_vm1, %v3090_v29, %v1885_v30 }
  0x9e   :  { %409 = vst.msk [vmem:[#allocation0] sm:$0x3] %vm408_vm9, %v407_v7   ;;  %411 = vst.msk [vmem:[#allocation0 + $0x16] sm:$0xc] %vm408_vm9, %v407_v7   ;;  %v469_v24 = vpop.permute.xlu1 %468   ;;  %v3097_v34 = vld [vmem:[%s5555_s0 + $0x1b6] sm:$0x2]   ;;  %v1909_v43 = vsel %vm9_vm1, %v3094_v32, %v1905_v31 }
  0x9f   :  { %1604 = vrot.lane.b32.xlu0 %v1603_v5, %s3450_s19  ;;  %471 = vst.msk [vmem:[#allocation0] sm:$0x3] %vm470_vm12, %v469_v24   ;;  %473 = vst.msk [vmem:[#allocation0 + $0x16] sm:$0xc] %vm470_vm12, %v469_v24   ;;  %v1769_v5 = vsel %vm13_vm2, %v3067_v58, %v1765_v57  ;;  %vm676_vm9 = vcmask 827152   ;;  %v1926_v46 = vsel %vm5_vm0, %v3097_v34, %v3096_v33  ;;  %s3462_s11 = smov 41  }
  0xa0   :  { %1666 = vrot.lane.b32.xlu1 %v1665_v22, %s3453_s9  ;;  %v1831_v22 = vsel %vm13_vm2, %v3079_v12, %v1827_v11  ;;  %v3101_v36 = vld [vmem:[%s5555_s0 + $0x10b] sm:$0x2]   ;;  %v3091_v42 = vld [vmem:[%s5555_s0 + $0x18a] sm:$0x8]   ;;  %v3095_v44 = vld [vmem:[%s5555_s0 + $0x15f] sm:$0x8]  }
  0xa1   :  { %v448_v23 = vpop.permute.xlu0 %447   ;;  %v3098_v45 = vld [vmem:[%s5555_s0 + $0x35] sm:$0x4]   ;;  %v1947_v47 = vsel %vm5_vm0, %v3101_v36, %v3100_v35  ;;  %v3102_v48 = vld [vmem:[%s5555_s0 + $0x8a] sm:$0x4]   ;;  %v3104_v49 = vld [vmem:[%s5555_s0 + $0xe1] sm:$0x1]  }
  0xa2   :  { %451 = vst.msk [vmem:[#allocation0 + $0x20] sm:$0x3] %vm449_vm11, %v448_v23   ;;  %453 = vst.msk [vmem:[#allocation0 + $0x6] sm:$0xc] %vm449_vm11, %v448_v23   ;;  %v510_v40 = vpop.permute.xlu1 %509   ;;  %v3105_v50 = vld [vmem:[%s5555_s0 + $0x1e0] sm:$0x2]   ;;  %v1930_v57 = vsel %vm9_vm1, %v3098_v45, %v1926_v46  ;;  %v1951_v59 = vsel %vm9_vm1, %v3102_v48, %v1947_v47 }
  0xa3   :  { %1646 = vrot.lane.b32.xlu0 %v1645_v21, %s3452_s8  ;;  %513 = vst.msk [vmem:[#allocation0 + $0x20] sm:$0x3] %vm511_vm14, %v510_v40   ;;  %515 = vst.msk [vmem:[#allocation0 + $0x6] sm:$0xc] %vm511_vm14, %v510_v40   ;;  %v1810_v21 = vsel %vm13_vm2, %v3075_v10, %v1806_v9  ;;  %vm697_vm10 = vcmask 818952   ;;  %s3463_s12 = smov 40   ;;  %v1967_v62 = vsel %vm5_vm0, %v3105_v50, %v3104_v49 }
  0xa4   :  { %1708 = vrot.lane.b32.xlu1 %v1707_v38, %s3455_s27  ;;  %v1872_v38 = vsel %vm13_vm2, %v3087_v28, %v1868_v27  ;;  %vm718_vm11 = vcmask 810752   ;;  %v3108_v51 = vld [vmem:[%s5555_s0 + $0xb6] sm:$0x1]   ;;  %v3099_v58 = vld [vmem:[%s5555_s0 + $0x134] sm:$0x8]   ;;  %s3464_s29 = smov 39  }
  0xa5   :  { %v489_v39 = vpop.permute.xlu0 %488   ;;  %v3109_v52 = vld [vmem:[%s5555_s0 + $0x1b5] sm:$0x2]   ;;  %v3103_v60 = vld [vmem:[%s5555_s0 + $0x189] sm:$0x8]   ;;  %v3106_v61 = vld [vmem:[%s5555_s0 + $0x5f] sm:$0x4]  }
  0xa6   :  { %492 = vst.msk [vmem:[#allocation0 + $0x28] sm:$0x3] %vm490_vm13, %v489_v39   ;;  %494 = vst.msk [vmem:[#allocation0 + $0xe] sm:$0xc] %vm490_vm13, %v489_v39   ;;  %v551_v56 = vpop.permute.xlu1 %550   ;;  %v1988_v63 = vsel %vm5_vm0, %v3109_v52, %v3108_v51  ;;  %v3110_v0 = vld [vmem:[%s5555_s0 + $0x34] sm:$0x4]   ;;  %v1971_v9 = vsel %vm9_vm1, %v3106_v61, %v1967_v62 }
  0xa7   :  { %1687 = vrot.lane.b32.xlu0 %v1686_v37, %s3454_s26  ;;  %554 = vst.msk [vmem:[#allocation0 + $0x28] sm:$0x3] %vm552_vm3, %v551_v56   ;;  %556 = vst.msk [vmem:[#allocation0 + $0xe] sm:$0xc] %vm552_vm3, %v551_v56   ;;  %v1851_v37 = vsel %vm13_vm2, %v3083_v26, %v1847_v25  ;;  %v3112_v1 = vld [vmem:[%s5555_s0 + $0xb] sm:$0x1]   ;;  %v1992_v11 = vsel %vm9_vm1, %v3110_v0, %v1988_v63 }
  0xa8   :  { %1749 = vrot.lane.b32.xlu1 %v1748_v54, %s3457_s16  ;;  %v1913_v54 = vsel %vm13_vm2, %v3095_v44, %v1909_v43  ;;  %v3113_v2 = vld [vmem:[%s5555_s0 + $0x10a] sm:$0x2]   ;;  %vm738_vm12 = vcmask 802552   ;;  %s3465_s30 = smov 38   ;;  %vm759_vm13 = vcmask 794352   ;;  %s3466_s18 = smov 37  }
  0xa9   :  { %v531_v55 = vpop.permute.xlu0 %530   ;;  %v3116_v3 = vld [vmem:[%s5555_s0 + $0xe0] sm:$0x1]   ;;  %v3107_v10 = vld [vmem:[%s5555_s0 + $0x15e] sm:$0x8]   ;;  %v3111_v12 = vld [vmem:[%s5555_s0 + $0x133] sm:$0x8]   ;;  %v2009_v14 = vsel %vm5_vm0, %v3113_v2, %v3112_v1 }
  0xaa   :  { %533 = vst.msk [vmem:[#allocation0] sm:$0x3] %vm532_vm15, %v531_v55   ;;  %535 = vst.msk [vmem:[#allocation0 + $0x16] sm:$0xc] %vm532_vm15, %v531_v55   ;;  %v593_v8 = vpop.permute.xlu1 %592   ;;  %v3117_v4 = vld [vmem:[%s5555_s0 + $0x1df] sm:$0x2]  }
  0xab   :  { %1728 = vrot.lane.b32.xlu0 %v1727_v53, %s3456_s15  ;;  %595 = vst.msk [vmem:[#allocation0] sm:$0x3] %vm594_vm5, %v593_v8   ;;  %597 = vst.msk [vmem:[#allocation0 + $0x16] sm:$0xc] %vm594_vm5, %v593_v8   ;;  %v1893_v53 = vsel %vm13_vm2, %v3091_v42, %v1889_v41  ;;  %v3114_v13 = vld [vmem:[%s5555_s0 + $0x89] sm:$0x4]   ;;  %v2029_v15 = vsel %vm5_vm0, %v3117_v4, %v3116_v3 }
  0xac   :  { %1790 = vrot.lane.b32.xlu1 %v1789_v6, %s3459_s5  ;;  %v1955_v6 = vsel %vm13_vm2, %v3103_v60, %v1951_v59  ;;  %v3118_v16 = vld [vmem:[%s5555_s0 + $0x5e] sm:$0x4]   ;;  %v3120_v17 = vld [vmem:[%s5555_s0 + $0xb5] sm:$0x1]   ;;  %vm780_vm14 = vcmask 786152   ;;  %s3467_s19 = smov 36   ;;  %v2013_v25 = vsel %vm9_vm1, %v3114_v13, %v2009_v14 }
  0xad   :  { %v572_v7 = vpop.permute.xlu0 %571   ;;  %v3121_v18 = vld [vmem:[%s5555_s0 + $0x1b4] sm:$0x2]   ;;  %vm800_vm15 = vcmask 777952   ;;  %v3124_v19 = vld [vmem:[%s5555_s0 + $0xa] sm:$0x1]   ;;  %v2033_v27 = vsel %vm9_vm1, %v3118_v16, %v2029_v15  ;;  %s3468_s7 = smov 35  }
  0xae   :  { %575 = vst.msk [vmem:[#allocation0 + $0x20] sm:$0x3] %vm573_vm4, %v572_v7   ;;  %577 = vst.msk [vmem:[#allocation0 + $0x6] sm:$0xc] %vm573_vm4, %v572_v7   ;;  %v634_v24 = vpop.permute.xlu1 %633   ;;  %v3125_v20 = vld [vmem:[%s5555_s0 + $0x109] sm:$0x2]   ;;  %v2050_v30 = vsel %vm5_vm0, %v3121_v18, %v3120_v17 }
  0xaf   :  { %1770 = vrot.lane.b32.xlu0 %v1769_v5, %s3458_s4  ;;  %637 = vst.msk [vmem:[#allocation0 + $0x20] sm:$0x3] %vm635_vm7, %v634_v24   ;;  %639 = vst.msk [vmem:[#allocation0 + $0x6] sm:$0xc] %vm635_vm7, %v634_v24   ;;  %v1934_v5 = vsel %vm13_vm2, %v3099_v58, %v1930_v57  ;;  %v3115_v26 = vld [vmem:[%s5555_s0 + $0x188] sm:$0x8]   ;;  %v2071_v31 = vsel %vm5_vm0, %v3125_v20, %v3124_v19 }
  0xb0   :  { %1832 = vrot.lane.b32.xlu1 %v1831_v22, %s3461_s23  ;;  %v1996_v22 = vsel %vm13_vm2, %v3111_v12, %v1992_v11  ;;  %v3119_v28 = vld [vmem:[%s5555_s0 + $0x15d] sm:$0x8]   ;;  %v3122_v29 = vld [vmem:[%s5555_s0 + $0x33] sm:$0x4]   ;;  %v3126_v32 = vld [vmem:[%s5555_s0 + $0x88] sm:$0x4]  }
  0xb1   :  { %v613_v23 = vpop.permute.xlu0 %612   ;;  %v3128_v33 = vld [vmem:[%s5555_s0 + $0xdf] sm:$0x1]   ;;  %vm821_vm3 = vcmask 769752   ;;  %s3469_s8 = smov 34   ;;  %vm842_vm4 = vcmask 761552   ;;  %v2054_v41 = vsel %vm9_vm1, %v3122_v29, %v2050_v30  ;;  %v2075_v43 = vsel %vm9_vm1, %v3126_v32, %v2071_v31  ;;  %s3470_s25 = smov 33  }
  0xb2   :  { %616 = vst.msk [vmem:[#allocation0 + $0x28] sm:$0x3] %vm614_vm6, %v613_v23   ;;  %618 = vst.msk [vmem:[#allocation0 + $0xe] sm:$0xc] %vm614_vm6, %v613_v23   ;;  %v675_v40 = vpop.permute.xlu1 %674   ;;  %v3129_v34 = vld [vmem:[%s5555_s0 + $0x1de] sm:$0x2]  }
  0xb3   :  { %1811 = vrot.lane.b32.xlu0 %v1810_v21, %s3460_s22  ;;  %678 = vst.msk [vmem:[#allocation0 + $0x28] sm:$0x3] %vm676_vm9, %v675_v40   ;;  %680 = vst.msk [vmem:[#allocation0 + $0xe] sm:$0xc] %vm676_vm9, %v675_v40   ;;  %v1975_v21 = vsel %vm13_vm2, %v3107_v10, %v1971_v9  ;;  %v3132_v35 = vld [vmem:[%s5555_s0 + $0xb4] sm:$0x1]   ;;  %v2091_v46 = vsel %vm5_vm0, %v3129_v34, %v3128_v33 }
  0xb4   :  { %1873 = vrot.lane.b32.xlu1 %v1872_v38, %s3463_s12  ;;  %v3133_v36 = vld [vmem:[%s5555_s0 + $0x1b3] sm:$0x2]   ;;  %v2037_v38 = vsel %vm13_vm2, %v3119_v28, %v2033_v27  ;;  %v3123_v42 = vld [vmem:[%s5555_s0 + $0x132] sm:$0x8]   ;;  %v3127_v44 = vld [vmem:[%s5555_s0 + $0x187] sm:$0x8]  }
  0xb5   :  { %v655_v39 = vpop.permute.xlu0 %654   ;;  %v3130_v45 = vld [vmem:[%s5555_s0 + $0x5d] sm:$0x4]   ;;  %v2112_v47 = vsel %vm5_vm0, %v3133_v36, %v3132_v35  ;;  %v3134_v48 = vld [vmem:[%s5555_s0 + $0x32] sm:$0x4]   ;;  %v3136_v49 = vld [vmem:[%s5555_s0 + $0x9] sm:$0x1]  }
  0xb6   :  { %657 = vst.msk [vmem:[#allocation0] sm:$0x3] %vm656_vm8, %v655_v39   ;;  %659 = vst.msk [vmem:[#allocation0 + $0x16] sm:$0xc] %vm656_vm8, %v655_v39   ;;  %v717_v56 = vpop.permute.xlu1 %716   ;;  %v3137_v50 = vld [vmem:[%s5555_s0 + $0x108] sm:$0x2]   ;;  %v2095_v57 = vsel %vm9_vm1, %v3130_v45, %v2091_v46  ;;  %v2116_v59 = vsel %vm9_vm1, %v3134_v48, %v2112_v47 }
  0xb7   :  { %1852 = vrot.lane.b32.xlu0 %v1851_v37, %s3462_s11  ;;  %719 = vst.msk [vmem:[#allocation0] sm:$0x3] %vm718_vm11, %v717_v56   ;;  %721 = vst.msk [vmem:[#allocation0 + $0x16] sm:$0xc] %vm718_vm11, %v717_v56   ;;  %v2017_v37 = vsel %vm13_vm2, %v3115_v26, %v2013_v25  ;;  %vm862_vm5 = vcmask 753352   ;;  %s3471_s26 = smov 32   ;;  %v2133_v62 = vsel %vm5_vm0, %v3137_v50, %v3136_v49 }
  0xb8   :  { %1914 = vrot.lane.b32.xlu1 %v1913_v54, %s3465_s30  ;;  %vm883_vm6 = vcmask 745152   ;;  %v3140_v51 = vld [vmem:[%s5555_s0 + $0xde] sm:$0x1]   ;;  %v2079_v54 = vsel %vm13_vm2, %v3127_v44, %v2075_v43  ;;  %v3131_v58 = vld [vmem:[%s5555_s0 + $0x15c] sm:$0x8]   ;;  %s3472_s14 = smov 31  }
  0xb9   :  { %v696_v55 = vpop.permute.xlu0 %695   ;;  %v3141_v52 = vld [vmem:[%s5555_s0 + $0x1dd] sm:$0x2]   ;;  %v3135_v60 = vld [vmem:[%s5555_s0 + $0x131] sm:$0x8]   ;;  %v3138_v61 = vld [vmem:[%s5555_s0 + $0x87] sm:$0x4]  }
  0xba   :  { %699 = vst.msk [vmem:[#allocation0 + $0x20] sm:$0x3] %vm697_vm10, %v696_v55   ;;  %701 = vst.msk [vmem:[#allocation0 + $0x6] sm:$0xc] %vm697_vm10, %v696_v55   ;;  %v758_v8 = vpop.permute.xlu1 %757   ;;  %v2153_v63 = vsel %vm5_vm0, %v3141_v52, %v3140_v51  ;;  %v3142_v0 = vld [vmem:[%s5555_s0 + $0x5c] sm:$0x4]   ;;  %v2137_v9 = vsel %vm9_vm1, %v3138_v61, %v2133_v62 }
  0xbb   :  { %1894 = vrot.lane.b32.xlu0 %v1893_v53, %s3464_s29  ;;  %761 = vst.msk [vmem:[#allocation0 + $0x20] sm:$0x3] %vm759_vm13, %v758_v8   ;;  %763 = vst.msk [vmem:[#allocation0 + $0x6] sm:$0xc] %vm759_vm13, %v758_v8   ;;  %v2058_v53 = vsel %vm13_vm2, %v3123_v42, %v2054_v41  ;;  %v3144_v1 = vld [vmem:[%s5555_s0 + $0xb3] sm:$0x1]   ;;  %v2157_v11 = vsel %vm9_vm1, %v3142_v0, %v2153_v63 }
  0xbc   :  { %1956 = vrot.lane.b32.xlu1 %v1955_v6, %s3467_s19  ;;  %v3145_v2 = vld [vmem:[%s5555_s0 + $0x1b2] sm:$0x2]   ;;  %vm904_vm7 = vcmask 736952   ;;  %s3473_s15 = smov 30   ;;  %vm924_vm8 = vcmask 728752   ;;  %v2120_v6 = vsel %vm13_vm2, %v3135_v60, %v2116_v59  ;;  %s3474_s3 = smov 29  }
  0xbd   :  { %v737_v7 = vpop.permute.xlu0 %736   ;;  %v3148_v3 = vld [vmem:[%s5555_s0 + $0x8] sm:$0x1]   ;;  %v3139_v10 = vld [vmem:[%s5555_s0 + $0x186] sm:$0x8]   ;;  %v3143_v12 = vld [vmem:[%s5555_s0 + $0x15b] sm:$0x8]   ;;  %v2174_v14 = vsel %vm5_vm0, %v3145_v2, %v3144_v1 }
  0xbe   :  { %740 = vst.msk [vmem:[#allocation0 + $0x28] sm:$0x3] %vm738_vm12, %v737_v7   ;;  %742 = vst.msk [vmem:[#allocation0 + $0xe] sm:$0xc] %vm738_vm12, %v737_v7   ;;  %v799_v24 = vpop.permute.xlu1 %798   ;;  %v3149_v4 = vld [vmem:[%s5555_s0 + $0x107] sm:$0x2]  }
  0xbf   :  { %1935 = vrot.lane.b32.xlu0 %v1934_v5, %s3466_s18  ;;  %802 = vst.msk [vmem:[#allocation0 + $0x28] sm:$0x3] %vm800_vm15, %v799_v24   ;;  %804 = vst.msk [vmem:[#allocation0 + $0xe] sm:$0xc] %vm800_vm15, %v799_v24   ;;  %v2099_v5 = vsel %vm13_vm2, %v3131_v58, %v2095_v57  ;;  %v3146_v13 = vld [vmem:[%s5555_s0 + $0x31] sm:$0x4]   ;;  %v2195_v15 = vsel %vm5_vm0, %v3149_v4, %v3148_v3 }
  0xc0   :  { %1997 = vrot.lane.b32.xlu1 %v1996_v22, %s3469_s8  ;;  %v3150_v16 = vld [vmem:[%s5555_s0 + $0x86] sm:$0x4]   ;;  %v3152_v17 = vld [vmem:[%s5555_s0 + $0xdd] sm:$0x1]   ;;  %vm945_vm9 = vcmask 720552   ;;  %s3475_s4 = smov 28   ;;  %v2161_v22 = vsel %vm13_vm2, %v3143_v12, %v2157_v11  ;;  %v2178_v25 = vsel %vm9_vm1, %v3146_v13, %v2174_v14 }
  0xc1   :  { %v779_v23 = vpop.permute.xlu0 %778   ;;  %v3153_v18 = vld [vmem:[%s5555_s0 + $0x1dc] sm:$0x2]   ;;  %vm966_vm10 = vcmask 712352   ;;  %v3156_v19 = vld [vmem:[%s5555_s0 + $0xb2] sm:$0x1]   ;;  %v2199_v27 = vsel %vm9_vm1, %v3150_v16, %v2195_v15  ;;  %s3476_s21 = smov 27  }
  0xc2   :  { %781 = vst.msk [vmem:[#allocation0] sm:$0x3] %vm780_vm14, %v779_v23   ;;  %783 = vst.msk [vmem:[#allocation0 + $0x16] sm:$0xc] %vm780_vm14, %v779_v23   ;;  %v841_v40 = vpop.permute.xlu1 %840   ;;  %v3157_v20 = vld [vmem:[%s5555_s0 + $0x1b1] sm:$0x2]   ;;  %v2215_v30 = vsel %vm5_vm0, %v3153_v18, %v3152_v17 }
  0xc3   :  { %1976 = vrot.lane.b32.xlu0 %v1975_v21, %s3468_s7  ;;  %843 = vst.msk [vmem:[#allocation0] sm:$0x3] %vm842_vm4, %v841_v40   ;;  %845 = vst.msk [vmem:[#allocation0 + $0x16] sm:$0xc] %vm842_vm4, %v841_v40   ;;  %v2141_v21 = vsel %vm13_vm2, %v3139_v10, %v2137_v9  ;;  %v3147_v26 = vld [vmem:[%s5555_s0 + $0x130] sm:$0x8]   ;;  %v2236_v31 = vsel %vm5_vm0, %v3157_v20, %v3156_v19 }
  0xc4   :  { %2038 = vrot.lane.b32.xlu1 %v2037_v38, %s3471_s26  ;;  %v3151_v28 = vld [vmem:[%s5555_s0 + $0x185] sm:$0x8]   ;;  %v3154_v29 = vld [vmem:[%s5555_s0 + $0x5b] sm:$0x4]   ;;  %v3158_v32 = vld [vmem:[%s5555_s0 + $0x30] sm:$0x4]  }
  0xc5   :  { %v820_v39 = vpop.permute.xlu0 %819   ;;  %v3160_v33 = vld [vmem:[%s5555_s0 + $0x7] sm:$0x1]   ;;  %vm986_vm11 = vcmask 704152   ;;  %s3477_s22 = smov 26   ;;  %vm1007_vm12 = vcmask 695952   ;;  %v2203_v38 = vsel %vm13_vm2, %v3151_v28, %v2199_v27  ;;  %v2219_v41 = vsel %vm9_vm1, %v3154_v29, %v2215_v30  ;;  %s3478_s10 = smov 25  }
  0xc6   :  { %823 = vst.msk [vmem:[#allocation0 + $0x20] sm:$0x3] %vm821_vm3, %v820_v39   ;;  %825 = vst.msk [vmem:[#allocation0 + $0x6] sm:$0xc] %vm821_vm3, %v820_v39   ;;  %v882_v56 = vpop.permute.xlu1 %881   ;;  %v3161_v34 = vld [vmem:[%s5555_s0 + $0x106] sm:$0x2]   ;;  %v2240_v43 = vsel %vm9_vm1, %v3158_v32, %v2236_v31 }
  0xc7   :  { %2018 = vrot.lane.b32.xlu0 %v2017_v37, %s3470_s25  ;;  %885 = vst.msk [vmem:[#allocation0 + $0x20] sm:$0x3] %vm883_vm6, %v882_v56   ;;  %887 = vst.msk [vmem:[#allocation0 + $0x6] sm:$0xc] %vm883_vm6, %v882_v56   ;;  %v3164_v35 = vld [vmem:[%s5555_s0 + $0xdc] sm:$0x1]   ;;  %v2182_v37 = vsel %vm13_vm2, %v3147_v26, %v2178_v25  ;;  %v2257_v46 = vsel %vm5_vm0, %v3161_v34, %v3160_v33 }
  0xc8   :  { %2080 = vrot.lane.b32.xlu1 %v2079_v54, %s3473_s15  ;;  %v3165_v36 = vld [vmem:[%s5555_s0 + $0x1db] sm:$0x2]   ;;  %v3155_v42 = vld [vmem:[%s5555_s0 + $0x15a] sm:$0x8]   ;;  %v3159_v44 = vld [vmem:[%s5555_s0 + $0x12f] sm:$0x8]  }
  0xc9   :  { %v861_v55 = vpop.permute.xlu0 %860   ;;  %v3162_v45 = vld [vmem:[%s5555_s0 + $0x85] sm:$0x4]   ;;  %v2277_v47 = vsel %vm5_vm0, %v3165_v36, %v3164_v35  ;;  %v3166_v48 = vld [vmem:[%s5555_s0 + $0x5a] sm:$0x4]   ;;  %v3168_v49 = vld [vmem:[%s5555_s0 + $0xb1] sm:$0x1]   ;;  %v2244_v54 = vsel %vm13_vm2, %v3159_v44, %v2240_v43 }
  0xca   :  { %864 = vst.msk [vmem:[#allocation0 + $0x28] sm:$0x3] %vm862_vm5, %v861_v55   ;;  %866 = vst.msk [vmem:[#allocation0 + $0xe] sm:$0xc] %vm862_vm5, %v861_v55   ;;  %v923_v8 = vpop.permute.xlu1 %922   ;;  %v3169_v50 = vld [vmem:[%s5555_s0 + $0x1b0] sm:$0x2]   ;;  %v2261_v57 = vsel %vm9_vm1, %v3162_v45, %v2257_v46  ;;  %v2281_v59 = vsel %vm9_vm1, %v3166_v48, %v2277_v47 }
  0xcb   :  { %2059 = vrot.lane.b32.xlu0 %v2058_v53, %s3472_s14  ;;  %926 = vst.msk [vmem:[#allocation0 + $0x28] sm:$0x3] %vm924_vm8, %v923_v8   ;;  %928 = vst.msk [vmem:[#allocation0 + $0xe] sm:$0xc] %vm924_vm8, %v923_v8   ;;  %vm1028_vm13 = vcmask 687752   ;;  %s3479_s11 = smov 24   ;;  %v2223_v53 = vsel %vm13_vm2, %v3155_v42, %v2219_v41  ;;  %v2298_v62 = vsel %vm5_vm0, %v3169_v50, %v3168_v49 }
  0xcc   :  { %2121 = vrot.lane.b32.xlu1 %v2120_v6, %s3475_s4  ;;  %vm1048_vm14 = vcmask 679552   ;;  %v3172_v51 = vld [vmem:[%s5555_s0 + $0x6] sm:$0x1]   ;;  %v3163_v58 = vld [vmem:[%s5555_s0 + $0x184] sm:$0x8]   ;;  %s3480_s28 = smov 23  }
  0xcd   :  { %v903_v7 = vpop.permute.xlu0 %902   ;;  %v3173_v52 = vld [vmem:[%s5555_s0 + $0x105] sm:$0x2]   ;;  %v3167_v60 = vld [vmem:[%s5555_s0 + $0x159] sm:$0x8]   ;;  %v3170_v61 = vld [vmem:[%s5555_s0 + $0x2f] sm:$0x4]  }
  0xce   :  { %905 = vst.msk [vmem:[#allocation0] sm:$0x3] %vm904_vm7, %v903_v7   ;;  %907 = vst.msk [vmem:[#allocation0 + $0x16] sm:$0xc] %vm904_vm7, %v903_v7   ;;  %v965_v24 = vpop.permute.xlu1 %964   ;;  %v2319_v63 = vsel %vm5_vm0, %v3173_v52, %v3172_v51  ;;  %v3174_v0 = vld [vmem:[%s5555_s0 + $0x84] sm:$0x4]   ;;  %v2285_v6 = vsel %vm13_vm2, %v3167_v60, %v2281_v59  ;;  %v2302_v9 = vsel %vm9_vm1, %v3170_v61, %v2298_v62 }
  0xcf   :  { %2100 = vrot.lane.b32.xlu0 %v2099_v5, %s3474_s3  ;;  %967 = vst.msk [vmem:[#allocation0] sm:$0x3] %vm966_vm10, %v965_v24   ;;  %969 = vst.msk [vmem:[#allocation0 + $0x16] sm:$0xc] %vm966_vm10, %v965_v24   ;;  %v3176_v1 = vld [vmem:[%s5555_s0 + $0xdb] sm:$0x1]   ;;  %v2265_v5 = vsel %vm13_vm2, %v3163_v58, %v2261_v57  ;;  %v2323_v11 = vsel %vm9_vm1, %v3174_v0, %v2319_v63 }
  0xd0   :  { %2162 = vrot.lane.b32.xlu1 %v2161_v22, %s3477_s22  ;;  %v3177_v2 = vld [vmem:[%s5555_s0 + $0x1da] sm:$0x2]   ;;  %vm1069_vm15 = vcmask 671352   ;;  %s3481_s29 = smov 22   ;;  %vm1090_vm3 = vcmask 663152   ;;  %s3482_s17 = smov 21  }
  0xd1   :  { %v944_v23 = vpop.permute.xlu0 %943   ;;  %v3180_v3 = vld [vmem:[%s5555_s0 + $0xb0] sm:$0x1]   ;;  %v3171_v10 = vld [vmem:[%s5555_s0 + $0x12e] sm:$0x8]   ;;  %v3175_v12 = vld [vmem:[%s5555_s0 + $0x183] sm:$0x8]   ;;  %v2339_v14 = vsel %vm5_vm0, %v3177_v2, %v3176_v1 }
  0xd2   :  { %947 = vst.msk [vmem:[#allocation0 + $0x20] sm:$0x3] %vm945_vm9, %v944_v23   ;;  %949 = vst.msk [vmem:[#allocation0 + $0x6] sm:$0xc] %vm945_vm9, %v944_v23   ;;  %v1006_v40 = vpop.permute.xlu1 %1005   ;;  %v3181_v4 = vld [vmem:[%s5555_s0 + $0x1af] sm:$0x2]   ;;  %v2327_v22 = vsel %vm13_vm2, %v3175_v12, %v2323_v11 }
  0xd3   :  { %2142 = vrot.lane.b32.xlu0 %v2141_v21, %s3476_s21  ;;  %1009 = vst.msk [vmem:[#allocation0 + $0x20] sm:$0x3] %vm1007_vm12, %v1006_v40   ;;  %1011 = vst.msk [vmem:[#allocation0 + $0x6] sm:$0xc] %vm1007_vm12, %v1006_v40   ;;  %v3178_v13 = vld [vmem:[%s5555_s0 + $0x59] sm:$0x4]   ;;  %v2360_v15 = vsel %vm5_vm0, %v3181_v4, %v3180_v3  ;;  %v2306_v21 = vsel %vm13_vm2, %v3171_v10, %v2302_v9 }
  0xd4   :  { %2204 = vrot.lane.b32.xlu1 %v2203_v38, %s3479_s11  ;;  %v3182_v16 = vld [vmem:[%s5555_s0 + $0x2e] sm:$0x4]   ;;  %v3184_v17 = vld [vmem:[%s5555_s0 + $0x5] sm:$0x1]   ;;  %vm1110_vm4 = vcmask 654952   ;;  %s3483_s18 = smov 20   ;;  %v2343_v25 = vsel %vm9_vm1, %v3178_v13, %v2339_v14 }
  0xd5   :  { %v985_v39 = vpop.permute.xlu0 %984   ;;  %v3185_v18 = vld [vmem:[%s5555_s0 + $0x104] sm:$0x2]   ;;  %vm1131_vm5 = vcmask 646752   ;;  %v3188_v19 = vld [vmem:[%s5555_s0 + $0xda] sm:$0x1]   ;;  %v2364_v27 = vsel %vm9_vm1, %v3182_v16, %v2360_v15  ;;  %s3484_s6 = smov 19  }
  0xd6   :  { %988 = vst.msk [vmem:[#allocation0 + $0x28] sm:$0x3] %vm986_vm11, %v985_v39   ;;  %990 = vst.msk [vmem:[#allocation0 + $0xe] sm:$0xc] %vm986_vm11, %v985_v39   ;;  %v1047_v56 = vpop.permute.xlu1 %1046   ;;  %v3189_v20 = vld [vmem:[%s5555_s0 + $0x1d9] sm:$0x2]   ;;  %v2381_v30 = vsel %vm5_vm0, %v3185_v18, %v3184_v17 }
  0xd7   :  { %2183 = vrot.lane.b32.xlu0 %v2182_v37, %s3478_s10  ;;  %1050 = vst.msk [vmem:[#allocation0 + $0x28] sm:$0x3] %vm1048_vm14, %v1047_v56   ;;  %1052 = vst.msk [vmem:[#allocation0 + $0xe] sm:$0xc] %vm1048_vm14, %v1047_v56   ;;  %v3179_v26 = vld [vmem:[%s5555_s0 + $0x158] sm:$0x8]   ;;  %v2401_v31 = vsel %vm5_vm0, %v3189_v20, %v3188_v19 }
  0xd8   :  { %2245 = vrot.lane.b32.xlu1 %v2244_v54, %s3481_s29  ;;  %v3183_v28 = vld [vmem:[%s5555_s0 + $0x12d] sm:$0x8]   ;;  %v3186_v29 = vld [vmem:[%s5555_s0 + $0x83] sm:$0x4]   ;;  %v3190_v32 = vld [vmem:[%s5555_s0 + $0x58] sm:$0x4]   ;;  %v2347_v37 = vsel %vm13_vm2, %v3179_v26, %v2343_v25 }
  0xd9   :  { %v1027_v55 = vpop.permute.xlu0 %1026   ;;  %v3192_v33 = vld [vmem:[%s5555_s0 + $0xaf] sm:$0x1]   ;;  %vm1152_vm6 = vcmask 638552   ;;  %s3485_s7 = smov 18   ;;  %vm1172_vm7 = vcmask 630352   ;;  %v2368_v38 = vsel %vm13_vm2, %v3183_v28, %v2364_v27  ;;  %v2385_v41 = vsel %vm9_vm1, %v3186_v29, %v2381_v30  ;;  %s3486_s24 = smov 17  }
  0xda   :  { %1029 = vst.msk [vmem:[#allocation0] sm:$0x3] %vm1028_vm13, %v1027_v55   ;;  %1031 = vst.msk [vmem:[#allocation0 + $0x16] sm:$0xc] %vm1028_vm13, %v1027_v55   ;;  %v1089_v8 = vpop.permute.xlu1 %1088   ;;  %v3193_v34 = vld [vmem:[%s5555_s0 + $0x1ae] sm:$0x2]   ;;  %v2405_v43 = vsel %vm9_vm1, %v3190_v32, %v2401_v31 }
  0xdb   :  { %2224 = vrot.lane.b32.xlu0 %v2223_v53, %s3480_s28  ;;  %1091 = vst.msk [vmem:[#allocation0] sm:$0x3] %vm1090_vm3, %v1089_v8   ;;  %1093 = vst.msk [vmem:[#allocation0 + $0x16] sm:$0xc] %vm1090_vm3, %v1089_v8   ;;  %v3196_v35 = vld [vmem:[%s5555_s0 + $0x4] sm:$0x1]   ;;  %v2422_v46 = vsel %vm5_vm0, %v3193_v34, %v3192_v33 }
  0xdc   :  { %2286 = vrot.lane.b32.xlu1 %v2285_v6, %s3483_s18  ;;  %v3197_v36 = vld [vmem:[%s5555_s0 + $0x103] sm:$0x2]   ;;  %v3187_v42 = vld [vmem:[%s5555_s0 + $0x182] sm:$0x8]   ;;  %v3191_v44 = vld [vmem:[%s5555_s0 + $0x157] sm:$0x8]  }
  0xdd   :  { %v1068_v7 = vpop.permute.xlu0 %1067   ;;  %v3194_v45 = vld [vmem:[%s5555_s0 + $0x2d] sm:$0x4]   ;;  %v2443_v47 = vsel %vm5_vm0, %v3197_v36, %v3196_v35  ;;  %v3198_v48 = vld [vmem:[%s5555_s0 + $0x82] sm:$0x4]   ;;  %v3200_v49 = vld [vmem:[%s5555_s0 + $0xd9] sm:$0x1]   ;;  %v2389_v53 = vsel %vm13_vm2, %v3187_v42, %v2385_v41  ;;  %v2409_v54 = vsel %vm13_vm2, %v3191_v44, %v2405_v43 }
  0xde   :  { %1071 = vst.msk [vmem:[#allocation0 + $0x20] sm:$0x3] %vm1069_vm15, %v1068_v7   ;;  %1073 = vst.msk [vmem:[#allocation0 + $0x6] sm:$0xc] %vm1069_vm15, %v1068_v7   ;;  %v1130_v24 = vpop.permute.xlu1 %1129   ;;  %v3201_v50 = vld [vmem:[%s5555_s0 + $0x1d8] sm:$0x2]   ;;  %v2426_v57 = vsel %vm9_vm1, %v3194_v45, %v2422_v46  ;;  %v2447_v59 = vsel %vm9_vm1, %v3198_v48, %v2443_v47 }
  0xdf   :  { %2266 = vrot.lane.b32.xlu0 %v2265_v5, %s3482_s17  ;;  %1133 = vst.msk [vmem:[#allocation0 + $0x20] sm:$0x3] %vm1131_vm5, %v1130_v24   ;;  %1135 = vst.msk [vmem:[#allocation0 + $0x6] sm:$0xc] %vm1131_vm5, %v1130_v24   ;;  %vm1193_vm8 = vcmask 622152   ;;  %s3487_s25 = smov 16   ;;  %v2463_v62 = vsel %vm5_vm0, %v3201_v50, %v3200_v49 }
  0xe0   :  { %2328 = vrot.lane.b32.xlu1 %v2327_v22, %s3485_s7  ;;  %vm1214_vm9 = vcmask 613952   ;;  %v3204_v51 = vld [vmem:[%s5555_s0 + $0xae] sm:$0x1]   ;;  %v3195_v58 = vld [vmem:[%s5555_s0 + $0x12c] sm:$0x8]   ;;  %s3488_s13 = smov 15  }
  0xe1   :  { %v1109_v23 = vpop.permute.xlu0 %1108   ;;  %v3205_v52 = vld [vmem:[%s5555_s0 + $0x1ad] sm:$0x2]   ;;  %v3199_v60 = vld [vmem:[%s5555_s0 + $0x181] sm:$0x8]   ;;  %v3202_v61 = vld [vmem:[%s5555_s0 + $0x57] sm:$0x4]   ;;  %v2430_v5 = vsel %vm13_vm2, %v3195_v58, %v2426_v57 }
  0xe2   :  { %1112 = vst.msk [vmem:[#allocation0 + $0x28] sm:$0x3] %vm1110_vm4, %v1109_v23   ;;  %1114 = vst.msk [vmem:[#allocation0 + $0xe] sm:$0xc] %vm1110_vm4, %v1109_v23   ;;  %v1171_v40 = vpop.permute.xlu1 %1170   ;;  %v2484_v63 = vsel %vm5_vm0, %v3205_v52, %v3204_v51  ;;  %v3206_v0 = vld [vmem:[%s5555_s0 + $0x2c] sm:$0x4]   ;;  %v2451_v6 = vsel %vm13_vm2, %v3199_v60, %v2447_v59  ;;  %v2467_v9 = vsel %vm9_vm1, %v3202_v61, %v2463_v62 }
  0xe3   :  { %2307 = vrot.lane.b32.xlu0 %v2306_v21, %s3484_s6  ;;  %1174 = vst.msk [vmem:[#allocation0 + $0x28] sm:$0x3] %vm1172_vm7, %v1171_v40   ;;  %1176 = vst.msk [vmem:[#allocation0 + $0xe] sm:$0xc] %vm1172_vm7, %v1171_v40   ;;  %v3208_v1 = vld [vmem:[%s5555_s0 + $0x3] sm:$0x1]   ;;  %v2488_v11 = vsel %vm9_vm1, %v3206_v0, %v2484_v63 }
  0xe4   :  { %2369 = vrot.lane.b32.xlu1 %v2368_v38, %s3487_s25  ;;  %v3209_v2 = vld [vmem:[%s5555_s0 + $0x102] sm:$0x2]   ;;  %vm1234_vm10 = vcmask 605752   ;;  %s3489_s14 = smov 14   ;;  %vm1255_vm11 = vcmask 597552   ;;  %s3490_s2 = smov 13  }
  0xe5   :  { %v1151_v39 = vpop.permute.xlu0 %1150   ;;  %v3212_v3 = vld [vmem:[%s5555_s0 + $0xd8] sm:$0x1]   ;;  %v3203_v10 = vld [vmem:[%s5555_s0 + $0x156] sm:$0x8]   ;;  %v3207_v12 = vld [vmem:[%s5555_s0 + $0x12b] sm:$0x8]   ;;  %v2505_v14 = vsel %vm5_vm0, %v3209_v2, %v3208_v1 }
  0xe6   :  { %1153 = vst.msk [vmem:[#allocation0] sm:$0x3] %vm1152_vm6, %v1151_v39   ;;  %1155 = vst.msk [vmem:[#allocation0 + $0x16] sm:$0xc] %vm1152_vm6, %v1151_v39   ;;  %v1213_v56 = vpop.permute.xlu1 %1212   ;;  %v3213_v4 = vld [vmem:[%s5555_s0 + $0x1d7] sm:$0x2]   ;;  %v2471_v21 = vsel %vm13_vm2, %v3203_v10, %v2467_v9  ;;  %v2492_v22 = vsel %vm13_vm2, %v3207_v12, %v2488_v11 }
  0xe7   :  { %2348 = vrot.lane.b32.xlu0 %v2347_v37, %s3486_s24  ;;  %1215 = vst.msk [vmem:[#allocation0] sm:$0x3] %vm1214_vm9, %v1213_v56   ;;  %1217 = vst.msk [vmem:[#allocation0 + $0x16] sm:$0xc] %vm1214_vm9, %v1213_v56   ;;  %v3210_v13 = vld [vmem:[%s5555_s0 + $0x81] sm:$0x4]   ;;  %v2525_v15 = vsel %vm5_vm0, %v3213_v4, %v3212_v3 }
  0xe8   :  { %2410 = vrot.lane.b32.xlu1 %v2409_v54, %s3489_s14  ;;  %v3214_v16 = vld [vmem:[%s5555_s0 + $0x56] sm:$0x4]   ;;  %v3216_v17 = vld [vmem:[%s5555_s0 + $0xad] sm:$0x1]   ;;  %vm1276_vm12 = vcmask 589352   ;;  %s3491_s3 = smov 12   ;;  %v2509_v25 = vsel %vm9_vm1, %v3210_v13, %v2505_v14 }
  0xe9   :  { %v1192_v55 = vpop.permute.xlu0 %1191   ;;  %v3217_v18 = vld [vmem:[%s5555_s0 + $0x1ac] sm:$0x2]   ;;  %vm1296_vm13 = vcmask 581152   ;;  %v3220_v19 = vld [vmem:[%s5555_s0 + $0x2] sm:$0x1]   ;;  %v2529_v27 = vsel %vm9_vm1, %v3214_v16, %v2525_v15  ;;  %s3492_s20 = smov 11  }
  0xea   :  { %1195 = vst.msk [vmem:[#allocation0 + $0x20] sm:$0x3] %vm1193_vm8, %v1192_v55   ;;  %1197 = vst.msk [vmem:[#allocation0 + $0x6] sm:$0xc] %vm1193_vm8, %v1192_v55   ;;  %v1254_v8 = vpop.permute.xlu1 %1253   ;;  %v3221_v20 = vld [vmem:[%s5555_s0 + $0x101] sm:$0x2]   ;;  %v2546_v30 = vsel %vm5_vm0, %v3217_v18, %v3216_v17 }
  0xeb   :  { %2390 = vrot.lane.b32.xlu0 %v2389_v53, %s3488_s13  ;;  %1257 = vst.msk [vmem:[#allocation0 + $0x20] sm:$0x3] %vm1255_vm11, %v1254_v8   ;;  %1259 = vst.msk [vmem:[#allocation0 + $0x6] sm:$0xc] %vm1255_vm11, %v1254_v8   ;;  %v3211_v26 = vld [vmem:[%s5555_s0 + $0x180] sm:$0x8]   ;;  %v2567_v31 = vsel %vm5_vm0, %v3221_v20, %v3220_v19 }
  0xec   :  { %2452 = vrot.lane.b32.xlu1 %v2451_v6, %s3491_s3  ;;  %v3215_v28 = vld [vmem:[%s5555_s0 + $0x155] sm:$0x8]   ;;  %v3218_v29 = vld [vmem:[%s5555_s0 + $0x2b] sm:$0x4]   ;;  %v3222_v32 = vld [vmem:[%s5555_s0 + $0x80] sm:$0x4]   ;;  %v2513_v37 = vsel %vm13_vm2, %v3211_v26, %v2509_v25 }
  0xed   :  { %v1233_v7 = vpop.permute.xlu0 %1232   ;;  %v3224_v33 = vld [vmem:[%s5555_s0 + $0xd7] sm:$0x1]   ;;  %vm1317_vm14 = vcmask 572952   ;;  %s3493_s21 = smov 10   ;;  %vm1338_vm15 = vcmask 564752   ;;  %v2533_v38 = vsel %vm13_vm2, %v3215_v28, %v2529_v27  ;;  %v2550_v41 = vsel %vm9_vm1, %v3218_v29, %v2546_v30  ;;  %s3494_s9 = smov 9  }
  0xee   :  { %1236 = vst.msk [vmem:[#allocation0 + $0x28] sm:$0x3] %vm1234_vm10, %v1233_v7   ;;  %1238 = vst.msk [vmem:[#allocation0 + $0xe] sm:$0xc] %vm1234_vm10, %v1233_v7   ;;  %v1295_v24 = vpop.permute.xlu1 %1294   ;;  %v3225_v34 = vld [vmem:[%s5555_s0 + $0x1d6] sm:$0x2]   ;;  %v2571_v43 = vsel %vm9_vm1, %v3222_v32, %v2567_v31 }
  0xef   :  { %2431 = vrot.lane.b32.xlu0 %v2430_v5, %s3490_s2  ;;  %1298 = vst.msk [vmem:[#allocation0 + $0x28] sm:$0x3] %vm1296_vm13, %v1295_v24   ;;  %1300 = vst.msk [vmem:[#allocation0 + $0xe] sm:$0xc] %vm1296_vm13, %v1295_v24   ;;  %v3228_v35 = vld [vmem:[%s5555_s0 + $0xac] sm:$0x1]   ;;  %v2587_v46 = vsel %vm5_vm0, %v3225_v34, %v3224_v33 }
  0xf0   :  { %2493 = vrot.lane.b32.xlu1 %v2492_v22, %s3493_s21  ;;  %v3229_v36 = vld [vmem:[%s5555_s0 + $0x1ab] sm:$0x2]   ;;  %v3219_v42 = vld [vmem:[%s5555_s0 + $0x12a] sm:$0x8]   ;;  %v3223_v44 = vld [vmem:[%s5555_s0 + $0x17f] sm:$0x8]  }
  0xf1   :  { %v1275_v23 = vpop.permute.xlu0 %1274   ;;  %v3226_v45 = vld [vmem:[%s5555_s0 + $0x55] sm:$0x4]   ;;  %v2608_v47 = vsel %vm5_vm0, %v3229_v36, %v3228_v35  ;;  %v3230_v48 = vld [vmem:[%s5555_s0 + $0x2a] sm:$0x4]   ;;  %v3232_v49 = vld [vmem:[%s5555_s0 + $0x1] sm:$0x1]   ;;  %v2554_v53 = vsel %vm13_vm2, %v3219_v42, %v2550_v41  ;;  %v2575_v54 = vsel %vm13_vm2, %v3223_v44, %v2571_v43 }
  0xf2   :  { %1277 = vst.msk [vmem:[#allocation0] sm:$0x3] %vm1276_vm12, %v1275_v23   ;;  %1279 = vst.msk [vmem:[#allocation0 + $0x16] sm:$0xc] %vm1276_vm12, %v1275_v23   ;;  %v1337_v40 = vpop.permute.xlu1 %1336   ;;  %v3233_v50 = vld [vmem:[%s5555_s0 + $0x100] sm:$0x2]   ;;  %v2591_v57 = vsel %vm9_vm1, %v3226_v45, %v2587_v46  ;;  %v2612_v59 = vsel %vm9_vm1, %v3230_v48, %v2608_v47 }
  0xf3   :  { %2472 = vrot.lane.b32.xlu0 %v2471_v21, %s3492_s20  ;;  %1339 = vst.msk [vmem:[#allocation0] sm:$0x3] %vm1338_vm15, %v1337_v40   ;;  %1341 = vst.msk [vmem:[#allocation0 + $0x16] sm:$0xc] %vm1338_vm15, %v1337_v40   ;;  %vm1358_vm3 = vcmask 556552   ;;  %s3495_s10 = smov 8   ;;  %v2629_v61 = vsel %vm5_vm0, %v3233_v50, %v3232_v49 }
  0xf4   :  { %2534 = vrot.lane.b32.xlu1 %v2533_v38, %s3495_s10  ;;  %vm1379_vm4 = vcmask 548352   ;;  %v3236_v51 = vld [vmem:[%s5555_s0 + $0xd6] sm:$0x1]   ;;  %v3227_v58 = vld [vmem:[%s5555_s0 + $0x154] sm:$0x8]   ;;  %s3496_s23 = smov 7  }
  0xf5   :  { %v1316_v39 = vpop.permute.xlu0 %1315   ;;  %v3237_v52 = vld [vmem:[%s5555_s0 + $0x1d5] sm:$0x2]   ;;  %v3231_v60 = vld [vmem:[%s5555_s0 + $0x129] sm:$0x8]   ;;  %v3234_v62 = vld [vmem:[%s5555_s0 + $0x7f] sm:$0x4]   ;;  %v2595_v3 = vsel %vm13_vm2, %v3227_v58, %v2591_v57 }
  0xf6   :  { %1319 = vst.msk [vmem:[#allocation0 + $0x20] sm:$0x3] %vm1317_vm14, %v1316_v39   ;;  %1321 = vst.msk [vmem:[#allocation0 + $0x6] sm:$0xc] %vm1317_vm14, %v1316_v39   ;;  %v1378_v56 = vpop.permute.xlu1 %1377   ;;  %v2649_v63 = vsel %vm5_vm0, %v3237_v52, %v3236_v51  ;;  %v3238_v0 = vld [vmem:[%s5555_s0 + $0x54] sm:$0x4]   ;;  %v2616_v4 = vsel %vm13_vm2, %v3231_v60, %v2612_v59  ;;  %v2633_v7 = vsel %vm9_vm1, %v3234_v62, %v2629_v61 }
  0xf7   :  { %2514 = vrot.lane.b32.xlu0 %v2513_v37, %s3494_s9  ;;  %1381 = vst.msk [vmem:[#allocation0 + $0x20] sm:$0x3] %vm1379_vm4, %v1378_v56   ;;  %1383 = vst.msk [vmem:[#allocation0 + $0x6] sm:$0xc] %vm1379_vm4, %v1378_v56   ;;  %vm1400_vm5 = vcmask 540152   ;;  %s3497_s24 = smov 6   ;;  %v2653_v9 = vsel %vm9_vm1, %v3238_v0, %v2649_v63 }
  0xf8   :  { %2576 = vrot.lane.b32.xlu1 %v2575_v54, %s3497_s24  ;;  %vm1420_vm6 = vcmask 531952   ;;  %v3240_v1 = vld [vmem:[%s5555_s0 + $0xab] sm:$0x1]   ;;  %v3235_v8 = vld [vmem:[%s5555_s0 + $0x17e] sm:$0x8]   ;;  %s3498_s6 = smov 5  }
  0xf9   :  { %v1357_v55 = vpop.permute.xlu0 %1356   ;;  %v3241_v2 = vld [vmem:[%s5555_s0 + $0x1aa] sm:$0x2]   ;;  %v3239_v10 = vld [vmem:[%s5555_s0 + $0x153] sm:$0x8]   ;;  %s3499_s7 = smov 4   ;;  %vm1462_vm7 = vcmask 515552   ;;  %v2637_v13 = vsel %vm13_vm2, %v3235_v8, %v2633_v7 }
  0xfa   :  { %1360 = vst.msk [vmem:[#allocation0 + $0x28] sm:$0x3] %vm1358_vm3, %v1357_v55   ;;  %1362 = vst.msk [vmem:[#allocation0 + $0xe] sm:$0xc] %vm1358_vm3, %v1357_v55   ;;  %v1419_v6 = vpop.permute.xlu1 %1418   ;;  %v2670_v11 = vsel %vm5_vm0, %v3241_v2, %v3240_v1  ;;  %v3242_v12 = vld [vmem:[%s5555_s0 + $0x29] sm:$0x4]   ;;  %v2657_v14 = vsel %vm13_vm2, %v3239_v10, %v2653_v9 }
  0xfb   :  { %2555 = vrot.lane.b32.xlu0 %v2554_v53, %s3496_s23  ;;  %1422 = vst.msk [vmem:[#allocation0 + $0x28] sm:$0x3] %vm1420_vm6, %v1419_v6   ;;  %1424 = vst.msk [vmem:[#allocation0 + $0xe] sm:$0xc] %vm1420_vm6, %v1419_v6   ;;  %vm1441_vm0 = vcmask 523752   ;;  %v2674_v17 = vsel %vm9_vm1, %v3242_v12, %v2670_v11  ;;  %vm1482_vm1 = vcmask 507352  }
  0xfc   :  { %2617 = vrot.lane.b32.xlu1 %v2616_v4, %s3499_s7  ;;  %v3243_v18 = vld [vmem:[%s5555_s0 + $0x128] sm:$0x8]   ;;  %s3500_s0 = smov 3   ;;  %s3501_s10 = smov 2   ;;  %vm1503_vm8 = vcmask 499152   ;;  %vm1544_vm9 = vcmask 482752  }
  0xfd   :  { %v1399_v5 = vpop.permute.xlu0 %1398   ;;  %v2678_v19 = vsel %vm13_vm2, %v3243_v18, %v2674_v17  ;;  %s3502_s11 = smov 1   ;;  %vm1524_vm2 = vcmask 490952   ;;  %vm1565_vm10 = vcmask 474552   ;;  %vm1586_vm11 = vcmask 466352  }
  0xfe   :  { %1401 = vst.msk [vmem:[#allocation0] sm:$0x3] %vm1400_vm5, %v1399_v5   ;;  %1403 = vst.msk [vmem:[#allocation0 + $0x16] sm:$0xc] %vm1400_vm5, %v1399_v5   ;;  %v1461_v16 = vpop.permute.xlu1 %1460   ;;  %vm1606_vm12 = vcmask 458152   ;;  %vm1627_vm13 = vcmask 449952  }
  0xff   :  { %2596 = vrot.lane.b32.xlu0 %v2595_v3, %s3498_s6  ;;  %1463 = vst.msk [vmem:[#allocation0] sm:$0x3] %vm1462_vm7, %v1461_v16   ;;  %1465 = vst.msk [vmem:[#allocation0 + $0x16] sm:$0xc] %vm1462_vm7, %v1461_v16   ;;  %vm1648_vm14 = vcmask 441752   ;;  %vm1668_vm15 = vcmask 433552  }
 0x100   :  { %2658 = vrot.lane.b32.xlu1 %v2657_v14, %s3501_s10  ;;  %vm1689_vm3 = vcmask 425352   ;;  %vm1710_vm4 = vcmask 417152   ;;  %vm1730_vm5 = vcmask 408952   ;;  %vm1751_vm6 = vcmask 400752  }
 0x101   :  { %v1440_v15 = vpop.permute.xlu0 %1439   ;;  %vm1792_vm7 = vcmask 384352  }
 0x102   :  { %1443 = vst.msk [vmem:[#allocation0 + $0x20] sm:$0x3] %vm1441_vm0, %v1440_v15   ;;  %1445 = vst.msk [vmem:[#allocation0 + $0x6] sm:$0xc] %vm1441_vm0, %v1440_v15   ;;  %v1502_v21 = vpop.permute.xlu1 %1501   ;;  %vm1772_vm0 = vcmask 392552  }
 0x103   :  { %2638 = vrot.lane.b32.xlu0 %v2637_v13, %s3500_s0  ;;  %1505 = vst.msk [vmem:[#allocation0 + $0x20] sm:$0x3] %vm1503_vm8, %v1502_v21   ;;  %1507 = vst.msk [vmem:[#allocation0 + $0x6] sm:$0xc] %vm1503_vm8, %v1502_v21   ;;  %vm1834_vm8 = vcmask 367952  }
 0x105   :  { %v1481_v20 = vpop.permute.xlu0 %1480  }
 0x106   :  { %1484 = vst.msk [vmem:[#allocation0 + $0x28] sm:$0x3] %vm1482_vm1, %v1481_v20   ;;  %1486 = vst.msk [vmem:[#allocation0 + $0xe] sm:$0xc] %vm1482_vm1, %v1481_v20   ;;  %v1543_v23 = vpop.permute.xlu1 %1542   ;;  %vm1813_vm1 = vcmask 376152  }
 0x107   :  { %2679 = vrot.lane.b32.xlu0 %v2678_v19, %s3502_s11  ;;  %1546 = vst.msk [vmem:[#allocation0 + $0x28] sm:$0x3] %vm1544_vm9, %v1543_v23   ;;  %1548 = vst.msk [vmem:[#allocation0 + $0xe] sm:$0xc] %vm1544_vm9, %v1543_v23   ;;  %vm1875_vm9 = vcmask 351552  }
 0x109   :  { %v1523_v22 = vpop.permute.xlu0 %1522  }
 0x10a   :  { %1525 = vst.msk [vmem:[#allocation0] sm:$0x3] %vm1524_vm2, %v1523_v22   ;;  %1527 = vst.msk [vmem:[#allocation0 + $0x16] sm:$0xc] %vm1524_vm2, %v1523_v22   ;;  %v1585_v25 = vpop.permute.xlu1 %1584   ;;  %vm1854_vm2 = vcmask 359752  }
 0x10b   :  { %1587 = vst.msk [vmem:[#allocation0] sm:$0x3] %vm1586_vm11, %v1585_v25   ;;  %1589 = vst.msk [vmem:[#allocation0 + $0x16] sm:$0xc] %vm1586_vm11, %v1585_v25   ;;  %vm1916_vm11 = vcmask 335152  }
 0x10d   :  { %v1564_v24 = vpop.permute.xlu0 %1563  }
 0x10e   :  { %1567 = vst.msk [vmem:[#allocation0 + $0x20] sm:$0x3] %vm1565_vm10, %v1564_v24   ;;  %1569 = vst.msk [vmem:[#allocation0 + $0x6] sm:$0xc] %vm1565_vm10, %v1564_v24   ;;  %v1626_v27 = vpop.permute.xlu1 %1625   ;;  %vm1896_vm10 = vcmask 343352  }
 0x10f   :  { %1629 = vst.msk [vmem:[#allocation0 + $0x20] sm:$0x3] %vm1627_vm13, %v1626_v27   ;;  %1631 = vst.msk [vmem:[#allocation0 + $0x6] sm:$0xc] %vm1627_vm13, %v1626_v27   ;;  %vm1958_vm13 = vcmask 318752  }
 0x111   :  { %v1605_v26 = vpop.permute.xlu0 %1604  }
 0x112   :  { %1608 = vst.msk [vmem:[#allocation0 + $0x28] sm:$0x3] %vm1606_vm12, %v1605_v26   ;;  %1610 = vst.msk [vmem:[#allocation0 + $0xe] sm:$0xc] %vm1606_vm12, %v1605_v26   ;;  %v1667_v29 = vpop.permute.xlu1 %1666   ;;  %vm1937_vm12 = vcmask 326952  }
 0x113   :  { %1670 = vst.msk [vmem:[#allocation0 + $0x28] sm:$0x3] %vm1668_vm15, %v1667_v29   ;;  %1672 = vst.msk [vmem:[#allocation0 + $0xe] sm:$0xc] %vm1668_vm15, %v1667_v29   ;;  %vm1999_vm15 = vcmask 302352  }
 0x115   :  { %v1647_v28 = vpop.permute.xlu0 %1646  }
 0x116   :  { %1649 = vst.msk [vmem:[#allocation0] sm:$0x3] %vm1648_vm14, %v1647_v28   ;;  %1651 = vst.msk [vmem:[#allocation0 + $0x16] sm:$0xc] %vm1648_vm14, %v1647_v28   ;;  %v1709_v31 = vpop.permute.xlu1 %1708   ;;  %vm1978_vm14 = vcmask 310552  }
 0x117   :  { %1711 = vst.msk [vmem:[#allocation0] sm:$0x3] %vm1710_vm4, %v1709_v31   ;;  %1713 = vst.msk [vmem:[#allocation0 + $0x16] sm:$0xc] %vm1710_vm4, %v1709_v31   ;;  %vm2040_vm4 = vcmask 285952  }
 0x119   :  { %v1688_v30 = vpop.permute.xlu0 %1687  }
 0x11a   :  { %1691 = vst.msk [vmem:[#allocation0 + $0x20] sm:$0x3] %vm1689_vm3, %v1688_v30   ;;  %1693 = vst.msk [vmem:[#allocation0 + $0x6] sm:$0xc] %vm1689_vm3, %v1688_v30   ;;  %v1750_v33 = vpop.permute.xlu1 %1749   ;;  %vm2020_vm3 = vcmask 294152  }
 0x11b   :  { %1753 = vst.msk [vmem:[#allocation0 + $0x20] sm:$0x3] %vm1751_vm6, %v1750_v33   ;;  %1755 = vst.msk [vmem:[#allocation0 + $0x6] sm:$0xc] %vm1751_vm6, %v1750_v33   ;;  %vm2082_vm6 = vcmask 269552  }
 0x11d   :  { %v1729_v32 = vpop.permute.xlu0 %1728  }
 0x11e   :  { %1732 = vst.msk [vmem:[#allocation0 + $0x28] sm:$0x3] %vm1730_vm5, %v1729_v32   ;;  %1734 = vst.msk [vmem:[#allocation0 + $0xe] sm:$0xc] %vm1730_vm5, %v1729_v32   ;;  %v1791_v35 = vpop.permute.xlu1 %1790   ;;  %vm2061_vm5 = vcmask 277752  }
 0x11f   :  { %1794 = vst.msk [vmem:[#allocation0 + $0x28] sm:$0x3] %vm1792_vm7, %v1791_v35   ;;  %1796 = vst.msk [vmem:[#allocation0 + $0xe] sm:$0xc] %vm1792_vm7, %v1791_v35   ;;  %vm2123_vm7 = vcmask 253152  }
 0x121   :  { %v1771_v34 = vpop.permute.xlu0 %1770  }
 0x122   :  { %1773 = vst.msk [vmem:[#allocation0] sm:$0x3] %vm1772_vm0, %v1771_v34   ;;  %1775 = vst.msk [vmem:[#allocation0 + $0x16] sm:$0xc] %vm1772_vm0, %v1771_v34   ;;  %v1833_v37 = vpop.permute.xlu1 %1832   ;;  %vm2102_vm0 = vcmask 261352  }
 0x123   :  { %1835 = vst.msk [vmem:[#allocation0] sm:$0x3] %vm1834_vm8, %v1833_v37   ;;  %1837 = vst.msk [vmem:[#allocation0 + $0x16] sm:$0xc] %vm1834_vm8, %v1833_v37   ;;  %vm2164_vm8 = vcmask 236752  }
 0x125   :  { %v1812_v36 = vpop.permute.xlu0 %1811  }
 0x126   :  { %1815 = vst.msk [vmem:[#allocation0 + $0x20] sm:$0x3] %vm1813_vm1, %v1812_v36   ;;  %1817 = vst.msk [vmem:[#allocation0 + $0x6] sm:$0xc] %vm1813_vm1, %v1812_v36   ;;  %v1874_v39 = vpop.permute.xlu1 %1873   ;;  %vm2144_vm1 = vcmask 244952  }
 0x127   :  { %1877 = vst.msk [vmem:[#allocation0 + $0x20] sm:$0x3] %vm1875_vm9, %v1874_v39   ;;  %1879 = vst.msk [vmem:[#allocation0 + $0x6] sm:$0xc] %vm1875_vm9, %v1874_v39   ;;  %vm2206_vm9 = vcmask 220352  }
 0x129   :  { %v1853_v38 = vpop.permute.xlu0 %1852  }
 0x12a   :  { %1856 = vst.msk [vmem:[#allocation0 + $0x28] sm:$0x3] %vm1854_vm2, %v1853_v38   ;;  %1858 = vst.msk [vmem:[#allocation0 + $0xe] sm:$0xc] %vm1854_vm2, %v1853_v38   ;;  %v1915_v41 = vpop.permute.xlu1 %1914   ;;  %vm2185_vm2 = vcmask 228552  }
 0x12b   :  { %1918 = vst.msk [vmem:[#allocation0 + $0x28] sm:$0x3] %vm1916_vm11, %v1915_v41   ;;  %1920 = vst.msk [vmem:[#allocation0 + $0xe] sm:$0xc] %vm1916_vm11, %v1915_v41   ;;  %vm2247_vm11 = vcmask 203952  }
 0x12d   :  { %v1895_v40 = vpop.permute.xlu0 %1894  }
 0x12e   :  { %1897 = vst.msk [vmem:[#allocation0] sm:$0x3] %vm1896_vm10, %v1895_v40   ;;  %1899 = vst.msk [vmem:[#allocation0 + $0x16] sm:$0xc] %vm1896_vm10, %v1895_v40   ;;  %v1957_v43 = vpop.permute.xlu1 %1956   ;;  %vm2226_vm10 = vcmask 212152  }
 0x12f   :  { %1959 = vst.msk [vmem:[#allocation0] sm:$0x3] %vm1958_vm13, %v1957_v43   ;;  %1961 = vst.msk [vmem:[#allocation0 + $0x16] sm:$0xc] %vm1958_vm13, %v1957_v43   ;;  %vm2288_vm13 = vcmask 187552  }
 0x131   :  { %v1936_v42 = vpop.permute.xlu0 %1935  }
 0x132   :  { %1939 = vst.msk [vmem:[#allocation0 + $0x20] sm:$0x3] %vm1937_vm12, %v1936_v42   ;;  %1941 = vst.msk [vmem:[#allocation0 + $0x6] sm:$0xc] %vm1937_vm12, %v1936_v42   ;;  %v1998_v45 = vpop.permute.xlu1 %1997   ;;  %vm2268_vm12 = vcmask 195752  }
 0x133   :  { %2001 = vst.msk [vmem:[#allocation0 + $0x20] sm:$0x3] %vm1999_vm15, %v1998_v45   ;;  %2003 = vst.msk [vmem:[#allocation0 + $0x6] sm:$0xc] %vm1999_vm15, %v1998_v45   ;;  %vm2330_vm15 = vcmask 171152  }
 0x135   :  { %v1977_v44 = vpop.permute.xlu0 %1976  }
 0x136   :  { %1980 = vst.msk [vmem:[#allocation0 + $0x28] sm:$0x3] %vm1978_vm14, %v1977_v44   ;;  %1982 = vst.msk [vmem:[#allocation0 + $0xe] sm:$0xc] %vm1978_vm14, %v1977_v44   ;;  %v2039_v47 = vpop.permute.xlu1 %2038   ;;  %vm2309_vm14 = vcmask 179352  }
 0x137   :  { %2042 = vst.msk [vmem:[#allocation0 + $0x28] sm:$0x3] %vm2040_vm4, %v2039_v47   ;;  %2044 = vst.msk [vmem:[#allocation0 + $0xe] sm:$0xc] %vm2040_vm4, %v2039_v47   ;;  %vm2371_vm4 = vcmask 154752  }
 0x139   :  { %v2019_v46 = vpop.permute.xlu0 %2018  }
 0x13a   :  { %2021 = vst.msk [vmem:[#allocation0] sm:$0x3] %vm2020_vm3, %v2019_v46   ;;  %2023 = vst.msk [vmem:[#allocation0 + $0x16] sm:$0xc] %vm2020_vm3, %v2019_v46   ;;  %v2081_v49 = vpop.permute.xlu1 %2080   ;;  %vm2350_vm3 = vcmask 162952  }
 0x13b   :  { %2083 = vst.msk [vmem:[#allocation0] sm:$0x3] %vm2082_vm6, %v2081_v49   ;;  %2085 = vst.msk [vmem:[#allocation0 + $0x16] sm:$0xc] %vm2082_vm6, %v2081_v49   ;;  %vm2412_vm6 = vcmask 138352  }
 0x13d   :  { %v2060_v48 = vpop.permute.xlu0 %2059  }
 0x13e   :  { %2063 = vst.msk [vmem:[#allocation0 + $0x20] sm:$0x3] %vm2061_vm5, %v2060_v48   ;;  %2065 = vst.msk [vmem:[#allocation0 + $0x6] sm:$0xc] %vm2061_vm5, %v2060_v48   ;;  %v2122_v51 = vpop.permute.xlu1 %2121   ;;  %vm2392_vm5 = vcmask 146552  }
 0x13f   :  { %2125 = vst.msk [vmem:[#allocation0 + $0x20] sm:$0x3] %vm2123_vm7, %v2122_v51   ;;  %2127 = vst.msk [vmem:[#allocation0 + $0x6] sm:$0xc] %vm2123_vm7, %v2122_v51   ;;  %vm2454_vm7 = vcmask 121952  }
 0x141   :  { %v2101_v50 = vpop.permute.xlu0 %2100  }
 0x142   :  { %2104 = vst.msk [vmem:[#allocation0 + $0x28] sm:$0x3] %vm2102_vm0, %v2101_v50   ;;  %2106 = vst.msk [vmem:[#allocation0 + $0xe] sm:$0xc] %vm2102_vm0, %v2101_v50   ;;  %v2163_v53 = vpop.permute.xlu1 %2162   ;;  %vm2433_vm0 = vcmask 130152  }
 0x143   :  { %2166 = vst.msk [vmem:[#allocation0 + $0x28] sm:$0x3] %vm2164_vm8, %v2163_v53   ;;  %2168 = vst.msk [vmem:[#allocation0 + $0xe] sm:$0xc] %vm2164_vm8, %v2163_v53   ;;  %vm2495_vm8 = vcmask 105552  }
 0x145   :  { %v2143_v52 = vpop.permute.xlu0 %2142  }
 0x146   :  { %2145 = vst.msk [vmem:[#allocation0] sm:$0x3] %vm2144_vm1, %v2143_v52   ;;  %2147 = vst.msk [vmem:[#allocation0 + $0x16] sm:$0xc] %vm2144_vm1, %v2143_v52   ;;  %v2205_v55 = vpop.permute.xlu1 %2204   ;;  %vm2474_vm1 = vcmask 113752  }
 0x147   :  { %2207 = vst.msk [vmem:[#allocation0] sm:$0x3] %vm2206_vm9, %v2205_v55   ;;  %2209 = vst.msk [vmem:[#allocation0 + $0x16] sm:$0xc] %vm2206_vm9, %v2205_v55   ;;  %vm2536_vm9 = vcmask 89152  }
 0x149   :  { %v2184_v54 = vpop.permute.xlu0 %2183  }
 0x14a   :  { %2187 = vst.msk [vmem:[#allocation0 + $0x20] sm:$0x3] %vm2185_vm2, %v2184_v54   ;;  %2189 = vst.msk [vmem:[#allocation0 + $0x6] sm:$0xc] %vm2185_vm2, %v2184_v54   ;;  %v2246_v57 = vpop.permute.xlu1 %2245   ;;  %vm2516_vm2 = vcmask 97352  }
 0x14b   :  { %2249 = vst.msk [vmem:[#allocation0 + $0x20] sm:$0x3] %vm2247_vm11, %v2246_v57   ;;  %2251 = vst.msk [vmem:[#allocation0 + $0x6] sm:$0xc] %vm2247_vm11, %v2246_v57   ;;  %vm2578_vm11 = vcmask 72752  }
 0x14d   :  { %v2225_v56 = vpop.permute.xlu0 %2224  }
 0x14e   :  { %2228 = vst.msk [vmem:[#allocation0 + $0x28] sm:$0x3] %vm2226_vm10, %v2225_v56   ;;  %2230 = vst.msk [vmem:[#allocation0 + $0xe] sm:$0xc] %vm2226_vm10, %v2225_v56   ;;  %v2287_v59 = vpop.permute.xlu1 %2286   ;;  %vm2557_vm10 = vcmask 80952  }
 0x14f   :  { %2290 = vst.msk [vmem:[#allocation0 + $0x28] sm:$0x3] %vm2288_vm13, %v2287_v59   ;;  %2292 = vst.msk [vmem:[#allocation0 + $0xe] sm:$0xc] %vm2288_vm13, %v2287_v59   ;;  %vm2619_vm13 = vcmask 56352  }
 0x151   :  { %v2267_v58 = vpop.permute.xlu0 %2266  }
 0x152   :  { %2269 = vst.msk [vmem:[#allocation0] sm:$0x3] %vm2268_vm12, %v2267_v58   ;;  %2271 = vst.msk [vmem:[#allocation0 + $0x16] sm:$0xc] %vm2268_vm12, %v2267_v58   ;;  %v2329_v61 = vpop.permute.xlu1 %2328   ;;  %vm2598_vm12 = vcmask 64552  }
 0x153   :  { %2331 = vst.msk [vmem:[#allocation0] sm:$0x3] %vm2330_vm15, %v2329_v61   ;;  %2333 = vst.msk [vmem:[#allocation0 + $0x16] sm:$0xc] %vm2330_vm15, %v2329_v61   ;;  %vm2660_vm15 = vcmask 39952  }
 0x155   :  { %v2308_v60 = vpop.permute.xlu0 %2307  }
 0x156   :  { %2311 = vst.msk [vmem:[#allocation0 + $0x20] sm:$0x3] %vm2309_vm14, %v2308_v60   ;;  %2313 = vst.msk [vmem:[#allocation0 + $0x6] sm:$0xc] %vm2309_vm14, %v2308_v60   ;;  %v2370_v63 = vpop.permute.xlu1 %2369   ;;  %vm2640_vm14 = vcmask 48152  }
 0x157   :  { %2373 = vst.msk [vmem:[#allocation0 + $0x20] sm:$0x3] %vm2371_vm4, %v2370_v63   ;;  %2375 = vst.msk [vmem:[#allocation0 + $0x6] sm:$0xc] %vm2371_vm4, %v2370_v63  }
 0x159   :  { %v2349_v62 = vpop.permute.xlu0 %2348  }
 0x15a   :  { %2352 = vst.msk [vmem:[#allocation0 + $0x28] sm:$0x3] %vm2350_vm3, %v2349_v62   ;;  %2354 = vst.msk [vmem:[#allocation0 + $0xe] sm:$0xc] %vm2350_vm3, %v2349_v62   ;;  %v2411_v1 = vpop.permute.xlu1 %2410   ;;  %vm2681_vm3 = vcmask 31752  }
 0x15b   :  { %2414 = vst.msk [vmem:[#allocation0 + $0x28] sm:$0x3] %vm2412_vm6, %v2411_v1   ;;  %2416 = vst.msk [vmem:[#allocation0 + $0xe] sm:$0xc] %vm2412_vm6, %v2411_v1  }
 0x15d   :  { %v2391_v0 = vpop.permute.xlu0 %2390  }
 0x15e   :  { %2393 = vst.msk [vmem:[#allocation0] sm:$0x3] %vm2392_vm5, %v2391_v0   ;;  %2395 = vst.msk [vmem:[#allocation0 + $0x16] sm:$0xc] %vm2392_vm5, %v2391_v0   ;;  %v2453_v3 = vpop.permute.xlu1 %2452  }
 0x15f   :  { %2455 = vst.msk [vmem:[#allocation0] sm:$0x3] %vm2454_vm7, %v2453_v3   ;;  %2457 = vst.msk [vmem:[#allocation0 + $0x16] sm:$0xc] %vm2454_vm7, %v2453_v3  }
 0x161   :  { %v2432_v2 = vpop.permute.xlu0 %2431  }
 0x162   :  { %2435 = vst.msk [vmem:[#allocation0 + $0x20] sm:$0x3] %vm2433_vm0, %v2432_v2   ;;  %2437 = vst.msk [vmem:[#allocation0 + $0x6] sm:$0xc] %vm2433_vm0, %v2432_v2   ;;  %v2494_v5 = vpop.permute.xlu1 %2493  }
 0x163   :  { %2497 = vst.msk [vmem:[#allocation0 + $0x20] sm:$0x3] %vm2495_vm8, %v2494_v5   ;;  %2499 = vst.msk [vmem:[#allocation0 + $0x6] sm:$0xc] %vm2495_vm8, %v2494_v5  }
 0x165   :  { %v2473_v4 = vpop.permute.xlu0 %2472  }
 0x166   :  { %2476 = vst.msk [vmem:[#allocation0 + $0x28] sm:$0x3] %vm2474_vm1, %v2473_v4   ;;  %2478 = vst.msk [vmem:[#allocation0 + $0xe] sm:$0xc] %vm2474_vm1, %v2473_v4   ;;  %v2535_v7 = vpop.permute.xlu1 %2534  }
 0x167   :  { %2538 = vst.msk [vmem:[#allocation0 + $0x28] sm:$0x3] %vm2536_vm9, %v2535_v7   ;;  %2540 = vst.msk [vmem:[#allocation0 + $0xe] sm:$0xc] %vm2536_vm9, %v2535_v7  }
 0x169   :  { %v2515_v6 = vpop.permute.xlu0 %2514  }
 0x16a   :  { %2517 = vst.msk [vmem:[#allocation0] sm:$0x3] %vm2516_vm2, %v2515_v6   ;;  %2519 = vst.msk [vmem:[#allocation0 + $0x16] sm:$0xc] %vm2516_vm2, %v2515_v6   ;;  %v2577_v9 = vpop.permute.xlu1 %2576  }
 0x16b   :  { %2579 = vst.msk [vmem:[#allocation0] sm:$0x3] %vm2578_vm11, %v2577_v9   ;;  %2581 = vst.msk [vmem:[#allocation0 + $0x16] sm:$0xc] %vm2578_vm11, %v2577_v9  }
 0x16d   :  { %v2556_v8 = vpop.permute.xlu0 %2555  }
 0x16e   :  { %2559 = vst.msk [vmem:[#allocation0 + $0x20] sm:$0x3] %vm2557_vm10, %v2556_v8   ;;  %2561 = vst.msk [vmem:[#allocation0 + $0x6] sm:$0xc] %vm2557_vm10, %v2556_v8   ;;  %v2618_v11 = vpop.permute.xlu1 %2617  }
 0x16f   :  { %2621 = vst.msk [vmem:[#allocation0 + $0x20] sm:$0x3] %vm2619_vm13, %v2618_v11   ;;  %2623 = vst.msk [vmem:[#allocation0 + $0x6] sm:$0xc] %vm2619_vm13, %v2618_v11  }
 0x171   :  { %v2597_v10 = vpop.permute.xlu0 %2596  }
 0x172   :  { %2600 = vst.msk [vmem:[#allocation0 + $0x28] sm:$0x3] %vm2598_vm12, %v2597_v10   ;;  %2602 = vst.msk [vmem:[#allocation0 + $0xe] sm:$0xc] %vm2598_vm12, %v2597_v10   ;;  %v2659_v13 = vpop.permute.xlu1 %2658  }
 0x173   :  { %2662 = vst.msk [vmem:[#allocation0 + $0x28] sm:$0x3] %vm2660_vm15, %v2659_v13   ;;  %2664 = vst.msk [vmem:[#allocation0 + $0xe] sm:$0xc] %vm2660_vm15, %v2659_v13  }
 0x175   :  { %v2639_v12 = vpop.permute.xlu0 %2638  }
 0x176   :  { %2641 = vst.msk [vmem:[#allocation0] sm:$0x3] %vm2640_vm14, %v2639_v12   ;;  %2643 = vst.msk [vmem:[#allocation0 + $0x16] sm:$0xc] %vm2640_vm14, %v2639_v12  }
 0x179   :  { %v2680_v14 = vpop.permute.xlu0 %2679  }
 0x17a   :  { %2683 = vst.msk [vmem:[#allocation0 + $0x20] sm:$0x3] %vm2681_vm3, %v2680_v14   ;;  %2685 = vst.msk [vmem:[#allocation0 + $0x6] sm:$0xc] %vm2681_vm3, %v2680_v14   ;;  %v2698_v17 = vld [vmem:[#allocation0 + $0x10] sm:$0x3] }
 0x17b   :  { %3245 = vst [vmem:[%s5556_s1 + $0x4] sm:$0x3] %v2698_v17  ;;  %v2716_v18 = vld [vmem:[#allocation0 + $0x28] sm:$0x3] }
 0x17c   :  { %3248 = vst [vmem:[%s5556_s1 + $0xa] sm:$0x3] %v2716_v18 }
 0x17d   :  { %v2689_v15 = vld [vmem:[#allocation0] sm:$0x3]  ;;  %v2704_v16 = vld [vmem:[#allocation0 + $0x18] sm:$0x3] }
 0x17e   :  { %2691 = vst [vmem:[%s5556_s1] sm:$0x3] %v2689_v15  ;;  %3246 = vst [vmem:[%s5556_s1 + $0x6] sm:$0x3] %v2704_v16 }
 0x181   :  { %v2693_v19 = vld [vmem:[#allocation0 + $0x8] sm:$0x3]  ;;  %v2710_v20 = vld [vmem:[#allocation0 + $0x20] sm:$0x3] }
 0x182   :  { %3244 = vst [vmem:[%s5556_s1 + $0x2] sm:$0x3] %v2693_v19  ;;  %3247 = vst [vmem:[%s5556_s1 + $0x8] sm:$0x3] %v2710_v20 }

// kernel: _lambda_.19
= control target key start
LH: loop header
LB: loop body
LE: loop exit
PB: predicated region body
PF: predicated region fallthrough
CT: control target
= control target key end

     0   :  { %v23_v26 = vlaneseq  ;;  %s470_s0 = inlined_call_operand.vmem [shape: f32[2,8,768], index: 0, kind: input, shape index: {}]   ;;  %s471_s1 = inlined_call_operand.vmem [shape: f32[8,768], index: 1, kind: input, shape index: {}]   ;;  %s472_s2 = inlined_call_operand.vmem [shape: f32[2,8,768], index: 2, kind: output, shape index: {}]  }
   0x1   :  { %v11_v0 = vld [vmem:[%s470_s0] sm:$0xff]  ;;  %v12_v1 = vld [vmem:[%s470_s0 + $0x8] sm:$0xff]  ;;  %v13_v5 = vld [vmem:[%s470_s0 + $0x10] sm:$0xff] }
   0x2   :  { %v193_v2 = vmul.f32 -1.442695, %v11_v0  ;;  %v97_v3 = vmul.f32 1.442695, %v11_v0  ;;  %v194_v4 = vmul.f32 -1.442695, %v12_v1 }
   0x3   :  { %v195_v6 = vmul.f32 -1.442695, %v13_v5  ;;  %v14_v7 = vld [vmem:[%s470_s0 + $0x18] sm:$0xff]  ;;  %v99_v8 = vmul.f32 1.442695, %v12_v1  ;;  %v15_v10 = vld [vmem:[%s470_s0 + $0x20] sm:$0xff] }
   0x4   :  { %205 = vpow2.f32 %v193_v2  ;;  %v196_v9 = vmul.f32 -1.442695, %v14_v7  ;;  %v101_v11 = vmul.f32 1.442695, %v13_v5  ;;  %v16_v12 = vld [vmem:[%s470_s0 + $0x28] sm:$0xff]  ;;  %v17_v15 = vld [vmem:[%s470_s0 + $0x30] sm:$0xff] }
   0x5   :  { %207 = vpow2.f32 %v194_v4  ;;  %v197_v13 = vmul.f32 -1.442695, %v15_v10  ;;  %v103_v14 = vmul.f32 1.442695, %v14_v7  ;;  %v198_v16 = vmul.f32 -1.442695, %v16_v12 }
   0x6   :  { %209 = vpow2.f32 %v97_v3  ;;  %v105_v17 = vmul.f32 1.442695, %v15_v10  ;;  %v199_v18 = vmul.f32 -1.442695, %v17_v15  ;;  %v18_v19 = vld [vmem:[%s470_s0 + $0x38] sm:$0xff]  ;;  %v19_v28 = vld [vmem:[%s470_s0 + $0x40] sm:$0xff] }
   0x7   :  { %211 = vpow2.f32 %v195_v6  ;;  %v107_v21 = vmul.f32 1.442695, %v16_v12  ;;  %v200_v24 = vmul.f32 -1.442695, %v18_v19  ;;  %v109_v30 = vmul.f32 1.442695, %v17_v15 }
   0x8   :  { %213 = vpow2.f32 %v99_v8  ;;  %v201_v34 = vmul.f32 -1.442695, %v19_v28  ;;  %v319_v36 = vshrl.u32 %v23_v26, 7  ;;  %v324_v37 = vld [vmem:[%s471_s1] sm:$0xff]  ;;  %v20_v39 = vld [vmem:[%s470_s0 + $0x48] sm:$0xff]  ;;  %v21_v48 = vld [vmem:[%s470_s0 + $0x50] sm:$0xff] }
   0x9   :  { %215 = vpow2.f32 %v196_v9  ;;  %v111_v41 = vmul.f32 1.442695, %v18_v19  ;;  %v332_v43 = vld [vmem:[%s471_s1 + $0x8] sm:$0xff]  ;;  %v202_v47 = vmul.f32 -1.442695, %v20_v39  ;;  %v342_v50 = vld [vmem:[%s471_s1 + $0x10] sm:$0xff] }
   0xa   :  { %217 = vpow2.f32 %v101_v11  ;;  %vm140_vm0 = vcmp.lt.s32.totalorder %v319_v36, 4  ;;  %v348_v54 = vld [vmem:[%s471_s1 + $0x18] sm:$0xff]  ;;  %v113_v55 = vmul.f32 1.442695, %v19_v28  ;;  %vm127_vm1 = vcmp.lt.s32.totalorder %v319_v36, 2  ;;  %v362_v2 = vld [vmem:[%s471_s1 + $0x20] sm:$0xff] }
   0xb   :  { %219 = vpow2.f32 %v197_v13  ;;  %v22_v56 = vld [vmem:[%s470_s0 + $0x58] sm:$0xff]  ;;  %v203_v59 = vmul.f32 -1.442695, %v21_v48  ;;  %v372_v8 = vld [vmem:[%s471_s1 + $0x28] sm:$0xff]  ;;  %v115_v11 = vmul.f32 1.442695, %v20_v39 }
   0xc   :  { %221 = vpow2.f32 %v103_v14  ;;  %v204_v3 = vmul.f32 -1.442695, %v22_v56  ;;  %v117_v19 = vmul.f32 1.442695, %v21_v48  ;;  %v119_v26 = vmul.f32 1.442695, %v22_v56 }
   0xd   :  { %223 = vpow2.f32 %v198_v16 }
   0xe   :  { %v206_v20 = vpop.eup %205  ;;  %225 = vpow2.f32 %v105_v17 }
   0xf   :  { %v61_v22 = vadd.f32 1.0, %v206_v20  ;;  %v208_v23 = vpop.eup %207  ;;  %227 = vpow2.f32 %v199_v18 }
  0x10   :  { %v210_v25 = vpop.eup %209  ;;  %v62_v27 = vadd.f32 1.0, %v208_v23 }
  0x11   :  { %229 = vrcp.f32 %v61_v22  ;;  %v212_v29 = vpop.eup %211  ;;  %v141_v46 = vmul.f32 %v210_v25, %v324_v37 }
  0x12   :  { %231 = vpow2.f32 %v107_v21  ;;  %v214_v31 = vpop.eup %213  ;;  %v63_v32 = vadd.f32 1.0, %v212_v29 }
  0x13   :  { %233 = vrcp.f32 %v62_v27  ;;  %v216_v33 = vpop.eup %215  ;;  %v142_v53 = vmul.f32 %v214_v31, %v332_v43 }
  0x14   :  { %235 = vpow2.f32 %v200_v24  ;;  %v218_v35 = vpop.eup %217  ;;  %v64_v38 = vadd.f32 1.0, %v216_v33 }
  0x15   :  { %237 = vrcp.f32 %v63_v32  ;;  %v220_v40 = vpop.eup %219  ;;  %v143_v63 = vmul.f32 %v218_v35, %v342_v50 }
  0x16   :  { %239 = vpow2.f32 %v109_v30  ;;  %v222_v42 = vpop.eup %221  ;;  %v65_v44 = vadd.f32 1.0, %v220_v40 }
  0x17   :  { %241 = vrcp.f32 %v64_v38  ;;  %v224_v45 = vpop.eup %223  ;;  %v144_v1 = vmul.f32 %v222_v42, %v348_v54 }
  0x18   :  { %243 = vpow2.f32 %v201_v34  ;;  %v226_v49 = vpop.eup %225  ;;  %v66_v51 = vadd.f32 1.0, %v224_v45 }
  0x19   :  { %245 = vrcp.f32 %v65_v44  ;;  %v228_v52 = vpop.eup %227  ;;  %v145_v16 = vmul.f32 %v226_v49, %v362_v2 }
  0x1a   :  { %247 = vpow2.f32 %v111_v41  ;;  %v67_v58 = vadd.f32 1.0, %v228_v52 }
  0x1b   :  { %v230_v57 = vpop.eup %229  ;;  %249 = vrcp.f32 %v66_v51 }
  0x1c   :  { %v232_v60 = vpop.eup %231  ;;  %v128_v61 = vadd.f32 %v230_v57, %v324_v37  ;;  %v153_v62 = vsel %vm140_vm0, %v141_v46, %v230_v57  ;;  %251 = vpow2.f32 %v202_v47 }
  0x1d   :  { %v234_v0 = vpop.eup %233  ;;  %253 = vrcp.f32 %v67_v58  ;;  %v146_v18 = vmul.f32 %v232_v60, %v372_v8 }
  0x1e   :  { %v236_v4 = vpop.eup %235  ;;  %v165_v5 = vsel %vm127_vm1, %v128_v61, %v153_v62  ;;  %v129_v6 = vadd.f32 %v234_v0, %v332_v43  ;;  %v154_v7 = vsel %vm140_vm0, %v142_v53, %v234_v0  ;;  %255 = vpow2.f32 %v113_v55 }
  0x1f   :  { %v238_v9 = vpop.eup %237  ;;  %177 = vst [vmem:[%s472_s2] sm:$0xff] %v165_v5  ;;  %v68_v10 = vadd.f32 1.0, %v236_v4  ;;  %257 = vpow2.f32 %v203_v59 }
  0x20   :  { %v240_v12 = vpop.eup %239  ;;  %v166_v13 = vsel %vm127_vm1, %v129_v6, %v154_v7  ;;  %v130_v14 = vadd.f32 %v238_v9, %v342_v50  ;;  %v155_v15 = vsel %vm140_vm0, %v143_v63, %v238_v9 }
  0x21   :  { %v242_v17 = vpop.eup %241  ;;  %178 = vst [vmem:[%s472_s2 + $0x8] sm:$0xff] %v166_v13  ;;  %259 = vrcp.f32 %v68_v10  ;;  %v147_v31 = vmul.f32 %v240_v12, %v324_v37 }
  0x22   :  { %v244_v20 = vpop.eup %243  ;;  %v167_v21 = vsel %vm127_vm1, %v130_v14, %v155_v15  ;;  %v131_v22 = vadd.f32 %v242_v17, %v348_v54  ;;  %v156_v23 = vsel %vm140_vm0, %v144_v1, %v242_v17  ;;  %261 = vpow2.f32 %v204_v3 }
  0x23   :  { %v246_v24 = vpop.eup %245  ;;  %179 = vst [vmem:[%s472_s2 + $0x10] sm:$0xff] %v167_v21  ;;  %v69_v25 = vadd.f32 1.0, %v244_v20  ;;  %263 = vpow2.f32 %v115_v11 }
  0x24   :  { %v248_v27 = vpop.eup %247  ;;  %v168_v28 = vsel %vm127_vm1, %v131_v22, %v156_v23  ;;  %v132_v29 = vadd.f32 %v246_v24, %v362_v2  ;;  %v157_v30 = vsel %vm140_vm0, %v145_v16, %v246_v24 }
  0x25   :  { %v250_v32 = vpop.eup %249  ;;  %180 = vst [vmem:[%s472_s2 + $0x18] sm:$0xff] %v168_v28  ;;  %265 = vrcp.f32 %v69_v25  ;;  %v148_v40 = vmul.f32 %v248_v27, %v332_v43 }
  0x26   :  { %v252_v33 = vpop.eup %251  ;;  %v169_v34 = vsel %vm127_vm1, %v132_v29, %v157_v30  ;;  %v133_v35 = vadd.f32 %v250_v32, %v372_v8  ;;  %v158_v38 = vsel %vm140_vm0, %v146_v18, %v250_v32  ;;  %267 = vpow2.f32 %v117_v19 }
  0x27   :  { %v254_v39 = vpop.eup %253  ;;  %181 = vst [vmem:[%s472_s2 + $0x20] sm:$0xff] %v169_v34  ;;  %v70_v41 = vadd.f32 1.0, %v252_v33  ;;  %269 = vpow2.f32 %v119_v26 }
  0x28   :  { %v256_v42 = vpop.eup %255  ;;  %v170_v44 = vsel %vm127_vm1, %v133_v35, %v158_v38  ;;  %v134_v45 = vadd.f32 %v254_v39, %v324_v37  ;;  %v159_v46 = vsel %vm140_vm0, %v147_v31, %v254_v39 }
  0x29   :  { %v258_v47 = vpop.eup %257  ;;  %182 = vst [vmem:[%s472_s2 + $0x28] sm:$0xff] %v170_v44  ;;  %271 = vrcp.f32 %v70_v41  ;;  %v149_v55 = vmul.f32 %v256_v42, %v342_v50 }
  0x2a   :  { %v171_v48 = vsel %vm127_vm1, %v134_v45, %v159_v46  ;;  %v71_v49 = vadd.f32 1.0, %v258_v47 }
  0x2b   :  { %v260_v51 = vpop.eup %259  ;;  %183 = vst [vmem:[%s472_s2 + $0x30] sm:$0xff] %v171_v48 }
  0x2c   :  { %v262_v37 = vpop.eup %261  ;;  %v135_v52 = vadd.f32 %v260_v51, %v332_v43  ;;  %v160_v53 = vsel %vm140_vm0, %v148_v40, %v260_v51  ;;  %273 = vrcp.f32 %v71_v49 }
  0x2d   :  { %v264_v56 = vpop.eup %263  ;;  %v72_v57 = vadd.f32 1.0, %v262_v37 }
  0x2e   :  { %v172_v58 = vsel %vm127_vm1, %v135_v52, %v160_v53  ;;  %v150_v62 = vmul.f32 %v264_v56, %v348_v54 }
  0x2f   :  { %v266_v59 = vpop.eup %265  ;;  %184 = vst [vmem:[%s472_s2 + $0x38] sm:$0xff] %v172_v58  ;;  %275 = vrcp.f32 %v72_v57 }
  0x30   :  { %v268_v60 = vpop.eup %267  ;;  %v136_v43 = vadd.f32 %v266_v59, %v342_v50  ;;  %v161_v61 = vsel %vm140_vm0, %v149_v55, %v266_v59 }
  0x31   :  { %v270_v63 = vpop.eup %269  ;;  %v151_v3 = vmul.f32 %v268_v60, %v362_v2 }
  0x32   :  { %v173_v0 = vsel %vm127_vm1, %v136_v43, %v161_v61  ;;  %v152_v7 = vmul.f32 %v270_v63, %v372_v8 }
  0x33   :  { %v272_v1 = vpop.eup %271  ;;  %185 = vst [vmem:[%s472_s2 + $0x40] sm:$0xff] %v173_v0 }
  0x34   :  { %v137_v4 = vadd.f32 %v272_v1, %v348_v54  ;;  %v162_v50 = vsel %vm140_vm0, %v150_v62, %v272_v1 }
  0x36   :  { %v274_v5 = vpop.eup %273  ;;  %v174_v6 = vsel %vm127_vm1, %v137_v4, %v162_v50 }
  0x37   :  { %186 = vst [vmem:[%s472_s2 + $0x48] sm:$0xff] %v174_v6  ;;  %v138_v9 = vadd.f32 %v274_v5, %v362_v2  ;;  %v163_v10 = vsel %vm140_vm0, %v151_v3, %v274_v5 }
  0x39   :  { %v276_v11 = vpop.eup %275  ;;  %v175_v54 = vsel %vm127_vm1, %v138_v9, %v163_v10 }
  0x3a   :  { %187 = vst [vmem:[%s472_s2 + $0x50] sm:$0xff] %v175_v54  ;;  %v139_v12 = vadd.f32 %v276_v11, %v372_v8  ;;  %v164_v13 = vsel %vm140_vm0, %v152_v7, %v276_v11 }
  0x3c   :  { %v176_v14 = vsel %vm127_vm1, %v139_v12, %v164_v13 }
  0x3d   :  { %188 = vst [vmem:[%s472_s2 + $0x58] sm:$0xff] %v176_v14 }

// kernel: tile.11
= control target key start
LH: loop header
LB: loop body
LE: loop exit
PB: predicated region body
PF: predicated region fallthrough
CT: control target
= control target key end

     0   :  { %vm5_vm0 = vcmask 1041409   ;;  %vm21_vm1 = vcmask 15360   ;;  %s875_s24 = smov 126   ;;  %s876_s25 = smov 120   ;;  %vm7_vm2 = vcmask 23552   ;;  %vm25_vm3 = vcmask 7168   ;;  %s1409_s0 = inlined_call_operand.vmem [shape: f32[2,64,3], index: 0, kind: input, shape index: {}]   ;;  %s1410_s1 = inlined_call_operand.vmem [shape: f32[2,192], index: 1, kind: output, shape index: {}]  }
   0x1   :  { %v683_v0 = vld [vmem:[%s1409_s0 + $0x2a] sm:$0x1]   ;;  %v689_v6 = vld [vmem:[%s1409_s0 + $0x28] sm:$0x1]   ;;  %v687_v8 = vld [vmem:[%s1409_s0 + $0x29] sm:$0x1]  }
   0x2   :  { %v684_v1 = vld [vmem:[%s1409_s0 + $0x69] sm:$0x2]   ;;  %v690_v7 = vld [vmem:[%s1409_s0 + $0x67] sm:$0x2]   ;;  %v688_v11 = vld [vmem:[%s1409_s0 + $0x68] sm:$0x2]  }
   0x3   :  { %v14_v2 = vsel %vm5_vm0, %v684_v1, %v683_v0  ;;  %v685_v3 = vld [vmem:[%s1409_s0 + $0x2a] sm:$0x1]   ;;  %v45_v10 = vsel %vm5_vm0, %v690_v7, %v689_v6  ;;  %v691_v12 = vld [vmem:[%s1409_s0 + $0x27] sm:$0x1]   ;;  %v35_v14 = vsel %vm5_vm0, %v688_v11, %v687_v8  ;;  %v693_v16 = vld [vmem:[%s1409_s0 + $0x26] sm:$0x1]  }
   0x4   :  { %v686_v4 = vld [vmem:[%s1409_s0 + $0x69] sm:$0x2]   ;;  %46 = vrot.lane.b32.xlu1 %v45_v10, %s876_s25  ;;  %v692_v13 = vld [vmem:[%s1409_s0 + $0x66] sm:$0x2]   ;;  %v694_v17 = vld [vmem:[%s1409_s0 + $0x65] sm:$0x2]  }
   0x5   :  { %v20_v5 = vsel %vm5_vm0, %v686_v4, %v685_v3  ;;  %v55_v15 = vsel %vm5_vm0, %v692_v13, %v691_v12  ;;  %v695_v18 = vld [vmem:[%s1409_s0 + $0x25] sm:$0x1]   ;;  %s877_s7 = smov 123   ;;  %s878_s8 = smov 117   ;;  %v65_v20 = vsel %vm5_vm0, %v694_v17, %v693_v16  ;;  %v697_v22 = vld [vmem:[%s1409_s0 + $0x24] sm:$0x1]  }
   0x6   :  { %v22_v9 = vsel %vm21_vm1, %v20_v5, %v14_v2  ;;  %v696_v19 = vld [vmem:[%s1409_s0 + $0x64] sm:$0x2]   ;;  %v698_v23 = vld [vmem:[%s1409_s0 + $0x63] sm:$0x2]   ;;  %v699_v24 = vld [vmem:[%s1409_s0 + $0x23] sm:$0x1]  }
   0x7   :  { %23 = vrot.lane.b32.xlu0 %v22_v9, %s875_s24  ;;  %v75_v21 = vsel %vm5_vm0, %v696_v19, %v695_v18  ;;  %v700_v25 = vld [vmem:[%s1409_s0 + $0x62] sm:$0x2]   ;;  %s879_s17 = smov 114   ;;  %s880_s18 = smov 111   ;;  %v85_v26 = vsel %vm5_vm0, %v698_v23, %v697_v22  ;;  %v701_v28 = vld [vmem:[%s1409_s0 + $0x22] sm:$0x1]  }
   0x8   :  { %56 = vrot.lane.b32.xlu1 %v55_v15, %s878_s8  ;;  %v95_v27 = vsel %vm5_vm0, %v700_v25, %v699_v24  ;;  %v702_v29 = vld [vmem:[%s1409_s0 + $0x61] sm:$0x2]   ;;  %v703_v30 = vld [vmem:[%s1409_s0 + $0x21] sm:$0x1]   ;;  %s881_s27 = smov 108   ;;  %s882_s28 = smov 105  }
   0x9   :  { %v704_v31 = vld [vmem:[%s1409_s0 + $0x60] sm:$0x2]   ;;  %v105_v32 = vsel %vm5_vm0, %v702_v29, %v701_v28  ;;  %v705_v34 = vld [vmem:[%s1409_s0 + $0x20] sm:$0x1]   ;;  %v707_v36 = vld [vmem:[%s1409_s0 + $0x1f] sm:$0x1]  }
   0xa   :  { %v115_v33 = vsel %vm5_vm0, %v704_v31, %v703_v30  ;;  %v706_v35 = vld [vmem:[%s1409_s0 + $0x5f] sm:$0x2]   ;;  %v708_v37 = vld [vmem:[%s1409_s0 + $0x5e] sm:$0x2]   ;;  %s883_s8 = smov 102   ;;  %s884_s9 = smov 99  }
   0xb   :  { %36 = vrot.lane.b32.xlu0 %v35_v14, %s877_s7  ;;  %v125_v38 = vsel %vm5_vm0, %v706_v35, %v705_v34  ;;  %v135_v39 = vsel %vm5_vm0, %v708_v37, %v707_v36  ;;  %v709_v40 = vld [vmem:[%s1409_s0 + $0x1e] sm:$0x1]   ;;  %v711_v42 = vld [vmem:[%s1409_s0 + $0x1d] sm:$0x1]   ;;  %s886_s19 = smov 93   ;;  %s888_s29 = smov 87  }
   0xc   :  { %76 = vrot.lane.b32.xlu1 %v75_v21, %s880_s18  ;;  %v710_v41 = vld [vmem:[%s1409_s0 + $0x5d] sm:$0x2]   ;;  %v712_v43 = vld [vmem:[%s1409_s0 + $0x5c] sm:$0x2]   ;;  %s885_s18 = smov 96   ;;  %s890_s10 = smov 81  }
   0xd   :  { %v145_v44 = vsel %vm5_vm0, %v710_v41, %v709_v40  ;;  %v155_v45 = vsel %vm5_vm0, %v712_v43, %v711_v42  ;;  %v713_v46 = vld [vmem:[%s1409_s0 + $0x1c] sm:$0x1]   ;;  %v715_v48 = vld [vmem:[%s1409_s0 + $0x1b] sm:$0x1]   ;;  %v717_v52 = vld [vmem:[%s1409_s0 + $0x1a] sm:$0x1]  }
   0xe   :  { %v714_v47 = vld [vmem:[%s1409_s0 + $0x5b] sm:$0x2]   ;;  %v716_v49 = vld [vmem:[%s1409_s0 + $0x5a] sm:$0x2]   ;;  %v718_v53 = vld [vmem:[%s1409_s0 + $0x59] sm:$0x2]  }
   0xf   :  { %66 = vrot.lane.b32.xlu0 %v65_v20, %s879_s17  ;;  %v165_v50 = vsel %vm5_vm0, %v714_v47, %v713_v46  ;;  %v175_v51 = vsel %vm5_vm0, %v716_v49, %v715_v48  ;;  %v719_v54 = vld [vmem:[%s1409_s0 + $0x19] sm:$0x1]   ;;  %v185_v56 = vsel %vm5_vm0, %v718_v53, %v717_v52  ;;  %v721_v58 = vld [vmem:[%s1409_s0 + $0x18] sm:$0x1]   ;;  %v723_v60 = vld [vmem:[%s1409_s0 + $0x17] sm:$0x1]  }
  0x10   :  { %96 = vrot.lane.b32.xlu1 %v95_v27, %s882_s28  ;;  %s887_s28 = smov 90   ;;  %v720_v55 = vld [vmem:[%s1409_s0 + $0x58] sm:$0x2]   ;;  %v722_v59 = vld [vmem:[%s1409_s0 + $0x57] sm:$0x2]   ;;  %s892_s20 = smov 75  }
  0x11   :  { %v195_v57 = vsel %vm5_vm0, %v720_v55, %v719_v54  ;;  %v724_v61 = vld [vmem:[%s1409_s0 + $0x56] sm:$0x2]   ;;  %v205_v62 = vsel %vm5_vm0, %v722_v59, %v721_v58  ;;  %v725_v0 = vld [vmem:[%s1409_s0 + $0x16] sm:$0x1]   ;;  %v727_v2 = vld [vmem:[%s1409_s0 + $0x15] sm:$0x1]  }
  0x12   :  { %v215_v63 = vsel %vm5_vm0, %v724_v61, %v723_v60  ;;  %v726_v1 = vld [vmem:[%s1409_s0 + $0x55] sm:$0x2]   ;;  %v728_v3 = vld [vmem:[%s1409_s0 + $0x54] sm:$0x2]   ;;  %s894_s30 = smov 69   ;;  %s896_s11 = smov 63  }
  0x13   :  { %86 = vrot.lane.b32.xlu0 %v85_v26, %s881_s27  ;;  %v225_v4 = vsel %vm5_vm0, %v726_v1, %v725_v0  ;;  %v235_v5 = vsel %vm5_vm0, %v728_v3, %v727_v2  ;;  %v729_v6 = vld [vmem:[%s1409_s0 + $0x3f] sm:$0x1]   ;;  %v731_v8 = vld [vmem:[%s1409_s0 + $0x14] sm:$0x1]   ;;  %v733_v12 = vld [vmem:[%s1409_s0 + $0x3e] sm:$0x1]  }
  0x14   :  { %116 = vrot.lane.b32.xlu1 %v115_v33, %s884_s9  ;;  %s889_s9 = smov 84   ;;  %v730_v7 = vld [vmem:[%s1409_s0 + $0x7e] sm:$0x2]   ;;  %v732_v9 = vld [vmem:[%s1409_s0 + $0x53] sm:$0x2]   ;;  %s898_s21 = smov 60  }
  0x15   :  { %v245_v10 = vsel %vm5_vm0, %v730_v7, %v729_v6  ;;  %v256_v11 = vsel %vm5_vm0, %v732_v9, %v731_v8  ;;  %v734_v13 = vld [vmem:[%s1409_s0 + $0x7d] sm:$0x2]   ;;  %v735_v14 = vld [vmem:[%s1409_s0 + $0x13] sm:$0x1]   ;;  %v737_v18 = vld [vmem:[%s1409_s0 + $0x3d] sm:$0x1]  }
  0x16   :  { %v736_v15 = vld [vmem:[%s1409_s0 + $0x52] sm:$0x2]   ;;  %v266_v16 = vsel %vm5_vm0, %v734_v13, %v733_v12  ;;  %v2_v19 = vld [vmem:[%s1409_s0] sm:$0x1]   ;;  %v738_v21 = vld [vmem:[%s1409_s0 + $0x7c] sm:$0x2]  }
  0x17   :  { %106 = vrot.lane.b32.xlu0 %v105_v32, %s883_s8  ;;  %v277_v17 = vsel %vm5_vm0, %v736_v15, %v735_v14  ;;  %v682_v20 = vld [vmem:[%s1409_s0 + $0x3f] sm:$0x2]   ;;  %v739_v22 = vld [vmem:[%s1409_s0 + $0x12] sm:$0x1]   ;;  %s899_s5 = smov 58   ;;  %s900_s6 = smov 57   ;;  %v287_v25 = vsel %vm5_vm0, %v738_v21, %v737_v18 }
  0x18   :  { %136 = vrot.lane.b32.xlu1 %v135_v39, %s886_s19  ;;  %s891_s19 = smov 78   ;;  %v740_v23 = vld [vmem:[%s1409_s0 + $0x51] sm:$0x2]   ;;  %v6_v24 = vsel %vm5_vm0, %v682_v20, %v2_v19  ;;  %v741_v27 = vld [vmem:[%s1409_s0 + $0x3c] sm:$0x1]   ;;  %s901_s15 = smov 55  }
  0x19   :  { %8 = vst.msk [vmem:[#allocation0] sm:$0x3] %vm7_vm2, %v6_v24   ;;  %v298_v26 = vsel %vm5_vm0, %v740_v23, %v739_v22  ;;  %v742_v28 = vld [vmem:[%s1409_s0 + $0x7b] sm:$0x2]   ;;  %v743_v29 = vld [vmem:[%s1409_s0 + $0x11] sm:$0x1]  }
  0x1a   :  { %v744_v30 = vld [vmem:[%s1409_s0 + $0x50] sm:$0x2]   ;;  %s902_s16 = smov 54   ;;  %v308_v31 = vsel %vm5_vm0, %v742_v28, %v741_v27  ;;  %v745_v33 = vld [vmem:[%s1409_s0 + $0x3b] sm:$0x1]   ;;  %s903_s25 = smov 52  }
  0x1b   :  { %126 = vrot.lane.b32.xlu0 %v125_v38, %s885_s18  ;;  %v319_v32 = vsel %vm5_vm0, %v744_v30, %v743_v29  ;;  %v746_v34 = vld [vmem:[%s1409_s0 + $0x7a] sm:$0x2]   ;;  %v747_v35 = vld [vmem:[%s1409_s0 + $0x10] sm:$0x1]   ;;  %s904_s26 = smov 51   ;;  %s906_s7 = smov 48  }
  0x1c   :  { %156 = vrot.lane.b32.xlu1 %v155_v45, %s888_s29  ;;  %s893_s29 = smov 72   ;;  %v748_v36 = vld [vmem:[%s1409_s0 + $0x4f] sm:$0x2]   ;;  %v329_v37 = vsel %vm5_vm0, %v746_v34, %v745_v33  ;;  %v749_v39 = vld [vmem:[%s1409_s0 + $0x3a] sm:$0x1]   ;;  %s908_s17 = smov 45  }
  0x1d   :  { %v340_v38 = vsel %vm5_vm0, %v748_v36, %v747_v35  ;;  %v750_v40 = vld [vmem:[%s1409_s0 + $0x79] sm:$0x2]   ;;  %v751_v41 = vld [vmem:[%s1409_s0 + $0xf] sm:$0x1]   ;;  %v753_v45 = vld [vmem:[%s1409_s0 + $0x39] sm:$0x1]  }
  0x1e   :  { %v752_v42 = vld [vmem:[%s1409_s0 + $0x4e] sm:$0x2]   ;;  %v350_v43 = vsel %vm5_vm0, %v750_v40, %v749_v39  ;;  %v754_v46 = vld [vmem:[%s1409_s0 + $0x78] sm:$0x2]   ;;  %v755_v47 = vld [vmem:[%s1409_s0 + $0xe] sm:$0x1]  }
  0x1f   :  { %146 = vrot.lane.b32.xlu0 %v145_v44, %s887_s28  ;;  %v361_v44 = vsel %vm5_vm0, %v752_v42, %v751_v41  ;;  %v756_v48 = vld [vmem:[%s1409_s0 + $0x4d] sm:$0x2]   ;;  %v371_v49 = vsel %vm5_vm0, %v754_v46, %v753_v45  ;;  %v758_v52 = vld [vmem:[%s1409_s0 + $0x77] sm:$0x2]   ;;  %v759_v53 = vld [vmem:[%s1409_s0 + $0xd] sm:$0x1]  }
  0x20   :  { %176 = vrot.lane.b32.xlu1 %v175_v51, %s890_s10  ;;  %s895_s10 = smov 66   ;;  %v757_v51 = vld [vmem:[%s1409_s0 + $0x38] sm:$0x1]   ;;  %v760_v54 = vld [vmem:[%s1409_s0 + $0x4c] sm:$0x2]   ;;  %s910_s27 = smov 42  }
  0x21   :  { %v392_v55 = vsel %vm5_vm0, %v758_v52, %v757_v51  ;;  %v762_v58 = vld [vmem:[%s1409_s0 + $0x76] sm:$0x2]   ;;  %v763_v59 = vld [vmem:[%s1409_s0 + $0xc] sm:$0x1]   ;;  %s912_s8 = smov 39   ;;  %s914_s18 = smov 36  }
  0x22   :  { %v764_v60 = vld [vmem:[%s1409_s0 + $0x4b] sm:$0x2]   ;;  %v766_v0 = vld [vmem:[%s1409_s0 + $0x75] sm:$0x2]   ;;  %v767_v1 = vld [vmem:[%s1409_s0 + $0xb] sm:$0x1]  }
  0x23   :  { %166 = vrot.lane.b32.xlu0 %v165_v50, %s889_s9  ;;  %v382_v50 = vsel %vm5_vm0, %v756_v48, %v755_v47  ;;  %v768_v2 = vld [vmem:[%s1409_s0 + $0x4a] sm:$0x2]   ;;  %v770_v6 = vld [vmem:[%s1409_s0 + $0x74] sm:$0x2]   ;;  %v771_v7 = vld [vmem:[%s1409_s0 + $0xa] sm:$0x1]  }
  0x24   :  { %196 = vrot.lane.b32.xlu1 %v195_v57, %s892_s20  ;;  %s897_s20 = smov 61   ;;  %v761_v57 = vld [vmem:[%s1409_s0 + $0x37] sm:$0x1]   ;;  %v772_v8 = vld [vmem:[%s1409_s0 + $0x49] sm:$0x2]   ;;  %s916_s28 = smov 33  }
  0x25   :  { %v413_v61 = vsel %vm5_vm0, %v762_v58, %v761_v57  ;;  %v774_v12 = vld [vmem:[%s1409_s0 + $0x73] sm:$0x2]   ;;  %v775_v13 = vld [vmem:[%s1409_s0 + $0x9] sm:$0x1]   ;;  %s918_s9 = smov 30   ;;  %vm28_vm4 = vcmask 1048560  }
  0x26   :  { %v776_v14 = vld [vmem:[%s1409_s0 + $0x48] sm:$0x2]   ;;  %v778_v18 = vld [vmem:[%s1409_s0 + $0x72] sm:$0x2]   ;;  %v779_v19 = vld [vmem:[%s1409_s0 + $0x8] sm:$0x1]  }
  0x27   :  { %186 = vrot.lane.b32.xlu0 %v185_v56, %s891_s19  ;;  %v403_v56 = vsel %vm5_vm0, %v760_v54, %v759_v53  ;;  %v780_v20 = vld [vmem:[%s1409_s0 + $0x47] sm:$0x2]   ;;  %s920_s19 = smov 27   ;;  %v781_v23 = vld [vmem:[%s1409_s0 + $0x32] sm:$0x1]   ;;  %vm38_vm5 = vcmask 1032152  }
  0x28   :  { %216 = vrot.lane.b32.xlu1 %v215_v63, %s894_s30  ;;  %v765_v63 = vld [vmem:[%s1409_s0 + $0x36] sm:$0x1]   ;;  %v508_v22 = vsel %vm5_vm0, %v780_v20, %v779_v19  ;;  %v782_v24 = vld [vmem:[%s1409_s0 + $0x71] sm:$0x2]   ;;  %v785_v29 = vld [vmem:[%s1409_s0 + $0x31] sm:$0x1]  }
  0x29   :  { %v434_v3 = vsel %vm5_vm0, %v766_v0, %v765_v63  ;;  %v518_v27 = vsel %vm5_vm0, %v782_v24, %v781_v23  ;;  %v786_v30 = vld [vmem:[%s1409_s0 + $0x70] sm:$0x2]   ;;  %v789_v35 = vld [vmem:[%s1409_s0 + $0x30] sm:$0x1]   ;;  %v793_v41 = vld [vmem:[%s1409_s0 + $0x2f] sm:$0x1]  }
  0x2a   :  { %v539_v33 = vsel %vm5_vm0, %v786_v30, %v785_v29  ;;  %v790_v36 = vld [vmem:[%s1409_s0 + $0x6f] sm:$0x2]   ;;  %v794_v42 = vld [vmem:[%s1409_s0 + $0x6e] sm:$0x2]   ;;  %s928_s30 = smov 15   ;;  %s934_s2 = smov 6  }
  0x2b   :  { %206 = vrot.lane.b32.xlu0 %v205_v62, %s893_s29  ;;  %v424_v62 = vsel %vm5_vm0, %v764_v60, %v763_v59  ;;  %s922_s29 = smov 24   ;;  %v560_v39 = vsel %vm5_vm0, %v790_v36, %v789_v35  ;;  %v581_v45 = vsel %vm5_vm0, %v794_v42, %v793_v41  ;;  %v797_v47 = vld [vmem:[%s1409_s0 + $0x2e] sm:$0x1]   ;;  %v801_v53 = vld [vmem:[%s1409_s0 + $0x2d] sm:$0x1]   ;;  %vm48_vm6 = vcmask 1007552  }
  0x2c   :  { %236 = vrot.lane.b32.xlu1 %v235_v5, %s896_s11  ;;  %v769_v5 = vld [vmem:[%s1409_s0 + $0x35] sm:$0x1]   ;;  %v798_v48 = vld [vmem:[%s1409_s0 + $0x6d] sm:$0x2]   ;;  %s930_s11 = smov 12   ;;  %vm58_vm7 = vcmask 982952  }
  0x2d   :  { %v455_v9 = vsel %vm5_vm0, %v770_v6, %v769_v5  ;;  %v602_v51 = vsel %vm5_vm0, %v798_v48, %v797_v47  ;;  %v802_v54 = vld [vmem:[%s1409_s0 + $0x6c] sm:$0x2]   ;;  %v805_v59 = vld [vmem:[%s1409_s0 + $0x2c] sm:$0x1]   ;;  %v807_v63 = vld [vmem:[%s1409_s0 + $0x1] sm:$0x1]  }
  0x2e   :  { %v623_v57 = vsel %vm5_vm0, %v802_v54, %v801_v53  ;;  %v808_v0 = vld [vmem:[%s1409_s0 + $0x40] sm:$0x2]   ;;  %v809_v5 = vld [vmem:[%s1409_s0 + $0x2b] sm:$0x1]   ;;  %vm68_vm8 = vcmask 958352   ;;  %vm78_vm9 = vcmask 933752  }
  0x2f   :  { %226 = vrot.lane.b32.xlu0 %v225_v4, %s895_s10  ;;  %v445_v4 = vsel %vm5_vm0, %v768_v2, %v767_v1  ;;  %s924_s10 = smov 21   ;;  %v655_v2 = vsel %vm5_vm0, %v808_v0, %v807_v63  ;;  %v810_v6 = vld [vmem:[%s1409_s0 + $0x6a] sm:$0x2]   ;;  %vm88_vm10 = vcmask 909152   ;;  %vm98_vm11 = vcmask 884552  }
  0x30   :  { %257 = vrot.lane.b32.xlu1 %v256_v11, %s898_s21  ;;  %v773_v11 = vld [vmem:[%s1409_s0 + $0x34] sm:$0x1]   ;;  %s932_s21 = smov 9   ;;  %vm108_vm12 = vcmask 859952   ;;  %vm118_vm13 = vcmask 835352   ;;  %vm128_vm14 = vcmask 810752  }
  0x31   :  { %v476_v15 = vsel %vm5_vm0, %v774_v12, %v773_v11  ;;  %vm138_vm15 = vcmask 786152   ;;  %vm158_vm1 = vcmask 736952   ;;  %vm168_vm2 = vcmask 712352  }
  0x33   :  { %246 = vrot.lane.b32.xlu0 %v245_v10, %s897_s20  ;;  %v466_v10 = vsel %vm5_vm0, %v772_v8, %v771_v7  ;;  %s926_s20 = smov 18   ;;  %v665_v7 = vsel %vm5_vm0, %v810_v6, %v809_v5 }
  0x34   :  { %278 = vrot.lane.b32.xlu1 %v277_v17, %s900_s6  ;;  %s905_s6 = smov 49   ;;  %v777_v17 = vld [vmem:[%s1409_s0 + $0x33] sm:$0x1]  }
  0x35   :  { %v497_v21 = vsel %vm5_vm0, %v778_v18, %v777_v17 }
  0x37   :  { %267 = vrot.lane.b32.xlu0 %v266_v16, %s899_s5  ;;  %v487_v16 = vsel %vm5_vm0, %v776_v14, %v775_v13 }
  0x38   :  { %299 = vrot.lane.b32.xlu1 %v298_v26, %s902_s16  ;;  %s907_s16 = smov 46   ;;  %v784_v26 = vld [vmem:[%s1409_s0 + $0x46] sm:$0x2]  }
  0x3b   :  { %288 = vrot.lane.b32.xlu0 %v287_v25, %s901_s15  ;;  %v783_v25 = vld [vmem:[%s1409_s0 + $0x7] sm:$0x1]  }
  0x3c   :  { %320 = vrot.lane.b32.xlu1 %v319_v32, %s904_s26  ;;  %s909_s26 = smov 43   ;;  %v529_v28 = vsel %vm5_vm0, %v784_v26, %v783_v25  ;;  %v788_v32 = vld [vmem:[%s1409_s0 + $0x45] sm:$0x2]  }
  0x3f   :  { %309 = vrot.lane.b32.xlu0 %v308_v31, %s903_s25  ;;  %v787_v31 = vld [vmem:[%s1409_s0 + $0x6] sm:$0x1]  }
  0x40   :  { %341 = vrot.lane.b32.xlu1 %v340_v38, %s906_s7  ;;  %s911_s7 = smov 40   ;;  %v550_v34 = vsel %vm5_vm0, %v788_v32, %v787_v31  ;;  %v792_v38 = vld [vmem:[%s1409_s0 + $0x44] sm:$0x2]  }
  0x43   :  { %330 = vrot.lane.b32.xlu0 %v329_v37, %s905_s6  ;;  %v791_v37 = vld [vmem:[%s1409_s0 + $0x5] sm:$0x1]  }
  0x44   :  { %362 = vrot.lane.b32.xlu1 %v361_v44, %s908_s17  ;;  %s913_s17 = smov 37   ;;  %v571_v40 = vsel %vm5_vm0, %v792_v38, %v791_v37  ;;  %v796_v44 = vld [vmem:[%s1409_s0 + $0x43] sm:$0x2]  }
  0x47   :  { %351 = vrot.lane.b32.xlu0 %v350_v43, %s907_s16  ;;  %v795_v43 = vld [vmem:[%s1409_s0 + $0x4] sm:$0x1]  }
  0x48   :  { %383 = vrot.lane.b32.xlu1 %v382_v50, %s910_s27  ;;  %s915_s27 = smov 34   ;;  %v592_v46 = vsel %vm5_vm0, %v796_v44, %v795_v43  ;;  %v800_v50 = vld [vmem:[%s1409_s0 + $0x42] sm:$0x2]  }
  0x4b   :  { %372 = vrot.lane.b32.xlu0 %v371_v49, %s909_s26  ;;  %v799_v49 = vld [vmem:[%s1409_s0 + $0x3] sm:$0x1]  }
  0x4c   :  { %404 = vrot.lane.b32.xlu1 %v403_v56, %s912_s8  ;;  %s917_s8 = smov 31   ;;  %v613_v52 = vsel %vm5_vm0, %v800_v50, %v799_v49  ;;  %v804_v56 = vld [vmem:[%s1409_s0 + $0x41] sm:$0x2]  }
  0x4f   :  { %393 = vrot.lane.b32.xlu0 %v392_v55, %s911_s7  ;;  %v803_v55 = vld [vmem:[%s1409_s0 + $0x2] sm:$0x1]   ;;  %s936_s7 = smov 3  }
  0x50   :  { %425 = vrot.lane.b32.xlu1 %v424_v62, %s914_s18  ;;  %s919_s18 = smov 28   ;;  %v634_v58 = vsel %vm5_vm0, %v804_v56, %v803_v55  ;;  %v806_v62 = vld [vmem:[%s1409_s0 + $0x6b] sm:$0x2]   ;;  %s935_s0 = smov 4  }
  0x51   :  { %v644_v1 = vsel %vm5_vm0, %v806_v62, %v805_v59  ;;  %vm148_vm0 = vcmask 761552  }
  0x53   :  { %414 = vrot.lane.b32.xlu0 %v413_v61, %s913_s17 }
  0x54   :  { %446 = vrot.lane.b32.xlu1 %v445_v4, %s916_s28  ;;  %s921_s28 = smov 25  }
  0x57   :  { %435 = vrot.lane.b32.xlu0 %v434_v3, %s915_s27 }
  0x58   :  { %467 = vrot.lane.b32.xlu1 %v466_v10, %s918_s9  ;;  %s923_s9 = smov 22  }
  0x5b   :  { %456 = vrot.lane.b32.xlu0 %v455_v9, %s917_s8  ;;  %s937_s8 = smov 1  }
  0x5c   :  { %488 = vrot.lane.b32.xlu1 %v487_v16, %s920_s19  ;;  %s925_s19 = smov 19  }
  0x5f   :  { %477 = vrot.lane.b32.xlu0 %v476_v15, %s919_s18 }
  0x60   :  { %509 = vrot.lane.b32.xlu1 %v508_v22, %s922_s29  ;;  %s927_s29 = smov 16  }
  0x63   :  { %498 = vrot.lane.b32.xlu0 %v497_v21, %s921_s28 }
  0x64   :  { %530 = vrot.lane.b32.xlu1 %v529_v28, %s924_s10  ;;  %s929_s10 = smov 13  }
  0x67   :  { %519 = vrot.lane.b32.xlu0 %v518_v27, %s923_s9 }
  0x68   :  { %551 = vrot.lane.b32.xlu1 %v550_v34, %s926_s20  ;;  %s931_s20 = smov 10  }
  0x6b   :  { %540 = vrot.lane.b32.xlu0 %v539_v33, %s925_s19 }
  0x6c   :  { %572 = vrot.lane.b32.xlu1 %v571_v40, %s928_s30  ;;  %s933_s30 = smov 7  }
  0x6f   :  { %561 = vrot.lane.b32.xlu0 %v560_v39, %s927_s29 }
  0x70   :  { %593 = vrot.lane.b32.xlu1 %v592_v46, %s930_s11 }
  0x73   :  { %582 = vrot.lane.b32.xlu0 %v581_v45, %s929_s10 }
  0x74   :  { %614 = vrot.lane.b32.xlu1 %v613_v52, %s932_s21 }
  0x76   :  { %v47_v61 = vpop.permute.xlu1 %46  }
  0x77   :  { %603 = vrot.lane.b32.xlu0 %v602_v51, %s931_s20 }
  0x78   :  { %635 = vrot.lane.b32.xlu1 %v634_v58, %s934_s2 }
  0x79   :  { %v24_v60 = vpop.permute.xlu0 %23  }
  0x7a   :  { %27 = vst.msk [vmem:[#allocation0 + $0x8] sm:$0x3] %vm25_vm3, %v24_v60   ;;  %v57_v4 = vpop.permute.xlu1 %56   ;;  %vm178_vm3 = vcmask 687752  }
  0x7b   :  { %29 = vst.msk [vmem:[#allocation0] sm:$0x3] %vm28_vm4, %v24_v60   ;;  %624 = vrot.lane.b32.xlu0 %v623_v57, %s933_s30  ;;  %vm188_vm4 = vcmask 663152  }
  0x7c   :  { %656 = vrot.lane.b32.xlu1 %v655_v2, %s936_s7 }
  0x7d   :  { %v37_v3 = vpop.permute.xlu0 %36  }
  0x7e   :  { %39 = vst.msk [vmem:[#allocation0] sm:$0x3] %vm38_vm5, %v37_v3   ;;  %v77_v9 = vpop.permute.xlu1 %76   ;;  %vm198_vm5 = vcmask 638552  }
  0x7f   :  { %49 = vst.msk [vmem:[#allocation0] sm:$0x3] %vm48_vm6, %v47_v61   ;;  %645 = vrot.lane.b32.xlu0 %v644_v1, %s935_s0  ;;  %vm208_vm6 = vcmask 613952  }
  0x80   :  { %59 = vst.msk [vmem:[#allocation0] sm:$0x3] %vm58_vm7, %v57_v4   ;;  %vm218_vm7 = vcmask 589352  }
  0x81   :  { %v67_v8 = vpop.permute.xlu0 %66  }
  0x82   :  { %69 = vst.msk [vmem:[#allocation0] sm:$0x3] %vm68_vm8, %v67_v8   ;;  %v97_v11 = vpop.permute.xlu1 %96   ;;  %vm228_vm8 = vcmask 564752  }
  0x83   :  { %666 = vrot.lane.b32.xlu0 %v665_v7, %s937_s8  ;;  %79 = vst.msk [vmem:[#allocation0] sm:$0x3] %vm78_vm9, %v77_v9   ;;  %vm238_vm9 = vcmask 540152  }
  0x85   :  { %v87_v10 = vpop.permute.xlu0 %86  }
  0x86   :  { %89 = vst.msk [vmem:[#allocation0] sm:$0x3] %vm88_vm10, %v87_v10   ;;  %v117_v13 = vpop.permute.xlu1 %116   ;;  %vm248_vm10 = vcmask 523752  }
  0x87   :  { %99 = vst.msk [vmem:[#allocation0] sm:$0x3] %vm98_vm11, %v97_v11   ;;  %vm259_vm11 = vcmask 515552  }
  0x89   :  { %v107_v12 = vpop.permute.xlu0 %106  }
  0x8a   :  { %109 = vst.msk [vmem:[#allocation0] sm:$0x3] %vm108_vm12, %v107_v12   ;;  %v137_v15 = vpop.permute.xlu1 %136   ;;  %vm269_vm12 = vcmask 499152  }
  0x8b   :  { %119 = vst.msk [vmem:[#allocation0] sm:$0x3] %vm118_vm13, %v117_v13   ;;  %vm280_vm13 = vcmask 490952  }
  0x8d   :  { %v127_v14 = vpop.permute.xlu0 %126  }
  0x8e   :  { %129 = vst.msk [vmem:[#allocation0] sm:$0x3] %vm128_vm14, %v127_v14   ;;  %v157_v17 = vpop.permute.xlu1 %156   ;;  %vm290_vm14 = vcmask 474552  }
  0x8f   :  { %139 = vst.msk [vmem:[#allocation0] sm:$0x3] %vm138_vm15, %v137_v15   ;;  %vm301_vm15 = vcmask 466352  }
  0x91   :  { %v147_v16 = vpop.permute.xlu0 %146  }
  0x92   :  { %149 = vst.msk [vmem:[#allocation0] sm:$0x3] %vm148_vm0, %v147_v16   ;;  %v177_v19 = vpop.permute.xlu1 %176   ;;  %vm311_vm0 = vcmask 449952  }
  0x93   :  { %159 = vst.msk [vmem:[#allocation0] sm:$0x3] %vm158_vm1, %v157_v17   ;;  %vm322_vm1 = vcmask 441752  }
  0x95   :  { %v167_v18 = vpop.permute.xlu0 %166  }
  0x96   :  { %169 = vst.msk [vmem:[#allocation0] sm:$0x3] %vm168_vm2, %v167_v18   ;;  %v197_v21 = vpop.permute.xlu1 %196   ;;  %vm332_vm2 = vcmask 425352  }
  0x97   :  { %179 = vst.msk [vmem:[#allocation0] sm:$0x3] %vm178_vm3, %v177_v19   ;;  %vm343_vm3 = vcmask 417152  }
  0x99   :  { %v187_v20 = vpop.permute.xlu0 %186  }
  0x9a   :  { %189 = vst.msk [vmem:[#allocation0] sm:$0x3] %vm188_vm4, %v187_v20   ;;  %v217_v23 = vpop.permute.xlu1 %216   ;;  %vm353_vm4 = vcmask 400752  }
  0x9b   :  { %199 = vst.msk [vmem:[#allocation0] sm:$0x3] %vm198_vm5, %v197_v21   ;;  %vm364_vm5 = vcmask 392552  }
  0x9d   :  { %v207_v22 = vpop.permute.xlu0 %206  }
  0x9e   :  { %209 = vst.msk [vmem:[#allocation0] sm:$0x3] %vm208_vm6, %v207_v22   ;;  %v237_v25 = vpop.permute.xlu1 %236   ;;  %vm374_vm6 = vcmask 376152  }
  0x9f   :  { %219 = vst.msk [vmem:[#allocation0] sm:$0x3] %vm218_vm7, %v217_v23   ;;  %vm385_vm7 = vcmask 367952  }
  0xa1   :  { %v227_v24 = vpop.permute.xlu0 %226  }
  0xa2   :  { %229 = vst.msk [vmem:[#allocation0] sm:$0x3] %vm228_vm8, %v227_v24   ;;  %v258_v27 = vpop.permute.xlu1 %257   ;;  %vm395_vm8 = vcmask 351552  }
  0xa3   :  { %239 = vst.msk [vmem:[#allocation0] sm:$0x3] %vm238_vm9, %v237_v25   ;;  %vm406_vm9 = vcmask 343352  }
  0xa4   :  { %260 = vst.msk [vmem:[#allocation0] sm:$0x3] %vm259_vm11, %v258_v27   ;;  %vm427_vm11 = vcmask 318752  }
  0xa5   :  { %v247_v26 = vpop.permute.xlu0 %246  }
  0xa6   :  { %250 = vst.msk [vmem:[#allocation0 + $0x8] sm:$0x3] %vm248_vm10, %v247_v26   ;;  %v279_v29 = vpop.permute.xlu1 %278   ;;  %vm416_vm10 = vcmask 326952  }
  0xa7   :  { %281 = vst.msk [vmem:[#allocation0] sm:$0x3] %vm280_vm13, %v279_v29   ;;  %vm448_vm13 = vcmask 294152  }
  0xa9   :  { %v268_v28 = vpop.permute.xlu0 %267  }
  0xaa   :  { %271 = vst.msk [vmem:[#allocation0 + $0x8] sm:$0x3] %vm269_vm12, %v268_v28   ;;  %v300_v31 = vpop.permute.xlu1 %299   ;;  %vm437_vm12 = vcmask 302352  }
  0xab   :  { %302 = vst.msk [vmem:[#allocation0] sm:$0x3] %vm301_vm15, %v300_v31   ;;  %vm469_vm15 = vcmask 269552  }
  0xad   :  { %v289_v30 = vpop.permute.xlu0 %288  }
  0xae   :  { %292 = vst.msk [vmem:[#allocation0 + $0x8] sm:$0x3] %vm290_vm14, %v289_v30   ;;  %v321_v33 = vpop.permute.xlu1 %320   ;;  %vm458_vm14 = vcmask 277752  }
  0xaf   :  { %323 = vst.msk [vmem:[#allocation0] sm:$0x3] %vm322_vm1, %v321_v33   ;;  %vm490_vm1 = vcmask 244952  }
  0xb1   :  { %v310_v32 = vpop.permute.xlu0 %309  }
  0xb2   :  { %313 = vst.msk [vmem:[#allocation0 + $0x8] sm:$0x3] %vm311_vm0, %v310_v32   ;;  %v342_v35 = vpop.permute.xlu1 %341   ;;  %vm479_vm0 = vcmask 253152  }
  0xb3   :  { %344 = vst.msk [vmem:[#allocation0] sm:$0x3] %vm343_vm3, %v342_v35   ;;  %vm511_vm3 = vcmask 220352  }
  0xb5   :  { %v331_v34 = vpop.permute.xlu0 %330  }
  0xb6   :  { %334 = vst.msk [vmem:[#allocation0 + $0x8] sm:$0x3] %vm332_vm2, %v331_v34   ;;  %v363_v37 = vpop.permute.xlu1 %362   ;;  %vm500_vm2 = vcmask 228552  }
  0xb7   :  { %365 = vst.msk [vmem:[#allocation0] sm:$0x3] %vm364_vm5, %v363_v37   ;;  %vm532_vm5 = vcmask 195752  }
  0xb9   :  { %v352_v36 = vpop.permute.xlu0 %351  }
  0xba   :  { %355 = vst.msk [vmem:[#allocation0 + $0x8] sm:$0x3] %vm353_vm4, %v352_v36   ;;  %v384_v39 = vpop.permute.xlu1 %383   ;;  %vm521_vm4 = vcmask 203952  }
  0xbb   :  { %386 = vst.msk [vmem:[#allocation0] sm:$0x3] %vm385_vm7, %v384_v39   ;;  %vm553_vm7 = vcmask 171152  }
  0xbd   :  { %v373_v38 = vpop.permute.xlu0 %372  }
  0xbe   :  { %376 = vst.msk [vmem:[#allocation0 + $0x8] sm:$0x3] %vm374_vm6, %v373_v38   ;;  %v405_v41 = vpop.permute.xlu1 %404   ;;  %vm542_vm6 = vcmask 179352  }
  0xbf   :  { %407 = vst.msk [vmem:[#allocation0] sm:$0x3] %vm406_vm9, %v405_v41   ;;  %vm574_vm9 = vcmask 146552  }
  0xc1   :  { %v394_v40 = vpop.permute.xlu0 %393  }
  0xc2   :  { %397 = vst.msk [vmem:[#allocation0 + $0x8] sm:$0x3] %vm395_vm8, %v394_v40   ;;  %v426_v43 = vpop.permute.xlu1 %425   ;;  %vm563_vm8 = vcmask 154752  }
  0xc3   :  { %428 = vst.msk [vmem:[#allocation0] sm:$0x3] %vm427_vm11, %v426_v43   ;;  %vm595_vm11 = vcmask 121952  }
  0xc5   :  { %v415_v42 = vpop.permute.xlu0 %414  }
  0xc6   :  { %418 = vst.msk [vmem:[#allocation0 + $0x8] sm:$0x3] %vm416_vm10, %v415_v42   ;;  %v447_v45 = vpop.permute.xlu1 %446   ;;  %vm584_vm10 = vcmask 130152  }
  0xc7   :  { %449 = vst.msk [vmem:[#allocation0] sm:$0x3] %vm448_vm13, %v447_v45   ;;  %vm616_vm13 = vcmask 97352  }
  0xc9   :  { %v436_v44 = vpop.permute.xlu0 %435  }
  0xca   :  { %439 = vst.msk [vmem:[#allocation0 + $0x8] sm:$0x3] %vm437_vm12, %v436_v44   ;;  %v468_v47 = vpop.permute.xlu1 %467   ;;  %vm605_vm12 = vcmask 105552  }
  0xcb   :  { %470 = vst.msk [vmem:[#allocation0] sm:$0x3] %vm469_vm15, %v468_v47   ;;  %vm637_vm15 = vcmask 72752  }
  0xcd   :  { %v457_v46 = vpop.permute.xlu0 %456  }
  0xce   :  { %460 = vst.msk [vmem:[#allocation0 + $0x8] sm:$0x3] %vm458_vm14, %v457_v46   ;;  %v489_v49 = vpop.permute.xlu1 %488   ;;  %vm626_vm14 = vcmask 80952  }
  0xcf   :  { %491 = vst.msk [vmem:[#allocation0] sm:$0x3] %vm490_vm1, %v489_v49   ;;  %vm658_vm1 = vcmask 48152  }
  0xd1   :  { %v478_v48 = vpop.permute.xlu0 %477  }
  0xd2   :  { %481 = vst.msk [vmem:[#allocation0 + $0x8] sm:$0x3] %vm479_vm0, %v478_v48   ;;  %v510_v51 = vpop.permute.xlu1 %509   ;;  %vm647_vm0 = vcmask 56352  }
  0xd3   :  { %512 = vst.msk [vmem:[#allocation0] sm:$0x3] %vm511_vm3, %v510_v51  }
  0xd5   :  { %v499_v50 = vpop.permute.xlu0 %498  }
  0xd6   :  { %502 = vst.msk [vmem:[#allocation0 + $0x8] sm:$0x3] %vm500_vm2, %v499_v50   ;;  %v531_v53 = vpop.permute.xlu1 %530   ;;  %vm668_vm2 = vcmask 31752  }
  0xd7   :  { %533 = vst.msk [vmem:[#allocation0] sm:$0x3] %vm532_vm5, %v531_v53  }
  0xd9   :  { %v520_v52 = vpop.permute.xlu0 %519  }
  0xda   :  { %523 = vst.msk [vmem:[#allocation0 + $0x8] sm:$0x3] %vm521_vm4, %v520_v52   ;;  %v552_v55 = vpop.permute.xlu1 %551  }
  0xdb   :  { %554 = vst.msk [vmem:[#allocation0] sm:$0x3] %vm553_vm7, %v552_v55  }
  0xdd   :  { %v541_v54 = vpop.permute.xlu0 %540  }
  0xde   :  { %544 = vst.msk [vmem:[#allocation0 + $0x8] sm:$0x3] %vm542_vm6, %v541_v54   ;;  %v573_v57 = vpop.permute.xlu1 %572  }
  0xdf   :  { %575 = vst.msk [vmem:[#allocation0] sm:$0x3] %vm574_vm9, %v573_v57  }
  0xe1   :  { %v562_v56 = vpop.permute.xlu0 %561  }
  0xe2   :  { %565 = vst.msk [vmem:[#allocation0 + $0x8] sm:$0x3] %vm563_vm8, %v562_v56   ;;  %v594_v59 = vpop.permute.xlu1 %593  }
  0xe3   :  { %596 = vst.msk [vmem:[#allocation0] sm:$0x3] %vm595_vm11, %v594_v59  }
  0xe5   :  { %v583_v58 = vpop.permute.xlu0 %582  }
  0xe6   :  { %586 = vst.msk [vmem:[#allocation0 + $0x8] sm:$0x3] %vm584_vm10, %v583_v58   ;;  %v615_v61 = vpop.permute.xlu1 %614  }
  0xe7   :  { %617 = vst.msk [vmem:[#allocation0] sm:$0x3] %vm616_vm13, %v615_v61  }
  0xe9   :  { %v604_v60 = vpop.permute.xlu0 %603  }
  0xea   :  { %607 = vst.msk [vmem:[#allocation0 + $0x8] sm:$0x3] %vm605_vm12, %v604_v60   ;;  %v636_v63 = vpop.permute.xlu1 %635  }
  0xeb   :  { %638 = vst.msk [vmem:[#allocation0] sm:$0x3] %vm637_vm15, %v636_v63  }
  0xed   :  { %v625_v62 = vpop.permute.xlu0 %624  }
  0xee   :  { %628 = vst.msk [vmem:[#allocation0 + $0x8] sm:$0x3] %vm626_vm14, %v625_v62   ;;  %v657_v1 = vpop.permute.xlu1 %656  }
  0xef   :  { %659 = vst.msk [vmem:[#allocation0] sm:$0x3] %vm658_vm1, %v657_v1  }
  0xf1   :  { %v646_v0 = vpop.permute.xlu0 %645  }
  0xf2   :  { %649 = vst.msk [vmem:[#allocation0 + $0x8] sm:$0x3] %vm647_vm0, %v646_v0  }
  0xf5   :  { %v667_v2 = vpop.permute.xlu0 %666  }
  0xf6   :  { %670 = vst.msk [vmem:[#allocation0 + $0x8] sm:$0x3] %vm668_vm2, %v667_v2   ;;  %v674_v3 = vld [vmem:[#allocation0] sm:$0x3] }
  0xf7   :  { %676 = vst [vmem:[%s1410_s1] sm:$0x3] %v674_v3 }
  0xfd   :  { %v678_v4 = vld [vmem:[#allocation0 + $0x8] sm:$0x3] }
  0xfe   :  { %811 = vst [vmem:[%s1410_s1 + $0x2] sm:$0x3] %v678_v4 }

// kernel: _lambda_.16
= control target key start
LH: loop header
LB: loop body
LE: loop exit
PB: predicated region body
PF: predicated region fallthrough
CT: control target
= control target key end

     0   :  { %s705_s1 = inlined_call_operand.vmem [shape: bf16[128,128], index: 1, kind: input, shape index: {}]   ;;  %s706_s0 = inlined_call_operand.vmem [shape: bf16[128,128], index: 0, kind: input, shape index: {}]   ;;  %s707_s2 = inlined_call_operand.vmem [shape: f32[1,128], index: 2, kind: input, shape index: {}]   ;;  %s708_s3 = inlined_call_operand.vmem [shape: bf16[128,128], index: 3, kind: output, shape index: {}]  }
   0x1   :  { %v594_v0 = vld [vmem:[%s705_s1] sm:$0xff]   ;;  %v595_v1 = vld [vmem:[%s705_s1 + $0x8] sm:$0xff]   ;;  %v596_v2 = vld [vmem:[%s705_s1 + $0x10] sm:$0xff]  }
   0x2   :  { %546 = vmatprep.subr.bf16.mxu0 %v594_v0  ;;  %578 = vmatprep.subr.bf16.mxu1 %v594_v0  ;;  %v597_v3 = vld [vmem:[%s705_s1 + $0x18] sm:$0xff]   ;;  %v602_v4 = vld [vmem:[%s706_s0] sm:$0xff]   ;;  %v599_v7 = vld [vmem:[%s705_s1 + $0x28] sm:$0xff]  }
   0x3   :  { %547 = vmatpush3.bf16.msra.mxu0 %v594_v0  ;;  %586 = vmatpush3.bf16.msra.mxu1 %v594_v0  ;;  %v603_v5 = vld [vmem:[%s706_s0 + $0x20] sm:$0xff]   ;;  %v600_v8 = vld [vmem:[%s705_s1 + $0x30] sm:$0xff]   ;;  %v601_v9 = vld [vmem:[%s705_s1 + $0x38] sm:$0xff]  }
   0x4   :  { %548 = vmatprep.subr.bf16.mxu0 %v595_v1  ;;  %579 = vmatprep.subr.bf16.mxu1 %v595_v1  ;;  %v598_v6 = vld [vmem:[%s705_s1 + $0x20] sm:$0xff]   ;;  %v604_v10 = vld [vmem:[%s706_s0 + $0x8] sm:$0xff]   ;;  %v606_v12 = vld [vmem:[%s706_s0 + $0x10] sm:$0xff]  }
   0x5   :  { %562 = vmatprep.mubr.bf16.mxu0 %v602_v4  ;;  %570 = vmatprep.mubr.bf16.mxu1 %v603_v5  ;;  %v605_v11 = vld [vmem:[%s706_s0 + $0x28] sm:$0xff]   ;;  %v607_v13 = vld [vmem:[%s706_s0 + $0x30] sm:$0xff]   ;;  %v608_v14 = vld [vmem:[%s706_s0 + $0x18] sm:$0xff]  }
   0x6   :  { %v609_v15 = vld [vmem:[%s706_s0 + $0x38] sm:$0xff]   ;;  %v450_v17 = vld [vmem:[%s707_s2] ss:$0 sm:$0xff] }
   0x7   :  { %549 = vmatpush3.bf16.msra.mxu0 %v595_v1  ;;  %587 = vmatpush3.bf16.msra.mxu1 %v595_v1 }
   0x8   :  { %550 = vmatprep.subr.bf16.mxu0 %v596_v2  ;;  %580 = vmatprep.subr.bf16.mxu1 %v596_v2 }
   0xb   :  { %551 = vmatpush3.bf16.msra.mxu0 %v596_v2  ;;  %588 = vmatpush3.bf16.msra.mxu1 %v596_v2 }
   0xc   :  { %552 = vmatprep.subr.bf16.mxu0 %v597_v3  ;;  %581 = vmatprep.subr.bf16.mxu1 %v597_v3 }
   0xf   :  { %553 = vmatpush3.bf16.msra.mxu0 %v597_v3  ;;  %589 = vmatpush3.bf16.msra.mxu1 %v597_v3 }
  0x10   :  { %554 = vmatprep.subr.bf16.mxu0 %v598_v6  ;;  %582 = vmatprep.subr.bf16.mxu1 %v598_v6 }
  0x13   :  { %555 = vmatpush3.bf16.msra.mxu0 %v598_v6  ;;  %590 = vmatpush3.bf16.msra.mxu1 %v598_v6 }
  0x14   :  { %556 = vmatprep.subr.bf16.mxu0 %v599_v7  ;;  %583 = vmatprep.subr.bf16.mxu1 %v599_v7 }
  0x17   :  { %557 = vmatpush3.bf16.msra.mxu0 %v599_v7  ;;  %591 = vmatpush3.bf16.msra.mxu1 %v599_v7 }
  0x18   :  { %558 = vmatprep.subr.bf16.mxu0 %v600_v8  ;;  %584 = vmatprep.subr.bf16.mxu1 %v600_v8 }
  0x1b   :  { %559 = vmatpush3.bf16.msra.mxu0 %v600_v8  ;;  %592 = vmatpush3.bf16.msra.mxu1 %v600_v8 }
  0x1c   :  { %560 = vmatprep.subr.bf16.mxu0 %v601_v9  ;;  %585 = vmatprep.subr.bf16.mxu1 %v601_v9 }
  0x1f   :  { %561 = vmatpush3.bf16.msra.mxu0 %v601_v9  ;;  %593 = vmatpush3.bf16.msra.mxu1 %v601_v9 }
  0x22   :  { %563 = vmatmul.mubr.bf16.vlgmr.msra.gmra.mrb[0].mxu0 %v604_v10  ;;  %571 = vmatmul.mubr.bf16.vlgmr.msra.gmra.mrb[0].mxu1 %v605_v11 }
  0x23   :  { %566 = vmatprep.mubr.bf16.mxu0 %v606_v12  ;;  %574 = vmatprep.mubr.bf16.mxu1 %v607_v13 }
  0x2a   :  { %567 = vmatmul.mubr.bf16.gmra.mrb[4].mxu0 %v608_v14  ;;  %575 = vmatmul.mubr.bf16.gmra.mrb[4].mxu1 %v609_v15 }
  0xf5   :  { %v564_v16 = vpop.f32.mrb[0].mxu0  ;;  %v572_v18 = vpop.f32.mrb[0].mxu1 }
  0xf6   :  { %v213_v19 = vpop.f32.mrb[1].mxu0  ;;  %v245_v20 = vpop.f32.mrb[1].mxu1  ;;  %v336_v23 = vadd.f32 %v564_v16, %v450_v17  ;;  %v344_v24 = vadd.f32 %v572_v18, %v450_v17 }
  0xf7   :  { %v565_v21 = vpop.f32.mrb[2].mxu0  ;;  %v573_v22 = vpop.f32.mrb[2].mxu1  ;;  %v334_v29 = vadd.f32 %v450_v17, %v213_v19  ;;  %v342_v30 = vadd.f32 %v450_v17, %v245_v20 }
  0xf8   :  { %v337_v25 = vadd.f32 %v565_v21, %v450_v17  ;;  %v345_v26 = vadd.f32 %v573_v22, %v450_v17  ;;  %v216_v27 = vpop.f32.mrb[3].mxu0  ;;  %v248_v28 = vpop.f32.mrb[3].mxu1 }
  0xf9   :  { %v335_v31 = vadd.f32 %v450_v17, %v216_v27  ;;  %v343_v32 = vadd.f32 %v450_v17, %v248_v28 }
  0xfa   :  { %v491_v33 = vpack.c.bf16 %v337_v25, %v336_v23  ;;  %v511_v34 = vpack.c.bf16 %v345_v26, %v344_v24 }
  0xfb   :  { %v486_v35 = vpack.c.bf16 %v335_v31, %v334_v29  ;;  %v506_v36 = vpack.c.bf16 %v343_v32, %v342_v30 }
  0xfc   :  { %523 = vst [vmem:[%s708_s3 + $0x8] sm:$0xff] %v491_v33   ;;  %527 = vst [vmem:[%s708_s3 + $0x28] sm:$0xff] %v511_v34  }
  0xfd   :  { %487 = vst [vmem:[%s708_s3] sm:$0xff] %v486_v35   ;;  %526 = vst [vmem:[%s708_s3 + $0x20] sm:$0xff] %v506_v36   ;;  %v568_v37 = vpop.f32.mrb[4].mxu0  ;;  %v576_v38 = vpop.f32.mrb[4].mxu1 }
  0xfe   :  { %v229_v39 = vpop.f32.mrb[5].mxu0  ;;  %v261_v40 = vpop.f32.mrb[5].mxu1  ;;  %v340_v43 = vadd.f32 %v568_v37, %v450_v17  ;;  %v348_v44 = vadd.f32 %v576_v38, %v450_v17 }
  0xff   :  { %v569_v41 = vpop.f32.mrb[6].mxu0  ;;  %v577_v42 = vpop.f32.mrb[6].mxu1  ;;  %v338_v49 = vadd.f32 %v450_v17, %v229_v39  ;;  %v346_v50 = vadd.f32 %v450_v17, %v261_v40 }
 0x100   :  { %v341_v45 = vadd.f32 %v569_v41, %v450_v17  ;;  %v349_v46 = vadd.f32 %v577_v42, %v450_v17  ;;  %v232_v47 = vpop.f32.mrb[7].mxu0  ;;  %v264_v48 = vpop.f32.mrb[7].mxu1 }
 0x101   :  { %v339_v51 = vadd.f32 %v450_v17, %v232_v47  ;;  %v347_v52 = vadd.f32 %v450_v17, %v264_v48 }
 0x102   :  { %v501_v53 = vpack.c.bf16 %v341_v45, %v340_v43  ;;  %v521_v54 = vpack.c.bf16 %v349_v46, %v348_v44 }
 0x103   :  { %v496_v55 = vpack.c.bf16 %v339_v51, %v338_v49  ;;  %v516_v56 = vpack.c.bf16 %v347_v52, %v346_v50 }
 0x104   :  { %525 = vst [vmem:[%s708_s3 + $0x18] sm:$0xff] %v501_v53   ;;  %529 = vst [vmem:[%s708_s3 + $0x38] sm:$0xff] %v521_v54  }
 0x105   :  { %524 = vst [vmem:[%s708_s3 + $0x10] sm:$0xff] %v496_v55   ;;  %528 = vst [vmem:[%s708_s3 + $0x30] sm:$0xff] %v516_v56  }

// kernel: _lambda_.17
= control target key start
LH: loop header
LB: loop body
LE: loop exit
PB: predicated region body
PF: predicated region fallthrough
CT: control target
= control target key end

     0   :  { %v15_v17 = vlaneseq  ;;  %s162_s0 = inlined_call_operand.vmem [shape: f32[2,8,256], index: 0, kind: input, shape index: {}]   ;;  %s163_s1 = inlined_call_operand.vmem [shape: f32[8,256], index: 1, kind: input, shape index: {}]   ;;  %s164_s2 = inlined_call_operand.vmem [shape: f32[2,8,256], index: 2, kind: output, shape index: {}]  }
   0x1   :  { %v11_v0 = vld [vmem:[%s162_s0] sm:$0xff]  ;;  %v12_v1 = vld [vmem:[%s162_s0 + $0x8] sm:$0xff]  ;;  %v13_v4 = vld [vmem:[%s162_s0 + $0x10] sm:$0xff] }
   0x2   :  { %v81_v2 = vmul.f32 -1.442695, %v11_v0  ;;  %v82_v3 = vmul.f32 -1.442695, %v12_v1  ;;  %v14_v5 = vld [vmem:[%s162_s0 + $0x18] sm:$0xff]  ;;  %v16_v22 = vshrl.u32 %v15_v17, 7 }
   0x3   :  { %v83_v6 = vmul.f32 -1.442695, %v13_v4  ;;  %v84_v7 = vmul.f32 -1.442695, %v14_v5  ;;  %v41_v8 = vmul.f32 1.442695, %v11_v0 }
   0x4   :  { %85 = vpow2.f32 %v81_v2  ;;  %v43_v9 = vmul.f32 1.442695, %v12_v1  ;;  %v45_v10 = vmul.f32 1.442695, %v13_v4  ;;  %v47_v12 = vmul.f32 1.442695, %v14_v5 }
   0x5   :  { %87 = vpow2.f32 %v82_v3  ;;  %v49_v23 = vld [vmem:[%s163_s1] sm:$0xff]  ;;  %v50_v25 = vld [vmem:[%s163_s1 + $0x8] sm:$0xff]  ;;  %vm60_vm0 = vcmp.lt.s32.totalorder %v16_v22, 4  ;;  %vm51_vm1 = vcmp.lt.s32.totalorder %v16_v22, 2 }
   0x6   :  { %89 = vpow2.f32 %v83_v6 }
   0x7   :  { %91 = vpow2.f32 %v84_v7 }
   0x8   :  { %93 = vpow2.f32 %v41_v8 }
   0x9   :  { %95 = vpow2.f32 %v43_v9 }
   0xa   :  { %97 = vpow2.f32 %v45_v10 }
   0xe   :  { %v86_v11 = vpop.eup %85 }
   0xf   :  { %v29_v13 = vadd.f32 1.0, %v86_v11  ;;  %v88_v14 = vpop.eup %87 }
  0x10   :  { %v30_v15 = vadd.f32 1.0, %v88_v14  ;;  %v90_v16 = vpop.eup %89 }
  0x11   :  { %99 = vrcp.f32 %v29_v13  ;;  %v31_v18 = vadd.f32 1.0, %v90_v16  ;;  %v92_v19 = vpop.eup %91 }
  0x12   :  { %101 = vpow2.f32 %v47_v12  ;;  %v32_v20 = vadd.f32 1.0, %v92_v19  ;;  %v94_v21 = vpop.eup %93 }
  0x13   :  { %103 = vrcp.f32 %v30_v15  ;;  %v96_v24 = vpop.eup %95  ;;  %v61_v26 = vmul.f32 %v94_v21, %v49_v23 }
  0x14   :  { %105 = vrcp.f32 %v31_v18  ;;  %v98_v27 = vpop.eup %97  ;;  %v62_v29 = vmul.f32 %v96_v24, %v50_v25 }
  0x15   :  { %107 = vrcp.f32 %v32_v20  ;;  %v63_v34 = vmul.f32 %v98_v27, %v49_v23 }
  0x1b   :  { %v100_v28 = vpop.eup %99 }
  0x1c   :  { %v102_v30 = vpop.eup %101  ;;  %v52_v31 = vadd.f32 %v100_v28, %v49_v23  ;;  %v65_v33 = vsel %vm60_vm0, %v61_v26, %v100_v28 }
  0x1d   :  { %v104_v32 = vpop.eup %103  ;;  %v64_v39 = vmul.f32 %v102_v30, %v50_v25 }
  0x1e   :  { %v56_v35 = vmul.f32 2.0, %v52_v31  ;;  %v53_v36 = vadd.f32 %v104_v32, %v50_v25  ;;  %v106_v37 = vpop.eup %105  ;;  %v66_v38 = vsel %vm60_vm0, %v62_v29, %v104_v32 }
  0x1f   :  { %v54_v42 = vadd.f32 %v106_v37, %v49_v23  ;;  %v108_v43 = vpop.eup %107  ;;  %v67_v44 = vsel %vm60_vm0, %v63_v34, %v106_v37 }
  0x20   :  { %v69_v40 = vsel %vm51_vm1, %v56_v35, %v65_v33  ;;  %v57_v41 = vmul.f32 2.0, %v53_v36  ;;  %v55_v47 = vadd.f32 %v108_v43, %v50_v25  ;;  %v68_v48 = vsel %vm60_vm0, %v64_v39, %v108_v43 }
  0x21   :  { %73 = vst [vmem:[%s164_s2] sm:$0xff] %v69_v40  ;;  %v58_v46 = vmul.f32 2.0, %v54_v42 }
  0x22   :  { %v70_v45 = vsel %vm51_vm1, %v57_v41, %v66_v38  ;;  %v59_v50 = vmul.f32 2.0, %v55_v47 }
  0x23   :  { %74 = vst [vmem:[%s164_s2 + $0x8] sm:$0xff] %v70_v45  ;;  %v71_v49 = vsel %vm51_vm1, %v58_v46, %v67_v44 }
  0x24   :  { %75 = vst [vmem:[%s164_s2 + $0x10] sm:$0xff] %v71_v49  ;;  %v72_v51 = vsel %vm51_vm1, %v59_v50, %v68_v48 }
  0x25   :  { %76 = vst [vmem:[%s164_s2 + $0x18] sm:$0xff] %v72_v51 }

</bundles_post_ra>
